<compile_context>
chip_gen: v7x
topology: tpu7x:2x2x1
jax: 0.10.0
libtpu: 0.0.40
codegen_flags: <defaults>
</compile_context>

<pallas_src>
import functools

import jax
import jax.numpy as jnp
from jax import lax
from jax.experimental import pallas as pl
from jax.experimental.pallas import tpu as pltpu


def _attention_kernel(x_ref, wp_ref, bp_ref, wo_ref, bo_ref, o_ref, res_ref,
                      *, n_heads: int, d_k: int, scale: float):
    """Grid = (batch,); one batch element per step.

    x_ref  : (1, C, S)          input, channels-major (== x.view(B, C, -1))
    wp_ref : (3*H*dk, C)        qkv projection weight, transposed
    bp_ref : (3*H*dk, 1)        qkv projection bias (column)
    wo_ref : (C, H*dk)          output projection weight, transposed
    bo_ref : (C, 1)             output bias (column)
    o_ref  : (1, C, S)          result, channels-major (residual included)
    res_ref: (H*dk, S) f32      VMEM scratch holding all heads' attention out
    """
    x_cs = x_ref[0]                                        # [C, S]

    # Fused qkv projection for ALL heads in one MXU pass: [3*H*dk, S].
    qkv_t = (jnp.dot(wp_ref[...], x_cs, preferred_element_type=jnp.float32)
             + bp_ref[...])

    # Per-head attention (static unroll; n_heads is tiny).
    for h in range(n_heads):
        base = h * 3 * d_k
        q_t = qkv_t[base:base + d_k, :]                    # [dk, S]
        k_t = qkv_t[base + d_k:base + 2 * d_k, :]          # [dk, S]
        v_t = qkv_t[base + 2 * d_k:base + 3 * d_k, :]      # [dk, S]

        # s[i, j] = <q_i, k_j> * scale   (contract on dk; no explicit .T)
        s = lax.dot_general(q_t, k_t, (((0,), (0,)), ((), ())),
                            preferred_element_type=jnp.float32) * scale  # [S,S]

        # softmax over j (dim=2 in the reference), kept in f32.
        m = jnp.max(s, axis=-1, keepdims=True)
        e = jnp.exp(s - m)
        p = e * pl.reciprocal(jnp.sum(e, axis=-1, keepdims=True), approx=True)

        # res_t[d, i] = sum_j v_t[d, j] * p[i, j]  -> head-major scratch rows.
        res_ref[h * d_k:(h + 1) * d_k, :] = lax.dot_general(
            v_t, p, (((1,), (1,)), ((), ())),
            preferred_element_type=jnp.float32)            # [dk, S]

    # Single full-width output projection + bias + residual (skip connection).
    out = jnp.dot(wo_ref[...], res_ref[...], preferred_element_type=jnp.float32)
    o_ref[0] = (out + bo_ref[...] + x_cs.astype(jnp.float32)).astype(o_ref.dtype)


def attention_block_pallas(x_nchw, w_proj, b_proj, w_out, b_out,
                           *, n_heads: int, d_k: int):
    """x_nchw: [B, C, H, W]. Weights in 'x @ W + b' orientation:
       w_proj: [C, 3*n_heads*d_k], w_out: [n_heads*d_k, C]."""
    B, C, H, W = x_nchw.shape
    S = H * W
    hd = n_heads * d_k

    # NCHW -> [B, C, S] is a free reshape (no HBM transpose of activations).
    x_cs = x_nchw.reshape(B, C, S)

    # Tiny one-time weight repacks into W^T @ x orientation.
    wp_t = w_proj.T                       # [3*H*dk, C]
    bp = b_proj.reshape(3 * hd, 1)
    wo_t = w_out.T                        # [C, H*dk]
    bo = b_out.reshape(C, 1)

    kernel = functools.partial(_attention_kernel, n_heads=n_heads, d_k=d_k,
                               scale=d_k ** (-0.5))

    out_cs = pl.pallas_call(
        kernel,
        out_shape=jax.ShapeDtypeStruct((B, C, S), x_cs.dtype),
        grid=(B,),
        in_specs=[
            pl.BlockSpec((1, C, S), lambda b: (b, 0, 0)),
            pl.BlockSpec((3 * hd, C), lambda b: (0, 0)),
            pl.BlockSpec((3 * hd, 1), lambda b: (0, 0)),
            pl.BlockSpec((C, hd), lambda b: (0, 0)),
            pl.BlockSpec((C, 1), lambda b: (0, 0)),
        ],
        out_specs=pl.BlockSpec((1, C, S), lambda b: (b, 0, 0)),
        scratch_shapes=[pltpu.VMEM((hd, S), jnp.float32)],
        compiler_params=pltpu.CompilerParams(
            dimension_semantics=("parallel",)),
    )(x_cs, wp_t, bp, wo_t, bo)

    # [B, C, S] -> NCHW is again a free reshape.
    return out_cs.reshape(B, C, H, W)


def attention_block_ref(x_nchw, w_proj, b_proj, w_out, b_out,
                        *, n_heads: int, d_k: int):
    """Plain-JAX mirror of the PyTorch forward, for correctness check."""
    B, C, H, W = x_nchw.shape
    S = H * W
    scale = d_k ** (-0.5)
    x = jnp.transpose(x_nchw.reshape(B, C, S), (0, 2, 1))          # [B, S, C]
    qkv = x @ w_proj + b_proj                                      # [B, S, 3*H*dk]
    qkv = qkv.reshape(B, S, n_heads, 3 * d_k)
    q, k, v = jnp.split(qkv, 3, axis=-1)
    attn = jnp.einsum('bihd,bjhd->bijh', q, k) * scale
    attn = jax.nn.softmax(attn, axis=2)
    res = jnp.einsum('bijh,bjhd->bihd', attn, v)
    res = res.reshape(B, S, n_heads * d_k)
    res = res @ w_out + b_out
    res = res + x
    return jnp.transpose(res, (0, 2, 1)).reshape(B, C, H, W)


if __name__ == "__main__":
    # Module hyper-parameters (small but MXU/lane friendly:
    # C = 128, S = 16*16 = 256, n_heads*d_k = 128, 3*n_heads*d_k = 384).
    n_channels = 128
    n_heads = 4
    d_k = 32
    n_groups = 8              # GroupNorm is constructed but unused in forward
    B, H, W = 2, 16, 16

    key = jax.random.PRNGKey(0)
    k_x, k_wp, k_bp, k_wo, k_bo = jax.random.split(key, 5)

    x = jax.random.normal(k_x, (B, n_channels, H, W), dtype=jnp.float32)

    # Deterministic "nn.Linear-like" init (uniform +/- 1/sqrt(fan_in)),
    # stored directly in x @ W + b orientation.
    fan_in_p = n_channels
    w_proj = jax.random.uniform(k_wp, (n_channels, 3 * n_heads * d_k),
                                minval=-1.0, maxval=1.0) / jnp.sqrt(fan_in_p)
    b_proj = jax.random.uniform(k_bp, (3 * n_heads * d_k,),
                                minval=-1.0, maxval=1.0) / jnp.sqrt(fan_in_p)
    fan_in_o = n_heads * d_k
    w_out = jax.random.uniform(k_wo, (n_heads * d_k, n_channels),
                               minval=-1.0, maxval=1.0) / jnp.sqrt(fan_in_o)
    b_out = jax.random.uniform(k_bo, (n_channels,),
                               minval=-1.0, maxval=1.0) / jnp.sqrt(fan_in_o)

    out = attention_block_pallas(x, w_proj, b_proj, w_out, b_out,
                                 n_heads=n_heads, d_k=d_k)
    out = jax.block_until_ready(out)

    ref = attention_block_ref(x, w_proj, b_proj, w_out, b_out,
                              n_heads=n_heads, d_k=d_k)
    assert out.shape == (B, n_channels, H, W)
    # Tolerance loosened slightly for the approx (EUP) softmax reciprocal.
    assert jnp.allclose(out, ref, atol=5e-3, rtol=5e-3), (
        float(jnp.max(jnp.abs(out - ref))))

    print("KERNEL_OK")
</pallas_src>

<mosaic_0001>
module attributes {stable_mosaic.version = 11 : i64} {
  func.func @_attention_kernel(%arg0: i32, %arg1: memref<1x128x256xf32, #tpu.memory_space<vmem>>, %arg2: memref<384x128xf32, #tpu.memory_space<vmem>>, %arg3: memref<384x1xf32, #tpu.memory_space<vmem>>, %arg4: memref<128x128xf32, #tpu.memory_space<vmem>>, %arg5: memref<128x1xf32, #tpu.memory_space<vmem>>, %arg6: memref<1x128x256xf32, #tpu.memory_space<vmem>>, %arg7: memref<128x256xf32, #tpu.memory_space<vmem>>) attributes {dimension_semantics = [#tpu.dimension_semantics<parallel>], iteration_bounds = array<i64: 2>, scalar_prefetch = 0 : i64, scratch_operands = 1 : i64, tpu.core_type = #tpu.core_type<tc>, window_params = [{transform_indices = @transform_0, window_bounds = array<i64: 1, 128, 256>}, {pipeline_mode = #tpu.pipeline_mode<synchronous>, transform_indices = @transform_1, window_bounds = array<i64: 384, 128>}, {pipeline_mode = #tpu.pipeline_mode<synchronous>, transform_indices = @transform_2, window_bounds = array<i64: 384, 1>}, {pipeline_mode = #tpu.pipeline_mode<synchronous>, transform_indices = @transform_3, window_bounds = array<i64: 128, 128>}, {pipeline_mode = #tpu.pipeline_mode<synchronous>, transform_indices = @transform_4, window_bounds = array<i64: 128, 1>}, {transform_indices = @transform_5, window_bounds = array<i64: 1, 128, 256>}]} {
    %c0 = arith.constant 0 : index
    %c0_0 = arith.constant 0 : index
    %c0_1 = arith.constant 0 : index
    %0 = vector.load %arg1[%c0, %c0_0, %c0_1] : memref<1x128x256xf32, #tpu.memory_space<vmem>>, vector<1x128x256xf32>
    %1 = vector.shape_cast %0 : vector<1x128x256xf32> to vector<128x256xf32>
    %c0_2 = arith.constant 0 : index
    %c0_3 = arith.constant 0 : index
    %2 = vector.load %arg2[%c0_2, %c0_3] : memref<384x128xf32, #tpu.memory_space<vmem>>, vector<384x128xf32>
    %cst = arith.constant dense<0.000000e+00> : vector<384x256xf32>
    %3 = tpu.matmul %2, %1, %cst {dimension_numbers = #tpu.dot_dimension_numbers<[1], [0], [0], [1], [0, 0, 1, 1], [], []>} : vector<384x128xf32>, vector<128x256xf32>, vector<384x256xf32> -> vector<384x256xf32>
    %c0_4 = arith.constant 0 : index
    %c0_5 = arith.constant 0 : index
    %4 = vector.load %arg3[%c0_4, %c0_5] : memref<384x1xf32, #tpu.memory_space<vmem>>, vector<384x1xf32>
    %5 = vector.broadcast %4 : vector<384x1xf32> to vector<384x256xf32>
    %6 = arith.addf %3, %5 : vector<384x256xf32>
    %7 = vector.extract_strided_slice %6 {offsets = [0, 0], sizes = [32, 256], strides = [1, 1]} : vector<384x256xf32> to vector<32x256xf32>
    %8 = vector.extract_strided_slice %6 {offsets = [32, 0], sizes = [32, 256], strides = [1, 1]} : vector<384x256xf32> to vector<32x256xf32>
    %9 = vector.extract_strided_slice %6 {offsets = [64, 0], sizes = [32, 256], strides = [1, 1]} : vector<384x256xf32> to vector<32x256xf32>
    %cst_6 = arith.constant dense<0.000000e+00> : vector<256x256xf32>
    %10 = tpu.matmul %7, %8, %cst_6 {dimension_numbers = #tpu.dot_dimension_numbers<[0], [0], [1], [1], [0, 1, 1, 1], [], []>} : vector<32x256xf32>, vector<32x256xf32>, vector<256x256xf32> -> vector<256x256xf32>
    %cst_7 = arith.constant 0.176776692 : f32
    %11 = vector.broadcast %cst_7 : f32 to vector<256x256xf32>
    %12 = arith.mulf %10, %11 : vector<256x256xf32>
    %cst_8 = arith.constant dense<0xFF800000> : vector<256xf32>
    %13 = vector.multi_reduction <maximumf>, %12, %cst_8 [1] : vector<256x256xf32> to vector<256xf32>
    %14 = vector.shape_cast %13 : vector<256xf32> to vector<256x1xf32>
    %15 = vector.broadcast %14 : vector<256x1xf32> to vector<256x256xf32>
    %16 = arith.subf %12, %15 : vector<256x256xf32>
    %17 = math.exp %16 : vector<256x256xf32>
    %cst_9 = arith.constant dense<0.000000e+00> : vector<256xf32>
    %18 = vector.multi_reduction <add>, %17, %cst_9 [1] : vector<256x256xf32> to vector<256xf32>
    %19 = vector.shape_cast %18 : vector<256xf32> to vector<256x1xf32>
    %20 = tpu.reciprocal %19 {approx = true} : vector<256x1xf32> -> vector<256x1xf32>
    %21 = vector.broadcast %20 : vector<256x1xf32> to vector<256x256xf32>
    %22 = arith.mulf %17, %21 : vector<256x256xf32>
    %cst_10 = arith.constant dense<0.000000e+00> : vector<32x256xf32>
    %23 = tpu.matmul %9, %22, %cst_10 {dimension_numbers = #tpu.dot_dimension_numbers<[1], [1], [0], [0], [0, 0, 1, 0], [], []>} : vector<32x256xf32>, vector<256x256xf32>, vector<32x256xf32> -> vector<32x256xf32>
    %c0_11 = arith.constant 0 : index
    %c0_12 = arith.constant 0 : index
    %24 = vector.load %arg7[%c0_11, %c0_12] : memref<128x256xf32, #tpu.memory_space<vmem>>, vector<32x256xf32>
    tpu.vector_store %arg7[%c0_11, %c0_12], %23 {strides = array<i32>} : memref<128x256xf32, #tpu.memory_space<vmem>>, vector<32x256xf32>,
    %25 = vector.extract_strided_slice %6 {offsets = [96, 0], sizes = [32, 256], strides = [1, 1]} : vector<384x256xf32> to vector<32x256xf32>
    %26 = vector.extract_strided_slice %6 {offsets = [128, 0], sizes = [32, 256], strides = [1, 1]} : vector<384x256xf32> to vector<32x256xf32>
    %27 = vector.extract_strided_slice %6 {offsets = [160, 0], sizes = [32, 256], strides = [1, 1]} : vector<384x256xf32> to vector<32x256xf32>
    %cst_13 = arith.constant dense<0.000000e+00> : vector<256x256xf32>
    %28 = tpu.matmul %25, %26, %cst_13 {dimension_numbers = #tpu.dot_dimension_numbers<[0], [0], [1], [1], [0, 1, 1, 1], [], []>} : vector<32x256xf32>, vector<32x256xf32>, vector<256x256xf32> -> vector<256x256xf32>
    %cst_14 = arith.constant 0.176776692 : f32
    %29 = vector.broadcast %cst_14 : f32 to vector<256x256xf32>
    %30 = arith.mulf %28, %29 : vector<256x256xf32>
    %cst_15 = arith.constant dense<0xFF800000> : vector<256xf32>
    %31 = vector.multi_reduction <maximumf>, %30, %cst_15 [1] : vector<256x256xf32> to vector<256xf32>
    %32 = vector.shape_cast %31 : vector<256xf32> to vector<256x1xf32>
    %33 = vector.broadcast %32 : vector<256x1xf32> to vector<256x256xf32>
    %34 = arith.subf %30, %33 : vector<256x256xf32>
    %35 = math.exp %34 : vector<256x256xf32>
    %cst_16 = arith.constant dense<0.000000e+00> : vector<256xf32>
    %36 = vector.multi_reduction <add>, %35, %cst_16 [1] : vector<256x256xf32> to vector<256xf32>
    %37 = vector.shape_cast %36 : vector<256xf32> to vector<256x1xf32>
    %38 = tpu.reciprocal %37 {approx = true} : vector<256x1xf32> -> vector<256x1xf32>
    %39 = vector.broadcast %38 : vector<256x1xf32> to vector<256x256xf32>
    %40 = arith.mulf %35, %39 : vector<256x256xf32>
    %cst_17 = arith.constant dense<0.000000e+00> : vector<32x256xf32>
    %41 = tpu.matmul %27, %40, %cst_17 {dimension_numbers = #tpu.dot_dimension_numbers<[1], [1], [0], [0], [0, 0, 1, 0], [], []>} : vector<32x256xf32>, vector<256x256xf32>, vector<32x256xf32> -> vector<32x256xf32>
    %c32 = arith.constant 32 : index
    %c0_18 = arith.constant 0 : index
    %42 = vector.load %arg7[%c32, %c0_18] : memref<128x256xf32, #tpu.memory_space<vmem>>, vector<32x256xf32>
    tpu.vector_store %arg7[%c32, %c0_18], %41 {strides = array<i32>} : memref<128x256xf32, #tpu.memory_space<vmem>>, vector<32x256xf32>,
    %43 = vector.extract_strided_slice %6 {offsets = [192, 0], sizes = [32, 256], strides = [1, 1]} : vector<384x256xf32> to vector<32x256xf32>
    %44 = vector.extract_strided_slice %6 {offsets = [224, 0], sizes = [32, 256], strides = [1, 1]} : vector<384x256xf32> to vector<32x256xf32>
    %45 = vector.extract_strided_slice %6 {offsets = [256, 0], sizes = [32, 256], strides = [1, 1]} : vector<384x256xf32> to vector<32x256xf32>
    %cst_19 = arith.constant dense<0.000000e+00> : vector<256x256xf32>
    %46 = tpu.matmul %43, %44, %cst_19 {dimension_numbers = #tpu.dot_dimension_numbers<[0], [0], [1], [1], [0, 1, 1, 1], [], []>} : vector<32x256xf32>, vector<32x256xf32>, vector<256x256xf32> -> vector<256x256xf32>
    %cst_20 = arith.constant 0.176776692 : f32
    %47 = vector.broadcast %cst_20 : f32 to vector<256x256xf32>
    %48 = arith.mulf %46, %47 : vector<256x256xf32>
    %cst_21 = arith.constant dense<0xFF800000> : vector<256xf32>
    %49 = vector.multi_reduction <maximumf>, %48, %cst_21 [1] : vector<256x256xf32> to vector<256xf32>
    %50 = vector.shape_cast %49 : vector<256xf32> to vector<256x1xf32>
    %51 = vector.broadcast %50 : vector<256x1xf32> to vector<256x256xf32>
    %52 = arith.subf %48, %51 : vector<256x256xf32>
    %53 = math.exp %52 : vector<256x256xf32>
    %cst_22 = arith.constant dense<0.000000e+00> : vector<256xf32>
    %54 = vector.multi_reduction <add>, %53, %cst_22 [1] : vector<256x256xf32> to vector<256xf32>
    %55 = vector.shape_cast %54 : vector<256xf32> to vector<256x1xf32>
    %56 = tpu.reciprocal %55 {approx = true} : vector<256x1xf32> -> vector<256x1xf32>
    %57 = vector.broadcast %56 : vector<256x1xf32> to vector<256x256xf32>
    %58 = arith.mulf %53, %57 : vector<256x256xf32>
    %cst_23 = arith.constant dense<0.000000e+00> : vector<32x256xf32>
    %59 = tpu.matmul %45, %58, %cst_23 {dimension_numbers = #tpu.dot_dimension_numbers<[1], [1], [0], [0], [0, 0, 1, 0], [], []>} : vector<32x256xf32>, vector<256x256xf32>, vector<32x256xf32> -> vector<32x256xf32>
    %c64 = arith.constant 64 : index
    %c0_24 = arith.constant 0 : index
    %60 = vector.load %arg7[%c64, %c0_24] : memref<128x256xf32, #tpu.memory_space<vmem>>, vector<32x256xf32>
    tpu.vector_store %arg7[%c64, %c0_24], %59 {strides = array<i32>} : memref<128x256xf32, #tpu.memory_space<vmem>>, vector<32x256xf32>,
    %61 = vector.extract_strided_slice %6 {offsets = [288, 0], sizes = [32, 256], strides = [1, 1]} : vector<384x256xf32> to vector<32x256xf32>
    %62 = vector.extract_strided_slice %6 {offsets = [320, 0], sizes = [32, 256], strides = [1, 1]} : vector<384x256xf32> to vector<32x256xf32>
    %63 = vector.extract_strided_slice %6 {offsets = [352, 0], sizes = [32, 256], strides = [1, 1]} : vector<384x256xf32> to vector<32x256xf32>
    %cst_25 = arith.constant dense<0.000000e+00> : vector<256x256xf32>
    %64 = tpu.matmul %61, %62, %cst_25 {dimension_numbers = #tpu.dot_dimension_numbers<[0], [0], [1], [1], [0, 1, 1, 1], [], []>} : vector<32x256xf32>, vector<32x256xf32>, vector<256x256xf32> -> vector<256x256xf32>
    %cst_26 = arith.constant 0.176776692 : f32
    %65 = vector.broadcast %cst_26 : f32 to vector<256x256xf32>
    %66 = arith.mulf %64, %65 : vector<256x256xf32>
    %cst_27 = arith.constant dense<0xFF800000> : vector<256xf32>
    %67 = vector.multi_reduction <maximumf>, %66, %cst_27 [1] : vector<256x256xf32> to vector<256xf32>
    %68 = vector.shape_cast %67 : vector<256xf32> to vector<256x1xf32>
    %69 = vector.broadcast %68 : vector<256x1xf32> to vector<256x256xf32>
    %70 = arith.subf %66, %69 : vector<256x256xf32>
    %71 = math.exp %70 : vector<256x256xf32>
    %cst_28 = arith.constant dense<0.000000e+00> : vector<256xf32>
    %72 = vector.multi_reduction <add>, %71, %cst_28 [1] : vector<256x256xf32> to vector<256xf32>
    %73 = vector.shape_cast %72 : vector<256xf32> to vector<256x1xf32>
    %74 = tpu.reciprocal %73 {approx = true} : vector<256x1xf32> -> vector<256x1xf32>
    %75 = vector.broadcast %74 : vector<256x1xf32> to vector<256x256xf32>
    %76 = arith.mulf %71, %75 : vector<256x256xf32>
    %cst_29 = arith.constant dense<0.000000e+00> : vector<32x256xf32>
    %77 = tpu.matmul %63, %76, %cst_29 {dimension_numbers = #tpu.dot_dimension_numbers<[1], [1], [0], [0], [0, 0, 1, 0], [], []>} : vector<32x256xf32>, vector<256x256xf32>, vector<32x256xf32> -> vector<32x256xf32>
    %c96 = arith.constant 96 : index
    %c0_30 = arith.constant 0 : index
    %78 = vector.load %arg7[%c96, %c0_30] : memref<128x256xf32, #tpu.memory_space<vmem>>, vector<32x256xf32>
    tpu.vector_store %arg7[%c96, %c0_30], %77 {strides = array<i32>} : memref<128x256xf32, #tpu.memory_space<vmem>>, vector<32x256xf32>,
    %c0_31 = arith.constant 0 : index
    %c0_32 = arith.constant 0 : index
    %79 = vector.load %arg4[%c0_31, %c0_32] : memref<128x128xf32, #tpu.memory_space<vmem>>, vector<128x128xf32>
    %c0_33 = arith.constant 0 : index
    %c0_34 = arith.constant 0 : index
    %80 = vector.load %arg7[%c0_33, %c0_34] : memref<128x256xf32, #tpu.memory_space<vmem>>, vector<128x256xf32>
    %cst_35 = arith.constant dense<0.000000e+00> : vector<128x256xf32>
    %81 = tpu.matmul %79, %80, %cst_35 {dimension_numbers = #tpu.dot_dimension_numbers<[1], [0], [0], [1], [0, 0, 1, 1], [], []>} : vector<128x128xf32>, vector<128x256xf32>, vector<128x256xf32> -> vector<128x256xf32>
    %c0_36 = arith.constant 0 : index
    %c0_37 = arith.constant 0 : index
    %82 = vector.load %arg5[%c0_36, %c0_37] : memref<128x1xf32, #tpu.memory_space<vmem>>, vector<128x1xf32>
    %83 = vector.broadcast %82 : vector<128x1xf32> to vector<128x256xf32>
    %84 = arith.addf %81, %83 : vector<128x256xf32>
    %85 = arith.addf %84, %1 : vector<128x256xf32>
    %c0_38 = arith.constant 0 : index
    %c0_39 = arith.constant 0 : index
    %c0_40 = arith.constant 0 : index
    %86 = vector.load %arg6[%c0_38, %c0_39, %c0_40] : memref<1x128x256xf32, #tpu.memory_space<vmem>>, vector<1x128x256xf32>
    %87 = vector.shape_cast %86 : vector<1x128x256xf32> to vector<128x256xf32>
    %88 = vector.shape_cast %85 : vector<128x256xf32> to vector<1x128x256xf32>
    tpu.vector_store %arg6[%c0_38, %c0_39, %c0_40], %88 {strides = array<i32>} : memref<1x128x256xf32, #tpu.memory_space<vmem>>, vector<1x128x256xf32>,
    return
  }
  func.func @transform_0(%arg0: i32) -> (i32, i32, i32) {
    %c0_i32 = arith.constant 0 : i32
    %c0_i32_0 = arith.constant 0 : i32
    %c0_i32_1 = arith.constant 0 : i32
    return %arg0, %c0_i32, %c0_i32_0 : i32, i32, i32
  }
  func.func @transform_1(%arg0: i32) -> (i32, i32) {
    %c0_i32 = arith.constant 0 : i32
    %c0_i32_0 = arith.constant 0 : i32
    %c0_i32_1 = arith.constant 0 : i32
    return %c0_i32, %c0_i32_0 : i32, i32
  }
  func.func @transform_2(%arg0: i32) -> (i32, i32) {
    %c0_i32 = arith.constant 0 : i32
    %c0_i32_0 = arith.constant 0 : i32
    %c0_i32_1 = arith.constant 0 : i32
    return %c0_i32, %c0_i32_0 : i32, i32
  }
  func.func @transform_3(%arg0: i32) -> (i32, i32) {
    %c0_i32 = arith.constant 0 : i32
    %c0_i32_0 = arith.constant 0 : i32
    %c0_i32_1 = arith.constant 0 : i32
    return %c0_i32, %c0_i32_0 : i32, i32
  }
  func.func @transform_4(%arg0: i32) -> (i32, i32) {
    %c0_i32 = arith.constant 0 : i32
    %c0_i32_0 = arith.constant 0 : i32
    %c0_i32_1 = arith.constant 0 : i32
    return %c0_i32, %c0_i32_0 : i32, i32
  }
  func.func @transform_5(%arg0: i32) -> (i32, i32, i32) {
    %c0_i32 = arith.constant 0 : i32
    %c0_i32_0 = arith.constant 0 : i32
    %c0_i32_1 = arith.constant 0 : i32
    return %arg0, %c0_i32, %c0_i32_0 : i32, i32, i32
  }
}

</mosaic_0001>

<bundles_post_ra>
// kernel: tpu_custom_call.1
= control target key start
LH: loop header
LB: loop body
LE: loop exit
PB: predicated region body
PF: predicated region fallthrough
CT: control target
= control target key end

     0   :  { %10 = vsyncpa [#allocation4], 0  ;;  %s10522_s0 = inlined_call_operand.vmem [shape: f32[2,128,256], index: 0, kind: input, shape index: {}]   ;;  %s10523_s1 = inlined_call_operand.hbm [shape: f32[384,128], index: 1, kind: input, shape index: {}]   ;;  %s10524_s2 = inlined_call_operand.vmem [shape: f32[384,1], index: 2, kind: input, shape index: {}]   ;;  %s10525_s3 = inlined_call_operand.hbm [shape: f32[128,128], index: 3, kind: input, shape index: {}]   ;;  %s10526_s4 = inlined_call_operand.vmem [shape: f32[128,1], index: 4, kind: input, shape index: {}]   ;;  %s10527_s5 = inlined_call_operand.hbm [shape: f32[2,128,256], index: 5, kind: output, shape index: {}]  }
   0x1   :  { %11 = vsyncpa [#allocation7], 0 }
   0x2   :  { %12 = vsyncpa [#allocation5], 0 }
   0x3   :  { %14 = vsyncpa [#allocation5 + $0x1], 0  ;;  %s7207_s18 = smov 0   ;;  %s7209_s19 = smov 0  }
   0x4   :  { %s7211_s20 = smov 0   ;;  %s7213_s21 = smov 0  }
   0x5 LB: > { %s7228_s22 = sadd.s32 4294967295, %s7166_s21   ;;  %s5674_s23 = sadd.s32 4294967294, %s7166_s21   ;;  %s7166_s21 = sphi %s7213_s21, %s11095_s21   ;;  %s7162_s20 = sphi %s7211_s20, %s11094_s20   ;;  %s7158_s19 = sphi %s7209_s19, %s11093_s19   ;;  %s7154_s18 = sphi %s7207_s18, %s11092_s18  }
   0x6   : > { %s7232_s24 = sadd.s32 1, %s7166_s21   ;;  %s137_s25 = sadd.s32 1, %s7162_s20 }
   0x7   : > { %s134_s26 = ssub.s32 %s7166_s21, %s7232_s24  ;;  %p147_p0 = scmp.ne.s32.totalorder %s7162_s20, %s7158_s19 }
   0x8   : > { %p135_p1 = scmp.eq.s32.totalorder %s134_s26, 0  ;;  %p148_p2 = scmp.eq.s32.totalorder %s7228_s22, 1 }
   0x9   : > { %p153_p3 = scmp.ne.s32.totalorder %s7158_s19, %s7154_s18  ;;  %p154_p4 = scmp.eq.s32.totalorder %s5674_s23, 1 }
   0xa   : > { %s7243_s27 = scalar_select %p135_p1, %s7162_s20, %s137_s25  }
   0xb   : > { %p7245_p5 = por %p148_p2, %p147_p0  ;;  %p7249_p6 = por %p154_p4, %p153_p3 }
   0xc   : > { %p5675_p7 = scmp.ge.s32.totalorder %s7166_s21, 1  ;;  %p161_p8 = scmp.lt.s32.totalorder %s7166_s21, 3 }
   0xd   : > { %s10672_s28 = scalar_select %p7245_p5, 1, 0 }
   0xe   : > { %s10673_s29 = scalar_select %p7249_p6, 1, 0 }
   0xf   : > { %p10528_p9 = scmp.eq.s32.totalorder %s7228_s22, 0  ;;  %p7256_p10 = pnand %p5675_p7, %p161_p8 }
  0x10   : > { %s7168_s6 = smov [#allocation3]   ;;  %s7169_s9 = smov [#allocation6]  }
  0x11   : > { %s10674_s30 = scalar_select %p7256_p10, 1, 0 }
  0x12   : > { %s173_s7 = sshll.u32 %s7168_s6, 4  ;;  %p6182_p11 = pneg %p7256_p10  ;;  %s174_s7 = int_to_ptr.vmem [resolvable:$true] %s173_s7 }
  0x13   : > { %s189_s10 = sshll.u32 %s7169_s9, 4  ;;  %s7040_s13 = scalar_lea.hbm %s10523_s1, 6144  ;;  %s7268_s10 = int_to_ptr.vmem [resolvable:$true] %s189_s10 }
  0x14   : > { %p7264_p12 = pnand %p10528_p9, %p6182_p11  ;;  %p7041_p13 = scmp.ne.s32.totalorder %s10523_s1, %s7040_s13 }
  0x15   : > { %p7047_p3 = scmp.lt.u32.totalorder %s7040_s13, %s10523_s1 }
  0x16   : > { %p7042_p0 = pneg %p7264_p12 }
  0x18   : > { %p7043_p1 = pnand %p7042_p0, %p7041_p13 }
  0x1a   : > { %p7044_p2 = pneg %p7043_p1 }
  0x1c   : > { %p7049_p4 = pnand %p7047_p3, %p7044_p2 }
  0x1e   : > { %7052 = shalt.err (!%p7049_p4)
}
  0x1f   : > { %s7053_s23 = scalar_lea.vmem %s174_s7, 6144  ;;  %p7061_p9 = scmp.lt.s32.totalorder %s174_s7, %s174_s7 }
  0x20   : > { %p7054_p7 = scmp.ne.s32.totalorder %s174_s7, %s7053_s23  ;;  %p7062_p6 = scmp.lt.s32.totalorder %s7053_s23, %s7053_s23 }
  0x22   : > { %p7056_p8 = pnand %p7054_p7, %p7042_p0  ;;  %p7063_p5 = por %p7062_p6, %p7061_p9 }
  0x24   : > { %p7057_p11 = pneg %p7056_p8 }
  0x26   : > { %p7064_p10 = pnand %p7063_p5, %p7057_p11 }
  0x28   : > { %7067 = shalt.err (!%p7064_p10)
}
  0x29   : > { %s7170_s25 = smov 128   ;;  %s7171_s26 = smov 8  }
  0x2a   : > { %6185 = dma.hbm_to_vmem [thread:$0]  (!%p7264_p12), %s10523_s1, 6144, %s174_s7, [#allocation4], %s7170_s25, %s7170_s25, %s7171_s26  }
  0x2b   : > { %s7068_s13 = scalar_lea.hbm %s10525_s3, 2048 }
  0x2c   : > { %p7069_p13 = scmp.ne.s32.totalorder %s10525_s3, %s7068_s13  ;;  %p7075_p9 = scmp.lt.u32.totalorder %s7068_s13, %s10525_s3 }
  0x2e   : > { %p7071_p5 = pnand %p7069_p13, %p7042_p0 }
  0x30   : > { %p7072_p6 = pneg %p7071_p5 }
  0x32   : > { %p7077_p10 = pnand %p7075_p9, %p7072_p6 }
  0x34   : > { %7080 = shalt.err (!%p7077_p10)
}
  0x35   : > { %s7081_s7 = scalar_lea.vmem %s7268_s10, 2048  ;;  %p7089_p4 = scmp.lt.s32.totalorder %s7268_s10, %s7268_s10 }
  0x36   : > { %p7082_p1 = scmp.ne.s32.totalorder %s7268_s10, %s7081_s7  ;;  %p7090_p7 = scmp.lt.s32.totalorder %s7081_s7, %s7081_s7 }
  0x38   : > { %p7084_p2 = pnand %p7082_p1, %p7042_p0  ;;  %p7091_p8 = por %p7090_p7, %p7089_p4 }
  0x3a   : > { %p7085_p3 = pneg %p7084_p2 }
  0x3c   : > { %p7092_p11 = pnand %p7091_p8, %p7085_p3 }
  0x3e   : > { %7095 = shalt.err (!%p7092_p11)
}
  0x3f   : > { %6188 = dma.hbm_to_vmem [thread:$0]  (!%p7264_p12), %s10525_s3, 2048, %s7268_s10, [#allocation7], %s7170_s25, %s7170_s25, %s7171_s26  }
  0x40   : > { %p10676_p13 = scmp.ne.s32.totalorder %s10674_s30, 0 }
  0x42   : > { %216 = sbr.rel (%p10676_p13) target bundleno = 3950 (0xf6e), region = 40 }
  0x49   : > { %p10677_p5 = scmp.eq.s32.totalorder %s7228_s22, 0 }
  0x4b   : > { %7141 = dma.done.wait (%p10677_p5), [#allocation4], 6144   ;;  %p10678_p0 = pmov %p10677_p5 }
  0x4d   : > { %7143 = vsyncadd (%p10678_p0), [#allocation4], 4294961152  ;;  %p10679_p6 = pmov %p10678_p0 }
  0x4e   : > { %p10680_p9 = pmov %p10678_p0 }
  0x4f   : > { %7145 = dma.done.wait (%p10679_p6), [#allocation7], 2048  }
  0x50   : > { %7147 = vsyncadd (%p10680_p9), [#allocation7], 4294965248  ;;  %p248_p10 = scmp.lt.s32.totalorder %s7228_s22, 1  ;;  %v10531_v0 = vmov 0.0   ;;  %v7173_v1 = vmov 0   ;;  %v333_v31 = vld [vmem:[%s10524_s2] sm:$0xff] }
  0x51   : > { %685 = vmatprep.mubr.f32.mxu0 %v10531_v0  ;;  %6238 = vset.pattern.permute.xlu0 %v7173_v1  ;;  %v335_v34 = vld [vmem:[%s10524_s2 + $0x10] sm:$0xff]  ;;  %v334_v35 = vld [vmem:[%s10524_s2 + $0x8] sm:$0xff]  ;;  %v336_v37 = vld [vmem:[%s10524_s2 + $0x18] sm:$0xff]  ;;  %vm1038_vm0 = vcmask 261120   ;;  %s245_s7 = sand.u32 1, %s7158_s19   ;;  %p11090_p1 = scmp.ne.s32.totalorder %s10672_s28, 0 }
  0x52   : > { %s249_s30 = scalar_select %p248_p10, %s7228_s22, 1  ;;  %6239 = vset.pattern.permute.xlu1 %v7173_v1  ;;  %1199 = vmatprep.mubr.f32.mxu1 %v10531_v0  ;;  %v337_v43 = vld [vmem:[%s10524_s2 + $0x20] sm:$0xff]  ;;  %v338_v45 = vld [vmem:[%s10524_s2 + $0x28] sm:$0xff]  ;;  %v339_v51 = vld [vmem:[%s10524_s2 + $0x30] sm:$0xff] }
  0x53   : > { %383 = vperm.xlu0 %6238, %v333_v31   ;;  %393 = vperm.xlu1 %6239, %v335_v34   ;;  %v340_v53 = vld [vmem:[%s10524_s2 + $0x38] sm:$0xff]  ;;  %v285_v58 = vld [vmem:[#allocation3] sm:$0xff]  ;;  %v286_v59 = vld [vmem:[#allocation3 + $0x8] sm:$0xff]  ;;  %s5682_s23 = sshll.u32 %s245_s7, 8  ;;  %s7174_s12 = smov [#allocation8]  }
  0x54   : > { %s5818_s8 = sshll.u32 %s249_s30, 8  ;;  %v287_v60 = vld [vmem:[#allocation3 + $0x10] sm:$0xff]  ;;  %v288_v61 = vld [vmem:[#allocation3 + $0x18] sm:$0xff]  ;;  %v289_v62 = vld [vmem:[#allocation3 + $0x20] sm:$0xff]  ;;  %s10406_s6 = scalar_lea.vmem [#allocation8], %s5682_s23 }
  0x55   : > { %s7334_s26 = scalar_lea.vmem %s10522_s0, %s5818_s8  ;;  %v290_v63 = vld [vmem:[#allocation3 + $0x28] sm:$0xff]  ;;  %v291_v1 = vld [vmem:[#allocation3 + $0x30] sm:$0xff]  ;;  %s5819_s30 = sshll.u32 %s7228_s22, 12 }
  0x56   : > { %v254_v2 = vld [vmem:[%s7334_s26 + $0x8] sm:$0xff]  ;;  %v256_v3 = vld [vmem:[%s7334_s26 + $0x18] sm:$0xff]  ;;  %v253_v4 = vld [vmem:[%s7334_s26] sm:$0xff]  ;;  %s5590_s8 = sshll.u32 %s10406_s6, 4  ;;  %s10472_s9 = scalar_lea.hbm %s10527_s5, %s5819_s30  ;;  %s10474_s8 = int_to_ptr.vmem [resolvable:$true] %s5590_s8 }
  0x57   : > { %v5820_v5 = vpack.c.bf16 %v256_v3, %v254_v2  ;;  %v255_v6 = vld [vmem:[%s7334_s26 + $0x10] sm:$0xff]  ;;  %v258_v7 = vld [vmem:[%s7334_s26 + $0x28] sm:$0xff]  ;;  %v260_v8 = vld [vmem:[%s7334_s26 + $0x38] sm:$0xff]  ;;  %388 = vperm.xlu0 %6238, %v334_v35   ;;  %398 = vperm.xlu1 %6239, %v336_v37   ;;  %s10481_s22 = scalar_lea.sflag [#allocation5], %s245_s7  ;;  %s7096_s11 = scalar_lea.vmem %s10474_s8, 4096 }
  0x58   : > { %v5822_v9 = vpack.c.bf16 %v255_v6, %v253_v4  ;;  %v5824_v10 = vpack.c.bf16 %v260_v8, %v258_v7  ;;  %v257_v11 = vld [vmem:[%s7334_s26 + $0x20] sm:$0xff]  ;;  %v259_v12 = vld [vmem:[%s7334_s26 + $0x30] sm:$0xff]  ;;  %v262_v13 = vld [vmem:[%s7334_s26 + $0x48] sm:$0xff]  ;;  %p7097_p12 = scmp.ne.s32.totalorder %s10474_s8, %s7096_s11  ;;  %s7100_s13 = sshll.u32 %s7174_s12, 4  ;;  %s7101_s13 = int_to_ptr.vmem [resolvable:$false] %s7100_s13 }
  0x59   : > { %5821 = vmatprep.subr.bf16.mxu0 %v5820_v5  ;;  %v264_v14 = vld [vmem:[%s7334_s26 + $0x58] sm:$0xff]  ;;  %v5826_v15 = vpack.c.bf16 %v259_v12, %v257_v11  ;;  %v261_v17 = vld [vmem:[%s7334_s26 + $0x40] sm:$0xff]  ;;  %v263_v18 = vld [vmem:[%s7334_s26 + $0x50] sm:$0xff]  ;;  %s7102_s14 = scalar_lea.vmem %s7101_s13, 8192  ;;  %p7103_p4 = scmp.lt.s32.totalorder %s10474_s8, %s7101_s13 }
  0x5a   : > { %5823 = vmatpush1.bf16.msra.mxu0 %v5822_v9  ;;  %v5828_v16 = vpack.c.bf16 %v264_v14, %v262_v13  ;;  %v266_v19 = vld [vmem:[%s7334_s26 + $0x68] sm:$0xff]  ;;  %v268_v20 = vld [vmem:[%s7334_s26 + $0x78] sm:$0xff]  ;;  %v5830_v21 = vpack.c.bf16 %v263_v18, %v261_v17  ;;  %v265_v23 = vld [vmem:[%s7334_s26 + $0x60] sm:$0xff]  ;;  %p7098_p2 = pnand %p7097_p12, %p11090_p1  ;;  %p7104_p7 = scmp.lt.s32.totalorder %s7102_s14, %s7096_s11 }
  0x5b   : > { %5825 = vmatprep.subr.bf16.mxu0 %v5824_v10  ;;  %v5832_v22 = vpack.c.bf16 %v268_v20, %v266_v19  ;;  %v267_v24 = vld [vmem:[%s7334_s26 + $0x70] sm:$0xff]  ;;  %v270_v25 = vld [vmem:[%s7334_s26 + $0x88] sm:$0xff]  ;;  %v272_v26 = vld [vmem:[%s7334_s26 + $0x98] sm:$0xff]  ;;  %403 = vperm.xlu0 %6238, %v337_v43  }
  0x5c   : > { %v5834_v27 = vpack.c.bf16 %v267_v24, %v265_v23  ;;  %v5836_v28 = vpack.c.bf16 %v272_v26, %v270_v25  ;;  %v269_v29 = vld [vmem:[%s7334_s26 + $0x80] sm:$0xff]  ;;  %v271_v30 = vld [vmem:[%s7334_s26 + $0x90] sm:$0xff]  ;;  %v274_v32 = vld [vmem:[%s7334_s26 + $0xa8] sm:$0xff]  ;;  %408 = vperm.xlu1 %6239, %v338_v45   ;;  %p7099_p3 = pneg %p7098_p2  ;;  %p7105_p8 = por %p7104_p7, %p7103_p4 }
  0x5d   : > { %v276_v33 = vld [vmem:[%s7334_s26 + $0xb8] sm:$0xff]  ;;  %v5838_v36 = vpack.c.bf16 %v271_v30, %v269_v29  ;;  %v273_v39 = vld [vmem:[%s7334_s26 + $0xa0] sm:$0xff]  ;;  %v275_v40 = vld [vmem:[%s7334_s26 + $0xb0] sm:$0xff] }
  0x5e   : > { %5827 = vmatpush1.bf16.msra.mxu0 %v5826_v15  ;;  %v5840_v38 = vpack.c.bf16 %v276_v33, %v274_v32  ;;  %v278_v41 = vld [vmem:[%s7334_s26 + $0xc8] sm:$0xff]  ;;  %v280_v42 = vld [vmem:[%s7334_s26 + $0xd8] sm:$0xff]  ;;  %v5842_v44 = vpack.c.bf16 %v275_v40, %v273_v39  ;;  %v277_v47 = vld [vmem:[%s7334_s26 + $0xc0] sm:$0xff]  ;;  %p7106_p11 = pnand %p7105_p8, %p7099_p3 }
  0x5f   : > { %5829 = vmatprep.subr.bf16.mxu0 %v5828_v16  ;;  %v5844_v46 = vpack.c.bf16 %v280_v42, %v278_v41  ;;  %v279_v48 = vld [vmem:[%s7334_s26 + $0xd0] sm:$0xff]  ;;  %v282_v49 = vld [vmem:[%s7334_s26 + $0xe8] sm:$0xff]  ;;  %v284_v50 = vld [vmem:[%s7334_s26 + $0xf8] sm:$0xff]  ;;  %413 = vperm.xlu0 %6238, %v339_v51  }
  0x60   : > { %v5846_v52 = vpack.c.bf16 %v279_v48, %v277_v47  ;;  %v5848_v54 = vpack.c.bf16 %v284_v50, %v282_v49  ;;  %v281_v55 = vld [vmem:[%s7334_s26 + $0xe0] sm:$0xff]  ;;  %v283_v56 = vld [vmem:[%s7334_s26 + $0xf0] sm:$0xff]  ;;  %418 = vperm.xlu1 %6239, %v340_v53   ;;  %v292_v2 = vld [vmem:[#allocation3 + $0x38] sm:$0xff] }
  0x61   : > { %v5850_v57 = vpack.c.bf16 %v283_v56, %v281_v55  ;;  %v293_v3 = vld [vmem:[#allocation3 + $0x40] sm:$0xff]  ;;  %v294_v4 = vld [vmem:[#allocation3 + $0x48] sm:$0xff]  ;;  %v295_v5 = vld [vmem:[#allocation3 + $0x50] sm:$0xff] }
  0x62   : > { %5831 = vmatpush1.bf16.msra.mxu0 %v5830_v21  ;;  %v296_v6 = vld [vmem:[#allocation3 + $0x58] sm:$0xff]  ;;  %v297_v7 = vld [vmem:[#allocation3 + $0x60] sm:$0xff]  ;;  %v298_v8 = vld [vmem:[#allocation3 + $0x68] sm:$0xff] }
  0x63   : > { %5833 = vmatprep.subr.bf16.mxu0 %v5832_v22  ;;  %v299_v9 = vld [vmem:[#allocation3 + $0x70] sm:$0xff]  ;;  %v300_v10 = vld [vmem:[#allocation3 + $0x78] sm:$0xff] }
  0x66   : > { %5835 = vmatpush1.bf16.msra.mxu0 %v5834_v27 }
  0x67   : > { %5837 = vmatprep.subr.bf16.mxu0 %v5836_v28 }
  0x6a   : > { %5839 = vmatpush1.bf16.msra.mxu0 %v5838_v36 }
  0x6b   : > { %5841 = vmatprep.subr.bf16.mxu0 %v5840_v38 }
  0x6e   : > { %5843 = vmatpush1.bf16.msra.mxu0 %v5842_v44 }
  0x6f   : > { %5845 = vmatprep.subr.bf16.mxu0 %v5844_v46 }
  0x72   : > { %5847 = vmatpush1.bf16.msra.mxu0 %v5846_v52 }
  0x73   : > { %5849 = vmatprep.subr.bf16.mxu0 %v5848_v54 }
  0x76   : > { %5851 = vmatpush1.bf16.msra.mxu0 %v5850_v57 }
  0x79   : > { %686 = vmatmul.mubr.f32.vlgmr.msra.gmra.mrb[0].mxu0 %v285_v58 }
  0x7a   : > { %691 = vmatprep.mubr.f32.mxu0 %v10531_v0 }
  0x7d   : > { %692 = vmatmul.mubr.f32.gmra.mrb[2].mxu0 %v286_v59 }
  0x7e   : > { %697 = vmatprep.mubr.f32.mxu0 %v10531_v0 }
  0x81   : > { %698 = vmatmul.mubr.f32.gmra.mrb[4].mxu0 %v287_v60 }
  0x82   : > { %703 = vmatprep.mubr.f32.mxu0 %v10531_v0 }
  0x85   : > { %704 = vmatmul.mubr.f32.gmra.mrb[6].mxu0 %v288_v61 }
  0x86   : > { %709 = vmatprep.mubr.f32.mxu0 %v10531_v0 }
  0x89   : > { %710 = vmatmul.mubr.f32.gmra.mrb[8].mxu0 %v289_v62 }
  0x8a   : > { %715 = vmatprep.mubr.f32.mxu0 %v10531_v0 }
  0x8d   : > { %716 = vmatmul.mubr.f32.gmra.mrb[10].mxu0 %v290_v63  ;;  %v345_v63 = vld [vmem:[%s10524_s2 + $0x60] sm:$0xff] }
  0x8e   : > { %721 = vmatprep.mubr.f32.mxu0 %v10531_v0 }
  0x91   : > { %722 = vmatmul.mubr.f32.gmra.mrb[12].mxu0 %v291_v1 }
  0x92   : > { %727 = vmatprep.mubr.f32.mxu0 %v10531_v0 }
  0x95   : > { %728 = vmatmul.mubr.f32.gmra.mrb[14].mxu0 %v292_v2 }
  0x96   : > { %733 = vmatprep.mubr.f32.mxu0 %v10531_v0 }
  0x99   : > { %734 = vmatmul.mubr.f32.gmra.mrb[16].mxu0 %v293_v3 }
  0x9a   : > { %739 = vmatprep.mubr.f32.mxu0 %v10531_v0 }
  0x9d   : > { %740 = vmatmul.mubr.f32.gmra.mrb[18].mxu0 %v294_v4  ;;  %v347_v4 = vld [vmem:[%s10524_s2 + $0x70] sm:$0xff] }
  0x9e   : > { %745 = vmatprep.mubr.f32.mxu0 %v10531_v0 }
  0xa1   : > { %746 = vmatmul.mubr.f32.gmra.mrb[20].mxu0 %v295_v5 }
  0xa2   : > { %751 = vmatprep.mubr.f32.mxu0 %v10531_v0 }
  0xa5   : > { %752 = vmatmul.mubr.f32.gmra.mrb[22].mxu0 %v296_v6 }
  0xa6   : > { %757 = vmatprep.mubr.f32.mxu0 %v10531_v0 }
  0xa9   : > { %758 = vmatmul.mubr.f32.gmra.mrb[24].mxu0 %v297_v7 }
  0xaa   : > { %763 = vmatprep.mubr.f32.mxu0 %v10531_v0 }
  0xad   : > { %764 = vmatmul.mubr.f32.gmra.mrb[26].mxu0 %v298_v8  ;;  %v348_v8 = vld [vmem:[%s10524_s2 + $0x78] sm:$0xff] }
  0xae   : > { %769 = vmatprep.mubr.f32.mxu0 %v10531_v0 }
  0xb1   : > { %770 = vmatmul.mubr.f32.gmra.mrb[28].mxu0 %v299_v9 }
  0xb2   : > { %775 = vmatprep.mubr.f32.mxu0 %v10531_v0 }
  0xb5   : > { %776 = vmatmul.mubr.f32.gmra.mrb[30].mxu0 %v300_v10  ;;  %v346_v10 = vld [vmem:[%s10524_s2 + $0x68] sm:$0xff] }
  0xb6   : > { %781 = vmatprep.mubr.f32.mxu0 %v10531_v0 }
  0xd2   : > { %v384_v11 = vpop.permute.xlu0 %383  ;;  %v394_v20 = vpop.permute.xlu1 %393 }
  0xd6   : > { %v389_v16 = vpop.permute.xlu0 %388  ;;  %v399_v26 = vpop.permute.xlu1 %398 }
  0xda   : > { %v404_v33 = vpop.permute.xlu0 %403 }
  0xdb   : > { %v409_v34 = vpop.permute.xlu1 %408 }
  0xde   : > { %v414_v45 = vpop.permute.xlu0 %413 }
  0xdf   : > { %v419_v46 = vpop.permute.xlu1 %418 }
 0x14c   : > { %v687_v12 = vpop.f32.mrb[0].mxu0 }
 0x14d   : > { %v688_v13 = vadd.f32 %v687_v12, %v384_v11  ;;  %v689_v14 = vpop.f32.mrb[1].mxu0 }
 0x14e   : > { %v690_v15 = vadd.f32 %v689_v14, %v384_v11 }
 0x14f   : > { %974 = vxpose.xlu0.b32.start [1/4] (short) %v688_v13, 128 }
 0x150   : > { %v693_v17 = vpop.f32.mrb[2].mxu0  ;;  %1006 = vxpose.xlu1.b32.start [1/4] (short) %v690_v15, 128 }
 0x151   : > { %v694_v18 = vadd.f32 %v693_v17, %v389_v16  ;;  %v695_v19 = vpop.f32.mrb[3].mxu0 }
 0x152   : > { %v696_v21 = vadd.f32 %v695_v19, %v389_v16 }
 0x153   : > { %975 = vxpose.xlu0.b32.cont [2/4] (short) %v694_v18, 128 }
 0x154   : > { %v699_v22 = vpop.f32.mrb[4].mxu0  ;;  %1007 = vxpose.xlu1.b32.cont [2/4] (short) %v696_v21, 128 }
 0x155   : > { %v700_v23 = vadd.f32 %v699_v22, %v394_v20  ;;  %v701_v24 = vpop.f32.mrb[5].mxu0 }
 0x156   : > { %v702_v25 = vadd.f32 %v701_v24, %v394_v20 }
 0x157   : > { %976 = vxpose.xlu0.b32.cont [3/4] (short) %v700_v23, 128 }
 0x158   : > { %v705_v27 = vpop.f32.mrb[6].mxu0  ;;  %1008 = vxpose.xlu1.b32.cont [3/4] (short) %v702_v25, 128 }
 0x159   : > { %v706_v28 = vadd.f32 %v705_v27, %v399_v26  ;;  %v707_v29 = vpop.f32.mrb[7].mxu0 }
 0x15a   : > { %v708_v30 = vadd.f32 %v707_v29, %v399_v26 }
 0x15b   : > { %977 = vxpose.xlu0.b32.end [4/4] (short) %v706_v28, 128 }
 0x15c   : > { %v711_v31 = vpop.f32.mrb[8].mxu0  ;;  %1009 = vxpose.xlu1.b32.end [4/4] (short) %v708_v30, 128 }
 0x15d   : > { %v713_v32 = vpop.f32.mrb[9].mxu0  ;;  %v712_v36 = vadd.f32 %v711_v31, %v404_v33 }
 0x15e   : > { %v714_v39 = vadd.f32 %v713_v32, %v404_v33 }
 0x160   : > { %v717_v35 = vpop.f32.mrb[10].mxu0 }
 0x161   : > { %v718_v37 = vadd.f32 %v717_v35, %v409_v34  ;;  %v719_v38 = vpop.f32.mrb[11].mxu0 }
 0x162   : > { %v720_v40 = vadd.f32 %v719_v38, %v409_v34 }
 0x163   : > { %v5854_v41 = vpack.c.bf16 %v718_v37, %v712_v36 }
 0x164   : > { %v723_v42 = vpop.f32.mrb[12].mxu0  ;;  %v5852_v43 = vpack.c.bf16 %v720_v40, %v714_v39 }
 0x165   : > { %v725_v44 = vpop.f32.mrb[13].mxu0  ;;  %v724_v48 = vadd.f32 %v723_v42, %v414_v45 }
 0x166   : > { %5853 = vmatprep.subr.bf16.mxu1 %v5852_v43  ;;  %v726_v51 = vadd.f32 %v725_v44, %v414_v45 }
 0x167   : > { %5855 = vmatpush1.bf16.msra.mxu1 %v5854_v41 }
 0x168   : > { %v729_v47 = vpop.f32.mrb[14].mxu0 }
 0x169   : > { %v730_v49 = vadd.f32 %v729_v47, %v419_v46  ;;  %v731_v50 = vpop.f32.mrb[15].mxu0 }
 0x16a   : > { %v732_v52 = vadd.f32 %v731_v50, %v419_v46 }
 0x16b   : > { %v5858_v53 = vpack.c.bf16 %v730_v49, %v724_v48 }
 0x16c   : > { %v5856_v54 = vpack.c.bf16 %v732_v52, %v726_v51  ;;  %v7408_v55 = vpop.f32.mrb[16].mxu0 }
 0x16d   : > { %10681 = vst [vmem:[#allocation12_spill] sm:$0xff] %v7408_v55  ;;  %v7410_v56 = vpop.f32.mrb[17].mxu0 }
 0x16e   : > { %5857 = vmatprep.subr.bf16.mxu1 %v5856_v54  ;;  %10682 = vst [vmem:[#allocation13_spill] sm:$0xff] %v7410_v56 }
 0x16f   : > { %5859 = vmatpush1.bf16.msra.mxu1 %v5858_v53 }
 0x170   : > { %v7412_v57 = vpop.f32.mrb[18].mxu0 }
 0x171   : > { %10683 = vst [vmem:[#allocation14_spill] sm:$0xff] %v7412_v57  ;;  %v7414_v58 = vpop.f32.mrb[19].mxu0 }
 0x172   : > { %10684 = vst [vmem:[#allocation15_spill] sm:$0xff] %v7414_v58 }
 0x174   : > { %v7416_v59 = vpop.f32.mrb[20].mxu0 }
 0x175   : > { %10685 = vst [vmem:[#allocation16_spill] sm:$0xff] %v7416_v59  ;;  %v7418_v60 = vpop.f32.mrb[21].mxu0 }
 0x176   : > { %10686 = vst [vmem:[#allocation17_spill] sm:$0xff] %v7418_v60 }
 0x178   : > { %v7420_v61 = vpop.f32.mrb[22].mxu0 }
 0x179   : > { %10687 = vst [vmem:[#allocation18_spill] sm:$0xff] %v7420_v61  ;;  %v7422_v62 = vpop.f32.mrb[23].mxu0 }
 0x17a   : > { %10688 = vst [vmem:[#allocation19_spill] sm:$0xff] %v7422_v62 }
 0x17c   : > { %v7427_v1 = vpop.f32.mrb[24].mxu0 }
 0x17d   : > { %v7429_v2 = vpop.f32.mrb[25].mxu0 }
 0x180   : > { %v7431_v3 = vpop.f32.mrb[26].mxu0 }
 0x181   : > { %10689 = vst [vmem:[#allocation20_spill] sm:$0xff] %v7431_v3  ;;  %v7436_v5 = vpop.f32.mrb[27].mxu0 }
 0x182   : > { %10690 = vst [vmem:[#allocation21_spill] sm:$0xff] %v7436_v5 }
 0x184   : > { %v7438_v6 = vpop.f32.mrb[28].mxu0 }
 0x185   : > { %v7440_v7 = vpop.f32.mrb[29].mxu0 }
 0x188   : > { %v7445_v9 = vpop.f32.mrb[30].mxu0 }
 0x189   : > { %10691 = vst [vmem:[#allocation22_spill] sm:$0xff] %v7445_v9  ;;  %v7450_v11 = vpop.f32.mrb[31].mxu0 }
 0x18a   : > { %10692 = vst [vmem:[#allocation23_spill] sm:$0xff] %v7450_v11 }
 0x1aa   : > { %443 = vperm.xlu1 %6239, %v345_v63  }
 0x1ae   : > { %453 = vperm.xlu1 %6239, %v347_v4  }
 0x1b2   : > { %458 = vperm.xlu1 %6239, %v348_v8  }
 0x1b4   : > { %448 = vperm.xlu0 %6238, %v346_v10  }
 0x1cf   : > { %v990_v12 = vpop.trf.xlu0 }
 0x1d0   : > { %5685 = vmatmul.mubr.msk.f32.vlgmr.msra.gmra.mrb[0].mxu1 %vm1038_vm0, %v990_v12  ;;  %v1022_v13 = vpop.trf.xlu1 }
 0x1d1   : > { %1205 = vmatprep.mubr.f32.mxu1 %v10531_v0 }
 0x1d3   : > { %v991_v14 = vpop.trf.xlu0 }
 0x1d4   : > { %5686 = vmatmul.mubr.msk.f32.gmra.mrb[2].mxu1 %vm1038_vm0, %v991_v14  ;;  %v1023_v15 = vpop.trf.xlu1 }
 0x1d5   : > { %1211 = vmatprep.mubr.f32.mxu1 %v10531_v0 }
 0x1d7   : > { %v992_v16 = vpop.trf.xlu0 }
 0x1d8   : > { %5687 = vmatmul.mubr.msk.f32.gmra.mrb[4].mxu1 %vm1038_vm0, %v992_v16  ;;  %v1024_v17 = vpop.trf.xlu1 }
 0x1d9   : > { %1217 = vmatprep.mubr.f32.mxu1 %v10531_v0 }
 0x1db   : > { %v993_v18 = vpop.trf.xlu0 }
 0x1dc   : > { %5688 = vmatmul.mubr.msk.f32.gmra.mrb[6].mxu1 %vm1038_vm0, %v993_v18  ;;  %v1025_v19 = vpop.trf.xlu1 }
 0x1dd   : > { %1223 = vmatprep.mubr.f32.mxu1 %v10531_v0 }
 0x1df   : > { %v994_v20 = vpop.trf.xlu0 }
 0x1e0   : > { %5689 = vmatmul.mubr.msk.f32.gmra.mrb[8].mxu1 %vm1038_vm0, %v994_v20  ;;  %v1026_v21 = vpop.trf.xlu1 }
 0x1e1   : > { %1229 = vmatprep.mubr.f32.mxu1 %v10531_v0 }
 0x1e3   : > { %v995_v22 = vpop.trf.xlu0 }
 0x1e4   : > { %5690 = vmatmul.mubr.msk.f32.gmra.mrb[10].mxu1 %vm1038_vm0, %v995_v22  ;;  %v1027_v24 = vpop.trf.xlu1 }
 0x1e5   : > { %1235 = vmatprep.mubr.f32.mxu1 %v10531_v0 }
 0x1e7   : > { %v996_v23 = vpop.trf.xlu0 }
 0x1e8   : > { %5691 = vmatmul.mubr.msk.f32.gmra.mrb[12].mxu1 %vm1038_vm0, %v996_v23  ;;  %v1028_v26 = vpop.trf.xlu1 }
 0x1e9   : > { %1241 = vmatprep.mubr.f32.mxu1 %v10531_v0 }
 0x1eb   : > { %v997_v25 = vpop.trf.xlu0 }
 0x1ec   : > { %5692 = vmatmul.mubr.msk.f32.gmra.mrb[14].mxu1 %vm1038_vm0, %v997_v25  ;;  %v1029_v29 = vpop.trf.xlu1 }
 0x1ed   : > { %1247 = vmatprep.mubr.f32.mxu1 %v10531_v0 }
 0x1ef   : > { %v998_v27 = vpop.trf.xlu0 }
 0x1f0   : > { %5693 = vmatmul.mubr.msk.f32.gmra.mrb[16].mxu1 %vm1038_vm0, %v998_v27  ;;  %v1030_v31 = vpop.trf.xlu1 }
 0x1f1   : > { %1253 = vmatprep.mubr.f32.mxu1 %v10531_v0 }
 0x1f3   : > { %v999_v28 = vpop.trf.xlu0 }
 0x1f4   : > { %5694 = vmatmul.mubr.msk.f32.gmra.mrb[18].mxu1 %vm1038_vm0, %v999_v28  ;;  %v1031_v34 = vpop.trf.xlu1 }
 0x1f5   : > { %1259 = vmatprep.mubr.f32.mxu1 %v10531_v0 }
 0x1f7   : > { %v1000_v30 = vpop.trf.xlu0 }
 0x1f8   : > { %5695 = vmatmul.mubr.msk.f32.gmra.mrb[20].mxu1 %vm1038_vm0, %v1000_v30  ;;  %v1032_v36 = vpop.trf.xlu1 }
 0x1f9   : > { %1265 = vmatprep.mubr.f32.mxu1 %v10531_v0 }
 0x1fb   : > { %v1001_v32 = vpop.trf.xlu0 }
 0x1fc   : > { %5696 = vmatmul.mubr.msk.f32.gmra.mrb[22].mxu1 %vm1038_vm0, %v1001_v32  ;;  %v1033_v39 = vpop.trf.xlu1 }
 0x1fd   : > { %1271 = vmatprep.mubr.f32.mxu1 %v10531_v0 }
 0x1ff   : > { %v1002_v33 = vpop.trf.xlu0 }
 0x200   : > { %5697 = vmatmul.mubr.msk.f32.gmra.mrb[24].mxu1 %vm1038_vm0, %v1002_v33  ;;  %v1034_v40 = vpop.trf.xlu1 }
 0x201   : > { %1277 = vmatprep.mubr.f32.mxu1 %v10531_v0 }
 0x203   : > { %v1003_v35 = vpop.trf.xlu0 }
 0x204   : > { %5698 = vmatmul.mubr.msk.f32.gmra.mrb[26].mxu1 %vm1038_vm0, %v1003_v35  ;;  %v1035_v41 = vpop.trf.xlu1 }
 0x205   : > { %1283 = vmatprep.mubr.f32.mxu1 %v10531_v0 }
 0x207   : > { %v1004_v37 = vpop.trf.xlu0 }
 0x208   : > { %5699 = vmatmul.mubr.msk.f32.gmra.mrb[28].mxu1 %vm1038_vm0, %v1004_v37  ;;  %v1036_v42 = vpop.trf.xlu1 }
 0x209   : > { %1289 = vmatprep.mubr.f32.mxu1 %v10531_v0 }
 0x20b   : > { %v1005_v38 = vpop.trf.xlu0 }
 0x20c   : > { %5700 = vmatmul.mubr.msk.f32.gmra.mrb[30].mxu1 %vm1038_vm0, %v1005_v38  ;;  %v1037_v43 = vpop.trf.xlu1 }
 0x20d   : > { %1295 = vmatprep.mubr.f32.mxu1 %v10531_v0 }
 0x210   : > { %5701 = vmatmul.mubr.msk.f32.gmra.mrb[32].mxu1 %vm1038_vm0, %v1022_v13 }
 0x211   : > { %1301 = vmatprep.mubr.f32.mxu1 %v10531_v0 }
 0x214   : > { %5702 = vmatmul.mubr.msk.f32.gmra.mrb[34].mxu1 %vm1038_vm0, %v1023_v15 }
 0x215   : > { %1307 = vmatprep.mubr.f32.mxu1 %v10531_v0 }
 0x218   : > { %5703 = vmatmul.mubr.msk.f32.gmra.mrb[36].mxu1 %vm1038_vm0, %v1024_v17 }
 0x219   : > { %1313 = vmatprep.mubr.f32.mxu1 %v10531_v0 }
 0x21c   : > { %5704 = vmatmul.mubr.msk.f32.gmra.mrb[38].mxu1 %vm1038_vm0, %v1025_v19 }
 0x21d   : > { %1319 = vmatprep.mubr.f32.mxu1 %v10531_v0 }
 0x220   : > { %5705 = vmatmul.mubr.msk.f32.gmra.mrb[40].mxu1 %vm1038_vm0, %v1026_v21 }
 0x221   : > { %1325 = vmatprep.mubr.f32.mxu1 %v10531_v0 }
 0x224   : > { %5706 = vmatmul.mubr.msk.f32.gmra.mrb[42].mxu1 %vm1038_vm0, %v1027_v24 }
 0x225   : > { %1331 = vmatprep.mubr.f32.mxu1 %v10531_v0 }
 0x228   : > { %5707 = vmatmul.mubr.msk.f32.gmra.mrb[44].mxu1 %vm1038_vm0, %v1028_v26 }
 0x229   : > { %v444_v44 = vpop.permute.xlu1 %443  ;;  %1337 = vmatprep.mubr.f32.mxu1 %v10531_v0 }
 0x22a   : > { %v7499_v45 = vadd.f32 %v7427_v1, %v444_v44  ;;  %v7502_v46 = vadd.f32 %v7429_v2, %v444_v44 }
 0x22c   : > { %10693 = vst [vmem:[#allocation24_spill] sm:$0xff] %v7499_v45  ;;  %10694 = vst [vmem:[#allocation25_spill] sm:$0xff] %v7502_v46  ;;  %5708 = vmatmul.mubr.msk.f32.gmra.mrb[46].mxu1 %vm1038_vm0, %v1029_v29 }
 0x22d   : > { %v454_v47 = vpop.permute.xlu1 %453  ;;  %1343 = vmatprep.mubr.f32.mxu1 %v10531_v0 }
 0x22e   : > { %v7507_v48 = vadd.f32 %v7438_v6, %v454_v47  ;;  %v7510_v49 = vadd.f32 %v7440_v7, %v454_v47 }
 0x230   : > { %10695 = vst [vmem:[#allocation26_spill] sm:$0xff] %v7507_v48  ;;  %10696 = vst [vmem:[#allocation27_spill] sm:$0xff] %v7510_v49  ;;  %5709 = vmatmul.mubr.msk.f32.gmra.mrb[48].mxu1 %vm1038_vm0, %v1030_v31 }
 0x231   : > { %1349 = vmatprep.mubr.f32.mxu1 %v10531_v0 }
 0x234   : > { %5710 = vmatmul.mubr.msk.f32.gmra.mrb[50].mxu1 %vm1038_vm0, %v1031_v34 }
 0x235   : > { %1355 = vmatprep.mubr.f32.mxu1 %v10531_v0 }
 0x238   : > { %5711 = vmatmul.mubr.msk.f32.gmra.mrb[52].mxu1 %vm1038_vm0, %v1032_v36 }
 0x239   : > { %1361 = vmatprep.mubr.f32.mxu1 %v10531_v0 }
 0x23c   : > { %5712 = vmatmul.mubr.msk.f32.gmra.mrb[54].mxu1 %vm1038_vm0, %v1033_v39 }
 0x23d   : > { %1367 = vmatprep.mubr.f32.mxu1 %v10531_v0 }
 0x240   : > { %5713 = vmatmul.mubr.msk.f32.gmra.mrb[56].mxu1 %vm1038_vm0, %v1034_v40 }
 0x241   : > { %1373 = vmatprep.mubr.f32.mxu1 %v10531_v0 }
 0x244   : > { %5714 = vmatmul.mubr.msk.f32.gmra.mrb[58].mxu1 %vm1038_vm0, %v1035_v41 }
 0x245   : > { %1379 = vmatprep.mubr.f32.mxu1 %v10531_v0 }
 0x248   : > { %5715 = vmatmul.mubr.msk.f32.gmra.mrb[60].mxu1 %vm1038_vm0, %v1036_v42 }
 0x249   : > { %1385 = vmatprep.mubr.f32.mxu1 %v10531_v0 }
 0x24c   : > { %5716 = vmatmul.mubr.msk.f32.gmra.mrb[62].mxu1 %vm1038_vm0, %v1037_v43 }
 0x2a3   : > { %v1201_v50 = vpop.f32.mrb[0].mxu1 }
 0x2a4   : > { %v7527_v51 = vmul.f32 0.17677669, %v1201_v50  ;;  %v1203_v52 = vpop.f32.mrb[1].mxu1 }
 0x2a5   : > { %v7529_v53 = vmul.f32 0.17677669, %v1203_v52 }
 0x2a7   : > { %v1207_v54 = vpop.f32.mrb[2].mxu1  ;;  %v1456_v63 = vmax.f32 %v7527_v51, %v7529_v53 }
 0x2a8   : > { %v7533_v1 = vmul.f32 0.17677669, %v1207_v54  ;;  %v1209_v2 = vpop.f32.mrb[3].mxu1 }
 0x2a9   : > { %v7535_v4 = vmul.f32 0.17677669, %v1209_v2  ;;  %1457 = vmax.xlane.f32.xlu0 %v1456_v63 }
 0x2ab   : > { %v1213_v6 = vpop.f32.mrb[4].mxu1  ;;  %v1459_v7 = vmax.f32 %v7533_v1, %v7535_v4 }
 0x2ac   : > { %v7539_v8 = vmul.f32 0.17677669, %v1213_v6  ;;  %v1215_v10 = vpop.f32.mrb[5].mxu1 }
 0x2ad   : > { %v7541_v12 = vmul.f32 0.17677669, %v1215_v10  ;;  %1460 = vmax.xlane.f32.xlu1 %v1459_v7 }
 0x2af   : > { %v1219_v13 = vpop.f32.mrb[6].mxu1  ;;  %v1462_v14 = vmax.f32 %v7539_v8, %v7541_v12 }
 0x2b0   : > { %v7545_v15 = vmul.f32 0.17677669, %v1219_v13  ;;  %v1221_v16 = vpop.f32.mrb[7].mxu1 }
 0x2b1   : > { %v7547_v17 = vmul.f32 0.17677669, %v1221_v16  ;;  %1463 = vmax.xlane.f32.xlu0 %v1462_v14 }
 0x2b3   : > { %v1225_v18 = vpop.f32.mrb[8].mxu1  ;;  %v1465_v19 = vmax.f32 %v7545_v15, %v7547_v17 }
 0x2b4   : > { %v7551_v20 = vmul.f32 0.17677669, %v1225_v18  ;;  %v1227_v21 = vpop.f32.mrb[9].mxu1 }
 0x2b5   : > { %v7553_v22 = vmul.f32 0.17677669, %v1227_v21  ;;  %1466 = vmax.xlane.f32.xlu0 %v1465_v19 }
 0x2b7   : > { %v1231_v23 = vpop.f32.mrb[10].mxu1  ;;  %v1468_v24 = vmax.f32 %v7551_v20, %v7553_v22 }
 0x2b8   : > { %v7557_v25 = vmul.f32 0.17677669, %v1231_v23  ;;  %v1233_v26 = vpop.f32.mrb[11].mxu1 }
 0x2b9   : > { %v7559_v27 = vmul.f32 0.17677669, %v1233_v26  ;;  %1469 = vmax.xlane.f32.xlu1 %v1468_v24 }
 0x2bb   : > { %v1237_v28 = vpop.f32.mrb[12].mxu1  ;;  %v1471_v29 = vmax.f32 %v7557_v25, %v7559_v27 }
 0x2bc   : > { %v7563_v30 = vmul.f32 0.17677669, %v1237_v28  ;;  %v1239_v31 = vpop.f32.mrb[13].mxu1 }
 0x2bd   : > { %v7565_v32 = vmul.f32 0.17677669, %v1239_v31  ;;  %1472 = vmax.xlane.f32.xlu0 %v1471_v29 }
 0x2bf   : > { %v1243_v33 = vpop.f32.mrb[14].mxu1  ;;  %v1474_v34 = vmax.f32 %v7563_v30, %v7565_v32 }
 0x2c0   : > { %v7569_v35 = vmul.f32 0.17677669, %v1243_v33  ;;  %v1245_v36 = vpop.f32.mrb[15].mxu1 }
 0x2c1   : > { %v7571_v37 = vmul.f32 0.17677669, %v1245_v36  ;;  %1475 = vmax.xlane.f32.xlu1 %v1474_v34 }
 0x2c3   : > { %v1249_v38 = vpop.f32.mrb[16].mxu1  ;;  %v1477_v39 = vmax.f32 %v7569_v35, %v7571_v37 }
 0x2c4   : > { %v7575_v40 = vmul.f32 0.17677669, %v1249_v38  ;;  %v1251_v41 = vpop.f32.mrb[17].mxu1 }
 0x2c5   : > { %v7577_v42 = vmul.f32 0.17677669, %v1251_v41  ;;  %1478 = vmax.xlane.f32.xlu0 %v1477_v39 }
 0x2c7   : > { %v1255_v43 = vpop.f32.mrb[18].mxu1  ;;  %v1480_v44 = vmax.f32 %v7575_v40, %v7577_v42 }
 0x2c8   : > { %v7581_v47 = vmul.f32 0.17677669, %v1255_v43  ;;  %v1257_v50 = vpop.f32.mrb[19].mxu1 }
 0x2c9   : > { %v7583_v52 = vmul.f32 0.17677669, %v1257_v50  ;;  %1481 = vmax.xlane.f32.xlu1 %v1480_v44 }
 0x2cb   : > { %v1261_v54 = vpop.f32.mrb[20].mxu1  ;;  %v1483_v63 = vmax.f32 %v7581_v47, %v7583_v52 }
 0x2cc   : > { %v7587_v2 = vmul.f32 0.17677669, %v1261_v54  ;;  %v1263_v6 = vpop.f32.mrb[21].mxu1 }
 0x2cd   : > { %v7589_v7 = vmul.f32 0.17677669, %v1263_v6  ;;  %1484 = vmax.xlane.f32.xlu0 %v1483_v63 }
 0x2cf   : > { %v1267_v10 = vpop.f32.mrb[22].mxu1  ;;  %v1486_v13 = vmax.f32 %v7587_v2, %v7589_v7 }
 0x2d0   : > { %v7593_v14 = vmul.f32 0.17677669, %v1267_v10  ;;  %v1269_v16 = vpop.f32.mrb[23].mxu1 }
 0x2d1   : > { %v7595_v18 = vmul.f32 0.17677669, %v1269_v16  ;;  %1487 = vmax.xlane.f32.xlu1 %v1486_v13 }
 0x2d3   : > { %v1273_v19 = vpop.f32.mrb[24].mxu1  ;;  %v1489_v21 = vmax.f32 %v7593_v14, %v7595_v18 }
 0x2d4   : > { %v7599_v23 = vmul.f32 0.17677669, %v1273_v19  ;;  %v1275_v24 = vpop.f32.mrb[25].mxu1 }
 0x2d5   : > { %v7601_v26 = vmul.f32 0.17677669, %v1275_v24  ;;  %1490 = vmax.xlane.f32.xlu0 %v1489_v21 }
 0x2d7   : > { %v1279_v28 = vpop.f32.mrb[26].mxu1  ;;  %v1492_v29 = vmax.f32 %v7599_v23, %v7601_v26 }
 0x2d8   : > { %v7605_v31 = vmul.f32 0.17677669, %v1279_v28  ;;  %v1281_v33 = vpop.f32.mrb[27].mxu1 }
 0x2d9   : > { %v7607_v34 = vmul.f32 0.17677669, %v1281_v33  ;;  %1493 = vmax.xlane.f32.xlu1 %v1492_v29 }
 0x2db   : > { %v1285_v36 = vpop.f32.mrb[28].mxu1  ;;  %v1495_v38 = vmax.f32 %v7605_v31, %v7607_v34 }
 0x2dc   : > { %v7611_v39 = vmul.f32 0.17677669, %v1285_v36  ;;  %v1287_v41 = vpop.f32.mrb[29].mxu1 }
 0x2dd   : > { %v7613_v43 = vmul.f32 0.17677669, %v1287_v41  ;;  %1496 = vmax.xlane.f32.xlu0 %v1495_v38 }
 0x2df   : > { %v1291_v44 = vpop.f32.mrb[30].mxu1  ;;  %v1498_v50 = vmax.f32 %v7611_v39, %v7613_v43 }
 0x2e0   : > { %v7617_v54 = vmul.f32 0.17677669, %v1291_v44  ;;  %v1293_v63 = vpop.f32.mrb[31].mxu1 }
 0x2e1   : > { %v7619_v6 = vmul.f32 0.17677669, %v1293_v63  ;;  %1499 = vmax.xlane.f32.xlu1 %v1498_v50 }
 0x2e3   : > { %v1297_v10 = vpop.f32.mrb[32].mxu1  ;;  %v1501_v13 = vmax.f32 %v7617_v54, %v7619_v6 }
 0x2e4   : > { %v7623_v16 = vmul.f32 0.17677669, %v1297_v10  ;;  %v1299_v19 = vpop.f32.mrb[33].mxu1 }
 0x2e5   : > { %v7625_v21 = vmul.f32 0.17677669, %v1299_v19  ;;  %1502 = vmax.xlane.f32.xlu0 %v1501_v13 }
 0x2e7   : > { %v1303_v24 = vpop.f32.mrb[34].mxu1  ;;  %v1504_v28 = vmax.f32 %v7623_v16, %v7625_v21 }
 0x2e8   : > { %v7629_v29 = vmul.f32 0.17677669, %v1303_v24  ;;  %v1305_v33 = vpop.f32.mrb[35].mxu1 }
 0x2e9   : > { %v7631_v36 = vmul.f32 0.17677669, %v1305_v33  ;;  %1505 = vmax.xlane.f32.xlu1 %v1504_v28  ;;  %v301_v28 = vld [vmem:[#allocation3 + $0x80] sm:$0xff] }
 0x2ea   : > { %782 = vmatmul.mubr.f32.gmra.mrb[32].mxu0 %v301_v28 }
 0x2eb   : > { %v1309_v38 = vpop.f32.mrb[36].mxu1  ;;  %v1507_v41 = vmax.f32 %v7629_v29, %v7631_v36 }
 0x2ec   : > { %v7635_v44 = vmul.f32 0.17677669, %v1309_v38  ;;  %v1311_v50 = vpop.f32.mrb[37].mxu1 }
 0x2ed   : > { %v7637_v63 = vmul.f32 0.17677669, %v1311_v50  ;;  %1508 = vmax.xlane.f32.xlu0 %v1507_v41  ;;  %v10697_v41 = vmov 0.0  }
 0x2ee   : > { %787 = vmatprep.mubr.f32.mxu0 %v10697_v41 }
 0x2ef   : > { %v1315_v10 = vpop.f32.mrb[38].mxu1  ;;  %v1510_v13 = vmax.f32 %v7635_v44, %v7637_v63 }
 0x2f0   : > { %v7641_v19 = vmul.f32 0.17677669, %v1315_v10  ;;  %v1317_v24 = vpop.f32.mrb[39].mxu1  ;;  %v302_v10 = vld [vmem:[#allocation3 + $0x88] sm:$0xff] }
 0x2f1   : > { %v7643_v33 = vmul.f32 0.17677669, %v1317_v24  ;;  %1511 = vmax.xlane.f32.xlu1 %v1510_v13  ;;  %788 = vmatmul.mubr.f32.gmra.mrb[34].mxu0 %v302_v10 }
 0x2f2   : > { %793 = vmatprep.mubr.f32.mxu0 %v10697_v41 }
 0x2f3   : > { %v1321_v0 = vpop.f32.mrb[40].mxu1  ;;  %v1513_v38 = vmax.f32 %v7641_v19, %v7643_v33 }
 0x2f4   : > { %v7647_v61 = vmul.f32 0.17677669, %v1321_v0  ;;  %v1323_v50 = vpop.f32.mrb[41].mxu1 }
 0x2f5   : > { %v7650_v62 = vmul.f32 0.17677669, %v1323_v50  ;;  %1514 = vmax.xlane.f32.xlu0 %v1513_v38 }
 0x2f7   : > { %v1327_v59 = vpop.f32.mrb[42].mxu1  ;;  %v1516_v24 = vmax.f32 %v7647_v61, %v7650_v62 }
 0x2f8   : > { %v7654_v13 = vmul.f32 0.17677669, %v1327_v59  ;;  %v1329_v60 = vpop.f32.mrb[43].mxu1 }
 0x2f9   : > { %v7657_v28 = vmul.f32 0.17677669, %v1329_v60  ;;  %1517 = vmax.xlane.f32.xlu1 %v1516_v24 }
 0x2fb   : > { %v1333_v0 = vpop.f32.mrb[44].mxu1  ;;  %v1519_v50 = vmax.f32 %v7654_v13, %v7657_v28 }
 0x2fc   : > { %v7661_v57 = vmul.f32 0.17677669, %v1333_v0  ;;  %v1335_v38 = vpop.f32.mrb[45].mxu1 }
 0x2fd   : > { %v7663_v58 = vmul.f32 0.17677669, %v1335_v38  ;;  %1520 = vmax.xlane.f32.xlu0 %v1519_v50 }
 0x2ff   : > { %v1339_v55 = vpop.f32.mrb[46].mxu1  ;;  %v1522_v59 = vmax.f32 %v7661_v57, %v7663_v58 }
 0x300   : > { %v7667_v10 = vmul.f32 0.17677669, %v1339_v55  ;;  %v1341_v11 = vpop.f32.mrb[47].mxu1 }
 0x301   : > { %v7669_v60 = vmul.f32 0.17677669, %v1341_v11  ;;  %1523 = vmax.xlane.f32.xlu1 %v1522_v59 }
 0x303   : > { %v1345_v24 = vpop.f32.mrb[48].mxu1  ;;  %v1525_v49 = vmax.f32 %v7667_v10, %v7669_v60 }
 0x304   : > { %v7673_v0 = vmul.f32 0.17677669, %v1345_v24  ;;  %v1347_v9 = vpop.f32.mrb[49].mxu1 }
 0x305   : > { %v7675_v38 = vmul.f32 0.17677669, %v1347_v9  ;;  %1526 = vmax.xlane.f32.xlu0 %v1525_v49 }
 0x307   : > { %v1351_v50 = vpop.f32.mrb[50].mxu1  ;;  %v1528_v48 = vmax.f32 %v7673_v0, %v7675_v38 }
 0x308   : > { %v7679_v55 = vmul.f32 0.17677669, %v1351_v50  ;;  %v1353_v5 = vpop.f32.mrb[51].mxu1 }
 0x309   : > { %v7681_v11 = vmul.f32 0.17677669, %v1353_v5  ;;  %1529 = vmax.xlane.f32.xlu1 %v1528_v48 }
 0x30a   : > { %10698 = vst [vmem:[#allocation28_spill] sm:$0xff] %v7679_v55 }
 0x30b   : > { %10699 = vst [vmem:[#allocation29_spill] sm:$0xff] %v7681_v11  ;;  %v1357_v59 = vpop.f32.mrb[52].mxu1  ;;  %v1531_v46 = vmax.f32 %v7679_v55, %v7681_v11 }
 0x30c   : > { %v7685_v24 = vmul.f32 0.17677669, %v1357_v59  ;;  %v1359_v3 = vpop.f32.mrb[53].mxu1 }
 0x30d   : > { %v7687_v9 = vmul.f32 0.17677669, %v1359_v3  ;;  %1532 = vmax.xlane.f32.xlu0 %v1531_v46 }
 0x30e   : > { %10700 = vst [vmem:[#allocation30_spill] sm:$0xff] %v7685_v24 }
 0x30f   : > { %10701 = vst [vmem:[#allocation31_spill] sm:$0xff] %v7687_v9  ;;  %v1363_v49 = vpop.f32.mrb[54].mxu1  ;;  %v1534_v45 = vmax.f32 %v7685_v24, %v7687_v9 }
 0x310   : > { %v7691_v50 = vmul.f32 0.17677669, %v1363_v49  ;;  %v1365_v56 = vpop.f32.mrb[55].mxu1 }
 0x311   : > { %v7693_v5 = vmul.f32 0.17677669, %v1365_v56  ;;  %1535 = vmax.xlane.f32.xlu1 %v1534_v45 }
 0x312   : > { %10702 = vst [vmem:[#allocation32_spill] sm:$0xff] %v7691_v50 }
 0x313   : > { %10703 = vst [vmem:[#allocation33_spill] sm:$0xff] %v7693_v5  ;;  %v1369_v48 = vpop.f32.mrb[56].mxu1  ;;  %v1537_v11 = vmax.f32 %v7691_v50, %v7693_v5 }
 0x314   : > { %v7697_v59 = vmul.f32 0.17677669, %v1369_v48  ;;  %v1371_v55 = vpop.f32.mrb[57].mxu1 }
 0x315   : > { %v7699_v3 = vmul.f32 0.17677669, %v1371_v55  ;;  %1538 = vmax.xlane.f32.xlu0 %v1537_v11 }
 0x316   : > { %10704 = vst [vmem:[#allocation34_spill] sm:$0xff] %v7697_v59 }
 0x317   : > { %10705 = vst [vmem:[#allocation35_spill] sm:$0xff] %v7699_v3  ;;  %v1375_v46 = vpop.f32.mrb[58].mxu1  ;;  %v1540_v9 = vmax.f32 %v7697_v59, %v7699_v3 }
 0x318   : > { %v7703_v49 = vmul.f32 0.17677669, %v1375_v46  ;;  %v1377_v24 = vpop.f32.mrb[59].mxu1 }
 0x319   : > { %v7705_v56 = vmul.f32 0.17677669, %v1377_v24  ;;  %1541 = vmax.xlane.f32.xlu1 %v1540_v9 }
 0x31b   : > { %10706 = vst [vmem:[#allocation36_spill] sm:$0xff] %v7705_v56  ;;  %v1381_v45 = vpop.f32.mrb[60].mxu1  ;;  %v1543_v5 = vmax.f32 %v7703_v49, %v7705_v56 }
 0x31c   : > { %v7709_v48 = vmul.f32 0.17677669, %v1381_v45  ;;  %v1383_v50 = vpop.f32.mrb[61].mxu1  ;;  %v303_v45 = vld [vmem:[#allocation3 + $0x90] sm:$0xff] }
 0x31d   : > { %v7711_v55 = vmul.f32 0.17677669, %v1383_v50  ;;  %1544 = vmax.xlane.f32.xlu0 %v1543_v5  ;;  %794 = vmatmul.mubr.f32.gmra.mrb[36].mxu0 %v303_v45  ;;  %v7722_v50 = vpop.permute.xlu0 %448  ;;  %v7724_v5 = vpop.permute.xlu1 %458 }
 0x31e   : > { %10707 = vst [vmem:[#allocation37_spill] sm:$0xff] %v7709_v48  ;;  %799 = vmatprep.mubr.f32.mxu0 %v10697_v41  ;;  %10711 = vst [vmem:[#allocation41_spill] sm:$0xff] %v7722_v50 }
 0x31f   : > { %10708 = vst [vmem:[#allocation38_spill] sm:$0xff] %v7711_v55  ;;  %v1387_v11 = vpop.f32.mrb[62].mxu1  ;;  %v1546_v3 = vmax.f32 %v7709_v48, %v7711_v55  ;;  %10712 = vst [vmem:[#allocation42_spill] sm:$0xff] %v7724_v5 }
 0x320   : > { %v7715_v46 = vmul.f32 0.17677669, %v1387_v11  ;;  %v1389_v59 = vpop.f32.mrb[63].mxu1 }
 0x321   : > { %v7717_v24 = vmul.f32 0.17677669, %v1389_v59  ;;  %1547 = vmax.xlane.f32.xlu1 %v1546_v3  ;;  %v304_v59 = vld [vmem:[#allocation3 + $0x98] sm:$0xff] }
 0x322   : > { %10709 = vst [vmem:[#allocation39_spill] sm:$0xff] %v7715_v46  ;;  %800 = vmatmul.mubr.f32.gmra.mrb[38].mxu0 %v304_v59 }
 0x323   : > { %10710 = vst [vmem:[#allocation40_spill] sm:$0xff] %v7717_v24  ;;  %v1549_v9 = vmax.f32 %v7715_v46, %v7717_v24  ;;  %805 = vmatprep.mubr.f32.mxu0 %v10697_v41 }
 0x325   : > { %1550 = vmax.xlane.f32.xlu0 %v1549_v9 }
 0x336   : > { %v1458_v56 = vpop.xlane.xlu0 %1457 }
 0x337   : > { %v1552_v11 = vsub.f32 %v7527_v51, %v1458_v56  ;;  %v1553_v55 = vsub.f32 %v7529_v53, %v1458_v56 }
 0x339   : > { %v1616_v3 = vmul.f32 1.442695, %v1552_v11  ;;  %v1618_v48 = vmul.f32 1.442695, %v1553_v55 }
 0x33a   : > { %v1461_v9 = vpop.xlane.xlu1 %1460 }
 0x33b   : > { %6240 = vpow2.f32 %v1616_v3  ;;  %v1554_v45 = vsub.f32 %v7533_v1, %v1461_v9  ;;  %v1555_v24 = vsub.f32 %v7535_v4, %v1461_v9 }
 0x33c   : > { %6242 = vpow2.f32 %v1618_v48 }
 0x33d   : > { %v1620_v50 = vmul.f32 1.442695, %v1554_v45  ;;  %v1622_v5 = vmul.f32 1.442695, %v1555_v24 }
 0x33e   : > { %v1464_v46 = vpop.xlane.xlu0 %1463 }
 0x33f   : > { %6244 = vpow2.f32 %v1620_v50  ;;  %v1556_v51 = vsub.f32 %v7539_v8, %v1464_v46  ;;  %v1557_v53 = vsub.f32 %v7541_v12, %v1464_v46 }
 0x340   : > { %6246 = vpow2.f32 %v1622_v5 }
 0x341   : > { %v1624_v56 = vmul.f32 1.442695, %v1556_v51  ;;  %v1626_v55 = vmul.f32 1.442695, %v1557_v53 }
 0x342   : > { %v1467_v11 = vpop.xlane.xlu0 %1466 }
 0x343   : > { %6248 = vpow2.f32 %v1624_v56  ;;  %v1558_v59 = vsub.f32 %v7545_v15, %v1467_v11  ;;  %v1559_v1 = vsub.f32 %v7547_v17, %v1467_v11 }
 0x344   : > { %6250 = vpow2.f32 %v1626_v55 }
 0x345   : > { %v7735_v4 = vpop.eup %6240  ;;  %v1628_v48 = vmul.f32 1.442695, %v1558_v59  ;;  %v1630_v24 = vmul.f32 1.442695, %v1559_v1 }
 0x346   : > { %v7737_v3 = vpop.eup %6242  ;;  %v1470_v50 = vpop.xlane.xlu1 %1469 }
 0x347   : > { %6252 = vpow2.f32 %v1628_v48  ;;  %v1560_v8 = vsub.f32 %v7551_v20, %v1470_v50  ;;  %v1561_v12 = vsub.f32 %v7553_v22, %v1470_v50  ;;  %v1744_v46 = vadd.f32 %v7737_v3, %v7735_v4 }
 0x348   : > { %6254 = vpow2.f32 %v1630_v24 }
 0x349   : > { %v7743_v15 = vpop.eup %6244  ;;  %v1632_v17 = vmul.f32 1.442695, %v1560_v8  ;;  %v1634_v5 = vmul.f32 1.442695, %v1561_v12  ;;  %1745 = vadd.xlane.f32.xlu1 %v1744_v46 }
 0x34a   : > { %v7745_v9 = vpop.eup %6246  ;;  %v1473_v45 = vpop.xlane.xlu0 %1472 }
 0x34b   : > { %6256 = vpow2.f32 %v1632_v17  ;;  %v1562_v51 = vsub.f32 %v7557_v25, %v1473_v45  ;;  %v1563_v53 = vsub.f32 %v7559_v27, %v1473_v45  ;;  %v1747_v20 = vadd.f32 %v7745_v9, %v7743_v15  ;;  %v342_v17 = vld [vmem:[%s10524_s2 + $0x48] sm:$0xff] }
 0x34c   : > { %6258 = vpow2.f32 %v1634_v5  ;;  %v341_v5 = vld [vmem:[%s10524_s2 + $0x40] sm:$0xff] }
 0x34d   : > { %v7751_v22 = vpop.eup %6248  ;;  %v1636_v56 = vmul.f32 1.442695, %v1562_v51  ;;  %v1638_v55 = vmul.f32 1.442695, %v1563_v53  ;;  %1748 = vadd.xlane.f32.xlu0 %v1747_v20 }
 0x34e   : > { %v7753_v11 = vpop.eup %6250  ;;  %v1476_v45 = vpop.xlane.xlu1 %1475 }
 0x34f   : > { %6260 = vpow2.f32 %v1636_v56  ;;  %v1750_v59 = vadd.f32 %v7753_v11, %v7751_v22  ;;  %v1564_v53 = vsub.f32 %v7563_v30, %v1476_v45  ;;  %v1565_v20 = vsub.f32 %v7565_v32, %v1476_v45 }
 0x350   : > { %6262 = vpow2.f32 %v1638_v55 }
 0x351   : > { %v7757_v1 = vpop.eup %6252  ;;  %1751 = vadd.xlane.f32.xlu1 %v1750_v59 }
 0x352   : > { %v7759_v25 = vpop.eup %6254  ;;  %v1479_v51 = vpop.xlane.xlu0 %1478 }
 0x353   : > { %v1753_v27 = vadd.f32 %v7759_v25, %v7757_v1  ;;  %v1566_v55 = vsub.f32 %v7569_v35, %v1479_v51  ;;  %v1567_v59 = vsub.f32 %v7571_v37, %v1479_v51 }
 0x355   : > { %v7763_v48 = vpop.eup %6256  ;;  %1754 = vadd.xlane.f32.xlu0 %v1753_v27 }
 0x356   : > { %10713 = vst [vmem:[#allocation43_spill] sm:$0xff] %v7763_v48  ;;  %v7765_v24 = vpop.eup %6258  ;;  %v1482_v56 = vpop.xlane.xlu1 %1481 }
 0x357   : > { %10714 = vst [vmem:[#allocation44_spill] sm:$0xff] %v7765_v24  ;;  %v1756_v50 = vadd.f32 %v7765_v24, %v7763_v48  ;;  %v1646_v24 = vmul.f32 1.442695, %v1567_v59 }
 0x359   : > { %v7769_v8 = vpop.eup %6260  ;;  %1757 = vadd.xlane.f32.xlu1 %v1756_v50  ;;  %v1640_v50 = vmul.f32 1.442695, %v1564_v53 }
 0x35a   : > { %10715 = vst [vmem:[#allocation45_spill] sm:$0xff] %v7769_v8  ;;  %v7771_v12 = vpop.eup %6262  ;;  %v1485_v27 = vpop.xlane.xlu0 %1484 }
 0x35b   : > { %10716 = vst [vmem:[#allocation46_spill] sm:$0xff] %v7771_v12  ;;  %v1759_v46 = vadd.f32 %v7771_v12, %v7769_v8  ;;  %v1569_v8 = vsub.f32 %v7577_v42, %v1482_v56  ;;  %v1644_v12 = vmul.f32 1.442695, %v1566_v55  ;;  %v1571_v30 = vsub.f32 %v7583_v52, %v1485_v27 }
 0x35c   : > { %6264 = vpow2.f32 %v1640_v50 }
 0x35d   : > { %1760 = vadd.xlane.f32.xlu0 %v1759_v46  ;;  %v1568_v46 = vsub.f32 %v7575_v40, %v1482_v56  ;;  %v1650_v37 = vmul.f32 1.442695, %v1569_v8 }
 0x35e   : > { %v1488_v48 = vpop.xlane.xlu1 %1487 }
 0x35f   : > { %v1648_v45 = vmul.f32 1.442695, %v1568_v46  ;;  %v1572_v35 = vsub.f32 %v7587_v2, %v1488_v48  ;;  %v1573_v51 = vsub.f32 %v7589_v7, %v1488_v48 }
 0x361   : > { %v1656_v52 = vmul.f32 1.442695, %v1572_v35  ;;  %v1658_v2 = vmul.f32 1.442695, %v1573_v51 }
 0x362   : > { %v1491_v32 = vpop.xlane.xlu0 %1490 }
 0x363   : > { %v1574_v42 = vsub.f32 %v7593_v14, %v1491_v32 }
 0x365   : > { %v1660_v7 = vmul.f32 1.442695, %v1574_v42 }
 0x366   : > { %v1494_v40 = vpop.xlane.xlu1 %1493 }
 0x367   : > { %v1576_v55 = vsub.f32 %v7599_v23, %v1494_v40  ;;  %v1577_v8 = vsub.f32 %v7601_v26, %v1494_v40  ;;  %v7799_v26 = vpop.eup %6264 }
 0x369   : > { %v1666_v23 = vmul.f32 1.442695, %v1577_v8 }
 0x36a   : > { %428 = vperm.xlu1 %6239, %v342_v17   ;;  %v1642_v17 = vmul.f32 1.442695, %v1565_v20  ;;  %v1654_v20 = vmul.f32 1.442695, %v1571_v30  ;;  %v1497_v56 = vpop.xlane.xlu0 %1496 }
 0x36b   : > { %v1578_v48 = vsub.f32 %v7605_v31, %v1497_v56 }
 0x36c   : > { %6266 = vpow2.f32 %v1642_v17 }
 0x36d   : > { %6268 = vpow2.f32 %v1644_v12  ;;  %v1668_v17 = vmul.f32 1.442695, %v1578_v48 }
 0x36e   : > { %6270 = vpow2.f32 %v1646_v24  ;;  %v1500_v59 = vpop.xlane.xlu1 %1499  ;;  %v1579_v24 = vsub.f32 %v7607_v34, %v1497_v56 }
 0x36f   : > { %6272 = vpow2.f32 %v1648_v45  ;;  %v1581_v50 = vsub.f32 %v7613_v43, %v1500_v59 }
 0x370   : > { %6274 = vpow2.f32 %v1650_v37  ;;  %v1670_v34 = vmul.f32 1.442695, %v1579_v24 }
 0x371   : > { %v1674_v37 = vmul.f32 1.442695, %v1581_v50 }
 0x372   : > { %v1503_v12 = vpop.xlane.xlu0 %1502 }
 0x373   : > { %423 = vperm.xlu0 %6238, %v341_v5   ;;  %v1570_v5 = vsub.f32 %v7581_v47, %v1485_v27  ;;  %v1575_v47 = vsub.f32 %v7595_v18, %v1491_v32  ;;  %v1664_v18 = vmul.f32 1.442695, %v1576_v55  ;;  %v1580_v27 = vsub.f32 %v7611_v39, %v1500_v59 }
 0x374   : > { %v1582_v31 = vsub.f32 %v7617_v54, %v1503_v12  ;;  %v1583_v30 = vsub.f32 %v7619_v6, %v1503_v12 }
 0x375   : > { %v1652_v53 = vmul.f32 1.442695, %v1570_v5  ;;  %v1662_v14 = vmul.f32 1.442695, %v1575_v47  ;;  %v1672_v39 = vmul.f32 1.442695, %v1580_v27 }
 0x376   : > { %v1506_v46 = vpop.xlane.xlu1 %1505  ;;  %v7802_v5 = vpop.eup %6266 }
 0x377   : > { %6276 = vpow2.f32 %v1652_v53  ;;  %v7805_v45 = vpop.eup %6268  ;;  %v1584_v43 = vsub.f32 %v7623_v16, %v1506_v46  ;;  %v1585_v51 = vsub.f32 %v7625_v21, %v1506_v46  ;;  %v1676_v53 = vmul.f32 1.442695, %v1582_v31 }
 0x378   : > { %6278 = vpow2.f32 %v1654_v20  ;;  %v7808_v35 = vpop.eup %6270  ;;  %v1762_v42 = vadd.f32 %v7802_v5, %v7799_v26  ;;  %v1678_v16 = vmul.f32 1.442695, %v1583_v30 }
 0x379   : > { %6280 = vpow2.f32 %v1656_v52  ;;  %v7811_v40 = vpop.eup %6272  ;;  %v1680_v21 = vmul.f32 1.442695, %v1584_v43 }
 0x37a   : > { %6282 = vpow2.f32 %v1658_v2  ;;  %v1509_v32 = vpop.xlane.xlu0 %1508  ;;  %v7816_v20 = vpop.eup %6274 }
 0x37b   : > { %6284 = vpow2.f32 %v1660_v7  ;;  %v1586_v6 = vsub.f32 %v7629_v29, %v1509_v32  ;;  %v1587_v47 = vsub.f32 %v7631_v36, %v1509_v32  ;;  %v1682_v29 = vmul.f32 1.442695, %v1585_v51 }
 0x37c   : > { %6286 = vpow2.f32 %v1662_v14  ;;  %v1765_v7 = vadd.f32 %v7808_v35, %v7805_v45 }
 0x37d   : > { %6288 = vpow2.f32 %v1664_v18  ;;  %v1684_v36 = vmul.f32 1.442695, %v1586_v6  ;;  %v1686_v12 = vmul.f32 1.442695, %v1587_v47 }
 0x37e   : > { %6290 = vpow2.f32 %v1666_v23  ;;  %v1512_v54 = vpop.xlane.xlu1 %1511 }
 0x37f   : > { %6292 = vpow2.f32 %v1668_v17  ;;  %v1588_v55 = vsub.f32 %v7635_v44, %v1512_v54  ;;  %v1589_v8 = vsub.f32 %v7637_v63, %v1512_v54  ;;  %v1768_v44 = vadd.f32 %v7816_v20, %v7811_v40 }
 0x380   : > { %6294 = vpow2.f32 %v1670_v34 }
 0x381   : > { %v7819_v52 = vpop.eup %6276  ;;  %6296 = vpow2.f32 %v1672_v39  ;;  %v1688_v23 = vmul.f32 1.442695, %v1588_v55 }
 0x382   : > { %v1515_v56 = vpop.xlane.xlu0 %1514  ;;  %v7822_v2 = vpop.eup %6278  ;;  %6298 = vpow2.f32 %v1674_v37 }
 0x383   : > { %v7827_v48 = vpop.eup %6280  ;;  %6300 = vpow2.f32 %v1676_v53  ;;  %v1590_v14 = vsub.f32 %v7641_v19, %v1515_v56  ;;  %v1591_v18 = vsub.f32 %v7643_v33, %v1515_v56  ;;  %v1690_v19 = vmul.f32 1.442695, %v1589_v8 }
 0x384   : > { %v7832_v24 = vpop.eup %6282  ;;  %6302 = vpow2.f32 %v1678_v16  ;;  %v1771_v34 = vadd.f32 %v7822_v2, %v7819_v52 }
 0x385   : > { %v7835_v27 = vpop.eup %6284  ;;  %6304 = vpow2.f32 %v1680_v21  ;;  %v1692_v30 = vmul.f32 1.442695, %v1590_v14  ;;  %v1694_v43 = vmul.f32 1.442695, %v1591_v18 }
 0x386   : > { %v1518_v59 = vpop.xlane.xlu1 %1517  ;;  %v7838_v46 = vpop.eup %6286  ;;  %6306 = vpow2.f32 %v1682_v29 }
 0x387   : > { %v1592_v50 = vsub.f32 %v7647_v61, %v1518_v59  ;;  %v1593_v17 = vsub.f32 %v7650_v62, %v1518_v59  ;;  %v7843_v33 = vpop.eup %6288  ;;  %6308 = vpow2.f32 %v1684_v36  ;;  %v1774_v61 = vadd.f32 %v7832_v24, %v7827_v48 }
 0x388   : > { %v7848_v39 = vpop.eup %6290  ;;  %6310 = vpow2.f32 %v1686_v12  ;;  %v1777_v47 = vadd.f32 %v7838_v46, %v7835_v27 }
 0x389   : > { %v7851_v51 = vpop.eup %6292  ;;  %6312 = vpow2.f32 %v1688_v23  ;;  %v1696_v54 = vmul.f32 1.442695, %v1592_v50  ;;  %v305_v50 = vld [vmem:[#allocation3 + $0xa0] sm:$0xff] }
 0x38a   : > { %v1521_v63 = vpop.xlane.xlu0 %1520  ;;  %v7854_v6 = vpop.eup %6294  ;;  %6314 = vpow2.f32 %v1690_v19  ;;  %806 = vmatmul.mubr.f32.gmra.mrb[40].mxu0 %v305_v50 }
 0x38b   : > { %v1594_v32 = vsub.f32 %v7654_v13, %v1521_v63  ;;  %v1595_v37 = vsub.f32 %v7657_v28, %v1521_v63  ;;  %v1698_v13 = vmul.f32 1.442695, %v1593_v17  ;;  %v7859_v28 = vpop.eup %6296  ;;  %6316 = vpow2.f32 %v1692_v30  ;;  %v10717_v63 = vld [vmem:[#allocation28_spill] sm:$0xff]  ;;  %811 = vmatprep.mubr.f32.mxu0 %v10697_v41 }
 0x38c   : > { %v7864_v55 = vpop.eup %6298  ;;  %6318 = vpow2.f32 %v1694_v43  ;;  %v1783_v12 = vadd.f32 %v7854_v6, %v7851_v51 }
 0x38d   : > { %v1700_v56 = vmul.f32 1.442695, %v1594_v32  ;;  %v1702_v29 = vmul.f32 1.442695, %v1595_v37  ;;  %6320 = vpow2.f32 %v1696_v54  ;;  %v10719_v37 = vld [vmem:[#allocation30_spill] sm:$0xff]  ;;  %v10720_v54 = vld [vmem:[#allocation31_spill] sm:$0xff] }
 0x38e   : > { %1763 = vadd.xlane.f32.xlu1 %v1762_v42  ;;  %v1524_v31 = vpop.xlane.xlu1 %1523  ;;  %6322 = vpow2.f32 %v1698_v13 }
 0x38f   : > { %v1596_v53 = vsub.f32 %v7661_v57, %v1524_v31  ;;  %v1597_v42 = vsub.f32 %v7663_v58, %v1524_v31  ;;  %v1780_v57 = vadd.f32 %v7848_v39, %v7843_v33  ;;  %v7867_v58 = vpop.eup %6300  ;;  %6324 = vpow2.f32 %v1700_v56  ;;  %v10718_v31 = vld [vmem:[#allocation29_spill] sm:$0xff] }
 0x390   : > { %v7870_v14 = vpop.eup %6302  ;;  %6326 = vpow2.f32 %v1702_v29 }
 0x391   : > { %v1704_v59 = vmul.f32 1.442695, %v1596_v53  ;;  %v7875_v18 = vpop.eup %6304 }
 0x392   : > { %1769 = vadd.xlane.f32.xlu1 %v1768_v44  ;;  %1766 = vadd.xlane.f32.xlu0 %v1765_v7  ;;  %v1527_v62 = vpop.xlane.xlu0 %1526  ;;  %v7880_v19 = vpop.eup %6306 }
 0x393   : > { %v1598_v21 = vsub.f32 %v7667_v10, %v1527_v62  ;;  %v1599_v8 = vsub.f32 %v7669_v60, %v1527_v62  ;;  %v1706_v10 = vmul.f32 1.442695, %v1597_v42  ;;  %6328 = vpow2.f32 %v1704_v59 }
 0x395   : > { %v1708_v60 = vmul.f32 1.442695, %v1598_v21  ;;  %v1710_v17 = vmul.f32 1.442695, %v1599_v8  ;;  %6330 = vpow2.f32 %v1706_v10  ;;  %v10721_v10 = vld [vmem:[#allocation32_spill] sm:$0xff] }
 0x396   : > { %1775 = vadd.xlane.f32.xlu1 %v1774_v61  ;;  %1772 = vadd.xlane.f32.xlu0 %v1771_v34  ;;  %v1530_v16 = vpop.xlane.xlu1 %1529 }
 0x397   : > { %v1600_v7 = vsub.f32 %v7673_v0, %v1530_v16  ;;  %v1601_v44 = vsub.f32 %v7675_v38, %v1530_v16  ;;  %v1786_v0 = vadd.f32 %v7864_v55, %v7859_v28  ;;  %v7883_v38 = vpop.eup %6308  ;;  %6332 = vpow2.f32 %v1708_v60 }
 0x398   : > { %v7885_v61 = vpop.eup %6310  ;;  %v1792_v16 = vadd.f32 %v7880_v19, %v7875_v18  ;;  %6334 = vpow2.f32 %v1710_v17 }
 0x399   : > { %v1712_v30 = vmul.f32 1.442695, %v1600_v7  ;;  %v1714_v43 = vmul.f32 1.442695, %v1601_v44  ;;  %v7890_v13 = vpop.eup %6312 }
 0x39a   : > { %1781 = vadd.xlane.f32.xlu1 %v1780_v57  ;;  %1778 = vadd.xlane.f32.xlu0 %v1777_v47  ;;  %v1533_v36 = vpop.xlane.xlu0 %1532  ;;  %v1789_v47 = vadd.f32 %v7870_v14, %v7867_v58  ;;  %v7896_v56 = vpop.eup %6314  ;;  %v306_v57 = vld [vmem:[#allocation3 + $0xa8] sm:$0xff] }
 0x39b   : > { %v1602_v23 = vsub.f32 %v10717_v63, %v1533_v36  ;;  %v1603_v34 = vsub.f32 %v10718_v31, %v1533_v36  ;;  %v7898_v29 = vpop.eup %6316  ;;  %6336 = vpow2.f32 %v1712_v30  ;;  %812 = vmatmul.mubr.f32.gmra.mrb[42].mxu0 %v306_v57  ;;  %v307_v31 = vld [vmem:[#allocation3 + $0xb0] sm:$0xff] }
 0x39c   : > { %v7900_v7 = vpop.eup %6318  ;;  %6338 = vpow2.f32 %v1714_v43  ;;  %817 = vmatprep.mubr.f32.mxu0 %v10697_v41 }
 0x39d   : > { %v1716_v42 = vmul.f32 1.442695, %v1602_v23  ;;  %v1718_v21 = vmul.f32 1.442695, %v1603_v34  ;;  %v7904_v63 = vpop.eup %6320  ;;  %v1798_v23 = vadd.f32 %v7896_v56, %v7890_v13 }
 0x39e   : > { %1787 = vadd.xlane.f32.xlu1 %v1786_v0  ;;  %1784 = vadd.xlane.f32.xlu0 %v1783_v12  ;;  %v1536_v32 = vpop.xlane.xlu1 %1535  ;;  %v10722_v12 = vld [vmem:[#allocation33_spill] sm:$0xff]  ;;  %v1795_v0 = vadd.f32 %v7885_v61, %v7883_v38  ;;  %v7911_v50 = vpop.eup %6322 }
 0x39f   : > { %v1604_v62 = vsub.f32 %v10719_v37, %v1536_v32  ;;  %v1605_v53 = vsub.f32 %v10720_v54, %v1536_v32  ;;  %6340 = vpow2.f32 %v1716_v42  ;;  %v7913_v34 = vpop.eup %6324  ;;  %v10723_v37 = vld [vmem:[#allocation34_spill] sm:$0xff]  ;;  %v10724_v54 = vld [vmem:[#allocation35_spill] sm:$0xff]  ;;  %818 = vmatmul.mubr.f32.gmra.mrb[44].mxu0 %v307_v31 }
 0x3a0   : > { %6342 = vpow2.f32 %v1718_v21  ;;  %v7915_v43 = vpop.eup %6326  ;;  %823 = vmatprep.mubr.f32.mxu0 %v10697_v41 }
 0x3a1   : > { %v1720_v8 = vmul.f32 1.442695, %v1604_v62  ;;  %v1722_v36 = vmul.f32 1.442695, %v1605_v53  ;;  %v7919_v42 = vpop.eup %6328  ;;  %v1807_v31 = vadd.f32 %v7915_v43, %v7913_v34 }
 0x3a2   : > { %1793 = vadd.xlane.f32.xlu1 %v1792_v16  ;;  %1790 = vadd.xlane.f32.xlu0 %v1789_v47  ;;  %v1539_v59 = vpop.xlane.xlu0 %1538  ;;  %10725 = vst [vmem:[#allocation28_spill] sm:$0xff] %v7919_v42  ;;  %v1804_v16 = vadd.f32 %v7911_v50, %v7904_v63  ;;  %v1801_v47 = vadd.f32 %v7900_v7, %v7898_v29  ;;  %v7926_v21 = vpop.eup %6330 }
 0x3a3   : > { %v1606_v44 = vsub.f32 %v10721_v10, %v1539_v59  ;;  %v1607_v60 = vsub.f32 %v10722_v12, %v1539_v59  ;;  %6344 = vpow2.f32 %v1720_v8  ;;  %v308_v59 = vld [vmem:[#allocation3 + $0xb8] sm:$0xff] }
 0x3a4   : > { %6346 = vpow2.f32 %v1722_v36  ;;  %v7928_v36 = vpop.eup %6332  ;;  %824 = vmatmul.mubr.f32.gmra.mrb[46].mxu0 %v308_v59 }
 0x3a5   : > { %v1724_v17 = vmul.f32 1.442695, %v1606_v44  ;;  %v1726_v30 = vmul.f32 1.442695, %v1607_v60  ;;  %10726 = vst [vmem:[#allocation29_spill] sm:$0xff] %v7928_v36  ;;  %v7930_v44 = vpop.eup %6334  ;;  %v10727_v60 = vld [vmem:[#allocation36_spill] sm:$0xff]  ;;  %829 = vmatprep.mubr.f32.mxu0 %v10697_v41 }
 0x3a6   : > { %1799 = vadd.xlane.f32.xlu1 %v1798_v23  ;;  %1796 = vadd.xlane.f32.xlu0 %v1795_v0  ;;  %v1542_v32 = vpop.xlane.xlu1 %1541  ;;  %v7934_v0 = vpop.eup %6336 }
 0x3a7   : > { %v1608_v62 = vsub.f32 %v10723_v37, %v1542_v32  ;;  %v1609_v53 = vsub.f32 %v10724_v54, %v1542_v32  ;;  %6348 = vpow2.f32 %v1724_v17  ;;  %10728 = vst [vmem:[#allocation30_spill] sm:$0xff] %v7934_v0  ;;  %v1810_v17 = vadd.f32 %v7926_v21, %v7919_v42 }
 0x3a8   : > { %6350 = vpow2.f32 %v1726_v30  ;;  %v7941_v30 = vpop.eup %6338 }
 0x3a9   : > { %v1728_v57 = vmul.f32 1.442695, %v1608_v62  ;;  %v1730_v8 = vmul.f32 1.442695, %v1609_v53  ;;  %10729 = vst [vmem:[#allocation31_spill] sm:$0xff] %v7941_v30  ;;  %v309_v62 = vld [vmem:[#allocation3 + $0xc0] sm:$0xff] }
 0x3aa   : > { %1805 = vadd.xlane.f32.xlu1 %v1804_v16  ;;  %1802 = vadd.xlane.f32.xlu0 %v1801_v47  ;;  %v1545_v10 = vpop.xlane.xlu0 %1544  ;;  %v1816_v16 = vadd.f32 %v7941_v30, %v7934_v0  ;;  %v1813_v47 = vadd.f32 %v7930_v44, %v7928_v36 }
 0x3ab   : > { %6352 = vpow2.f32 %v1728_v57  ;;  %v1610_v12 = vsub.f32 %v7703_v49, %v1545_v10  ;;  %v1611_v23 = vsub.f32 %v10727_v60, %v1545_v10  ;;  %v7943_v49 = vpop.eup %6340  ;;  %830 = vmatmul.mubr.f32.gmra.mrb[48].mxu0 %v309_v62 }
 0x3ac   : > { %6354 = vpow2.f32 %v1730_v8  ;;  %10730 = vst [vmem:[#allocation32_spill] sm:$0xff] %v7943_v49  ;;  %v7945_v54 = vpop.eup %6342  ;;  %835 = vmatprep.mubr.f32.mxu0 %v10697_v41  ;;  %v310_v8 = vld [vmem:[#allocation3 + $0xc8] sm:$0xff] }
 0x3ad   : > { %v1732_v32 = vmul.f32 1.442695, %v1610_v12  ;;  %v1734_v37 = vmul.f32 1.442695, %v1611_v23  ;;  %10731 = vst [vmem:[#allocation33_spill] sm:$0xff] %v7945_v54  ;;  %v7947_v53 = vpop.eup %6344  ;;  %v1819_v60 = vadd.f32 %v7945_v54, %v7943_v49  ;;  %v10743_v49 = vld [vmem:[#allocation40_spill] sm:$0xff] }
 0x3ae   : > { %1811 = vadd.xlane.f32.xlu1 %v1810_v17  ;;  %1808 = vadd.xlane.f32.xlu0 %v1807_v31  ;;  %10732 = vst [vmem:[#allocation34_spill] sm:$0xff] %v7947_v53  ;;  %v7954_v57 = vpop.eup %6346  ;;  %v311_v17 = vld [vmem:[#allocation3 + $0xd0] sm:$0xff] }
 0x3af   : > { %6356 = vpow2.f32 %v1732_v32  ;;  %10733 = vst [vmem:[#allocation35_spill] sm:$0xff] %v7954_v57  ;;  %836 = vmatmul.mubr.f32.gmra.mrb[50].mxu0 %v310_v8  ;;  %v1822_v12 = vadd.f32 %v7954_v57, %v7947_v53  ;;  %v10741_v53 = vld [vmem:[#allocation38_spill] sm:$0xff] }
 0x3b0   : > { %6358 = vpow2.f32 %v1734_v37  ;;  %841 = vmatprep.mubr.f32.mxu0 %v10697_v41 }
 0x3b1   : > { %v7956_v59 = vpop.eup %6348 }
 0x3b2   : > { %1817 = vadd.xlane.f32.xlu1 %v1816_v16  ;;  %1814 = vadd.xlane.f32.xlu0 %v1813_v47  ;;  %10734 = vst [vmem:[#allocation36_spill] sm:$0xff] %v7956_v59  ;;  %v7958_v10 = vpop.eup %6350  ;;  %v312_v47 = vld [vmem:[#allocation3 + $0xd8] sm:$0xff] }
 0x3b3   : > { %10735 = vst [vmem:[#allocation47_spill] sm:$0xff] %v7958_v10  ;;  %842 = vmatmul.mubr.f32.gmra.mrb[52].mxu0 %v311_v17  ;;  %v1825_v37 = vadd.f32 %v7958_v10, %v7956_v59  ;;  %v10742_v59 = vld [vmem:[#allocation39_spill] sm:$0xff] }
 0x3b4   : > { %847 = vmatprep.mubr.f32.mxu0 %v10697_v41 }
 0x3b5   : > { %v7965_v23 = vpop.eup %6352 }
 0x3b6   : > { %10736 = vst [vmem:[#allocation48_spill] sm:$0xff] %v7965_v23  ;;  %v7967_v31 = vpop.eup %6354  ;;  %1823 = vadd.xlane.f32.xlu1 %v1822_v12  ;;  %1820 = vadd.xlane.f32.xlu0 %v1819_v60  ;;  %v350_v12 = vld [vmem:[%s10524_s2 + $0x88] sm:$0xff] }
 0x3b7   : > { %10737 = vst [vmem:[#allocation49_spill] sm:$0xff] %v7967_v31  ;;  %v1828_v32 = vadd.f32 %v7967_v31, %v7965_v23  ;;  %848 = vmatmul.mubr.f32.gmra.mrb[54].mxu0 %v312_v47  ;;  %v1548_v47 = vpop.xlane.xlu1 %1547 }
 0x3b8   : > { %853 = vmatprep.mubr.f32.mxu0 %v10697_v41 }
 0x3b9   : > { %v7974_v62 = vpop.eup %6356 }
 0x3ba   : > { %10738 = vst [vmem:[#allocation50_spill] sm:$0xff] %v7974_v62  ;;  %v7976_v16 = vpop.eup %6358  ;;  %1829 = vadd.xlane.f32.xlu1 %v1828_v32  ;;  %1826 = vadd.xlane.f32.xlu0 %v1825_v37  ;;  %v349_v37 = vld [vmem:[%s10524_s2 + $0x80] sm:$0xff] }
 0x3bb   : > { %10739 = vst [vmem:[#allocation51_spill] sm:$0xff] %v7976_v16  ;;  %v1831_v8 = vadd.f32 %v7976_v16, %v7974_v62  ;;  %v10740_v62 = vld [vmem:[#allocation37_spill] sm:$0xff]  ;;  %v1613_v16 = vsub.f32 %v10741_v53, %v1548_v47 }
 0x3bc   : > { %v1612_v31 = vsub.f32 %v10740_v62, %v1548_v47 }
 0x3bd   : > { %v7984_v60 = vpop.f32.mrb[32].mxu0  ;;  %v1738_v10 = vmul.f32 1.442695, %v1613_v16 }
 0x3be   : > { %1832 = vadd.xlane.f32.xlu0 %v1831_v8  ;;  %v7986_v17 = vpop.f32.mrb[33].mxu0  ;;  %v1551_v8 = vpop.xlane.xlu0 %1550  ;;  %v1736_v0 = vmul.f32 1.442695, %v1612_v31 }
 0x3bf   : > { %v1614_v57 = vsub.f32 %v10742_v59, %v1551_v8  ;;  %v1615_v30 = vsub.f32 %v10743_v49, %v1551_v8 }
 0x3c1   : > { %v1740_v42 = vmul.f32 1.442695, %v1614_v57 }
 0x3c4   : > { %v7988_v23 = vpop.f32.mrb[34].mxu0 }
 0x3c5   : > { %v7990_v32 = vpop.f32.mrb[35].mxu0 }
 0x3cb   : > { %468 = vperm.xlu1 %6239, %v350_v12  }
 0x3d4   : > { %463 = vperm.xlu0 %6238, %v349_v37   ;;  %v1742_v37 = vmul.f32 1.442695, %v1615_v30 }
 0x3d6   : > { %v1746_v41 = vpop.xlane.xlu1 %1745 }
 0x3d7   : > { %6360 = vrcp.f32 %v1746_v41 }
 0x3da   : > { %v1749_v12 = vpop.xlane.xlu0 %1748 }
 0x3db   : > { %6362 = vrcp.f32 %v1749_v12 }
 0x3dc   : > { %6364 = vpow2.f32 %v1736_v0 }
 0x3dd   : > { %6366 = vpow2.f32 %v1738_v10 }
 0x3de   : > { %v1752_v54 = vpop.xlane.xlu1 %1751 }
 0x3df   : > { %6368 = vrcp.f32 %v1752_v54 }
 0x3e0   : > { %6370 = vpow2.f32 %v1740_v42 }
 0x3e1   : > { %v6361_v62 = vpop.eup %6360 }
 0x3e2   : > { %v1755_v36 = vpop.xlane.xlu0 %1754  ;;  %v1873_v59 = vmul.f32 %v6361_v62, %v7737_v3  ;;  %v1872_v16 = vmul.f32 %v6361_v62, %v7735_v4 }
 0x3e3   : > { %6372 = vrcp.f32 %v1755_v36 }
 0x3e4   : > { %6374 = vpow2.f32 %v1742_v37 }
 0x3e5   : > { %v6363_v41 = vpop.eup %6362 }
 0x3e6   : > { %v1758_v53 = vpop.xlane.xlu1 %1757  ;;  %v1875_v31 = vmul.f32 %v6363_v41, %v7745_v9  ;;  %v1874_v49 = vmul.f32 %v6363_v41, %v7743_v15  ;;  %v8003_v10 = vpop.eup %6364 }
 0x3e7   : > { %6376 = vrcp.f32 %v1758_v53  ;;  %v8005_v42 = vpop.eup %6366 }
 0x3e8   : > { %v5860_v57 = vpack.c.bf16 %v1875_v31, %v1873_v59  ;;  %v5862_v0 = vpack.c.bf16 %v1874_v49, %v1872_v16  ;;  %v1834_v4 = vadd.f32 %v8005_v42, %v8003_v10  ;;  %v10745_v31 = vld [vmem:[#allocation13_spill] sm:$0xff] }
 0x3e9   : > { %v6369_v30 = vpop.eup %6368 }
 0x3ea   : > { %5861 = vmatprep.subr.bf16.mxu1 %v5860_v57  ;;  %v1761_v36 = vpop.xlane.xlu0 %1760  ;;  %v8007_v54 = vpop.eup %6370  ;;  %v1877_v15 = vmul.f32 %v6369_v30, %v7753_v11  ;;  %v1876_v8 = vmul.f32 %v6369_v30, %v7751_v22  ;;  %v10746_v22 = vld [vmem:[#allocation44_spill] sm:$0xff]  ;;  %v10748_v57 = vld [vmem:[#allocation43_spill] sm:$0xff] }
 0x3eb   : > { %6378 = vrcp.f32 %v1761_v36  ;;  %5863 = vmatpush1.bf16.xpose.msra.mxu1 %v5862_v0  ;;  %v10749_v36 = vld [vmem:[#allocation45_spill] sm:$0xff] }
 0x3ed   : > { %v6373_v3 = vpop.eup %6372 }
 0x3ee   : > { %v8011_v9 = vpop.eup %6374  ;;  %v1879_v47 = vmul.f32 %v6373_v3, %v7759_v25  ;;  %v1878_v12 = vmul.f32 %v6373_v3, %v7757_v1  ;;  %v10747_v1 = vld [vmem:[#allocation46_spill] sm:$0xff] }
 0x3ef   : > { %1835 = vadd.xlane.f32.xlu1 %v1834_v4  ;;  %v1837_v41 = vadd.f32 %v8011_v9, %v8007_v54 }
 0x3f0   : > { %v5864_v37 = vpack.c.bf16 %v1879_v47, %v1877_v15  ;;  %v5866_v62 = vpack.c.bf16 %v1878_v12, %v1876_v8  ;;  %v351_v15 = vld [vmem:[%s10524_s2 + $0x90] sm:$0xff]  ;;  %v8030_v47 = vpop.f32.mrb[36].mxu0  ;;  %v344_v12 = vld [vmem:[%s10524_s2 + $0x58] sm:$0xff] }
 0x3f1   : > { %v6377_v59 = vpop.eup %6376  ;;  %v8032_v8 = vpop.f32.mrb[37].mxu0 }
 0x3f2   : > { %5865 = vmatprep.subr.bf16.mxu1 %v5864_v37  ;;  %v8019_v53 = vpop.permute.xlu0 %423  ;;  %v1881_v25 = vmul.f32 %v6377_v59, %v10746_v22  ;;  %v1880_v0 = vmul.f32 %v6377_v59, %v10748_v57  ;;  %v343_v37 = vld [vmem:[%s10524_s2 + $0x50] sm:$0xff] }
 0x3f3   : > { %10744 = vst [vmem:[#allocation37_spill] sm:$0xff] %v8019_v53  ;;  %v738_v16 = vadd.f32 %v10745_v31, %v8019_v53  ;;  %1838 = vadd.xlane.f32.xlu0 %v1837_v41  ;;  %5867 = vmatpush1.bf16.xpose.msra.mxu1 %v5866_v62  ;;  %v352_v62 = vld [vmem:[%s10524_s2 + $0x98] sm:$0xff]  ;;  %v8047_v31 = vpop.permute.xlu1 %428 }
 0x3f4   : > { %10751 = vst [vmem:[#allocation39_spill] sm:$0xff] %v8047_v31 }
 0x3f5   : > { %v6379_v11 = vpop.eup %6378  ;;  %2000 = vmatprep.mubr.f32.mxu1 %v738_v16  ;;  %v8043_v41 = vpop.f32.mrb[38].mxu0 }
 0x3f6   : > { %v1883_v49 = vmul.f32 %v6379_v11, %v10747_v1  ;;  %v1882_v30 = vmul.f32 %v6379_v11, %v10749_v36  ;;  %v8045_v59 = vpop.f32.mrb[39].mxu0 }
 0x3f7   : > { %10750 = vst [vmem:[#allocation38_spill] sm:$0xff] %v8045_v59 }
 0x3f8   : > { %v5868_v3 = vpack.c.bf16 %v1883_v49, %v1881_v25  ;;  %v5870_v4 = vpack.c.bf16 %v1882_v30, %v1880_v0 }
 0x3fa   : > { %5869 = vmatprep.subr.bf16.mxu1 %v5868_v3  ;;  %v10752_v3 = vld [vmem:[#allocation24_spill] sm:$0xff] }
 0x3fb   : > { %5871 = vmatpush1.bf16.xpose.msra.mxu1 %v5870_v4 }
 0x400   : > { %473 = vperm.xlu1 %6239, %v351_v15  }
 0x404   : > { %438 = vperm.xlu1 %6239, %v344_v12  }
 0x409   : > { %433 = vperm.xlu0 %6238, %v343_v37  }
 0x40d   : > { %478 = vperm.xlu0 %6238, %v352_v62  }
 0x41b   : > { %v1764_v16 = vpop.xlane.xlu1 %1763 }
 0x41c   : > { %6380 = vrcp.f32 %v1764_v16 }
 0x41f   : > { %v1770_v11 = vpop.xlane.xlu1 %1769  ;;  %v1767_v22 = vpop.xlane.xlu0 %1766 }
 0x420   : > { %6382 = vrcp.f32 %v1767_v22  ;;  %v10754_v22 = vld [vmem:[#allocation20_spill] sm:$0xff] }
 0x421   : > { %6384 = vrcp.f32 %v1770_v11  ;;  %v10753_v11 = vld [vmem:[#allocation41_spill] sm:$0xff] }
 0x423   : > { %v1776_v25 = vpop.xlane.xlu1 %1775  ;;  %v1773_v1 = vpop.xlane.xlu0 %1772 }
 0x424   : > { %6386 = vrcp.f32 %v1773_v1  ;;  %v766_v1 = vadd.f32 %v10754_v22, %v10753_v11  ;;  %v10758_v22 = vld [vmem:[#allocation42_spill] sm:$0xff] }
 0x425   : > { %6388 = vrcp.f32 %v1776_v25  ;;  %v10755_v25 = vld [vmem:[#allocation25_spill] sm:$0xff] }
 0x426   : > { %v6381_v0 = vpop.eup %6380 }
 0x427   : > { %v1782_v49 = vpop.xlane.xlu1 %1781  ;;  %v1779_v57 = vpop.xlane.xlu0 %1778  ;;  %v1885_v15 = vmul.f32 %v6381_v0, %v7802_v5  ;;  %v1884_v37 = vmul.f32 %v6381_v0, %v7799_v26 }
 0x428   : > { %6390 = vrcp.f32 %v1779_v57 }
 0x42a   : > { %v6383_v36 = vpop.eup %6382 }
 0x42b   : > { %v1788_v30 = vpop.xlane.xlu1 %1787  ;;  %2033 = vxpose.xlu0.b32.start [1/4] (short) %v10752_v3, 128  ;;  %v1785_v4 = vpop.xlane.xlu0 %1784  ;;  %v1887_v12 = vmul.f32 %v6383_v36, %v7808_v35  ;;  %v1886_v62 = vmul.f32 %v6383_v36, %v7805_v45  ;;  %v10756_v3 = vld [vmem:[#allocation21_spill] sm:$0xff] }
 0x42c   : > { %v6385_v16 = vpop.eup %6384  ;;  %v768_v59 = vadd.f32 %v10756_v3, %v10753_v11  ;;  %6392 = vrcp.f32 %v1785_v4 }
 0x42d   : > { %2065 = vxpose.xlu1.b32.start [1/4] (short) %v10755_v25, 128  ;;  %v5872_v57 = vpack.c.bf16 %v1887_v12, %v1885_v15  ;;  %v5874_v31 = vpack.c.bf16 %v1886_v62, %v1884_v37  ;;  %v1889_v26 = vmul.f32 %v6385_v16, %v7816_v20  ;;  %6394 = vrcp.f32 %v1782_v49  ;;  %v10757_v37 = vld [vmem:[#allocation26_spill] sm:$0xff]  ;;  %v10760_v25 = vld [vmem:[#allocation27_spill] sm:$0xff] }
 0x42e   : > { %v6387_v53 = vpop.eup %6386 }
 0x42f   : > { %v1794_v5 = vpop.xlane.xlu1 %1793  ;;  %2034 = vxpose.xlu0.b32.cont [2/4] (short) %v766_v1, 128  ;;  %v1791_v35 = vpop.xlane.xlu0 %1790  ;;  %5873 = vmatprep.subr.bf16.mxu1 %v5872_v57  ;;  %v1891_v45 = vmul.f32 %v6387_v53, %v7822_v2  ;;  %v1890_v4 = vmul.f32 %v6387_v53, %v7819_v52  ;;  %v10759_v1 = vld [vmem:[#allocation22_spill] sm:$0xff]  ;;  %v1888_v2 = vmul.f32 %v6385_v16, %v7811_v40 }
 0x430   : > { %5875 = vmatpush1.bf16.xpose.msra.mxu1 %v5874_v31  ;;  %v6389_v0 = vpop.eup %6388  ;;  %v778_v20 = vadd.f32 %v10759_v1, %v10758_v22  ;;  %v10761_v31 = vld [vmem:[#allocation23_spill] sm:$0xff]  ;;  %6396 = vrcp.f32 %v1791_v35 }
 0x431   : > { %2066 = vxpose.xlu1.b32.cont [2/4] (short) %v768_v59, 128  ;;  %v5876_v36 = vpack.c.bf16 %v1891_v45, %v1889_v26  ;;  %v1893_v59 = vmul.f32 %v6389_v0, %v7832_v24  ;;  %v780_v49 = vadd.f32 %v10761_v31, %v10758_v22  ;;  %v5878_v52 = vpack.c.bf16 %v1890_v4, %v1888_v2 }
 0x432   : > { %v6391_v15 = vpop.eup %6390  ;;  %6398 = vrcp.f32 %v1788_v30  ;;  %v1892_v16 = vmul.f32 %v6389_v0, %v7827_v48 }
 0x433   : > { %v1800_v12 = vpop.xlane.xlu1 %1799  ;;  %2035 = vxpose.xlu0.b32.cont [3/4] (short) %v10757_v37, 128  ;;  %v1797_v62 = vpop.xlane.xlu0 %1796  ;;  %5877 = vmatprep.subr.bf16.mxu1 %v5876_v36  ;;  %v1895_v11 = vmul.f32 %v6391_v15, %v7838_v46  ;;  %v1894_v40 = vmul.f32 %v6391_v15, %v7835_v27 }
 0x434   : > { %6400 = vrcp.f32 %v1797_v62 }
 0x435   : > { %2067 = vxpose.xlu1.b32.cont [3/4] (short) %v10760_v25, 128  ;;  %v5880_v53 = vpack.c.bf16 %v1895_v11, %v1893_v59  ;;  %v5882_v11 = vpack.c.bf16 %v1894_v40, %v1892_v16  ;;  %6402 = vrcp.f32 %v1794_v5 }
 0x436   : > { %v6393_v26 = vpop.eup %6392 }
 0x437   : > { %v1806_v57 = vpop.xlane.xlu1 %1805  ;;  %2036 = vxpose.xlu0.b32.end [4/4] (short) %v778_v20, 128  ;;  %v1803_v3 = vpop.xlane.xlu0 %1802  ;;  %v1899_v24 = vmul.f32 %v6393_v26, %v7854_v6  ;;  %v1898_v27 = vmul.f32 %v6393_v26, %v7851_v51 }
 0x438   : > { %5879 = vmatpush1.bf16.xpose.msra.mxu1 %v5878_v52  ;;  %v6395_v46 = vpop.eup %6394  ;;  %6404 = vrcp.f32 %v1803_v3 }
 0x439   : > { %2068 = vxpose.xlu1.b32.end [4/4] (short) %v780_v49, 128  ;;  %5881 = vmatprep.subr.bf16.mxu1 %v5880_v53  ;;  %v1897_v35 = vmul.f32 %v6395_v46, %v7848_v39  ;;  %v1896_v48 = vmul.f32 %v6395_v46, %v7843_v33  ;;  %6406 = vrcp.f32 %v1800_v12 }
 0x43a   : > { %v6397_v22 = vpop.eup %6396 }
 0x43b   : > { %v1812_v45 = vpop.xlane.xlu1 %1811  ;;  %v1809_v36 = vpop.xlane.xlu0 %1808  ;;  %v5884_v30 = vpack.c.bf16 %v1899_v24, %v1897_v35  ;;  %v1903_v6 = vmul.f32 %v6397_v22, %v7870_v14  ;;  %v5886_v0 = vpack.c.bf16 %v1898_v27, %v1896_v48  ;;  %v1902_v51 = vmul.f32 %v6397_v22, %v7867_v58 }
 0x43c   : > { %v6399_v1 = vpop.eup %6398  ;;  %6408 = vrcp.f32 %v1809_v36 }
 0x43d   : > { %v1901_v39 = vmul.f32 %v6399_v1, %v7864_v55  ;;  %v1900_v31 = vmul.f32 %v6399_v1, %v7859_v28  ;;  %6410 = vrcp.f32 %v1806_v57 }
 0x43e   : > { %v6401_v25 = vpop.eup %6400 }
 0x43f   : > { %v8075_v37 = vpop.xlane.xlu1 %1817  ;;  %v1815_v4 = vpop.xlane.xlu0 %1814  ;;  %v5888_v62 = vpack.c.bf16 %v1903_v6, %v1901_v39  ;;  %v1907_v14 = vmul.f32 %v6401_v25, %v7885_v61  ;;  %v5890_v49 = vpack.c.bf16 %v1902_v51, %v1900_v31  ;;  %v1906_v46 = vmul.f32 %v6401_v25, %v7883_v38  ;;  %v10763_v6 = vld [vmem:[#allocation33_spill] sm:$0xff]  ;;  %v10766_v25 = vld [vmem:[#allocation32_spill] sm:$0xff] }
 0x440   : > { %5883 = vmatpush1.bf16.xpose.msra.mxu1 %v5882_v11  ;;  %v6403_v2 = vpop.eup %6402  ;;  %6412 = vrcp.f32 %v1815_v4 }
 0x441   : > { %5885 = vmatprep.subr.bf16.mxu1 %v5884_v30  ;;  %v1905_v33 = vmul.f32 %v6403_v2, %v7880_v19  ;;  %v1904_v36 = vmul.f32 %v6403_v2, %v7875_v18  ;;  %6414 = vrcp.f32 %v1812_v45  ;;  %v10767_v2 = vld [vmem:[#allocation47_spill] sm:$0xff] }
 0x442   : > { %v6405_v3 = vpop.eup %6404 }
 0x443   : > { %v1821_v20 = vpop.xlane.xlu0 %1820  ;;  %v8079_v15 = vpop.xlane.xlu1 %1823  ;;  %v5892_v52 = vpack.c.bf16 %v1907_v14, %v1905_v33  ;;  %v1911_v58 = vmul.f32 %v6405_v3, %v7900_v7  ;;  %v10768_v14 = vld [vmem:[#allocation30_spill] sm:$0xff]  ;;  %v10769_v33 = vld [vmem:[#allocation35_spill] sm:$0xff] }
 0x444   : > { %v6407_v53 = vpop.eup %6406  ;;  %6416 = vrcp.f32 %v1821_v20  ;;  %v10762_v20 = vld [vmem:[#allocation29_spill] sm:$0xff] }
 0x445   : > { %v1909_v38 = vmul.f32 %v6407_v53, %v7896_v56  ;;  %v1908_v16 = vmul.f32 %v6407_v53, %v7890_v13  ;;  %6418 = vrcp.f32 %v8075_v37  ;;  %v10770_v53 = vld [vmem:[#allocation36_spill] sm:$0xff] }
 0x446   : > { %v6409_v24 = vpop.eup %6408 }
 0x447   : > { %v1827_v5 = vpop.xlane.xlu0 %1826  ;;  %v8083_v59 = vpop.xlane.xlu1 %1829  ;;  %v1915_v18 = vmul.f32 %v6409_v24, %v7915_v43  ;;  %v1914_v4 = vmul.f32 %v6409_v24, %v7913_v34  ;;  %v10764_v34 = vld [vmem:[#allocation28_spill] sm:$0xff]  ;;  %v10775_v24 = vld [vmem:[#allocation49_spill] sm:$0xff] }
 0x448   : > { %5887 = vmatpush1.bf16.xpose.msra.mxu1 %v5886_v0  ;;  %6420 = vrcp.f32 %v1827_v5 }
 0x449   : > { %5889 = vmatprep.subr.bf16.mxu1 %v5888_v62  ;;  %6422 = vrcp.f32 %v8079_v15 }
 0x44b   : > { %v1833_v55 = vpop.xlane.xlu0 %1832  ;;  %v469_v12 = vpop.permute.xlu1 %468 }
 0x44c   : > { %v8092_v61 = vadd.f32 %v7988_v23, %v469_v12  ;;  %v8095_v28 = vadd.f32 %v7990_v32, %v469_v12  ;;  %v5894_v23 = vpack.c.bf16 %v1906_v46, %v1904_v36  ;;  %v5896_v32 = vpack.c.bf16 %v1911_v58, %v1909_v38  ;;  %v10771_v46 = vld [vmem:[#allocation51_spill] sm:$0xff]  ;;  %v10773_v38 = vld [vmem:[#allocation34_spill] sm:$0xff] }
 0x44d   : > { %6424 = vrcp.f32 %v1833_v55 }
 0x44e   : > { %6426 = vrcp.f32 %v8083_v59 }
 0x450   : > { %5891 = vmatpush1.bf16.xpose.msra.mxu1 %v5890_v49 }
 0x451   : > { %5893 = vmatprep.subr.bf16.mxu1 %v5892_v52 }
 0x453   : > { %v464_v26 = vpop.permute.xlu0 %463 }
 0x454   : > { %v8098_v19 = vadd.f32 %v7984_v60, %v464_v26  ;;  %v8101_v57 = vadd.f32 %v7986_v17, %v464_v26  ;;  %v6411_v60 = vpop.eup %6410  ;;  %v1910_v17 = vmul.f32 %v6405_v3, %v7898_v29 }
 0x455   : > { %v1913_v35 = vmul.f32 %v6411_v60, %v7911_v50  ;;  %v6413_v30 = vpop.eup %6412  ;;  %v1912_v29 = vmul.f32 %v6411_v60, %v7904_v63 }
 0x456   : > { %v5926_v40 = vpack.c.bf16 %v8092_v61, %v8098_v19  ;;  %v5924_v7 = vpack.c.bf16 %v8095_v28, %v8101_v57  ;;  %v5898_v56 = vpack.c.bf16 %v1910_v17, %v1908_v16  ;;  %v6415_v45 = vpop.eup %6414  ;;  %v1919_v22 = vmul.f32 %v6413_v30, %v7930_v44  ;;  %v10765_v44 = vld [vmem:[#allocation31_spill] sm:$0xff]  ;;  %v10795_v57 = vld [vmem:[#allocation16_spill] sm:$0xff] }
 0x457   : > { %v5900_v11 = vpack.c.bf16 %v1915_v18, %v1913_v35  ;;  %v1917_v43 = vmul.f32 %v6415_v45, %v7926_v21  ;;  %v5902_v13 = vpack.c.bf16 %v1914_v4, %v1912_v29  ;;  %v6417_v1 = vpop.eup %6416  ;;  %v1918_v27 = vmul.f32 %v6413_v30, %v10762_v20  ;;  %v357_v29 = vld [vmem:[%s10524_s2 + $0xc0] sm:$0xff] }
 0x458   : > { %5895 = vmatpush1.bf16.xpose.msra.mxu1 %v5894_v23  ;;  %v6419_v37 = vpop.eup %6418  ;;  %v1923_v48 = vmul.f32 %v6417_v1, %v10763_v6  ;;  %v1916_v39 = vmul.f32 %v6415_v45, %v10764_v34  ;;  %v1922_v5 = vmul.f32 %v6417_v1, %v10766_v25  ;;  %v10780_v45 = vld [vmem:[#allocation50_spill] sm:$0xff]  ;;  %v10798_v61 = vmov 0.0  }
 0x459   : > { %5897 = vmatprep.subr.bf16.mxu1 %v5896_v32  ;;  %v5904_v50 = vpack.c.bf16 %v1919_v22, %v1917_v43  ;;  %v1921_v0 = vmul.f32 %v6419_v37, %v10765_v44  ;;  %v6421_v62 = vpop.eup %6420  ;;  %v1920_v31 = vmul.f32 %v6419_v37, %v10768_v14 }
 0x45a   : > { %v5906_v63 = vpack.c.bf16 %v1918_v27, %v1916_v39  ;;  %v6423_v15 = vpop.eup %6422  ;;  %v1927_v51 = vmul.f32 %v6421_v62, %v10767_v2  ;;  %v1926_v26 = vmul.f32 %v6421_v62, %v10770_v53  ;;  %v10791_v53 = vld [vmem:[#allocation39_spill] sm:$0xff] }
 0x45b   : > { %v5908_v21 = vpack.c.bf16 %v1923_v48, %v1921_v0  ;;  %v1925_v49 = vmul.f32 %v6423_v15, %v10769_v33  ;;  %v5910_v3 = vpack.c.bf16 %v1922_v5, %v1920_v31  ;;  %v6425_v12 = vpop.eup %6424  ;;  %v1924_v23 = vmul.f32 %v6423_v15, %v10773_v38  ;;  %v359_v48 = vld [vmem:[%s10524_s2 + $0xd0] sm:$0xff]  ;;  %v360_v15 = vld [vmem:[%s10524_s2 + $0xd8] sm:$0xff]  ;;  %v10794_v38 = vld [vmem:[#allocation17_spill] sm:$0xff] }
 0x45c   : > { %v6427_v55 = vpop.eup %6426  ;;  %v1931_v58 = vmul.f32 %v6425_v12, %v10771_v46  ;;  %v1930_v4 = vmul.f32 %v6425_v12, %v10780_v45  ;;  %v10793_v46 = vld [vmem:[#allocation14_spill] sm:$0xff] }
 0x45d   : > { %v5912_v52 = vpack.c.bf16 %v1927_v51, %v1925_v49  ;;  %v8130_v36 = vpop.f32.mrb[40].mxu0  ;;  %v1929_v60 = vmul.f32 %v6427_v55, %v10775_v24  ;;  %v5914_v18 = vpack.c.bf16 %v1926_v26, %v1924_v23  ;;  %v10786_v49 = vld [vmem:[#allocation38_spill] sm:$0xff]  ;;  %v10792_v26 = vld [vmem:[#allocation15_spill] sm:$0xff] }
 0x45e   : > { %10772 = vst [vmem:[#allocation40_spill] sm:$0xff] %v8130_v36  ;;  %v8133_v32 = vpop.f32.mrb[41].mxu0  ;;  %v10796_v24 = vld [vmem:[#allocation19_spill] sm:$0xff] }
 0x45f   : > { %10774 = vst [vmem:[#allocation13_spill] sm:$0xff] %v8133_v32 }
 0x460   : > { %5899 = vmatpush1.bf16.xpose.msra.mxu1 %v5898_v56  ;;  %v5916_v56 = vpack.c.bf16 %v1931_v58, %v1929_v60  ;;  %v742_v58 = vadd.f32 %v10793_v46, %v10791_v53 }
 0x461   : > { %5901 = vmatprep.subr.bf16.mxu1 %v5900_v11 }
 0x468   : > { %5903 = vmatpush1.bf16.xpose.msra.mxu1 %v5902_v13  ;;  %v10783_v13 = vld [vmem:[#allocation48_spill] sm:$0xff] }
 0x469   : > { %5905 = vmatprep.subr.bf16.mxu1 %v5904_v50  ;;  %v1928_v50 = vmul.f32 %v6427_v55, %v10783_v13 }
 0x46b   : > { %v5918_v20 = vpack.c.bf16 %v1930_v4, %v1928_v50 }
 0x46e   : > { %v8136_v17 = vpop.f32.mrb[42].mxu0 }
 0x46f   : > { %10776 = vst [vmem:[#allocation44_spill] sm:$0xff] %v8136_v17  ;;  %v8138_v16 = vpop.f32.mrb[43].mxu0 }
 0x470   : > { %5907 = vmatpush1.bf16.xpose.msra.mxu1 %v5906_v63  ;;  %10777 = vst [vmem:[#allocation46_spill] sm:$0xff] %v8138_v16 }
 0x471   : > { %5909 = vmatprep.subr.bf16.mxu1 %v5908_v21 }
 0x472   : > { %v8140_v11 = vpop.f32.mrb[44].mxu0 }
 0x473   : > { %10778 = vst [vmem:[#allocation43_spill] sm:$0xff] %v8140_v11  ;;  %v8142_v30 = vpop.f32.mrb[45].mxu0  ;;  %v314_v11 = vld [vmem:[#allocation3 + $0xe8] sm:$0xff] }
 0x474   : > { %10779 = vst [vmem:[#allocation45_spill] sm:$0xff] %v8142_v30 }
 0x477   : > { %v8145_v22 = vpop.f32.mrb[46].mxu0 }
 0x478   : > { %5911 = vmatpush1.bf16.xpose.msra.mxu1 %v5910_v3  ;;  %10781 = vst [vmem:[#allocation24_spill] sm:$0xff] %v8145_v22  ;;  %v8150_v43 = vpop.f32.mrb[47].mxu0 }
 0x479   : > { %5913 = vmatprep.subr.bf16.mxu1 %v5912_v52  ;;  %10782 = vst [vmem:[#allocation41_spill] sm:$0xff] %v8150_v43  ;;  %v358_v52 = vld [vmem:[%s10524_s2 + $0xc8] sm:$0xff] }
 0x47c   : > { %v1836_v59 = vpop.xlane.xlu1 %1835 }
 0x47d   : > { %6428 = vrcp.f32 %v1836_v59  ;;  %v744_v59 = vadd.f32 %v10792_v26, %v10791_v53 }
 0x47e   : > { %v8153_v1 = vpop.f32.mrb[48].mxu0 }
 0x47f   : > { %v8155_v37 = vpop.f32.mrb[49].mxu0 }
 0x480   : > { %v1839_v35 = vpop.xlane.xlu0 %1838  ;;  %5915 = vmatpush1.bf16.xpose.msra.mxu1 %v5914_v18  ;;  %v474_v44 = vpop.permute.xlu1 %473  ;;  %v10797_v18 = vld [vmem:[#allocation18_spill] sm:$0xff] }
 0x481   : > { %6430 = vrcp.f32 %v1839_v35  ;;  %5917 = vmatprep.subr.bf16.mxu1 %v5916_v56  ;;  %v796_v14 = vadd.f32 %v8030_v47, %v474_v44  ;;  %v798_v31 = vadd.f32 %v8032_v8, %v474_v44  ;;  %v10789_v47 = vld [vmem:[#allocation37_spill] sm:$0xff]  ;;  %v10790_v8 = vld [vmem:[#allocation12_spill] sm:$0xff] }
 0x482   : > { %v8157_v27 = vpop.f32.mrb[50].mxu0 }
 0x483   : > { %10784 = vst [vmem:[#allocation20_spill] sm:$0xff] %v8157_v27  ;;  %v8162_v34 = vpop.f32.mrb[51].mxu0 }
 0x484   : > { %10785 = vst [vmem:[#allocation25_spill] sm:$0xff] %v8162_v34  ;;  %v439_v28 = vpop.permute.xlu1 %438 }
 0x485   : > { %v756_v60 = vadd.f32 %v10796_v24, %v439_v28  ;;  %v754_v35 = vadd.f32 %v10797_v18, %v439_v28 }
 0x486   : > { %v8164_v0 = vpop.f32.mrb[52].mxu0 }
 0x487   : > { %503 = vperm.xlu1 %6239, %v357_v29   ;;  %v6429_v39 = vpop.eup %6428  ;;  %v8166_v21 = vpop.f32.mrb[53].mxu0 }
 0x488   : > { %v434_v6 = vpop.permute.xlu0 %433  ;;  %5919 = vmatpush1.bf16.xpose.msra.mxu1 %v5918_v20  ;;  %v1933_v25 = vmul.f32 %v6429_v39, %v8005_v42  ;;  %v1932_v2 = vmul.f32 %v6429_v39, %v8003_v10 }
 0x489   : > { %v750_v23 = vadd.f32 %v10794_v38, %v434_v6 }
 0x48a   : > { %v8182_v55 = vpop.f32.mrb[54].mxu0 }
 0x48b   : > { %v6431_v63 = vpop.eup %6430  ;;  %513 = vperm.xlu1 %6239, %v359_v48   ;;  %10787 = vst [vmem:[#allocation21_spill] sm:$0xff] %v8182_v55 }
 0x48c   : > { %v479_v62 = vpop.permute.xlu0 %478  ;;  %v1935_v5 = vmul.f32 %v6431_v63, %v8011_v9  ;;  %v1934_v51 = vmul.f32 %v6431_v63, %v8007_v54  ;;  %v8184_v54 = vpop.f32.mrb[55].mxu0 }
 0x48d   : > { %v802_v33 = vadd.f32 %v8043_v41, %v479_v62  ;;  %v804_v3 = vadd.f32 %v10786_v49, %v479_v62  ;;  %10788 = vst [vmem:[#allocation26_spill] sm:$0xff] %v8184_v54  ;;  %v736_v41 = vadd.f32 %v10790_v8, %v10789_v47 }
 0x48e   : > { %v5920_v12 = vpack.c.bf16 %v1935_v5, %v1933_v25  ;;  %v5922_v42 = vpack.c.bf16 %v1934_v51, %v1932_v2 }
 0x48f   : > { %v5930_v9 = vpack.c.bf16 %v802_v33, %v796_v14  ;;  %518 = vperm.xlu1 %6239, %v360_v15   ;;  %v5928_v10 = vpack.c.bf16 %v804_v3, %v798_v31 }
 0x490   : > { %508 = vperm.xlu0 %6238, %v358_v52   ;;  %5921 = vmatprep.subr.bf16.mxu1 %v5920_v12 }
 0x491   : > { %5923 = vmatpush1.bf16.xpose.msra.mxu1 %v5922_v42 }
 0x492   : > { %5925 = vmatprep.subr.bf16.mxu1 %v5924_v7  ;;  %v748_v7 = vadd.f32 %v10795_v57, %v434_v6 }
 0x498   : > { %2001 = vmatmul.mubr.f32.vlgmr.msra.gmra.mrb[64].mxu1 %v736_v41 }
 0x499   : > { %2006 = vmatprep.mubr.f32.mxu1 %v744_v59  ;;  %5927 = vmatpush1.bf16.msra.mxu1 %v5926_v40 }
 0x49a   : > { %5929 = vmatprep.subr.bf16.mxu1 %v5928_v10 }
 0x49c   : > { %2007 = vmatmul.mubr.f32.gmra.mrb[66].mxu1 %v742_v58 }
 0x49d   : > { %2012 = vmatprep.mubr.f32.mxu1 %v750_v23  ;;  %5931 = vmatpush1.bf16.msra.mxu1 %v5930_v9 }
 0x4a0   : > { %2013 = vmatmul.mubr.f32.gmra.mrb[68].mxu1 %v748_v7 }
 0x4a1   : > { %2018 = vmatprep.mubr.f32.mxu1 %v756_v60 }
 0x4a4   : > { %2019 = vmatmul.mubr.f32.gmra.mrb[70].mxu1 %v754_v35 }
 0x4a5   : > { %2257 = vmatprep.mubr.f32.mxu1 %v10798_v61 }
 0x4ab   : > { %v2049_v19 = vpop.trf.xlu0 }
 0x4ac   : > { %5717 = vmatmul.mubr.msk.f32.vlgmr.msra.gmra.mrb[72].mxu1 %vm1038_vm0, %v2049_v19 }
 0x4ad   : > { %2263 = vmatprep.mubr.f32.mxu1 %v10798_v61  ;;  %v2081_v40 = vpop.trf.xlu1 }
 0x4af   : > { %v2050_v56 = vpop.trf.xlu0 }
 0x4b0   : > { %5718 = vmatmul.mubr.msk.f32.gmra.mrb[74].mxu1 %vm1038_vm0, %v2050_v56 }
 0x4b1   : > { %2269 = vmatprep.mubr.f32.mxu1 %v10798_v61  ;;  %v2082_v45 = vpop.trf.xlu1 }
 0x4b3   : > { %v2051_v4 = vpop.trf.xlu0 }
 0x4b4   : > { %5719 = vmatmul.mubr.msk.f32.gmra.mrb[76].mxu1 %vm1038_vm0, %v2051_v4 }
 0x4b5   : > { %2275 = vmatprep.mubr.f32.mxu1 %v10798_v61  ;;  %v2083_v29 = vpop.trf.xlu1 }
 0x4b7   : > { %v2052_v13 = vpop.trf.xlu0 }
 0x4b8   : > { %5720 = vmatmul.mubr.msk.f32.gmra.mrb[78].mxu1 %vm1038_vm0, %v2052_v13 }
 0x4b9   : > { %2281 = vmatprep.mubr.f32.mxu1 %v10798_v61  ;;  %v2084_v50 = vpop.trf.xlu1 }
 0x4bb   : > { %v2053_v20 = vpop.trf.xlu0 }
 0x4bc   : > { %5721 = vmatmul.mubr.msk.f32.gmra.mrb[80].mxu1 %vm1038_vm0, %v2053_v20 }
 0x4bd   : > { %2287 = vmatprep.mubr.f32.mxu1 %v10798_v61  ;;  %v2085_v6 = vpop.trf.xlu1 }
 0x4bf   : > { %v2054_v48 = vpop.trf.xlu0 }
 0x4c0   : > { %5722 = vmatmul.mubr.msk.f32.gmra.mrb[82].mxu1 %vm1038_vm0, %v2054_v48 }
 0x4c1   : > { %2293 = vmatprep.mubr.f32.mxu1 %v10798_v61  ;;  %v2086_v44 = vpop.trf.xlu1 }
 0x4c3   : > { %v2055_v39 = vpop.trf.xlu0 }
 0x4c4   : > { %5723 = vmatmul.mubr.msk.f32.gmra.mrb[84].mxu1 %vm1038_vm0, %v2055_v39 }
 0x4c5   : > { %2299 = vmatprep.mubr.f32.mxu1 %v10798_v61  ;;  %v2087_v62 = vpop.trf.xlu1 }
 0x4c7   : > { %v2056_v63 = vpop.trf.xlu0 }
 0x4c8   : > { %5724 = vmatmul.mubr.msk.f32.gmra.mrb[86].mxu1 %vm1038_vm0, %v2056_v63 }
 0x4c9   : > { %2305 = vmatprep.mubr.f32.mxu1 %v10798_v61  ;;  %v2088_v5 = vpop.trf.xlu1 }
 0x4cb   : > { %v2057_v15 = vpop.trf.xlu0 }
 0x4cc   : > { %5725 = vmatmul.mubr.msk.f32.gmra.mrb[88].mxu1 %vm1038_vm0, %v2057_v15 }
 0x4cd   : > { %2311 = vmatprep.mubr.f32.mxu1 %v10798_v61  ;;  %v2089_v51 = vpop.trf.xlu1 }
 0x4cf   : > { %v2058_v25 = vpop.trf.xlu0 }
 0x4d0   : > { %5726 = vmatmul.mubr.msk.f32.gmra.mrb[90].mxu1 %vm1038_vm0, %v2058_v25 }
 0x4d1   : > { %2317 = vmatprep.mubr.f32.mxu1 %v10798_v61  ;;  %v2090_v33 = vpop.trf.xlu1 }
 0x4d3   : > { %v2059_v2 = vpop.trf.xlu0 }
 0x4d4   : > { %5727 = vmatmul.mubr.msk.f32.gmra.mrb[92].mxu1 %vm1038_vm0, %v2059_v2 }
 0x4d5   : > { %2323 = vmatprep.mubr.f32.mxu1 %v10798_v61  ;;  %v2091_v3 = vpop.trf.xlu1 }
 0x4d7   : > { %v2060_v14 = vpop.trf.xlu0 }
 0x4d8   : > { %5728 = vmatmul.mubr.msk.f32.gmra.mrb[94].mxu1 %vm1038_vm0, %v2060_v14 }
 0x4d9   : > { %2329 = vmatprep.mubr.f32.mxu1 %v10798_v61  ;;  %v2092_v42 = vpop.trf.xlu1 }
 0x4db   : > { %v2061_v31 = vpop.trf.xlu0 }
 0x4dc   : > { %5729 = vmatmul.mubr.msk.f32.gmra.mrb[96].mxu1 %vm1038_vm0, %v2061_v31 }
 0x4dd   : > { %2335 = vmatprep.mubr.f32.mxu1 %v10798_v61  ;;  %v2093_v9 = vpop.trf.xlu1 }
 0x4df   : > { %v2062_v49 = vpop.trf.xlu0 }
 0x4e0   : > { %5730 = vmatmul.mubr.msk.f32.gmra.mrb[98].mxu1 %vm1038_vm0, %v2062_v49 }
 0x4e1   : > { %2341 = vmatprep.mubr.f32.mxu1 %v10798_v61  ;;  %v2094_v10 = vpop.trf.xlu1 }
 0x4e3   : > { %v2063_v52 = vpop.trf.xlu0 }
 0x4e4   : > { %5731 = vmatmul.mubr.msk.f32.gmra.mrb[100].mxu1 %vm1038_vm0, %v2063_v52 }
 0x4e5   : > { %2347 = vmatprep.mubr.f32.mxu1 %v10798_v61  ;;  %v2095_v47 = vpop.trf.xlu1 }
 0x4e7   : > { %v2064_v12 = vpop.trf.xlu0 }
 0x4e8   : > { %5732 = vmatmul.mubr.msk.f32.gmra.mrb[102].mxu1 %vm1038_vm0, %v2064_v12 }
 0x4e9   : > { %2353 = vmatprep.mubr.f32.mxu1 %v10798_v61  ;;  %v2096_v8 = vpop.trf.xlu1 }
 0x4ec   : > { %5733 = vmatmul.mubr.msk.f32.gmra.mrb[104].mxu1 %vm1038_vm0, %v2081_v40 }
 0x4ed   : > { %2359 = vmatprep.mubr.f32.mxu1 %v10798_v61 }
 0x4f0   : > { %5734 = vmatmul.mubr.msk.f32.gmra.mrb[106].mxu1 %vm1038_vm0, %v2082_v45 }
 0x4f1   : > { %2365 = vmatprep.mubr.f32.mxu1 %v10798_v61 }
 0x4f4   : > { %5735 = vmatmul.mubr.msk.f32.gmra.mrb[108].mxu1 %vm1038_vm0, %v2083_v29 }
 0x4f5   : > { %2371 = vmatprep.mubr.f32.mxu1 %v10798_v61 }
 0x4f8   : > { %5736 = vmatmul.mubr.msk.f32.gmra.mrb[110].mxu1 %vm1038_vm0, %v2084_v50 }
 0x4f9   : > { %2377 = vmatprep.mubr.f32.mxu1 %v10798_v61 }
 0x4fc   : > { %5737 = vmatmul.mubr.msk.f32.gmra.mrb[112].mxu1 %vm1038_vm0, %v2085_v6 }
 0x4fd   : > { %2383 = vmatprep.mubr.f32.mxu1 %v10798_v61 }
 0x500   : > { %5738 = vmatmul.mubr.msk.f32.gmra.mrb[114].mxu1 %vm1038_vm0, %v2086_v44 }
 0x501   : > { %2389 = vmatprep.mubr.f32.mxu1 %v10798_v61 }
 0x504   : > { %5739 = vmatmul.mubr.msk.f32.gmra.mrb[116].mxu1 %vm1038_vm0, %v2087_v62 }
 0x505   : > { %2395 = vmatprep.mubr.f32.mxu1 %v10798_v61 }
 0x506   : > { %v504_v41 = vpop.permute.xlu1 %503 }
 0x507   : > { %v8250_v53 = vadd.f32 %v8153_v1, %v504_v41  ;;  %v8253_v26 = vadd.f32 %v8155_v37, %v504_v41 }
 0x508   : > { %5740 = vmatmul.mubr.msk.f32.gmra.mrb[118].mxu1 %vm1038_vm0, %v2088_v5 }
 0x509   : > { %10799 = vst [vmem:[#allocation42_spill] sm:$0xff] %v8250_v53  ;;  %10800 = vst [vmem:[#allocation22_spill] sm:$0xff] %v8253_v26  ;;  %2401 = vmatprep.mubr.f32.mxu1 %v10798_v61 }
 0x50a   : > { %v514_v59 = vpop.permute.xlu1 %513 }
 0x50b   : > { %v8258_v46 = vadd.f32 %v8164_v0, %v514_v59  ;;  %v8261_v58 = vadd.f32 %v8166_v21, %v514_v59 }
 0x50c   : > { %5741 = vmatmul.mubr.msk.f32.gmra.mrb[120].mxu1 %vm1038_vm0, %v2089_v51 }
 0x50d   : > { %10801 = vst [vmem:[#allocation27_spill] sm:$0xff] %v8258_v46  ;;  %10802 = vst [vmem:[#allocation23_spill] sm:$0xff] %v8261_v58  ;;  %2407 = vmatprep.mubr.f32.mxu1 %v10798_v61 }
 0x510   : > { %5742 = vmatmul.mubr.msk.f32.gmra.mrb[122].mxu1 %vm1038_vm0, %v2090_v33 }
 0x511   : > { %2413 = vmatprep.mubr.f32.mxu1 %v10798_v61 }
 0x514   : > { %5743 = vmatmul.mubr.msk.f32.gmra.mrb[124].mxu1 %vm1038_vm0, %v2091_v3 }
 0x515   : > { %2419 = vmatprep.mubr.f32.mxu1 %v10798_v61 }
 0x518   : > { %5744 = vmatmul.mubr.msk.f32.gmra.mrb[126].mxu1 %vm1038_vm0, %v2092_v42 }
 0x519   : > { %2425 = vmatprep.mubr.f32.mxu1 %v10798_v61 }
 0x51c   : > { %5745 = vmatmul.mubr.msk.f32.gmra.mrb[128].mxu1 %vm1038_vm0, %v2093_v9 }
 0x51d   : > { %2431 = vmatprep.mubr.f32.mxu1 %v10798_v61 }
 0x520   : > { %5746 = vmatmul.mubr.msk.f32.gmra.mrb[130].mxu1 %vm1038_vm0, %v2094_v10 }
 0x521   : > { %2437 = vmatprep.mubr.f32.mxu1 %v10798_v61 }
 0x524   : > { %5747 = vmatmul.mubr.msk.f32.gmra.mrb[132].mxu1 %vm1038_vm0, %v2095_v47 }
 0x525   : > { %2443 = vmatprep.mubr.f32.mxu1 %v10798_v61 }
 0x528   : > { %5748 = vmatmul.mubr.msk.f32.gmra.mrb[134].mxu1 %vm1038_vm0, %v2096_v8 }
 0x56b   : > { %v8278_v1 = vpop.f32.mrb[64].mxu1 }
 0x56c   : > { %10803 = vst [vmem:[#allocation29_spill] sm:$0xff] %v8278_v1  ;;  %v8280_v37 = vpop.f32.mrb[65].mxu1 }
 0x56d   : > { %10804 = vst [vmem:[#allocation33_spill] sm:$0xff] %v8280_v37 }
 0x56f   : > { %v8282_v0 = vpop.f32.mrb[66].mxu1 }
 0x570   : > { %10805 = vst [vmem:[#allocation28_spill] sm:$0xff] %v8282_v0  ;;  %v8286_v38 = vpop.f32.mrb[67].mxu1 }
 0x571   : > { %10806 = vst [vmem:[#allocation31_spill] sm:$0xff] %v8286_v38 }
 0x573   : > { %v8290_v28 = vpop.f32.mrb[68].mxu1 }
 0x574   : > { %10807 = vst [vmem:[#allocation32_spill] sm:$0xff] %v8290_v28  ;;  %v8292_v57 = vpop.f32.mrb[69].mxu1 }
 0x575   : > { %10808 = vst [vmem:[#allocation47_spill] sm:$0xff] %v8292_v57 }
 0x577   : > { %v8294_v7 = vpop.f32.mrb[70].mxu1 }
 0x578   : > { %10809 = vst [vmem:[#allocation30_spill] sm:$0xff] %v8294_v7  ;;  %v8298_v60 = vpop.f32.mrb[71].mxu1 }
 0x579   : > { %10810 = vst [vmem:[#allocation35_spill] sm:$0xff] %v8298_v60 }
 0x57f   : > { %v2259_v35 = vpop.f32.mrb[72].mxu1 }
 0x580   : > { %v8302_v19 = vmul.f32 0.17677669, %v2259_v35  ;;  %v2261_v40 = vpop.f32.mrb[73].mxu1 }
 0x581   : > { %v8304_v56 = vmul.f32 0.17677669, %v2261_v40 }
 0x583   : > { %v2514_v45 = vmax.f32 %v8302_v19, %v8304_v56  ;;  %v2265_v4 = vpop.f32.mrb[74].mxu1 }
 0x584   : > { %v8308_v29 = vmul.f32 0.17677669, %v2265_v4  ;;  %v2267_v13 = vpop.f32.mrb[75].mxu1 }
 0x585   : > { %v8310_v50 = vmul.f32 0.17677669, %v2267_v13  ;;  %2515 = vmax.xlane.f32.xlu0 %v2514_v45 }
 0x587   : > { %v2517_v20 = vmax.f32 %v8308_v29, %v8310_v50  ;;  %v2271_v6 = vpop.f32.mrb[76].mxu1 }
 0x588   : > { %v8314_v48 = vmul.f32 0.17677669, %v2271_v6  ;;  %v2273_v39 = vpop.f32.mrb[77].mxu1 }
 0x589   : > { %v8316_v44 = vmul.f32 0.17677669, %v2273_v39  ;;  %2518 = vmax.xlane.f32.xlu1 %v2517_v20 }
 0x58b   : > { %v2520_v63 = vmax.f32 %v8314_v48, %v8316_v44  ;;  %v2277_v62 = vpop.f32.mrb[78].mxu1 }
 0x58c   : > { %v8320_v15 = vmul.f32 0.17677669, %v2277_v62  ;;  %v2279_v25 = vpop.f32.mrb[79].mxu1 }
 0x58d   : > { %v8322_v5 = vmul.f32 0.17677669, %v2279_v25  ;;  %2521 = vmax.xlane.f32.xlu0 %v2520_v63 }
 0x58f   : > { %v2523_v2 = vmax.f32 %v8320_v15, %v8322_v5  ;;  %v2283_v51 = vpop.f32.mrb[80].mxu1 }
 0x590   : > { %v8326_v14 = vmul.f32 0.17677669, %v2283_v51  ;;  %v2285_v31 = vpop.f32.mrb[81].mxu1 }
 0x591   : > { %v8328_v33 = vmul.f32 0.17677669, %v2285_v31  ;;  %2524 = vmax.xlane.f32.xlu0 %v2523_v2 }
 0x593   : > { %v2526_v49 = vmax.f32 %v8326_v14, %v8328_v33  ;;  %v2289_v3 = vpop.f32.mrb[82].mxu1 }
 0x594   : > { %v8332_v52 = vmul.f32 0.17677669, %v2289_v3  ;;  %v2291_v12 = vpop.f32.mrb[83].mxu1 }
 0x595   : > { %v8334_v42 = vmul.f32 0.17677669, %v2291_v12  ;;  %2527 = vmax.xlane.f32.xlu1 %v2526_v49 }
 0x597   : > { %v2529_v9 = vmax.f32 %v8332_v52, %v8334_v42  ;;  %v2295_v10 = vpop.f32.mrb[84].mxu1 }
 0x598   : > { %v8338_v47 = vmul.f32 0.17677669, %v2295_v10  ;;  %v2297_v8 = vpop.f32.mrb[85].mxu1 }
 0x599   : > { %v8340_v41 = vmul.f32 0.17677669, %v2297_v8  ;;  %2530 = vmax.xlane.f32.xlu0 %v2529_v9 }
 0x59b   : > { %v2532_v59 = vmax.f32 %v8338_v47, %v8340_v41  ;;  %v2301_v35 = vpop.f32.mrb[86].mxu1 }
 0x59c   : > { %v8344_v40 = vmul.f32 0.17677669, %v2301_v35  ;;  %v2303_v45 = vpop.f32.mrb[87].mxu1 }
 0x59d   : > { %v8346_v4 = vmul.f32 0.17677669, %v2303_v45  ;;  %2533 = vmax.xlane.f32.xlu1 %v2532_v59 }
 0x59f   : > { %v2535_v13 = vmax.f32 %v8344_v40, %v8346_v4  ;;  %v2307_v20 = vpop.f32.mrb[88].mxu1 }
 0x5a0   : > { %v8350_v6 = vmul.f32 0.17677669, %v2307_v20  ;;  %v2309_v39 = vpop.f32.mrb[89].mxu1 }
 0x5a1   : > { %v8352_v63 = vmul.f32 0.17677669, %v2309_v39  ;;  %2536 = vmax.xlane.f32.xlu0 %v2535_v13 }
 0x5a3   : > { %v2538_v62 = vmax.f32 %v8350_v6, %v8352_v63  ;;  %v2313_v25 = vpop.f32.mrb[90].mxu1 }
 0x5a4   : > { %v8356_v2 = vmul.f32 0.17677669, %v2313_v25  ;;  %v2315_v51 = vpop.f32.mrb[91].mxu1 }
 0x5a5   : > { %v8358_v31 = vmul.f32 0.17677669, %v2315_v51  ;;  %2539 = vmax.xlane.f32.xlu1 %v2538_v62 }
 0x5a7   : > { %v2541_v49 = vmax.f32 %v8356_v2, %v8358_v31  ;;  %v2319_v3 = vpop.f32.mrb[92].mxu1 }
 0x5a8   : > { %v8362_v12 = vmul.f32 0.17677669, %v2319_v3  ;;  %v2321_v9 = vpop.f32.mrb[93].mxu1 }
 0x5a9   : > { %v8364_v10 = vmul.f32 0.17677669, %v2321_v9  ;;  %2542 = vmax.xlane.f32.xlu0 %v2541_v49 }
 0x5ab   : > { %v2544_v8 = vmax.f32 %v8362_v12, %v8364_v10  ;;  %v2325_v59 = vpop.f32.mrb[94].mxu1 }
 0x5ac   : > { %v8368_v35 = vmul.f32 0.17677669, %v2325_v59  ;;  %v2327_v45 = vpop.f32.mrb[95].mxu1 }
 0x5ad   : > { %v8370_v13 = vmul.f32 0.17677669, %v2327_v45  ;;  %2545 = vmax.xlane.f32.xlu1 %v2544_v8 }
 0x5af   : > { %v2547_v20 = vmax.f32 %v8368_v35, %v8370_v13  ;;  %v2331_v39 = vpop.f32.mrb[96].mxu1 }
 0x5b0   : > { %v8374_v62 = vmul.f32 0.17677669, %v2331_v39  ;;  %v2333_v25 = vpop.f32.mrb[97].mxu1 }
 0x5b1   : > { %v8376_v51 = vmul.f32 0.17677669, %v2333_v25  ;;  %2548 = vmax.xlane.f32.xlu0 %v2547_v20 }
 0x5b3   : > { %v2550_v49 = vmax.f32 %v8374_v62, %v8376_v51  ;;  %v2337_v3 = vpop.f32.mrb[98].mxu1 }
 0x5b4   : > { %v8380_v9 = vmul.f32 0.17677669, %v2337_v3  ;;  %v2339_v59 = vpop.f32.mrb[99].mxu1 }
 0x5b5   : > { %v8382_v45 = vmul.f32 0.17677669, %v2339_v59  ;;  %2551 = vmax.xlane.f32.xlu1 %v2550_v49 }
 0x5b7   : > { %v2553_v8 = vmax.f32 %v8380_v9, %v8382_v45  ;;  %v2343_v24 = vpop.f32.mrb[100].mxu1 }
 0x5b8   : > { %v8386_v39 = vmul.f32 0.17677669, %v2343_v24  ;;  %v2345_v18 = vpop.f32.mrb[101].mxu1 }
 0x5b9   : > { %v8388_v25 = vmul.f32 0.17677669, %v2345_v18  ;;  %2554 = vmax.xlane.f32.xlu0 %v2553_v8 }
 0x5bb   : > { %v2556_v20 = vmax.f32 %v8386_v39, %v8388_v25  ;;  %v2349_v21 = vpop.f32.mrb[102].mxu1 }
 0x5bc   : > { %v8392_v3 = vmul.f32 0.17677669, %v2349_v21  ;;  %v2351_v23 = vpop.f32.mrb[103].mxu1 }
 0x5bd   : > { %v8394_v59 = vmul.f32 0.17677669, %v2351_v23  ;;  %2557 = vmax.xlane.f32.xlu1 %v2556_v20 }
 0x5bf   : > { %v2559_v49 = vmax.f32 %v8392_v3, %v8394_v59  ;;  %v2355_v28 = vpop.f32.mrb[104].mxu1 }
 0x5c0   : > { %v8398_v24 = vmul.f32 0.17677669, %v2355_v28  ;;  %v2357_v7 = vpop.f32.mrb[105].mxu1 }
 0x5c1   : > { %v8400_v18 = vmul.f32 0.17677669, %v2357_v7  ;;  %2560 = vmax.xlane.f32.xlu0 %v2559_v49 }
 0x5c3   : > { %v2562_v8 = vmax.f32 %v8398_v24, %v8400_v18  ;;  %v2361_v57 = vpop.f32.mrb[106].mxu1 }
 0x5c4   : > { %v8404_v21 = vmul.f32 0.17677669, %v2361_v57  ;;  %v2363_v60 = vpop.f32.mrb[107].mxu1 }
 0x5c5   : > { %v8406_v23 = vmul.f32 0.17677669, %v2363_v60  ;;  %2563 = vmax.xlane.f32.xlu1 %v2562_v8 }
 0x5c7   : > { %v2565_v20 = vmax.f32 %v8404_v21, %v8406_v23  ;;  %v2367_v1 = vpop.f32.mrb[108].mxu1 }
 0x5c8   : > { %v8410_v28 = vmul.f32 0.17677669, %v2367_v1  ;;  %v2369_v0 = vpop.f32.mrb[109].mxu1  ;;  %v313_v1 = vld [vmem:[#allocation3 + $0xe0] sm:$0xff] }
 0x5c9   : > { %v8412_v7 = vmul.f32 0.17677669, %v2369_v0  ;;  %2566 = vmax.xlane.f32.xlu0 %v2565_v20  ;;  %854 = vmatmul.mubr.f32.gmra.mrb[56].mxu0 %v313_v1 }
 0x5ca   : > { %859 = vmatprep.mubr.f32.mxu0 %v10798_v61 }
 0x5cb   : > { %v2568_v49 = vmax.f32 %v8410_v28, %v8412_v7  ;;  %v2373_v22 = vpop.f32.mrb[110].mxu1 }
 0x5cc   : > { %v8416_v57 = vmul.f32 0.17677669, %v2373_v22  ;;  %v2375_v43 = vpop.f32.mrb[111].mxu1 }
 0x5cd   : > { %v8418_v60 = vmul.f32 0.17677669, %v2375_v43  ;;  %2569 = vmax.xlane.f32.xlu1 %v2568_v49  ;;  %860 = vmatmul.mubr.f32.gmra.mrb[58].mxu0 %v314_v11 }
 0x5ce   : > { %865 = vmatprep.mubr.f32.mxu0 %v10798_v61 }
 0x5cf   : > { %v2571_v8 = vmax.f32 %v8416_v57, %v8418_v60  ;;  %v2379_v37 = vpop.f32.mrb[112].mxu1 }
 0x5d0   : > { %v8422_v38 = vmul.f32 0.17677669, %v2379_v37  ;;  %v2381_v0 = vpop.f32.mrb[113].mxu1 }
 0x5d1   : > { %v8424_v20 = vmul.f32 0.17677669, %v2381_v0  ;;  %2572 = vmax.xlane.f32.xlu0 %v2571_v8 }
 0x5d3   : > { %v2574_v22 = vmax.f32 %v8422_v38, %v8424_v20  ;;  %v2385_v43 = vpop.f32.mrb[114].mxu1 }
 0x5d4   : > { %v8429_v49 = vmul.f32 0.17677669, %v2385_v43  ;;  %v2387_v30 = vpop.f32.mrb[115].mxu1 }
 0x5d5   : > { %v8431_v17 = vmul.f32 0.17677669, %v2387_v30  ;;  %2575 = vmax.xlane.f32.xlu1 %v2574_v22 }
 0x5d7   : > { %v2577_v37 = vmax.f32 %v8429_v49, %v8431_v17  ;;  %v2391_v8 = vpop.f32.mrb[116].mxu1 }
 0x5d8   : > { %v8436_v1 = vmul.f32 0.17677669, %v2391_v8  ;;  %v2393_v0 = vpop.f32.mrb[117].mxu1 }
 0x5d9   : > { %v8438_v16 = vmul.f32 0.17677669, %v2393_v0  ;;  %2578 = vmax.xlane.f32.xlu0 %v2577_v37 }
 0x5db   : > { %v2580_v43 = vmax.f32 %v8436_v1, %v8438_v16  ;;  %v2397_v36 = vpop.f32.mrb[118].mxu1 }
 0x5dc   : > { %v8442_v11 = vmul.f32 0.17677669, %v2397_v36  ;;  %v2399_v30 = vpop.f32.mrb[119].mxu1 }
 0x5dd   : > { %v8444_v22 = vmul.f32 0.17677669, %v2399_v30  ;;  %2581 = vmax.xlane.f32.xlu1 %v2580_v43 }
 0x5df   : > { %v2583_v54 = vmax.f32 %v8442_v11, %v8444_v22  ;;  %v2403_v58 = vpop.f32.mrb[120].mxu1 }
 0x5e0   : > { %v8448_v8 = vmul.f32 0.17677669, %v2403_v58  ;;  %v2405_v55 = vpop.f32.mrb[121].mxu1 }
 0x5e1   : > { %v8450_v0 = vmul.f32 0.17677669, %v2405_v55  ;;  %2584 = vmax.xlane.f32.xlu0 %v2583_v54 }
 0x5e3   : > { %v2586_v37 = vmax.f32 %v8448_v8, %v8450_v0  ;;  %v2409_v46 = vpop.f32.mrb[122].mxu1 }
 0x5e4   : > { %v8454_v36 = vmul.f32 0.17677669, %v2409_v46  ;;  %v2411_v34 = vpop.f32.mrb[123].mxu1 }
 0x5e5   : > { %v8456_v30 = vmul.f32 0.17677669, %v2411_v34  ;;  %2587 = vmax.xlane.f32.xlu1 %v2586_v37 }
 0x5e6   : > { %10811 = vst [vmem:[#allocation36_spill] sm:$0xff] %v8454_v36 }
 0x5e7   : > { %10812 = vst [vmem:[#allocation51_spill] sm:$0xff] %v8456_v30  ;;  %v2589_v43 = vmax.f32 %v8454_v36, %v8456_v30  ;;  %v2415_v26 = vpop.f32.mrb[124].mxu1 }
 0x5e8   : > { %v8460_v58 = vmul.f32 0.17677669, %v2415_v26  ;;  %v2417_v27 = vpop.f32.mrb[125].mxu1 }
 0x5e9   : > { %v8462_v55 = vmul.f32 0.17677669, %v2417_v27  ;;  %2590 = vmax.xlane.f32.xlu0 %v2589_v43 }
 0x5ea   : > { %10813 = vst [vmem:[#allocation34_spill] sm:$0xff] %v8460_v58 }
 0x5eb   : > { %10814 = vst [vmem:[#allocation49_spill] sm:$0xff] %v8462_v55  ;;  %v2592_v54 = vmax.f32 %v8460_v58, %v8462_v55  ;;  %v2421_v53 = vpop.f32.mrb[126].mxu1 }
 0x5ec   : > { %v8466_v46 = vmul.f32 0.17677669, %v2421_v53  ;;  %v2423_v32 = vpop.f32.mrb[127].mxu1 }
 0x5ed   : > { %v8468_v34 = vmul.f32 0.17677669, %v2423_v32  ;;  %2593 = vmax.xlane.f32.xlu1 %v2592_v54 }
 0x5ee   : > { %10815 = vst [vmem:[#allocation50_spill] sm:$0xff] %v8466_v46 }
 0x5ef   : > { %10816 = vst [vmem:[#allocation48_spill] sm:$0xff] %v8468_v34  ;;  %v2595_v37 = vmax.f32 %v8466_v46, %v8468_v34  ;;  %v2427_v30 = vpop.f32.mrb[128].mxu1 }
 0x5f0   : > { %v8472_v26 = vmul.f32 0.17677669, %v2427_v30  ;;  %v2429_v36 = vpop.f32.mrb[129].mxu1 }
 0x5f1   : > { %v8474_v27 = vmul.f32 0.17677669, %v2429_v36  ;;  %2596 = vmax.xlane.f32.xlu0 %v2595_v37 }
 0x5f2   : > { %10817 = vst [vmem:[#allocation38_spill] sm:$0xff] %v8472_v26 }
 0x5f3   : > { %10818 = vst [vmem:[#allocation37_spill] sm:$0xff] %v8474_v27  ;;  %v2598_v43 = vmax.f32 %v8472_v26, %v8474_v27  ;;  %v2433_v55 = vpop.f32.mrb[130].mxu1 }
 0x5f4   : > { %v8478_v53 = vmul.f32 0.17677669, %v2433_v55  ;;  %v2435_v58 = vpop.f32.mrb[131].mxu1 }
 0x5f5   : > { %v8480_v32 = vmul.f32 0.17677669, %v2435_v58  ;;  %2599 = vmax.xlane.f32.xlu1 %v2598_v43 }
 0x5f7   : > { %10819 = vst [vmem:[#allocation12_spill] sm:$0xff] %v8480_v32  ;;  %v2601_v54 = vmax.f32 %v8478_v53, %v8480_v32  ;;  %v2439_v34 = vpop.f32.mrb[132].mxu1 }
 0x5f8   : > { %v8484_v30 = vmul.f32 0.17677669, %v2439_v34  ;;  %v2441_v46 = vpop.f32.mrb[133].mxu1  ;;  %v315_v34 = vld [vmem:[#allocation3 + $0xf0] sm:$0xff] }
 0x5f9   : > { %v8486_v36 = vmul.f32 0.17677669, %v2441_v46  ;;  %2602 = vmax.xlane.f32.xlu0 %v2601_v54  ;;  %866 = vmatmul.mubr.f32.gmra.mrb[60].mxu0 %v315_v34  ;;  %v8497_v46 = vpop.permute.xlu0 %508  ;;  %v316_v54 = vld [vmem:[#allocation3 + $0xf8] sm:$0xff] }
 0x5fa   : > { %10820 = vst [vmem:[#allocation39_spill] sm:$0xff] %v8484_v30  ;;  %871 = vmatprep.mubr.f32.mxu0 %v10798_v61  ;;  %10824 = vst [vmem:[#allocation16_spill] sm:$0xff] %v8497_v46 }
 0x5fb   : > { %10821 = vst [vmem:[#allocation15_spill] sm:$0xff] %v8486_v36  ;;  %v2604_v37 = vmax.f32 %v8484_v30, %v8486_v36  ;;  %v2445_v27 = vpop.f32.mrb[134].mxu1  ;;  %v8499_v36 = vpop.permute.xlu1 %518  ;;  %v317_v30 = vld [vmem:[#allocation3 + $0x100] sm:$0xff] }
 0x5fc   : > { %v8490_v55 = vmul.f32 0.17677669, %v2445_v27  ;;  %v2447_v26 = vpop.f32.mrb[135].mxu1  ;;  %10825 = vst [vmem:[#allocation19_spill] sm:$0xff] %v8499_v36 }
 0x5fd   : > { %v8492_v58 = vmul.f32 0.17677669, %v2447_v26  ;;  %2605 = vmax.xlane.f32.xlu1 %v2604_v37  ;;  %872 = vmatmul.mubr.f32.gmra.mrb[62].mxu0 %v316_v54 }
 0x5fe   : > { %10822 = vst [vmem:[#allocation14_spill] sm:$0xff] %v8490_v55  ;;  %877 = vmatprep.mubr.f32.mxu0 %v10798_v61 }
 0x5ff   : > { %10823 = vst [vmem:[#allocation17_spill] sm:$0xff] %v8492_v58  ;;  %v2607_v43 = vmax.f32 %v8490_v55, %v8492_v58  ;;  %v318_v55 = vld [vmem:[#allocation3 + $0x108] sm:$0xff] }
 0x601   : > { %2608 = vmax.xlane.f32.xlu0 %v2607_v43  ;;  %878 = vmatmul.mubr.f32.gmra.mrb[64].mxu0 %v317_v30 }
 0x602   : > { %883 = vmatprep.mubr.f32.mxu0 %v10798_v61 }
 0x605   : > { %884 = vmatmul.mubr.f32.gmra.mrb[66].mxu0 %v318_v55 }
 0x606   : > { %889 = vmatprep.mubr.f32.mxu0 %v10798_v61 }
 0x612   : > { %v2516_v27 = vpop.xlane.xlu0 %2515 }
 0x613   : > { %v2610_v26 = vsub.f32 %v8302_v19, %v2516_v27  ;;  %v2611_v37 = vsub.f32 %v8304_v56, %v2516_v27  ;;  %v319_v56 = vld [vmem:[#allocation3 + $0x110] sm:$0xff] }
 0x614   : > { %890 = vmatmul.mubr.f32.gmra.mrb[68].mxu0 %v319_v56 }
 0x615   : > { %v2674_v58 = vmul.f32 1.442695, %v2610_v26  ;;  %v2676_v43 = vmul.f32 1.442695, %v2611_v37  ;;  %895 = vmatprep.mubr.f32.mxu0 %v10798_v61 }
 0x616   : > { %v2519_v34 = vpop.xlane.xlu1 %2518 }
 0x617   : > { %6432 = vpow2.f32 %v2674_v58  ;;  %v2612_v54 = vsub.f32 %v8308_v29, %v2519_v34  ;;  %v2613_v36 = vsub.f32 %v8310_v50, %v2519_v34  ;;  %v320_v50 = vld [vmem:[#allocation3 + $0x118] sm:$0xff] }
 0x618   : > { %6434 = vpow2.f32 %v2676_v43  ;;  %896 = vmatmul.mubr.f32.gmra.mrb[70].mxu0 %v320_v50  ;;  %v321_v43 = vld [vmem:[#allocation3 + $0x120] sm:$0xff] }
 0x619   : > { %v2678_v46 = vmul.f32 1.442695, %v2612_v54  ;;  %v2680_v32 = vmul.f32 1.442695, %v2613_v36  ;;  %901 = vmatprep.mubr.f32.mxu0 %v10798_v61 }
 0x61a   : > { %v2522_v19 = vpop.xlane.xlu0 %2521 }
 0x61b   : > { %6436 = vpow2.f32 %v2678_v46  ;;  %v2614_v30 = vsub.f32 %v8314_v48, %v2522_v19  ;;  %v2615_v27 = vsub.f32 %v8316_v44, %v2522_v19 }
 0x61c   : > { %6438 = vpow2.f32 %v2680_v32  ;;  %902 = vmatmul.mubr.f32.gmra.mrb[72].mxu0 %v321_v43 }
 0x61d   : > { %v2682_v26 = vmul.f32 1.442695, %v2614_v30  ;;  %v2684_v58 = vmul.f32 1.442695, %v2615_v27  ;;  %907 = vmatprep.mubr.f32.mxu0 %v10798_v61 }
 0x61e   : > { %v2525_v29 = vpop.xlane.xlu0 %2524 }
 0x61f   : > { %6440 = vpow2.f32 %v2682_v26  ;;  %v2616_v36 = vsub.f32 %v8320_v15, %v2525_v29  ;;  %v2617_v55 = vsub.f32 %v8322_v5, %v2525_v29 }
 0x620   : > { %6442 = vpow2.f32 %v2684_v58  ;;  %v322_v58 = vld [vmem:[#allocation3 + $0x128] sm:$0xff] }
 0x621   : > { %v8513_v37 = vpop.eup %6432  ;;  %v2686_v46 = vmul.f32 1.442695, %v2616_v36  ;;  %v2688_v48 = vmul.f32 1.442695, %v2617_v55  ;;  %908 = vmatmul.mubr.f32.gmra.mrb[74].mxu0 %v322_v58  ;;  %v328_v58 = vld [vmem:[#allocation3 + $0x158] sm:$0xff] }
 0x622   : > { %v8515_v44 = vpop.eup %6434  ;;  %v2528_v32 = vpop.xlane.xlu1 %2527  ;;  %913 = vmatprep.mubr.f32.mxu0 %v10798_v61 }
 0x623   : > { %6444 = vpow2.f32 %v2686_v46  ;;  %v2618_v34 = vsub.f32 %v8326_v14, %v2528_v32  ;;  %v2619_v54 = vsub.f32 %v8328_v33, %v2528_v32  ;;  %v2802_v15 = vadd.f32 %v8515_v44, %v8513_v37  ;;  %v323_v46 = vld [vmem:[#allocation3 + $0x130] sm:$0xff]  ;;  %v324_v32 = vld [vmem:[#allocation3 + $0x138] sm:$0xff] }
 0x624   : > { %6446 = vpow2.f32 %v2688_v48 }
 0x625   : > { %v8522_v5 = vpop.eup %6436  ;;  %v2690_v19 = vmul.f32 1.442695, %v2618_v34  ;;  %v2692_v56 = vmul.f32 1.442695, %v2619_v54  ;;  %2803 = vadd.xlane.f32.xlu1 %v2802_v15  ;;  %914 = vmatmul.mubr.f32.gmra.mrb[76].mxu0 %v323_v46  ;;  %v330_v46 = vld [vmem:[#allocation3 + $0x168] sm:$0xff] }
 0x626   : > { %v8524_v30 = vpop.eup %6438  ;;  %v2531_v27 = vpop.xlane.xlu0 %2530  ;;  %919 = vmatprep.mubr.f32.mxu0 %v10798_v61 }
 0x627   : > { %6448 = vpow2.f32 %v2690_v19  ;;  %v2620_v14 = vsub.f32 %v8332_v52, %v2531_v27  ;;  %v2621_v33 = vsub.f32 %v8334_v42, %v2531_v27  ;;  %v2805_v26 = vadd.f32 %v8524_v30, %v8522_v5  ;;  %v325_v19 = vld [vmem:[#allocation3 + $0x140] sm:$0xff] }
 0x628   : > { %6450 = vpow2.f32 %v2692_v56 }
 0x629   : > { %v8531_v29 = vpop.eup %6440  ;;  %v2694_v50 = vmul.f32 1.442695, %v2620_v14  ;;  %v2696_v36 = vmul.f32 1.442695, %v2621_v33  ;;  %2806 = vadd.xlane.f32.xlu0 %v2805_v26  ;;  %920 = vmatmul.mubr.f32.gmra.mrb[78].mxu0 %v324_v32  ;;  %v326_v33 = vld [vmem:[#allocation3 + $0x148] sm:$0xff]  ;;  %v327_v26 = vld [vmem:[#allocation3 + $0x150] sm:$0xff] }
 0x62a   : > { %v8533_v55 = vpop.eup %6442  ;;  %925 = vmatprep.mubr.f32.mxu0 %v10798_v61  ;;  %v353_v32 = vld [vmem:[%s10524_s2 + $0xa0] sm:$0xff] }
 0x62b   : > { %6452 = vpow2.f32 %v2694_v50  ;;  %v2808_v52 = vadd.f32 %v8533_v55, %v8531_v29  ;;  %v354_v50 = vld [vmem:[%s10524_s2 + $0xa8] sm:$0xff] }
 0x62c   : > { %6454 = vpow2.f32 %v2696_v36  ;;  %v329_v36 = vld [vmem:[#allocation3 + $0x160] sm:$0xff] }
 0x62d   : > { %v8538_v42 = vpop.eup %6444  ;;  %2809 = vadd.xlane.f32.xlu1 %v2808_v52  ;;  %926 = vmatmul.mubr.f32.gmra.mrb[80].mxu0 %v325_v19  ;;  %v331_v52 = vld [vmem:[#allocation3 + $0x170] sm:$0xff] }
 0x62e   : > { %v8540_v48 = vpop.eup %6446  ;;  %931 = vmatprep.mubr.f32.mxu0 %v10798_v61  ;;  %v2537_v19 = vpop.xlane.xlu0 %2536 }
 0x62f   : > { %v2811_v43 = vadd.f32 %v8540_v48, %v8538_v42 }
 0x631   : > { %v8545_v34 = vpop.eup %6448  ;;  %2812 = vadd.xlane.f32.xlu0 %v2811_v43  ;;  %932 = vmatmul.mubr.f32.gmra.mrb[82].mxu0 %v326_v33  ;;  %v2534_v43 = vpop.xlane.xlu1 %2533 }
 0x632   : > { %10826 = vst [vmem:[#allocation18_spill] sm:$0xff] %v8545_v34  ;;  %v8547_v54 = vpop.eup %6450  ;;  %937 = vmatprep.mubr.f32.mxu0 %v10798_v61  ;;  %v2623_v33 = vsub.f32 %v8340_v41, %v2534_v43 }
 0x633   : > { %v2814_v15 = vadd.f32 %v8547_v54, %v8545_v34 }
 0x635   : > { %v8552_v56 = vpop.eup %6452  ;;  %2815 = vadd.xlane.f32.xlu1 %v2814_v15  ;;  %938 = vmatmul.mubr.f32.gmra.mrb[84].mxu0 %v327_v26  ;;  %v332_v15 = vld [vmem:[#allocation3 + $0x178] sm:$0xff]  ;;  %v2540_v26 = vpop.xlane.xlu1 %2539 }
 0x636   : > { %10827 = vst [vmem:[#allocation52_spill] sm:$0xff] %v8552_v56  ;;  %v8554_v27 = vpop.eup %6454  ;;  %943 = vmatprep.mubr.f32.mxu0 %v10798_v61 }
 0x637   : > { %10828 = vst [vmem:[#allocation53_spill] sm:$0xff] %v8554_v27  ;;  %v2817_v14 = vadd.f32 %v8554_v27, %v8552_v56  ;;  %v2700_v56 = vmul.f32 1.442695, %v2623_v33 }
 0x639   : > { %2818 = vadd.xlane.f32.xlu0 %v2817_v14  ;;  %944 = vmatmul.mubr.f32.gmra.mrb[86].mxu0 %v328_v58  ;;  %v2622_v14 = vsub.f32 %v8338_v47, %v2534_v43  ;;  %v2624_v58 = vsub.f32 %v8344_v40, %v2537_v19 }
 0x63a   : > { %949 = vmatprep.mubr.f32.mxu0 %v10798_v61 }
 0x63b   : > { %v2702_v34 = vmul.f32 1.442695, %v2624_v58 }
 0x63d   : > { %950 = vmatmul.mubr.f32.gmra.mrb[88].mxu0 %v329_v36  ;;  %v2543_v36 = vpop.xlane.xlu0 %2542 }
 0x63e   : > { %955 = vmatprep.mubr.f32.mxu0 %v10798_v61  ;;  %v2629_v47 = vsub.f32 %v8358_v31, %v2543_v36 }
 0x640   : > { %v2712_v33 = vmul.f32 1.442695, %v2629_v47 }
 0x641   : > { %956 = vmatmul.mubr.f32.gmra.mrb[90].mxu0 %v330_v46  ;;  %v2698_v46 = vmul.f32 1.442695, %v2622_v14  ;;  %v2549_v41 = vpop.xlane.xlu0 %2548 }
 0x642   : > { %961 = vmatprep.mubr.f32.mxu0 %v10798_v61 }
 0x643   : > { %6456 = vpow2.f32 %v2698_v46 }
 0x644   : > { %6458 = vpow2.f32 %v2700_v56 }
 0x645   : > { %962 = vmatmul.mubr.f32.gmra.mrb[92].mxu0 %v331_v52  ;;  %v2626_v52 = vsub.f32 %v8350_v6, %v2540_v26  ;;  %6460 = vpow2.f32 %v2702_v34 }
 0x646   : > { %488 = vperm.xlu1 %6239, %v354_v50   ;;  %967 = vmatprep.mubr.f32.mxu0 %v10798_v61  ;;  %v2625_v50 = vsub.f32 %v8346_v4, %v2537_v19  ;;  %v2627_v61 = vsub.f32 %v8352_v63, %v2540_v26  ;;  %v2632_v63 = vsub.f32 %v8368_v35, %v2549_v41  ;;  %v2555_v26 = vpop.xlane.xlu0 %2554 }
 0x647   : > { %v2706_v43 = vmul.f32 1.442695, %v2626_v52  ;;  %v2636_v34 = vsub.f32 %v8380_v9, %v2555_v26 }
 0x648   : > { %v2704_v27 = vmul.f32 1.442695, %v2625_v50  ;;  %v2708_v4 = vmul.f32 1.442695, %v2627_v61 }
 0x649   : > { %968 = vmatmul.mubr.f32.gmra.mrb[94].mxu0 %v332_v15  ;;  %v2628_v15 = vsub.f32 %v8356_v2, %v2543_v36  ;;  %v2633_v2 = vsub.f32 %v8370_v13, %v2549_v41 }
 0x64a   : > { %6462 = vpow2.f32 %v2704_v27  ;;  %v2637_v27 = vsub.f32 %v8382_v45, %v2555_v26 }
 0x64b   : > { %v2710_v14 = vmul.f32 1.442695, %v2628_v15  ;;  %6464 = vpow2.f32 %v2706_v43  ;;  %v2720_v35 = vmul.f32 1.442695, %v2633_v2 }
 0x64c   : > { %6466 = vpow2.f32 %v2708_v4  ;;  %v2728_v45 = vmul.f32 1.442695, %v2637_v27 }
 0x64d   : > { %6468 = vpow2.f32 %v2710_v14 }
 0x64e   : > { %6470 = vpow2.f32 %v2712_v33  ;;  %v2561_v50 = vpop.xlane.xlu0 %2560 }
 0x64f   : > { %483 = vperm.xlu0 %6238, %v353_v32   ;;  %v2546_v32 = vpop.xlane.xlu1 %2545  ;;  %v2640_v9 = vsub.f32 %v8392_v3, %v2561_v50  ;;  %v2641_v47 = vsub.f32 %v8394_v59, %v2561_v50 }
 0x650   : > { %v2630_v40 = vsub.f32 %v8362_v12, %v2546_v32  ;;  %v2631_v19 = vsub.f32 %v8364_v10, %v2546_v32  ;;  %v2718_v10 = vmul.f32 1.442695, %v2632_v63  ;;  %v2726_v32 = vmul.f32 1.442695, %v2636_v34 }
 0x651   : > { %v2734_v14 = vmul.f32 1.442695, %v2640_v9 }
 0x652   : > { %v2714_v31 = vmul.f32 1.442695, %v2630_v40  ;;  %v2716_v12 = vmul.f32 1.442695, %v2631_v19 }
 0x653   : > { %v2552_v6 = vpop.xlane.xlu1 %2551 }
 0x654   : > { %v2634_v58 = vsub.f32 %v8374_v62, %v2552_v6  ;;  %v2635_v61 = vsub.f32 %v8376_v51, %v2552_v6  ;;  %6472 = vpow2.f32 %v2714_v31  ;;  %v8589_v51 = vpop.eup %6456 }
 0x655   : > { %6474 = vpow2.f32 %v2716_v12  ;;  %v8592_v15 = vpop.eup %6458 }
 0x656   : > { %v2722_v13 = vmul.f32 1.442695, %v2634_v58  ;;  %v2724_v62 = vmul.f32 1.442695, %v2635_v61  ;;  %6476 = vpow2.f32 %v2718_v10  ;;  %v2567_v41 = vpop.xlane.xlu0 %2566  ;;  %v8595_v43 = vpop.eup %6460  ;;  %v2820_v63 = vadd.f32 %v8592_v15, %v8589_v51 }
 0x657   : > { %v2558_v56 = vpop.xlane.xlu1 %2557  ;;  %6478 = vpow2.f32 %v2720_v35  ;;  %v8598_v40 = vpop.eup %6462  ;;  %v2644_v59 = vsub.f32 %v8404_v21, %v2567_v41  ;;  %v2645_v2 = vsub.f32 %v8406_v23, %v2567_v41 }
 0x658   : > { %v2638_v36 = vsub.f32 %v8386_v39, %v2558_v56  ;;  %v2639_v46 = vsub.f32 %v8388_v25, %v2558_v56  ;;  %6480 = vpow2.f32 %v2722_v13  ;;  %v8601_v6 = vpop.eup %6464  ;;  %v2823_v10 = vadd.f32 %v8598_v40, %v8595_v43 }
 0x659   : > { %6482 = vpow2.f32 %v2724_v62  ;;  %v8606_v33 = vpop.eup %6466  ;;  %v2742_v23 = vmul.f32 1.442695, %v2644_v59  ;;  %v2744_v50 = vmul.f32 1.442695, %v2645_v2 }
 0x65a   : > { %v2730_v39 = vmul.f32 1.442695, %v2638_v36  ;;  %v2732_v4 = vmul.f32 1.442695, %v2639_v46  ;;  %6484 = vpow2.f32 %v2726_v32  ;;  %v8609_v31 = vpop.eup %6468 }
 0x65b   : > { %v2564_v52 = vpop.xlane.xlu1 %2563  ;;  %6486 = vpow2.f32 %v2728_v45  ;;  %v8612_v12 = vpop.eup %6470 }
 0x65c   : > { %v2642_v25 = vsub.f32 %v8398_v24, %v2564_v52  ;;  %v2643_v19 = vsub.f32 %v8400_v18, %v2564_v52  ;;  %v2736_v24 = vmul.f32 1.442695, %v2641_v47  ;;  %6488 = vpow2.f32 %v2730_v39 }
 0x65d   : > { %6490 = vpow2.f32 %v2732_v4  ;;  %v2829_v45 = vadd.f32 %v8612_v12, %v8609_v31 }
 0x65e   : > { %v2573_v26 = vpop.xlane.xlu0 %2572  ;;  %v2738_v18 = vmul.f32 1.442695, %v2642_v25  ;;  %v2740_v21 = vmul.f32 1.442695, %v2643_v19  ;;  %v8617_v34 = vpop.eup %6472  ;;  %6492 = vpow2.f32 %v2734_v14 }
 0x65f   : > { %v2570_v3 = vpop.xlane.xlu1 %2569  ;;  %v2648_v35 = vsub.f32 %v8416_v57, %v2573_v26  ;;  %v8622_v27 = vpop.eup %6474  ;;  %6494 = vpow2.f32 %v2736_v24  ;;  %v2649_v13 = vsub.f32 %v8418_v60, %v2573_v26 }
 0x660   : > { %v2646_v58 = vsub.f32 %v8410_v28, %v2570_v3  ;;  %v2647_v61 = vsub.f32 %v8412_v7, %v2570_v3  ;;  %v2826_v28 = vadd.f32 %v8606_v33, %v8601_v6  ;;  %v8625_v36 = vpop.eup %6476  ;;  %6496 = vpow2.f32 %v2738_v18 }
 0x661   : > { %v8628_v52 = vpop.eup %6478  ;;  %6498 = vpow2.f32 %v2740_v21  ;;  %v2750_v47 = vmul.f32 1.442695, %v2648_v35  ;;  %v2752_v25 = vmul.f32 1.442695, %v2649_v13 }
 0x662   : > { %v2746_v62 = vmul.f32 1.442695, %v2646_v58  ;;  %v2748_v57 = vmul.f32 1.442695, %v2647_v61  ;;  %v8633_v60 = vpop.eup %6480  ;;  %6500 = vpow2.f32 %v2742_v23  ;;  %v2835_v2 = vadd.f32 %v8628_v52, %v8625_v36 }
 0x663   : > { %v2576_v56 = vpop.xlane.xlu1 %2575  ;;  %v8638_v39 = vpop.eup %6482  ;;  %6502 = vpow2.f32 %v2744_v50 }
 0x664   : > { %v2650_v46 = vsub.f32 %v8422_v38, %v2576_v56  ;;  %v2651_v32 = vsub.f32 %v8424_v20, %v2576_v56  ;;  %v2832_v38 = vadd.f32 %v8622_v27, %v8617_v34  ;;  %v8641_v19 = vpop.eup %6484  ;;  %6504 = vpow2.f32 %v2746_v62 }
 0x665   : > { %v8644_v59 = vpop.eup %6486  ;;  %6506 = vpow2.f32 %v2748_v57 }
 0x666   : > { %v2579_v7 = vpop.xlane.xlu0 %2578  ;;  %v2754_v3 = vmul.f32 1.442695, %v2650_v46  ;;  %6508 = vpow2.f32 %v2750_v47  ;;  %v2841_v50 = vadd.f32 %v8644_v59, %v8641_v19 }
 0x667   : > { %v2652_v41 = vsub.f32 %v8429_v49, %v2579_v7  ;;  %v2653_v4 = vsub.f32 %v8431_v17, %v2579_v7  ;;  %v2756_v49 = vmul.f32 1.442695, %v2651_v32  ;;  %v8649_v17 = vpop.eup %6488  ;;  %6510 = vpow2.f32 %v2752_v25  ;;  %v10829_v7 = vld [vmem:[#allocation36_spill] sm:$0xff]  ;;  %v10830_v32 = vld [vmem:[#allocation51_spill] sm:$0xff]  ;;  %v10831_v25 = vld [vmem:[#allocation34_spill] sm:$0xff] }
 0x668   : > { %v8654_v58 = vpop.eup %6490  ;;  %6512 = vpow2.f32 %v2754_v3 }
 0x669   : > { %v2758_v26 = vmul.f32 1.442695, %v2652_v41  ;;  %v2760_v21 = vmul.f32 1.442695, %v2653_v4  ;;  %6514 = vpow2.f32 %v2756_v49 }
 0x66a   : > { %2821 = vadd.xlane.f32.xlu1 %v2820_v63  ;;  %v2582_v9 = vpop.xlane.xlu1 %2581 }
 0x66b   : > { %v2654_v14 = vsub.f32 %v8436_v1, %v2582_v9  ;;  %v2655_v63 = vsub.f32 %v8438_v16, %v2582_v9  ;;  %v2838_v1 = vadd.f32 %v8638_v39, %v8633_v60  ;;  %v8657_v16 = vpop.eup %6492  ;;  %6516 = vpow2.f32 %v2758_v26 }
 0x66c   : > { %v8660_v35 = vpop.eup %6494  ;;  %6518 = vpow2.f32 %v2760_v21 }
 0x66d   : > { %v2762_v56 = vmul.f32 1.442695, %v2654_v14  ;;  %v8665_v13 = vpop.eup %6496 }
 0x66e   : > { %2827 = vadd.xlane.f32.xlu1 %v2826_v28  ;;  %2824 = vadd.xlane.f32.xlu0 %v2823_v10  ;;  %v2585_v20 = vpop.xlane.xlu0 %2584  ;;  %v8670_v46 = vpop.eup %6498 }
 0x66f   : > { %v2656_v18 = vsub.f32 %v8442_v11, %v2585_v20  ;;  %v2657_v61 = vsub.f32 %v8444_v22, %v2585_v20  ;;  %v2764_v11 = vmul.f32 1.442695, %v2655_v63  ;;  %6520 = vpow2.f32 %v2762_v56  ;;  %v10832_v20 = vld [vmem:[#allocation49_spill] sm:$0xff] }
 0x670   : > { %v2850_v63 = vadd.f32 %v8670_v46, %v8665_v13 }
 0x671   : > { %v2766_v22 = vmul.f32 1.442695, %v2656_v18  ;;  %v2768_v57 = vmul.f32 1.442695, %v2657_v61  ;;  %6522 = vpow2.f32 %v2764_v11  ;;  %v10834_v11 = vld [vmem:[#allocation48_spill] sm:$0xff] }
 0x672   : > { %2833 = vadd.xlane.f32.xlu1 %v2832_v38  ;;  %2830 = vadd.xlane.f32.xlu0 %v2829_v45  ;;  %v2588_v24 = vpop.xlane.xlu1 %2587  ;;  %v8673_v45 = vpop.eup %6500 }
 0x673   : > { %v2658_v10 = vsub.f32 %v8448_v8, %v2588_v24  ;;  %v2659_v28 = vsub.f32 %v8450_v0, %v2588_v24  ;;  %v2844_v8 = vadd.f32 %v8654_v58, %v8649_v17  ;;  %v8675_v41 = vpop.eup %6502  ;;  %6524 = vpow2.f32 %v2766_v22 }
 0x674   : > { %v8679_v14 = vpop.eup %6504  ;;  %v2847_v24 = vadd.f32 %v8660_v35, %v8657_v16  ;;  %6526 = vpow2.f32 %v2768_v57 }
 0x675   : > { %v2770_v0 = vmul.f32 1.442695, %v2658_v10  ;;  %v2772_v38 = vmul.f32 1.442695, %v2659_v28  ;;  %v10833_v10 = vld [vmem:[#allocation50_spill] sm:$0xff] }
 0x676   : > { %2839 = vadd.xlane.f32.xlu1 %v2838_v1  ;;  %2836 = vadd.xlane.f32.xlu0 %v2835_v2  ;;  %v2591_v23 = vpop.xlane.xlu0 %2590  ;;  %v8685_v2 = vpop.eup %6506 }
 0x677   : > { %v2660_v62 = vsub.f32 %v10829_v7, %v2591_v23  ;;  %v2661_v9 = vsub.f32 %v10830_v32, %v2591_v23  ;;  %v8687_v18 = vpop.eup %6508  ;;  %6528 = vpow2.f32 %v2770_v0  ;;  %v2856_v22 = vadd.f32 %v8685_v2, %v8679_v14 }
 0x678   : > { %v8689_v61 = vpop.eup %6510  ;;  %6530 = vpow2.f32 %v2772_v38  ;;  %v2853_v7 = vadd.f32 %v8675_v41, %v8673_v45 }
 0x679   : > { %v2774_v49 = vmul.f32 1.442695, %v2660_v62  ;;  %v2776_v26 = vmul.f32 1.442695, %v2661_v9 }
 0x67a   : > { %2845 = vadd.xlane.f32.xlu1 %v2844_v8  ;;  %2842 = vadd.xlane.f32.xlu0 %v2841_v50  ;;  %v2594_v47 = vpop.xlane.xlu1 %2593  ;;  %v8693_v50 = vpop.eup %6512 }
 0x67b   : > { %v2662_v4 = vsub.f32 %v10831_v25, %v2594_v47  ;;  %v2663_v3 = vsub.f32 %v10832_v20, %v2594_v47  ;;  %6532 = vpow2.f32 %v2774_v49  ;;  %v8699_v62 = vpop.eup %6514  ;;  %v10835_v47 = vld [vmem:[#allocation38_spill] sm:$0xff]  ;;  %v10836_v25 = vld [vmem:[#allocation37_spill] sm:$0xff]  ;;  %v2859_v49 = vadd.f32 %v8689_v61, %v8687_v18 }
 0x67c   : > { %6534 = vpow2.f32 %v2776_v26  ;;  %v8701_v57 = vpop.eup %6516 }
 0x67d   : > { %v2778_v1 = vmul.f32 1.442695, %v2662_v4  ;;  %v2780_v56 = vmul.f32 1.442695, %v2663_v3  ;;  %v8703_v0 = vpop.eup %6518  ;;  %v2862_v3 = vadd.f32 %v8699_v62, %v8693_v50 }
 0x67e   : > { %2851 = vadd.xlane.f32.xlu1 %v2850_v63  ;;  %2848 = vadd.xlane.f32.xlu0 %v2847_v24  ;;  %v2597_v21 = vpop.xlane.xlu0 %2596  ;;  %v8707_v20 = vpop.eup %6520 }
 0x67f   : > { %v2664_v23 = vsub.f32 %v10833_v10, %v2597_v21  ;;  %v2665_v28 = vsub.f32 %v10834_v11, %v2597_v21  ;;  %6536 = vpow2.f32 %v2778_v1  ;;  %10837 = vst [vmem:[#allocation36_spill] sm:$0xff] %v8707_v20  ;;  %v8713_v63 = vpop.eup %6522 }
 0x680   : > { %6538 = vpow2.f32 %v2780_v56  ;;  %10838 = vst [vmem:[#allocation51_spill] sm:$0xff] %v8713_v63  ;;  %v8715_v1 = vpop.eup %6524 }
 0x681   : > { %v2782_v8 = vmul.f32 1.442695, %v2664_v23  ;;  %v2784_v32 = vmul.f32 1.442695, %v2665_v28  ;;  %10839 = vst [vmem:[#allocation34_spill] sm:$0xff] %v8715_v1  ;;  %v8717_v56 = vpop.eup %6526  ;;  %v10840_v23 = vld [vmem:[#allocation12_spill] sm:$0xff] }
 0x682   : > { %2857 = vadd.xlane.f32.xlu1 %v2856_v22  ;;  %2854 = vadd.xlane.f32.xlu0 %v2853_v7  ;;  %v2600_v9 = vpop.xlane.xlu1 %2599  ;;  %v8721_v28 = vpop.eup %6528  ;;  %v2868_v22 = vadd.f32 %v8713_v63, %v8707_v20  ;;  %v2865_v7 = vadd.f32 %v8703_v0, %v8701_v57 }
 0x683   : > { %v2666_v38 = vsub.f32 %v10835_v47, %v2600_v9  ;;  %v2667_v4 = vsub.f32 %v10836_v25, %v2600_v9  ;;  %6540 = vpow2.f32 %v2782_v8  ;;  %10841 = vst [vmem:[#allocation49_spill] sm:$0xff] %v8721_v28  ;;  %v8727_v8 = vpop.eup %6530 }
 0x684   : > { %6542 = vpow2.f32 %v2784_v32  ;;  %10842 = vst [vmem:[#allocation50_spill] sm:$0xff] %v8727_v8  ;;  %v2874_v25 = vadd.f32 %v8727_v8, %v8721_v28  ;;  %v10856_v8 = vld [vmem:[#allocation17_spill] sm:$0xff] }
 0x685   : > { %v2786_v24 = vmul.f32 1.442695, %v2666_v38  ;;  %v2788_v26 = vmul.f32 1.442695, %v2667_v4  ;;  %v8729_v47 = vpop.eup %6532  ;;  %v2871_v4 = vadd.f32 %v8717_v56, %v8715_v1 }
 0x686   : > { %2863 = vadd.xlane.f32.xlu1 %v2862_v3  ;;  %2860 = vadd.xlane.f32.xlu0 %v2859_v49  ;;  %v2603_v21 = vpop.xlane.xlu0 %2602  ;;  %10843 = vst [vmem:[#allocation48_spill] sm:$0xff] %v8729_v47 }
 0x687   : > { %6544 = vpow2.f32 %v2786_v24  ;;  %v2668_v10 = vsub.f32 %v8478_v53, %v2603_v21  ;;  %v2669_v11 = vsub.f32 %v10840_v23, %v2603_v21  ;;  %v8731_v53 = vpop.eup %6534 }
 0x688   : > { %6546 = vpow2.f32 %v2788_v26  ;;  %10844 = vst [vmem:[#allocation38_spill] sm:$0xff] %v8731_v53  ;;  %v2877_v21 = vadd.f32 %v8731_v53, %v8729_v47 }
 0x689   : > { %v2790_v32 = vmul.f32 1.442695, %v2668_v10  ;;  %v2792_v9 = vmul.f32 1.442695, %v2669_v11  ;;  %v8733_v38 = vpop.eup %6536 }
 0x68a   : > { %2869 = vadd.xlane.f32.xlu1 %v2868_v22  ;;  %2866 = vadd.xlane.f32.xlu0 %v2865_v7  ;;  %10845 = vst [vmem:[#allocation37_spill] sm:$0xff] %v8733_v38  ;;  %v8739_v3 = vpop.eup %6538 }
 0x68b   : > { %6548 = vpow2.f32 %v2790_v32  ;;  %10846 = vst [vmem:[#allocation12_spill] sm:$0xff] %v8739_v3  ;;  %v2880_v26 = vadd.f32 %v8739_v3, %v8733_v38  ;;  %v10855_v3 = vld [vmem:[#allocation14_spill] sm:$0xff] }
 0x68c   : > { %6550 = vpow2.f32 %v2792_v9 }
 0x68d   : > { %v8741_v49 = vpop.eup %6540 }
 0x68e   : > { %2875 = vadd.xlane.f32.xlu1 %v2874_v25  ;;  %2872 = vadd.xlane.f32.xlu0 %v2871_v4  ;;  %10847 = vst [vmem:[#allocation54_spill] sm:$0xff] %v8741_v49  ;;  %v8743_v24 = vpop.eup %6542  ;;  %v362_v25 = vld [vmem:[%s10524_s2 + $0xe8] sm:$0xff] }
 0x68f   : > { %10848 = vst [vmem:[#allocation55_spill] sm:$0xff] %v8743_v24  ;;  %v2883_v22 = vadd.f32 %v8743_v24, %v8741_v49 }
 0x691   : > { %v8749_v10 = vpop.eup %6544 }
 0x692   : > { %10849 = vst [vmem:[#allocation56_spill] sm:$0xff] %v8749_v10  ;;  %v8751_v23 = vpop.eup %6546  ;;  %2881 = vadd.xlane.f32.xlu1 %v2880_v26  ;;  %2878 = vadd.xlane.f32.xlu0 %v2877_v21 }
 0x693   : > { %10850 = vst [vmem:[#allocation57_spill] sm:$0xff] %v8751_v23  ;;  %v2886_v11 = vadd.f32 %v8751_v23, %v8749_v10  ;;  %v10853_v23 = vld [vmem:[#allocation39_spill] sm:$0xff] }
 0x695   : > { %v8757_v7 = vpop.eup %6548 }
 0x696   : > { %10851 = vst [vmem:[#allocation58_spill] sm:$0xff] %v8757_v7  ;;  %v8759_v32 = vpop.eup %6550  ;;  %2887 = vadd.xlane.f32.xlu1 %v2886_v11  ;;  %2884 = vadd.xlane.f32.xlu0 %v2883_v22  ;;  %v361_v11 = vld [vmem:[%s10524_s2 + $0xe0] sm:$0xff]  ;;  %v2606_v22 = vpop.xlane.xlu1 %2605 }
 0x697   : > { %10852 = vst [vmem:[#allocation59_spill] sm:$0xff] %v8759_v32  ;;  %v2889_v9 = vadd.f32 %v8759_v32, %v8757_v7  ;;  %v2670_v38 = vsub.f32 %v10853_v23, %v2606_v22  ;;  %v10854_v32 = vld [vmem:[#allocation15_spill] sm:$0xff] }
 0x698   : > { %v2671_v49 = vsub.f32 %v10854_v32, %v2606_v22 }
 0x699   : > { %v2794_v24 = vmul.f32 1.442695, %v2670_v38 }
 0x69a   : > { %2890 = vadd.xlane.f32.xlu0 %v2889_v9  ;;  %v2609_v9 = vpop.xlane.xlu0 %2608  ;;  %v2796_v47 = vmul.f32 1.442695, %v2671_v49 }
 0x69b   : > { %v2672_v28 = vsub.f32 %v10855_v3, %v2609_v9  ;;  %v2673_v20 = vsub.f32 %v10856_v8, %v2609_v9 }
 0x69c   : > { %v8766_v4 = vpop.f32.mrb[56].mxu0 }
 0x69d   : > { %v8768_v26 = vpop.f32.mrb[57].mxu0  ;;  %v2798_v53 = vmul.f32 1.442695, %v2672_v28 }
 0x6a0   : > { %v8770_v21 = vpop.f32.mrb[58].mxu0 }
 0x6a1   : > { %v8772_v10 = vpop.f32.mrb[59].mxu0 }
 0x6a7   : > { %528 = vperm.xlu1 %6239, %v362_v25  }
 0x6b0   : > { %523 = vperm.xlu0 %6238, %v361_v11   ;;  %v2800_v11 = vmul.f32 1.442695, %v2673_v20 }
 0x6b2   : > { %v2804_v7 = vpop.xlane.xlu1 %2803 }
 0x6b3   : > { %6552 = vrcp.f32 %v2804_v7 }
 0x6b6   : > { %v2807_v25 = vpop.xlane.xlu0 %2806 }
 0x6b7   : > { %6554 = vrcp.f32 %v2807_v25 }
 0x6b8   : > { %6556 = vpow2.f32 %v2794_v24 }
 0x6b9   : > { %6558 = vpow2.f32 %v2796_v47 }
 0x6ba   : > { %v2810_v1 = vpop.xlane.xlu1 %2809 }
 0x6bb   : > { %6560 = vrcp.f32 %v2810_v1 }
 0x6bc   : > { %6562 = vpow2.f32 %v2798_v53 }
 0x6bd   : > { %v6553_v23 = vpop.eup %6552 }
 0x6be   : > { %v2813_v63 = vpop.xlane.xlu0 %2812  ;;  %v2931_v3 = vmul.f32 %v6553_v23, %v8515_v44  ;;  %v2930_v49 = vmul.f32 %v6553_v23, %v8513_v37 }
 0x6bf   : > { %6564 = vrcp.f32 %v2813_v63 }
 0x6c0   : > { %6566 = vpow2.f32 %v2800_v11 }
 0x6c1   : > { %v6555_v7 = vpop.eup %6554 }
 0x6c2   : > { %v2816_v32 = vpop.xlane.xlu1 %2815  ;;  %v2933_v38 = vmul.f32 %v6555_v7, %v8524_v30  ;;  %v2932_v28 = vmul.f32 %v6555_v7, %v8522_v5  ;;  %v8785_v47 = vpop.eup %6556 }
 0x6c3   : > { %6568 = vrcp.f32 %v2816_v32  ;;  %v8787_v20 = vpop.eup %6558 }
 0x6c4   : > { %v5932_v8 = vpack.c.bf16 %v2933_v38, %v2931_v3  ;;  %v5934_v24 = vpack.c.bf16 %v2932_v28, %v2930_v49  ;;  %v2892_v37 = vadd.f32 %v8787_v20, %v8785_v47  ;;  %v10858_v38 = vld [vmem:[#allocation13_spill] sm:$0xff]  ;;  %v10860_v28 = vld [vmem:[#allocation18_spill] sm:$0xff] }
 0x6c5   : > { %v6561_v1 = vpop.eup %6560 }
 0x6c6   : > { %5933 = vmatprep.subr.bf16.mxu0 %v5932_v8  ;;  %v2819_v63 = vpop.xlane.xlu0 %2818  ;;  %v8789_v53 = vpop.eup %6562  ;;  %v2935_v5 = vmul.f32 %v6561_v1, %v8533_v55  ;;  %v2934_v9 = vmul.f32 %v6561_v1, %v8531_v29 }
 0x6c7   : > { %6570 = vrcp.f32 %v2819_v63  ;;  %5935 = vmatpush1.bf16.xpose.msra.mxu0 %v5934_v24  ;;  %v10861_v24 = vld [vmem:[#allocation52_spill] sm:$0xff] }
 0x6c9   : > { %v6565_v44 = vpop.eup %6564 }
 0x6ca   : > { %v8793_v30 = vpop.eup %6566  ;;  %v2937_v22 = vmul.f32 %v6565_v44, %v8540_v48  ;;  %v2936_v25 = vmul.f32 %v6565_v44, %v8538_v42  ;;  %v10859_v42 = vld [vmem:[#allocation53_spill] sm:$0xff] }
 0x6cb   : > { %2893 = vadd.xlane.f32.xlu1 %v2892_v37  ;;  %v2895_v7 = vadd.f32 %v8793_v30, %v8789_v53  ;;  %v363_v37 = vld [vmem:[%s10524_s2 + $0xf0] sm:$0xff] }
 0x6cc   : > { %v5936_v11 = vpack.c.bf16 %v2937_v22, %v2935_v5  ;;  %v5938_v23 = vpack.c.bf16 %v2936_v25, %v2934_v9  ;;  %v8812_v5 = vpop.f32.mrb[60].mxu0  ;;  %v355_v9 = vld [vmem:[%s10524_s2 + $0xb0] sm:$0xff] }
 0x6cd   : > { %v6569_v3 = vpop.eup %6568  ;;  %v8817_v22 = vpop.f32.mrb[61].mxu0 }
 0x6ce   : > { %5937 = vmatprep.subr.bf16.mxu0 %v5936_v11  ;;  %v8801_v32 = vpop.permute.xlu0 %483  ;;  %v2939_v29 = vmul.f32 %v6569_v3, %v8547_v54  ;;  %v2938_v8 = vmul.f32 %v6569_v3, %v10860_v28  ;;  %v356_v54 = vld [vmem:[%s10524_s2 + $0xb8] sm:$0xff] }
 0x6cf   : > { %10857 = vst [vmem:[#allocation39_spill] sm:$0xff] %v8801_v32  ;;  %v810_v49 = vadd.f32 %v10858_v38, %v8801_v32  ;;  %2896 = vadd.xlane.f32.xlu0 %v2895_v7  ;;  %5939 = vmatpush1.bf16.xpose.msra.mxu0 %v5938_v23  ;;  %v364_v11 = vld [vmem:[%s10524_s2 + $0xf8] sm:$0xff]  ;;  %v8829_v7 = vpop.permute.xlu1 %488 }
 0x6d0   : > { %v8822_v25 = vpop.f32.mrb[62].mxu0  ;;  %10862 = vst [vmem:[#allocation15_spill] sm:$0xff] %v8829_v7 }
 0x6d1   : > { %v6571_v55 = vpop.eup %6570  ;;  %3058 = vmatprep.mubr.f32.mxu0 %v810_v49  ;;  %v8827_v23 = vpop.f32.mrb[63].mxu0 }
 0x6d2   : > { %v2941_v48 = vmul.f32 %v6571_v55, %v10859_v42  ;;  %v2940_v63 = vmul.f32 %v6571_v55, %v10861_v24 }
 0x6d4   : > { %v5940_v1 = vpack.c.bf16 %v2941_v48, %v2939_v29  ;;  %v5942_v44 = vpack.c.bf16 %v2940_v63, %v2938_v8  ;;  %v10863_v63 = vld [vmem:[#allocation42_spill] sm:$0xff] }
 0x6d6   : > { %5941 = vmatprep.subr.bf16.mxu0 %v5940_v1 }
 0x6d7   : > { %5943 = vmatpush1.bf16.xpose.msra.mxu0 %v5942_v44 }
 0x6dc   : > { %533 = vperm.xlu1 %6239, %v363_v37  }
 0x6e0   : > { %498 = vperm.xlu1 %6239, %v356_v54  }
 0x6e5   : > { %493 = vperm.xlu0 %6238, %v355_v9  }
 0x6e9   : > { %538 = vperm.xlu0 %6238, %v364_v11  }
 0x6f7   : > { %v2822_v3 = vpop.xlane.xlu1 %2821 }
 0x6f8   : > { %6572 = vrcp.f32 %v2822_v3  ;;  %v10864_v3 = vld [vmem:[#allocation16_spill] sm:$0xff] }
 0x6fb   : > { %v2828_v38 = vpop.xlane.xlu1 %2827  ;;  %v2825_v49 = vpop.xlane.xlu0 %2824 }
 0x6fc   : > { %6574 = vrcp.f32 %v2825_v49 }
 0x6fd   : > { %6576 = vrcp.f32 %v2828_v38  ;;  %v10865_v38 = vld [vmem:[#allocation20_spill] sm:$0xff] }
 0x6fe   : > { %v838_v49 = vadd.f32 %v10865_v38, %v10864_v3  ;;  %v10869_v38 = vld [vmem:[#allocation19_spill] sm:$0xff] }
 0x6ff   : > { %v2834_v55 = vpop.xlane.xlu1 %2833  ;;  %v2831_v29 = vpop.xlane.xlu0 %2830 }
 0x700   : > { %6578 = vrcp.f32 %v2831_v29 }
 0x701   : > { %6580 = vrcp.f32 %v2834_v55  ;;  %v10866_v55 = vld [vmem:[#allocation22_spill] sm:$0xff] }
 0x702   : > { %v6573_v28 = vpop.eup %6572 }
 0x703   : > { %v2840_v42 = vpop.xlane.xlu1 %2839  ;;  %v2837_v48 = vpop.xlane.xlu0 %2836  ;;  %v2943_v44 = vmul.f32 %v6573_v28, %v8592_v15  ;;  %v2942_v54 = vmul.f32 %v6573_v28, %v8589_v51 }
 0x704   : > { %6582 = vrcp.f32 %v2837_v48 }
 0x706   : > { %v6575_v8 = vpop.eup %6574 }
 0x707   : > { %v2846_v24 = vpop.xlane.xlu1 %2845  ;;  %3091 = vxpose.xlu0.b32.start [1/4] (short) %v10863_v63, 128  ;;  %v2843_v1 = vpop.xlane.xlu0 %2842  ;;  %v2945_v37 = vmul.f32 %v6575_v8, %v8598_v40  ;;  %v2944_v9 = vmul.f32 %v6575_v8, %v8595_v43  ;;  %v10867_v63 = vld [vmem:[#allocation25_spill] sm:$0xff] }
 0x708   : > { %v6577_v11 = vpop.eup %6576  ;;  %v840_v32 = vadd.f32 %v10867_v63, %v10864_v3  ;;  %6584 = vrcp.f32 %v2843_v1 }
 0x709   : > { %3123 = vxpose.xlu1.b32.start [1/4] (short) %v10866_v55, 128  ;;  %v5944_v29 = vpack.c.bf16 %v2945_v37, %v2943_v44  ;;  %v5946_v48 = vpack.c.bf16 %v2944_v9, %v2942_v54  ;;  %v2947_v51 = vmul.f32 %v6577_v11, %v8606_v33  ;;  %6586 = vrcp.f32 %v2840_v42  ;;  %v10868_v54 = vld [vmem:[#allocation27_spill] sm:$0xff]  ;;  %v10872_v42 = vld [vmem:[#allocation26_spill] sm:$0xff] }
 0x70a   : > { %v6579_v7 = vpop.eup %6578  ;;  %v10871_v55 = vld [vmem:[#allocation23_spill] sm:$0xff] }
 0x70b   : > { %v2852_v15 = vpop.xlane.xlu1 %2851  ;;  %3092 = vxpose.xlu0.b32.cont [2/4] (short) %v838_v49, 128  ;;  %v2849_v40 = vpop.xlane.xlu0 %2848  ;;  %5945 = vmatprep.subr.bf16.mxu0 %v5944_v29  ;;  %v2949_v43 = vmul.f32 %v6579_v7, %v8612_v12  ;;  %v2948_v1 = vmul.f32 %v6579_v7, %v8609_v31  ;;  %v10870_v49 = vld [vmem:[#allocation21_spill] sm:$0xff]  ;;  %v2946_v12 = vmul.f32 %v6577_v11, %v8601_v6 }
 0x70c   : > { %5947 = vmatpush1.bf16.xpose.msra.mxu0 %v5946_v48  ;;  %v6581_v28 = vpop.eup %6580  ;;  %v850_v33 = vadd.f32 %v10870_v49, %v10869_v38  ;;  %v852_v29 = vadd.f32 %v10872_v42, %v10869_v38  ;;  %6588 = vrcp.f32 %v2849_v40 }
 0x70d   : > { %3124 = vxpose.xlu1.b32.cont [2/4] (short) %v840_v32, 128  ;;  %v5948_v8 = vpack.c.bf16 %v2949_v43, %v2947_v51  ;;  %v2951_v32 = vmul.f32 %v6581_v28, %v8622_v27  ;;  %v5950_v31 = vpack.c.bf16 %v2948_v1, %v2946_v12  ;;  %6590 = vrcp.f32 %v2846_v24 }
 0x70e   : > { %v6583_v44 = vpop.eup %6582  ;;  %v2950_v11 = vmul.f32 %v6581_v28, %v8617_v34 }
 0x70f   : > { %v2858_v37 = vpop.xlane.xlu1 %2857  ;;  %3093 = vxpose.xlu0.b32.cont [3/4] (short) %v10868_v54, 128  ;;  %v2855_v9 = vpop.xlane.xlu0 %2854  ;;  %5949 = vmatprep.subr.bf16.mxu0 %v5948_v8  ;;  %v2953_v3 = vmul.f32 %v6583_v44, %v8628_v52  ;;  %v2952_v6 = vmul.f32 %v6583_v44, %v8625_v36 }
 0x710   : > { %6592 = vrcp.f32 %v2855_v9 }
 0x711   : > { %3125 = vxpose.xlu1.b32.cont [3/4] (short) %v10871_v55, 128  ;;  %v5952_v7 = vpack.c.bf16 %v2953_v3, %v2951_v32  ;;  %v5954_v3 = vpack.c.bf16 %v2952_v6, %v2950_v11  ;;  %6594 = vrcp.f32 %v2852_v15 }
 0x712   : > { %v6585_v51 = vpop.eup %6584 }
 0x713   : > { %v2864_v48 = vpop.xlane.xlu1 %2863  ;;  %3094 = vxpose.xlu0.b32.end [4/4] (short) %v850_v33, 128  ;;  %v2861_v63 = vpop.xlane.xlu0 %2860  ;;  %v2957_v27 = vmul.f32 %v6585_v51, %v8644_v59  ;;  %v2956_v36 = vmul.f32 %v6585_v51, %v8641_v19 }
 0x714   : > { %5951 = vmatpush1.bf16.xpose.msra.mxu0 %v5950_v31  ;;  %v6587_v52 = vpop.eup %6586  ;;  %6596 = vrcp.f32 %v2861_v63 }
 0x715   : > { %3126 = vxpose.xlu1.b32.end [4/4] (short) %v852_v29, 128  ;;  %5953 = vmatprep.subr.bf16.mxu0 %v5952_v7  ;;  %v2955_v40 = vmul.f32 %v6587_v52, %v8638_v39  ;;  %v2954_v34 = vmul.f32 %v6587_v52, %v8633_v60  ;;  %6598 = vrcp.f32 %v2858_v37 }
 0x716   : > { %v6589_v38 = vpop.eup %6588 }
 0x717   : > { %v2870_v43 = vpop.xlane.xlu1 %2869  ;;  %v2867_v8 = vpop.xlane.xlu0 %2866  ;;  %v5956_v24 = vpack.c.bf16 %v2957_v27, %v2955_v40  ;;  %v2961_v59 = vmul.f32 %v6589_v38, %v8660_v35  ;;  %v5958_v28 = vpack.c.bf16 %v2956_v36, %v2954_v34  ;;  %v2960_v19 = vmul.f32 %v6589_v38, %v8657_v16  ;;  %v10874_v36 = vld [vmem:[#allocation34_spill] sm:$0xff] }
 0x718   : > { %v6591_v49 = vpop.eup %6590  ;;  %6600 = vrcp.f32 %v2867_v8  ;;  %v10875_v34 = vld [vmem:[#allocation38_spill] sm:$0xff] }
 0x719   : > { %v2959_v39 = vmul.f32 %v6591_v49, %v8654_v58  ;;  %v2958_v42 = vmul.f32 %v6591_v49, %v8649_v17  ;;  %6602 = vrcp.f32 %v2864_v48 }
 0x71a   : > { %v6593_v55 = vpop.eup %6592 }
 0x71b   : > { %v8857_v54 = vpop.xlane.xlu1 %2875  ;;  %v2873_v1 = vpop.xlane.xlu0 %2872  ;;  %v5960_v9 = vpack.c.bf16 %v2961_v59, %v2959_v39  ;;  %v2965_v35 = vmul.f32 %v6593_v55, %v8675_v41  ;;  %v5962_v29 = vpack.c.bf16 %v2960_v19, %v2958_v42  ;;  %v2964_v52 = vmul.f32 %v6593_v55, %v8673_v45 }
 0x71c   : > { %5955 = vmatpush1.bf16.xpose.msra.mxu0 %v5954_v3  ;;  %v6595_v12 = vpop.eup %6594  ;;  %6604 = vrcp.f32 %v2873_v1 }
 0x71d   : > { %5957 = vmatprep.subr.bf16.mxu0 %v5956_v24  ;;  %v2963_v60 = vmul.f32 %v6595_v12, %v8670_v46  ;;  %v2962_v8 = vmul.f32 %v6595_v12, %v8665_v13  ;;  %6606 = vrcp.f32 %v2870_v43  ;;  %v10878_v12 = vld [vmem:[#allocation48_spill] sm:$0xff] }
 0x71e   : > { %v6597_v63 = vpop.eup %6596 }
 0x71f   : > { %v2879_v33 = vpop.xlane.xlu0 %2878  ;;  %v8861_v44 = vpop.xlane.xlu1 %2881  ;;  %v5964_v31 = vpack.c.bf16 %v2965_v35, %v2963_v60  ;;  %v2969_v16 = vmul.f32 %v6597_v63, %v8689_v61  ;;  %v10879_v35 = vld [vmem:[#allocation55_spill] sm:$0xff]  ;;  %v10880_v60 = vld [vmem:[#allocation49_spill] sm:$0xff] }
 0x720   : > { %v6599_v7 = vpop.eup %6598  ;;  %6608 = vrcp.f32 %v2879_v33 }
 0x721   : > { %v2967_v45 = vmul.f32 %v6599_v7, %v8685_v2  ;;  %v2966_v11 = vmul.f32 %v6599_v7, %v8679_v14  ;;  %6610 = vrcp.f32 %v8857_v54 }
 0x722   : > { %v6601_v27 = vpop.eup %6600 }
 0x723   : > { %v2885_v15 = vpop.xlane.xlu0 %2884  ;;  %v8865_v32 = vpop.xlane.xlu1 %2887  ;;  %v2973_v13 = vmul.f32 %v6601_v27, %v8703_v0  ;;  %v2972_v1 = vmul.f32 %v6601_v27, %v8701_v57  ;;  %v10873_v0 = vld [vmem:[#allocation51_spill] sm:$0xff]  ;;  %v10876_v57 = vld [vmem:[#allocation36_spill] sm:$0xff] }
 0x724   : > { %5959 = vmatpush1.bf16.xpose.msra.mxu0 %v5958_v28  ;;  %6612 = vrcp.f32 %v2885_v15 }
 0x725   : > { %5961 = vmatprep.subr.bf16.mxu0 %v5960_v9  ;;  %6614 = vrcp.f32 %v8861_v44 }
 0x727   : > { %v2891_v58 = vpop.xlane.xlu0 %2890  ;;  %v529_v37 = vpop.permute.xlu1 %528 }
 0x728   : > { %v8874_v41 = vadd.f32 %v8770_v21, %v529_v37  ;;  %v8877_v17 = vadd.f32 %v8772_v10, %v529_v37  ;;  %v5966_v21 = vpack.c.bf16 %v2964_v52, %v2962_v8  ;;  %v5968_v10 = vpack.c.bf16 %v2969_v16, %v2967_v45  ;;  %v10882_v52 = vld [vmem:[#allocation54_spill] sm:$0xff]  ;;  %v10883_v8 = vld [vmem:[#allocation59_spill] sm:$0xff] }
 0x729   : > { %6616 = vrcp.f32 %v2891_v58 }
 0x72a   : > { %6618 = vrcp.f32 %v8865_v32 }
 0x72c   : > { %5963 = vmatpush1.bf16.xpose.msra.mxu0 %v5962_v29 }
 0x72d   : > { %5965 = vmatprep.subr.bf16.mxu0 %v5964_v31 }
 0x72f   : > { %v524_v51 = vpop.permute.xlu0 %523 }
 0x730   : > { %v8880_v46 = vadd.f32 %v8766_v4, %v524_v51  ;;  %v8883_v48 = vadd.f32 %v8768_v26, %v524_v51  ;;  %v6603_v4 = vpop.eup %6602  ;;  %v2968_v26 = vmul.f32 %v6597_v63, %v8687_v18  ;;  %v10881_v63 = vld [vmem:[#allocation12_spill] sm:$0xff] }
 0x731   : > { %v2971_v40 = vmul.f32 %v6603_v4, %v8699_v62  ;;  %v6605_v24 = vpop.eup %6604  ;;  %v2970_v18 = vmul.f32 %v6603_v4, %v8693_v50 }
 0x732   : > { %v5998_v6 = vpack.c.bf16 %v8874_v41, %v8880_v46  ;;  %v5996_v61 = vpack.c.bf16 %v8877_v17, %v8883_v48  ;;  %v5970_v2 = vpack.c.bf16 %v2968_v26, %v2966_v11  ;;  %v6607_v43 = vpop.eup %6606  ;;  %v2977_v38 = vmul.f32 %v6605_v24, %v8717_v56  ;;  %v10877_v56 = vld [vmem:[#allocation50_spill] sm:$0xff]  ;;  %v10887_v26 = vld [vmem:[#allocation57_spill] sm:$0xff]  ;;  %v10906_v48 = vld [vmem:[#allocation43_spill] sm:$0xff] }
 0x733   : > { %v5972_v3 = vpack.c.bf16 %v2973_v13, %v2971_v40  ;;  %v2975_v49 = vmul.f32 %v6607_v43, %v10873_v0  ;;  %v5974_v14 = vpack.c.bf16 %v2972_v1, %v2970_v18  ;;  %v6609_v33 = vpop.eup %6608  ;;  %v2976_v59 = vmul.f32 %v6605_v24, %v10874_v36  ;;  %v10911_v41 = vld [vmem:[#allocation24_spill] sm:$0xff] }
 0x734   : > { %5967 = vmatpush1.bf16.xpose.msra.mxu0 %v5966_v21  ;;  %v6611_v54 = vpop.eup %6610  ;;  %v2981_v39 = vmul.f32 %v6609_v33, %v10875_v34  ;;  %v2974_v28 = vmul.f32 %v6607_v43, %v10876_v57  ;;  %v2980_v19 = vmul.f32 %v6609_v33, %v10878_v12  ;;  %v8912_v21 = vpop.f32.mrb[64].mxu0  ;;  %v371_v57 = vld [vmem:[%s10524_s2 + $0x130] sm:$0xff]  ;;  %v372_v12 = vld [vmem:[%s10524_s2 + $0x138] sm:$0xff] }
 0x735   : > { %5969 = vmatprep.subr.bf16.mxu0 %v5968_v10  ;;  %v5976_v62 = vpack.c.bf16 %v2977_v38, %v2975_v49  ;;  %v2979_v9 = vmul.f32 %v6611_v54, %v10877_v56  ;;  %v6613_v15 = vpop.eup %6612  ;;  %v2978_v29 = vmul.f32 %v6611_v54, %v10880_v60  ;;  %10884 = vst [vmem:[#allocation14_spill] sm:$0xff] %v8912_v21  ;;  %v10885_v10 = vld [vmem:[#allocation37_spill] sm:$0xff]  ;;  %v8915_v4 = vpop.f32.mrb[65].mxu0  ;;  %v10892_v38 = vld [vmem:[#allocation58_spill] sm:$0xff]  ;;  %v369_v49 = vld [vmem:[%s10524_s2 + $0x120] sm:$0xff] }
 0x736   : > { %v5978_v50 = vpack.c.bf16 %v2976_v59, %v2974_v28  ;;  %v6615_v44 = vpop.eup %6614  ;;  %v2985_v42 = vmul.f32 %v6613_v15, %v10879_v35  ;;  %v2984_v16 = vmul.f32 %v6613_v15, %v10882_v52  ;;  %10886 = vst [vmem:[#allocation17_spill] sm:$0xff] %v8915_v4  ;;  %v8918_v11 = vpop.f32.mrb[66].mxu0  ;;  %v10903_v52 = vld [vmem:[#allocation46_spill] sm:$0xff] }
 0x737   : > { %v5980_v55 = vpack.c.bf16 %v2981_v39, %v2979_v9  ;;  %v2983_v31 = vmul.f32 %v6615_v44, %v10881_v63  ;;  %v5982_v37 = vpack.c.bf16 %v2980_v19, %v2978_v29  ;;  %v6617_v51 = vpop.eup %6616  ;;  %v2982_v27 = vmul.f32 %v6615_v44, %v10885_v10  ;;  %10888 = vst [vmem:[#allocation13_spill] sm:$0xff] %v8918_v11 }
 0x738   : > { %v6619_v58 = vpop.eup %6618  ;;  %v2989_v45 = vmul.f32 %v6617_v51, %v10883_v8  ;;  %v2988_v18 = vmul.f32 %v6617_v51, %v10892_v38 }
 0x739   : > { %v5984_v7 = vpack.c.bf16 %v2985_v42, %v2983_v31  ;;  %v2987_v13 = vmul.f32 %v6619_v58, %v10887_v26  ;;  %v5986_v40 = vpack.c.bf16 %v2984_v16, %v2982_v27  ;;  %v10907_v27 = vld [vmem:[#allocation31_spill] sm:$0xff]  ;;  %v10908_v26 = vld [vmem:[#allocation33_spill] sm:$0xff] }
 0x73b   : > { %v5988_v24 = vpack.c.bf16 %v2989_v45, %v2987_v13  ;;  %v10905_v45 = vld [vmem:[#allocation45_spill] sm:$0xff]  ;;  %v10909_v13 = vpack.c.bf16 %v10907_v27, %v10908_v26 }
 0x73c   : > { %5971 = vmatpush1.bf16.xpose.msra.mxu0 %v5970_v2  ;;  %v8920_v2 = vpop.f32.mrb[67].mxu0 }
 0x73d   : > { %5973 = vmatprep.subr.bf16.mxu0 %v5972_v3  ;;  %10889 = vst [vmem:[#allocation53_spill] sm:$0xff] %v8920_v2  ;;  %v8922_v43 = vpop.f32.mrb[68].mxu0 }
 0x73e   : > { %10890 = vst [vmem:[#allocation18_spill] sm:$0xff] %v8922_v43  ;;  %v8924_v1 = vpop.f32.mrb[69].mxu0 }
 0x73f   : > { %10891 = vst [vmem:[#allocation52_spill] sm:$0xff] %v8924_v1  ;;  %v8927_v0 = vpop.f32.mrb[70].mxu0 }
 0x740   : > { %10893 = vst [vmem:[#allocation42_spill] sm:$0xff] %v8927_v0 }
 0x744   : > { %5975 = vmatpush1.bf16.xpose.msra.mxu0 %v5974_v14  ;;  %v8932_v14 = vpop.f32.mrb[71].mxu0 }
 0x745   : > { %5977 = vmatprep.subr.bf16.mxu0 %v5976_v62  ;;  %10894 = vst [vmem:[#allocation16_spill] sm:$0xff] %v8932_v14  ;;  %v10895_v62 = vld [vmem:[#allocation56_spill] sm:$0xff]  ;;  %v8935_v54 = vpop.f32.mrb[72].mxu0 }
 0x746   : > { %v2986_v33 = vmul.f32 %v6619_v58, %v10895_v62  ;;  %v8937_v36 = vpop.f32.mrb[73].mxu0 }
 0x747   : > { %v8939_v34 = vpop.f32.mrb[74].mxu0 }
 0x748   : > { %v5990_v59 = vpack.c.bf16 %v2988_v18, %v2986_v33  ;;  %10896 = vst [vmem:[#allocation20_spill] sm:$0xff] %v8939_v34  ;;  %v8944_v28 = vpop.f32.mrb[75].mxu0 }
 0x749   : > { %10897 = vst [vmem:[#allocation22_spill] sm:$0xff] %v8944_v28  ;;  %v8946_v9 = vpop.f32.mrb[76].mxu0 }
 0x74c   : > { %5979 = vmatpush1.bf16.xpose.msra.mxu0 %v5978_v50 }
 0x74d   : > { %5981 = vmatprep.subr.bf16.mxu0 %v5980_v55  ;;  %v8948_v55 = vpop.f32.mrb[77].mxu0 }
 0x74e   : > { %v8957_v29 = vpop.f32.mrb[78].mxu0 }
 0x74f   : > { %10898 = vst [vmem:[#allocation25_spill] sm:$0xff] %v8957_v29  ;;  %v8966_v51 = vpop.f32.mrb[79].mxu0 }
 0x750   : > { %10899 = vst [vmem:[#allocation27_spill] sm:$0xff] %v8966_v51 }
 0x754   : > { %5983 = vmatpush1.bf16.xpose.msra.mxu0 %v5982_v37 }
 0x755   : > { %5985 = vmatprep.subr.bf16.mxu0 %v5984_v7 }
 0x758   : > { %v2894_v32 = vpop.xlane.xlu1 %2893 }
 0x759   : > { %6620 = vrcp.f32 %v2894_v32  ;;  %v10904_v32 = vld [vmem:[#allocation44_spill] sm:$0xff] }
 0x75c   : > { %v2897_v3 = vpop.xlane.xlu0 %2896  ;;  %5987 = vmatpush1.bf16.xpose.msra.mxu0 %v5986_v40  ;;  %v534_v50 = vpop.permute.xlu1 %533  ;;  %v10910_v40 = vld [vmem:[#allocation41_spill] sm:$0xff] }
 0x75d   : > { %6622 = vrcp.f32 %v2897_v3  ;;  %5989 = vmatprep.subr.bf16.mxu0 %v5988_v24  ;;  %v868_v63 = vadd.f32 %v8812_v5, %v534_v50  ;;  %v870_v31 = vadd.f32 %v8817_v22, %v534_v50  ;;  %v10900_v5 = vld [vmem:[#allocation39_spill] sm:$0xff]  ;;  %v10901_v22 = vld [vmem:[#allocation40_spill] sm:$0xff]  ;;  %v8988_v24 = vpop.f32.mrb[80].mxu0 }
 0x75e   : > { %10913 = vst [vmem:[#allocation19_spill] sm:$0xff] %v8988_v24  ;;  %v8990_v38 = vpop.f32.mrb[81].mxu0 }
 0x75f   : > { %10914 = vst [vmem:[#allocation21_spill] sm:$0xff] %v8990_v38  ;;  %v8992_v18 = vpop.f32.mrb[82].mxu0 }
 0x760   : > { %v499_v17 = vpop.permute.xlu1 %498  ;;  %10915 = vst [vmem:[#allocation23_spill] sm:$0xff] %v8992_v18  ;;  %v8994_v62 = vpop.f32.mrb[83].mxu0 }
 0x761   : > { %v828_v3 = vadd.f32 %v10910_v40, %v499_v17  ;;  %v826_v46 = vadd.f32 %v10911_v41, %v499_v17  ;;  %10916 = vst [vmem:[#allocation26_spill] sm:$0xff] %v8994_v62  ;;  %v8997_v33 = vpop.f32.mrb[84].mxu0 }
 0x762   : > { %10917 = vst [vmem:[#allocation51_spill] sm:$0xff] %v8997_v33  ;;  %v9005_v50 = vpop.f32.mrb[85].mxu0 }
 0x763   : > { %563 = vperm.xlu1 %6239, %v369_v49   ;;  %v6621_v56 = vpop.eup %6620  ;;  %10921 = vst [vmem:[#allocation34_spill] sm:$0xff] %v9005_v50 }
 0x764   : > { %v494_v39 = vpop.permute.xlu0 %493  ;;  %5991 = vmatpush1.bf16.xpose.msra.mxu0 %v5990_v59  ;;  %v2991_v19 = vmul.f32 %v6621_v56, %v8787_v20  ;;  %v2990_v42 = vmul.f32 %v6621_v56, %v8785_v47  ;;  %v370_v20 = vld [vmem:[%s10524_s2 + $0x128] sm:$0xff]  ;;  %v10918_v59 = vld [vmem:[#allocation28_spill] sm:$0xff] }
 0x765   : > { %v822_v10 = vadd.f32 %v10905_v45, %v494_v39 }
 0x767   : > { %v6623_v15 = vpop.eup %6622  ;;  %573 = vperm.xlu1 %6239, %v371_v57  }
 0x768   : > { %v539_v44 = vpop.permute.xlu0 %538  ;;  %v2993_v35 = vmul.f32 %v6623_v15, %v8793_v30  ;;  %v2992_v60 = vmul.f32 %v6623_v15, %v8789_v53  ;;  %v10922_v15 = vld [vmem:[#allocation35_spill] sm:$0xff] }
 0x769   : > { %v874_v37 = vadd.f32 %v8822_v25, %v539_v44  ;;  %v876_v7 = vadd.f32 %v8827_v23, %v539_v44  ;;  %v808_v25 = vadd.f32 %v10901_v22, %v10900_v5  ;;  %v10902_v23 = vld [vmem:[#allocation15_spill] sm:$0xff] }
 0x76a   : > { %v5992_v30 = vpack.c.bf16 %v2993_v35, %v2991_v19  ;;  %v5994_v47 = vpack.c.bf16 %v2992_v60, %v2990_v42  ;;  %v816_v16 = vadd.f32 %v10903_v52, %v10902_v23  ;;  %v814_v8 = vadd.f32 %v10904_v32, %v10902_v23  ;;  %v10923_v44 = vld [vmem:[#allocation47_spill] sm:$0xff]  ;;  %v9010_v19 = vpop.f32.mrb[86].mxu0 }
 0x76b   : > { %v6002_v58 = vpack.c.bf16 %v874_v37, %v868_v63  ;;  %578 = vperm.xlu1 %6239, %v372_v12   ;;  %v6000_v53 = vpack.c.bf16 %v876_v7, %v870_v31  ;;  %v10924_v12 = vpack.c.bf16 %v10922_v15, %v10923_v44  ;;  %10925 = vst [vmem:[#allocation38_spill] sm:$0xff] %v9010_v19  ;;  %v9012_v42 = vpop.f32.mrb[87].mxu0  ;;  %v10928_v63 = vld [vmem:[#allocation30_spill] sm:$0xff]  ;;  %v10929_v31 = vld [vmem:[#allocation32_spill] sm:$0xff] }
 0x76c   : > { %568 = vperm.xlu0 %6238, %v370_v20   ;;  %5993 = vmatprep.subr.bf16.mxu0 %v5992_v30  ;;  %10926 = vst [vmem:[#allocation36_spill] sm:$0xff] %v9012_v42  ;;  %v9015_v60 = vpop.f32.mrb[88].mxu0  ;;  %v10930_v37 = vpack.c.bf16 %v10928_v63, %v10929_v31 }
 0x76d   : > { %5995 = vmatpush1.bf16.xpose.msra.mxu0 %v5994_v47  ;;  %10927 = vst [vmem:[#allocation50_spill] sm:$0xff] %v9015_v60  ;;  %v9023_v20 = vpop.f32.mrb[89].mxu0 }
 0x76e   : > { %5997 = vmatprep.subr.bf16.mxu0 %v5996_v61  ;;  %v820_v61 = vadd.f32 %v10906_v48, %v494_v39  ;;  %v10919_v39 = vld [vmem:[#allocation29_spill] sm:$0xff]  ;;  %10931 = vst [vmem:[#allocation48_spill] sm:$0xff] %v9023_v20  ;;  %v9025_v30 = vpop.f32.mrb[90].mxu0 }
 0x76f   : > { %v10920_v57 = vpack.c.bf16 %v10918_v59, %v10919_v39  ;;  %10932 = vst [vmem:[#allocation55_spill] sm:$0xff] %v9025_v30 }
 0x774   : > { %3059 = vmatmul.mubr.f32.vlgmr.msra.gmra.mrb[96].mxu0 %v808_v25 }
 0x775   : > { %3064 = vmatprep.mubr.f32.mxu0 %v816_v16  ;;  %5999 = vmatpush1.bf16.msra.mxu0 %v5998_v6  ;;  %v10912_v6 = vmov 0.0  }
 0x776   : > { %6001 = vmatprep.subr.bf16.mxu0 %v6000_v53 }
 0x778   : > { %3065 = vmatmul.mubr.f32.gmra.mrb[98].mxu0 %v814_v8 }
 0x779   : > { %3070 = vmatprep.mubr.f32.mxu0 %v822_v10  ;;  %6003 = vmatpush1.bf16.msra.mxu0 %v6002_v58  ;;  %v9027_v58 = vpop.f32.mrb[91].mxu0 }
 0x77a   : > { %6141 = vmatprep.subr.bf16.mxu0 %v10909_v13  ;;  %10933 = vst [vmem:[#allocation49_spill] sm:$0xff] %v9027_v58  ;;  %v9030_v53 = vpop.f32.mrb[92].mxu0 }
 0x77b   : > { %10934 = vst [vmem:[#allocation12_spill] sm:$0xff] %v9030_v53  ;;  %v9033_v22 = vpop.f32.mrb[93].mxu0 }
 0x77c   : > { %3071 = vmatmul.mubr.f32.gmra.mrb[100].mxu0 %v820_v61  ;;  %10935 = vst [vmem:[#allocation54_spill] sm:$0xff] %v9033_v22  ;;  %v9035_v25 = vpop.f32.mrb[94].mxu0 }
 0x77d   : > { %3076 = vmatprep.mubr.f32.mxu0 %v828_v3  ;;  %10936 = vst [vmem:[#allocation59_spill] sm:$0xff] %v9035_v25  ;;  %v9037_v52 = vpop.f32.mrb[95].mxu0 }
 0x77e   : > { %10937 = vst [vmem:[#allocation37_spill] sm:$0xff] %v9037_v52 }
 0x780   : > { %3077 = vmatmul.mubr.f32.gmra.mrb[102].mxu0 %v826_v46 }
 0x781   : > { %3315 = vmatprep.mubr.f32.mxu0 %v10912_v6 }
 0x787   : > { %v3107_v49 = vpop.trf.xlu0 }
 0x788   : > { %5749 = vmatmul.mubr.msk.f32.vlgmr.msra.gmra.mrb[104].mxu0 %vm1038_vm0, %v3107_v49 }
 0x789   : > { %6143 = vmatpush1.bf16.msra.mxu0 %v10920_v57  ;;  %3321 = vmatprep.mubr.f32.mxu0 %v10912_v6  ;;  %v9003_v56 = vpop.trf.xlu1 }
 0x78a   : > { %6145 = vmatprep.subr.bf16.mxu0 %v10924_v12 }
 0x78b   : > { %v3108_v35 = vpop.trf.xlu0 }
 0x78c   : > { %5750 = vmatmul.mubr.msk.f32.gmra.mrb[106].mxu0 %vm1038_vm0, %v3108_v35 }
 0x78d   : > { %6147 = vmatpush1.bf16.msra.mxu0 %v10930_v37  ;;  %3327 = vmatprep.mubr.f32.mxu0 %v10912_v6  ;;  %v9021_v7 = vpop.trf.xlu1 }
 0x78f   : > { %v3109_v47 = vpop.trf.xlu0 }
 0x790   : > { %5751 = vmatmul.mubr.msk.f32.gmra.mrb[108].mxu0 %vm1038_vm0, %v3109_v47 }
 0x791   : > { %3333 = vmatprep.mubr.f32.mxu0 %v10912_v6  ;;  %v3141_v5 = vpop.trf.xlu1 }
 0x793   : > { %v3110_v23 = vpop.trf.xlu0 }
 0x794   : > { %5752 = vmatmul.mubr.msk.f32.gmra.mrb[110].mxu0 %vm1038_vm0, %v3110_v23 }
 0x795   : > { %3339 = vmatprep.mubr.f32.mxu0 %v10912_v6  ;;  %v3142_v16 = vpop.trf.xlu1 }
 0x797   : > { %v3111_v32 = vpop.trf.xlu0 }
 0x798   : > { %5753 = vmatmul.mubr.msk.f32.gmra.mrb[112].mxu0 %vm1038_vm0, %v3111_v32 }
 0x799   : > { %3345 = vmatprep.mubr.f32.mxu0 %v10912_v6  ;;  %v3143_v8 = vpop.trf.xlu1 }
 0x79b   : > { %v3112_v45 = vpop.trf.xlu0 }
 0x79c   : > { %5754 = vmatmul.mubr.msk.f32.gmra.mrb[114].mxu0 %vm1038_vm0, %v3112_v45 }
 0x79d   : > { %3351 = vmatprep.mubr.f32.mxu0 %v10912_v6  ;;  %v3144_v17 = vpop.trf.xlu1 }
 0x79f   : > { %v3113_v10 = vpop.trf.xlu0 }
 0x7a0   : > { %5755 = vmatmul.mubr.msk.f32.gmra.mrb[116].mxu0 %vm1038_vm0, %v3113_v10 }
 0x7a1   : > { %3357 = vmatprep.mubr.f32.mxu0 %v10912_v6  ;;  %v3145_v61 = vpop.trf.xlu1 }
 0x7a3   : > { %v3114_v48 = vpop.trf.xlu0 }
 0x7a4   : > { %5756 = vmatmul.mubr.msk.f32.gmra.mrb[118].mxu0 %vm1038_vm0, %v3114_v48 }
 0x7a5   : > { %3363 = vmatprep.mubr.f32.mxu0 %v10912_v6  ;;  %v3146_v13 = vpop.trf.xlu1 }
 0x7a7   : > { %v3115_v27 = vpop.trf.xlu0 }
 0x7a8   : > { %5757 = vmatmul.mubr.msk.f32.gmra.mrb[120].mxu0 %vm1038_vm0, %v3115_v27 }
 0x7a9   : > { %3369 = vmatprep.mubr.f32.mxu0 %v10912_v6  ;;  %v3147_v3 = vpop.trf.xlu1 }
 0x7ab   : > { %v3116_v26 = vpop.trf.xlu0 }
 0x7ac   : > { %5758 = vmatmul.mubr.msk.f32.gmra.mrb[122].mxu0 %vm1038_vm0, %v3116_v26 }
 0x7ad   : > { %3375 = vmatprep.mubr.f32.mxu0 %v10912_v6  ;;  %v3148_v49 = vpop.trf.xlu1 }
 0x7af   : > { %v3117_v40 = vpop.trf.xlu0 }
 0x7b0   : > { %5759 = vmatmul.mubr.msk.f32.gmra.mrb[124].mxu0 %vm1038_vm0, %v3117_v40 }
 0x7b1   : > { %3381 = vmatprep.mubr.f32.mxu0 %v10912_v6  ;;  %v3149_v39 = vpop.trf.xlu1 }
 0x7b3   : > { %v3118_v41 = vpop.trf.xlu0 }
 0x7b4   : > { %5760 = vmatmul.mubr.msk.f32.gmra.mrb[126].mxu0 %vm1038_vm0, %v3118_v41 }
 0x7b5   : > { %3387 = vmatprep.mubr.f32.mxu0 %v10912_v6  ;;  %v3150_v44 = vpop.trf.xlu1 }
 0x7b7   : > { %v3119_v46 = vpop.trf.xlu0 }
 0x7b8   : > { %5761 = vmatmul.mubr.msk.f32.gmra.mrb[128].mxu0 %vm1038_vm0, %v3119_v46 }
 0x7b9   : > { %3393 = vmatprep.mubr.f32.mxu0 %v10912_v6  ;;  %v3151_v12 = vpop.trf.xlu1 }
 0x7bb   : > { %v3120_v59 = vpop.trf.xlu0 }
 0x7bc   : > { %5762 = vmatmul.mubr.msk.f32.gmra.mrb[130].mxu0 %vm1038_vm0, %v3120_v59 }
 0x7bd   : > { %3399 = vmatprep.mubr.f32.mxu0 %v10912_v6  ;;  %v3152_v35 = vpop.trf.xlu1 }
 0x7bf   : > { %v3121_v57 = vpop.trf.xlu0 }
 0x7c0   : > { %5763 = vmatmul.mubr.msk.f32.gmra.mrb[132].mxu0 %vm1038_vm0, %v3121_v57 }
 0x7c1   : > { %3405 = vmatprep.mubr.f32.mxu0 %v10912_v6  ;;  %v3153_v63 = vpop.trf.xlu1 }
 0x7c3   : > { %v3122_v15 = vpop.trf.xlu0 }
 0x7c4   : > { %5764 = vmatmul.mubr.msk.f32.gmra.mrb[134].mxu0 %vm1038_vm0, %v3122_v15 }
 0x7c5   : > { %3411 = vmatprep.mubr.f32.mxu0 %v10912_v6 }
 0x7c8   : > { %5765 = vmatmul.mubr.msk.f32.gmra.mrb[136].mxu0 %vm1038_vm0, %v9003_v56  ;;  %v3154_v56 = vpop.trf.xlu1 }
 0x7c9   : > { %3417 = vmatprep.mubr.f32.mxu0 %v10912_v6 }
 0x7cc   : > { %5766 = vmatmul.mubr.msk.f32.gmra.mrb[138].mxu0 %vm1038_vm0, %v9021_v7 }
 0x7cd   : > { %3423 = vmatprep.mubr.f32.mxu0 %v10912_v6 }
 0x7d0   : > { %5767 = vmatmul.mubr.msk.f32.gmra.mrb[140].mxu0 %vm1038_vm0, %v3141_v5 }
 0x7d1   : > { %3429 = vmatprep.mubr.f32.mxu0 %v10912_v6 }
 0x7d4   : > { %5768 = vmatmul.mubr.msk.f32.gmra.mrb[142].mxu0 %vm1038_vm0, %v3142_v16 }
 0x7d5   : > { %3435 = vmatprep.mubr.f32.mxu0 %v10912_v6 }
 0x7d8   : > { %5769 = vmatmul.mubr.msk.f32.gmra.mrb[144].mxu0 %vm1038_vm0, %v3143_v8 }
 0x7d9   : > { %3441 = vmatprep.mubr.f32.mxu0 %v10912_v6 }
 0x7dc   : > { %5770 = vmatmul.mubr.msk.f32.gmra.mrb[146].mxu0 %vm1038_vm0, %v3144_v17 }
 0x7dd   : > { %3447 = vmatprep.mubr.f32.mxu0 %v10912_v6 }
 0x7e0   : > { %5771 = vmatmul.mubr.msk.f32.gmra.mrb[148].mxu0 %vm1038_vm0, %v3145_v61 }
 0x7e1   : > { %3453 = vmatprep.mubr.f32.mxu0 %v10912_v6 }
 0x7e2   : > { %v564_v31 = vpop.permute.xlu1 %563 }
 0x7e3   : > { %v9082_v37 = vadd.f32 %v8935_v54, %v564_v31  ;;  %v9085_v7 = vadd.f32 %v8937_v36, %v564_v31 }
 0x7e4   : > { %5772 = vmatmul.mubr.msk.f32.gmra.mrb[150].mxu0 %vm1038_vm0, %v3146_v13 }
 0x7e5   : > { %10938 = vst [vmem:[#allocation57_spill] sm:$0xff] %v9082_v37  ;;  %10939 = vst [vmem:[#allocation58_spill] sm:$0xff] %v9085_v7  ;;  %3459 = vmatprep.mubr.f32.mxu0 %v10912_v6 }
 0x7e6   : > { %v574_v47 = vpop.permute.xlu1 %573 }
 0x7e7   : > { %v9090_v5 = vadd.f32 %v8946_v9, %v574_v47  ;;  %v9093_v23 = vadd.f32 %v8948_v55, %v574_v47 }
 0x7e8   : > { %5773 = vmatmul.mubr.msk.f32.gmra.mrb[152].mxu0 %vm1038_vm0, %v3147_v3 }
 0x7e9   : > { %10940 = vst [vmem:[#allocation56_spill] sm:$0xff] %v9090_v5  ;;  %10941 = vst [vmem:[#allocation39_spill] sm:$0xff] %v9093_v23  ;;  %3465 = vmatprep.mubr.f32.mxu0 %v10912_v6 }
 0x7ec   : > { %5774 = vmatmul.mubr.msk.f32.gmra.mrb[154].mxu0 %vm1038_vm0, %v3148_v49 }
 0x7ed   : > { %3471 = vmatprep.mubr.f32.mxu0 %v10912_v6 }
 0x7f0   : > { %5775 = vmatmul.mubr.msk.f32.gmra.mrb[156].mxu0 %vm1038_vm0, %v3149_v39 }
 0x7f1   : > { %3477 = vmatprep.mubr.f32.mxu0 %v10912_v6 }
 0x7f4   : > { %5776 = vmatmul.mubr.msk.f32.gmra.mrb[158].mxu0 %vm1038_vm0, %v3150_v44 }
 0x7f5   : > { %3483 = vmatprep.mubr.f32.mxu0 %v10912_v6 }
 0x7f8   : > { %5777 = vmatmul.mubr.msk.f32.gmra.mrb[160].mxu0 %vm1038_vm0, %v3151_v12 }
 0x7f9   : > { %3489 = vmatprep.mubr.f32.mxu0 %v10912_v6 }
 0x7fc   : > { %5778 = vmatmul.mubr.msk.f32.gmra.mrb[162].mxu0 %vm1038_vm0, %v3152_v35 }
 0x7fd   : > { %3495 = vmatprep.mubr.f32.mxu0 %v10912_v6 }
 0x800   : > { %5779 = vmatmul.mubr.msk.f32.gmra.mrb[164].mxu0 %vm1038_vm0, %v3153_v63 }
 0x801   : > { %3501 = vmatprep.mubr.f32.mxu0 %v10912_v6 }
 0x804   : > { %5780 = vmatmul.mubr.msk.f32.gmra.mrb[166].mxu0 %vm1038_vm0, %v3154_v56 }
 0x805   : > { %5415 = vmatprep.mubr.f32.mxu0 %v10912_v6 }
 0x847   : > { %v3060_v54 = vpop.f32.mrb[96].mxu0 }
 0x848   : > { %v3062_v36 = vpop.f32.mrb[97].mxu0 }
 0x84b   : > { %v3066_v9 = vpop.f32.mrb[98].mxu0 }
 0x84c   : > { %v6150_v55 = vpack.c.bf16 %v3066_v9, %v3060_v54  ;;  %v3068_v16 = vpop.f32.mrb[99].mxu0 }
 0x84d   : > { %v6148_v32 = vpack.c.bf16 %v3068_v16, %v3062_v36 }
 0x84f   : > { %v3072_v8 = vpop.f32.mrb[100].mxu0  ;;  %6149 = vmatprep.subr.bf16.mxu0 %v6148_v32 }
 0x850   : > { %v3074_v45 = vpop.f32.mrb[101].mxu0  ;;  %6151 = vmatpush1.bf16.msra.mxu0 %v6150_v55 }
 0x853   : > { %v3078_v10 = vpop.f32.mrb[102].mxu0 }
 0x854   : > { %v6154_v17 = vpack.c.bf16 %v3078_v10, %v3072_v8  ;;  %v3080_v48 = vpop.f32.mrb[103].mxu0 }
 0x855   : > { %v6152_v61 = vpack.c.bf16 %v3080_v48, %v3074_v45 }
 0x857   : > { %6153 = vmatprep.subr.bf16.mxu0 %v6152_v61 }
 0x858   : > { %6155 = vmatpush1.bf16.msra.mxu0 %v6154_v17 }
 0x85b   : > { %v3317_v27 = vpop.f32.mrb[104].mxu0 }
 0x85c   : > { %v9111_v26 = vmul.f32 0.17677669, %v3317_v27  ;;  %v3319_v13 = vpop.f32.mrb[105].mxu0 }
 0x85d   : > { %v9113_v40 = vmul.f32 0.17677669, %v3319_v13 }
 0x85f   : > { %v3572_v3 = vmax.f32 %v9111_v26, %v9113_v40  ;;  %v3323_v41 = vpop.f32.mrb[106].mxu0 }
 0x860   : > { %v9117_v46 = vmul.f32 0.17677669, %v3323_v41  ;;  %v3325_v49 = vpop.f32.mrb[107].mxu0 }
 0x861   : > { %v9119_v59 = vmul.f32 0.17677669, %v3325_v49  ;;  %3573 = vmax.xlane.f32.xlu0 %v3572_v3 }
 0x863   : > { %v3575_v39 = vmax.f32 %v9117_v46, %v9119_v59  ;;  %v3329_v57 = vpop.f32.mrb[108].mxu0 }
 0x864   : > { %v9123_v15 = vmul.f32 0.17677669, %v3329_v57  ;;  %v3331_v44 = vpop.f32.mrb[109].mxu0 }
 0x865   : > { %v9125_v12 = vmul.f32 0.17677669, %v3331_v44  ;;  %3576 = vmax.xlane.f32.xlu1 %v3575_v39 }
 0x867   : > { %v3578_v35 = vmax.f32 %v9123_v15, %v9125_v12  ;;  %v3335_v63 = vpop.f32.mrb[110].mxu0 }
 0x868   : > { %v9129_v56 = vmul.f32 0.17677669, %v3335_v63  ;;  %v3337_v31 = vpop.f32.mrb[111].mxu0 }
 0x869   : > { %v9131_v47 = vmul.f32 0.17677669, %v3337_v31  ;;  %3579 = vmax.xlane.f32.xlu0 %v3578_v35 }
 0x86b   : > { %v3581_v54 = vmax.f32 %v9129_v56, %v9131_v47  ;;  %v3341_v36 = vpop.f32.mrb[112].mxu0 }
 0x86c   : > { %v9135_v9 = vmul.f32 0.17677669, %v3341_v36  ;;  %v3343_v55 = vpop.f32.mrb[113].mxu0 }
 0x86d   : > { %v9137_v16 = vmul.f32 0.17677669, %v3343_v55  ;;  %3582 = vmax.xlane.f32.xlu0 %v3581_v54 }
 0x86f   : > { %v3584_v32 = vmax.f32 %v9135_v9, %v9137_v16  ;;  %v3347_v8 = vpop.f32.mrb[114].mxu0 }
 0x870   : > { %v9141_v45 = vmul.f32 0.17677669, %v3347_v8  ;;  %v3349_v10 = vpop.f32.mrb[115].mxu0 }
 0x871   : > { %v9143_v17 = vmul.f32 0.17677669, %v3349_v10  ;;  %3585 = vmax.xlane.f32.xlu1 %v3584_v32 }
 0x873   : > { %v3587_v48 = vmax.f32 %v9141_v45, %v9143_v17  ;;  %v3353_v61 = vpop.f32.mrb[116].mxu0 }
 0x874   : > { %v9147_v27 = vmul.f32 0.17677669, %v3353_v61  ;;  %v3355_v13 = vpop.f32.mrb[117].mxu0 }
 0x875   : > { %v9149_v3 = vmul.f32 0.17677669, %v3355_v13  ;;  %3588 = vmax.xlane.f32.xlu0 %v3587_v48 }
 0x877   : > { %v3590_v41 = vmax.f32 %v9147_v27, %v9149_v3  ;;  %v3359_v49 = vpop.f32.mrb[118].mxu0 }
 0x878   : > { %v9153_v39 = vmul.f32 0.17677669, %v3359_v49  ;;  %v3361_v57 = vpop.f32.mrb[119].mxu0 }
 0x879   : > { %v9155_v44 = vmul.f32 0.17677669, %v3361_v57  ;;  %3591 = vmax.xlane.f32.xlu1 %v3590_v41 }
 0x87b   : > { %v3593_v35 = vmax.f32 %v9153_v39, %v9155_v44  ;;  %v3365_v63 = vpop.f32.mrb[120].mxu0 }
 0x87c   : > { %v9159_v31 = vmul.f32 0.17677669, %v3365_v63  ;;  %v3367_v54 = vpop.f32.mrb[121].mxu0 }
 0x87d   : > { %v9161_v36 = vmul.f32 0.17677669, %v3367_v54  ;;  %3594 = vmax.xlane.f32.xlu0 %v3593_v35 }
 0x87f   : > { %v3596_v55 = vmax.f32 %v9159_v31, %v9161_v36  ;;  %v3371_v32 = vpop.f32.mrb[122].mxu0 }
 0x880   : > { %v9165_v8 = vmul.f32 0.17677669, %v3371_v32  ;;  %v3373_v10 = vpop.f32.mrb[123].mxu0 }
 0x881   : > { %v9167_v48 = vmul.f32 0.17677669, %v3373_v10  ;;  %3597 = vmax.xlane.f32.xlu1 %v3596_v55 }
 0x883   : > { %v3599_v61 = vmax.f32 %v9165_v8, %v9167_v48  ;;  %v3377_v13 = vpop.f32.mrb[124].mxu0 }
 0x884   : > { %v9171_v41 = vmul.f32 0.17677669, %v3377_v13  ;;  %v3379_v49 = vpop.f32.mrb[125].mxu0 }
 0x885   : > { %v9173_v57 = vmul.f32 0.17677669, %v3379_v49  ;;  %3600 = vmax.xlane.f32.xlu0 %v3599_v61 }
 0x887   : > { %v3602_v35 = vmax.f32 %v9171_v41, %v9173_v57  ;;  %v3383_v63 = vpop.f32.mrb[126].mxu0 }
 0x888   : > { %v9177_v54 = vmul.f32 0.17677669, %v3383_v63  ;;  %v3385_v32 = vpop.f32.mrb[127].mxu0 }
 0x889   : > { %v9179_v10 = vmul.f32 0.17677669, %v3385_v32  ;;  %3603 = vmax.xlane.f32.xlu1 %v3602_v35 }
 0x88b   : > { %v3605_v55 = vmax.f32 %v9177_v54, %v9179_v10  ;;  %v3389_v25 = vpop.f32.mrb[128].mxu0 }
 0x88c   : > { %v9183_v13 = vmul.f32 0.17677669, %v3389_v25  ;;  %v3391_v52 = vpop.f32.mrb[129].mxu0 }
 0x88d   : > { %v9185_v49 = vmul.f32 0.17677669, %v3391_v52  ;;  %3606 = vmax.xlane.f32.xlu0 %v3605_v55 }
 0x88f   : > { %v3608_v61 = vmax.f32 %v9183_v13, %v9185_v49  ;;  %v3395_v53 = vpop.f32.mrb[130].mxu0 }
 0x890   : > { %v9189_v63 = vmul.f32 0.17677669, %v3395_v53  ;;  %v3397_v22 = vpop.f32.mrb[131].mxu0 }
 0x891   : > { %v9191_v32 = vmul.f32 0.17677669, %v3397_v22  ;;  %3609 = vmax.xlane.f32.xlu1 %v3608_v61 }
 0x893   : > { %v3611_v35 = vmax.f32 %v9189_v63, %v9191_v32  ;;  %v3401_v30 = vpop.f32.mrb[132].mxu0 }
 0x894   : > { %v9195_v25 = vmul.f32 0.17677669, %v3401_v30  ;;  %v3403_v58 = vpop.f32.mrb[133].mxu0 }
 0x895   : > { %v9197_v52 = vmul.f32 0.17677669, %v3403_v58  ;;  %3612 = vmax.xlane.f32.xlu0 %v3611_v35 }
 0x897   : > { %v3614_v55 = vmax.f32 %v9195_v25, %v9197_v52  ;;  %v3407_v20 = vpop.f32.mrb[134].mxu0 }
 0x898   : > { %v9201_v53 = vmul.f32 0.17677669, %v3407_v20  ;;  %v3409_v60 = vpop.f32.mrb[135].mxu0 }
 0x899   : > { %v9203_v22 = vmul.f32 0.17677669, %v3409_v60  ;;  %3615 = vmax.xlane.f32.xlu1 %v3614_v55 }
 0x89b   : > { %v3617_v61 = vmax.f32 %v9201_v53, %v9203_v22  ;;  %v3413_v6 = vpop.f32.mrb[136].mxu0 }
 0x89c   : > { %v9207_v30 = vmul.f32 0.17677669, %v3413_v6  ;;  %v3415_v0 = vpop.f32.mrb[137].mxu0 }
 0x89d   : > { %v9209_v58 = vmul.f32 0.17677669, %v3415_v0  ;;  %3618 = vmax.xlane.f32.xlu0 %v3617_v61 }
 0x89f   : > { %v3620_v35 = vmax.f32 %v9207_v30, %v9209_v58  ;;  %v3419_v14 = vpop.f32.mrb[138].mxu0 }
 0x8a0   : > { %v9213_v20 = vmul.f32 0.17677669, %v3419_v14  ;;  %v3421_v43 = vpop.f32.mrb[139].mxu0 }
 0x8a1   : > { %v9215_v60 = vmul.f32 0.17677669, %v3421_v43  ;;  %3621 = vmax.xlane.f32.xlu1 %v3620_v35 }
 0x8a3   : > { %v3623_v55 = vmax.f32 %v9213_v20, %v9215_v60  ;;  %v3425_v1 = vpop.f32.mrb[140].mxu0 }
 0x8a4   : > { %v9219_v6 = vmul.f32 0.17677669, %v3425_v1  ;;  %v3427_v11 = vpop.f32.mrb[141].mxu0 }
 0x8a5   : > { %v9221_v0 = vmul.f32 0.17677669, %v3427_v11  ;;  %3624 = vmax.xlane.f32.xlu0 %v3623_v55 }
 0x8a7   : > { %v3626_v61 = vmax.f32 %v9219_v6, %v9221_v0  ;;  %v3431_v2 = vpop.f32.mrb[142].mxu0 }
 0x8a8   : > { %v9225_v14 = vmul.f32 0.17677669, %v3431_v2  ;;  %v3433_v21 = vpop.f32.mrb[143].mxu0 }
 0x8a9   : > { %v9227_v43 = vmul.f32 0.17677669, %v3433_v21  ;;  %3627 = vmax.xlane.f32.xlu1 %v3626_v61 }
 0x8ab   : > { %v3629_v35 = vmax.f32 %v9225_v14, %v9227_v43  ;;  %v3437_v42 = vpop.f32.mrb[144].mxu0 }
 0x8ac   : > { %v9231_v1 = vmul.f32 0.17677669, %v3437_v42  ;;  %v3439_v19 = vpop.f32.mrb[145].mxu0 }
 0x8ad   : > { %v9233_v11 = vmul.f32 0.17677669, %v3439_v19  ;;  %3630 = vmax.xlane.f32.xlu0 %v3629_v35 }
 0x8af   : > { %v3632_v55 = vmax.f32 %v9231_v1, %v9233_v11  ;;  %v3443_v50 = vpop.f32.mrb[146].mxu0 }
 0x8b0   : > { %v9237_v2 = vmul.f32 0.17677669, %v3443_v50  ;;  %v3445_v33 = vpop.f32.mrb[147].mxu0 }
 0x8b1   : > { %v9239_v21 = vmul.f32 0.17677669, %v3445_v33  ;;  %3633 = vmax.xlane.f32.xlu1 %v3632_v55 }
 0x8b3   : > { %v3635_v61 = vmax.f32 %v9237_v2, %v9239_v21  ;;  %v3449_v38 = vpop.f32.mrb[148].mxu0 }
 0x8b4   : > { %v9243_v42 = vmul.f32 0.17677669, %v3449_v38  ;;  %v3451_v24 = vpop.f32.mrb[149].mxu0 }
 0x8b5   : > { %v9245_v19 = vmul.f32 0.17677669, %v3451_v24  ;;  %3636 = vmax.xlane.f32.xlu0 %v3635_v61 }
 0x8b7   : > { %v3638_v35 = vmax.f32 %v9243_v42, %v9245_v19  ;;  %v3455_v62 = vpop.f32.mrb[150].mxu0 }
 0x8b8   : > { %v9249_v50 = vmul.f32 0.17677669, %v3455_v62  ;;  %v3457_v18 = vpop.f32.mrb[151].mxu0 }
 0x8b9   : > { %v9251_v33 = vmul.f32 0.17677669, %v3457_v18  ;;  %3639 = vmax.xlane.f32.xlu1 %v3638_v35 }
 0x8bb   : > { %v3641_v55 = vmax.f32 %v9249_v50, %v9251_v33  ;;  %v3461_v51 = vpop.f32.mrb[152].mxu0 }
 0x8bc   : > { %v9255_v38 = vmul.f32 0.17677669, %v3461_v51  ;;  %v3463_v23 = vpop.f32.mrb[153].mxu0 }
 0x8bd   : > { %v9257_v24 = vmul.f32 0.17677669, %v3463_v23  ;;  %3642 = vmax.xlane.f32.xlu0 %v3641_v55 }
 0x8bf   : > { %v3644_v61 = vmax.f32 %v9255_v38, %v9257_v24  ;;  %v3467_v29 = vpop.f32.mrb[154].mxu0 }
 0x8c0   : > { %v9261_v62 = vmul.f32 0.17677669, %v3467_v29  ;;  %v3469_v5 = vpop.f32.mrb[155].mxu0 }
 0x8c1   : > { %v9263_v18 = vmul.f32 0.17677669, %v3469_v5  ;;  %3645 = vmax.xlane.f32.xlu1 %v3644_v61 }
 0x8c3   : > { %10942 = vst [vmem:[#allocation40_spill] sm:$0xff] %v9263_v18  ;;  %v3647_v35 = vmax.f32 %v9261_v62, %v9263_v18  ;;  %v3473_v28 = vpop.f32.mrb[156].mxu0 }
 0x8c4   : > { %v9267_v51 = vmul.f32 0.17677669, %v3473_v28  ;;  %v3475_v7 = vpop.f32.mrb[157].mxu0 }
 0x8c5   : > { %v9269_v23 = vmul.f32 0.17677669, %v3475_v7  ;;  %3648 = vmax.xlane.f32.xlu0 %v3647_v35 }
 0x8c6   : > { %10943 = vst [vmem:[#allocation15_spill] sm:$0xff] %v9267_v51 }
 0x8c7   : > { %10944 = vst [vmem:[#allocation46_spill] sm:$0xff] %v9269_v23  ;;  %v3650_v55 = vmax.f32 %v9267_v51, %v9269_v23  ;;  %v3479_v34 = vpop.f32.mrb[158].mxu0 }
 0x8c8   : > { %v9273_v29 = vmul.f32 0.17677669, %v3479_v34  ;;  %v3481_v37 = vpop.f32.mrb[159].mxu0 }
 0x8c9   : > { %v9275_v5 = vmul.f32 0.17677669, %v3481_v37  ;;  %3651 = vmax.xlane.f32.xlu1 %v3650_v55 }
 0x8ca   : > { %10945 = vst [vmem:[#allocation44_spill] sm:$0xff] %v9273_v29 }
 0x8cb   : > { %10946 = vst [vmem:[#allocation45_spill] sm:$0xff] %v9275_v5  ;;  %v3653_v61 = vmax.f32 %v9273_v29, %v9275_v5  ;;  %v3485_v4 = vpop.f32.mrb[160].mxu0 }
 0x8cc   : > { %v9279_v28 = vmul.f32 0.17677669, %v3485_v4  ;;  %v3487_v18 = vpop.f32.mrb[161].mxu0 }
 0x8cd   : > { %v9281_v7 = vmul.f32 0.17677669, %v3487_v18  ;;  %3654 = vmax.xlane.f32.xlu0 %v3653_v61 }
 0x8ce   : > { %10947 = vst [vmem:[#allocation43_spill] sm:$0xff] %v9279_v28 }
 0x8cf   : > { %10948 = vst [vmem:[#allocation31_spill] sm:$0xff] %v9281_v7  ;;  %v3656_v35 = vmax.f32 %v9279_v28, %v9281_v7  ;;  %v3491_v23 = vpop.f32.mrb[162].mxu0 }
 0x8d0   : > { %v9285_v34 = vmul.f32 0.17677669, %v3491_v23  ;;  %v3493_v51 = vpop.f32.mrb[163].mxu0 }
 0x8d1   : > { %v9287_v37 = vmul.f32 0.17677669, %v3493_v51  ;;  %3657 = vmax.xlane.f32.xlu1 %v3656_v35 }
 0x8d2   : > { %10949 = vst [vmem:[#allocation33_spill] sm:$0xff] %v9285_v34 }
 0x8d3   : > { %10950 = vst [vmem:[#allocation41_spill] sm:$0xff] %v9287_v37  ;;  %v3659_v55 = vmax.f32 %v9285_v34, %v9287_v37  ;;  %v3497_v5 = vpop.f32.mrb[164].mxu0  ;;  %v9305_v37 = vpop.permute.xlu1 %578 }
 0x8d4   : > { %v9291_v4 = vmul.f32 0.17677669, %v3497_v5  ;;  %v3499_v29 = vpop.f32.mrb[165].mxu0  ;;  %v9303_v5 = vpop.permute.xlu0 %568  ;;  %10956 = vst [vmem:[#allocation30_spill] sm:$0xff] %v9305_v37 }
 0x8d5   : > { %v9293_v18 = vmul.f32 0.17677669, %v3499_v29  ;;  %3660 = vmax.xlane.f32.xlu0 %v3659_v55  ;;  %10955 = vst [vmem:[#allocation47_spill] sm:$0xff] %v9303_v5 }
 0x8d6   : > { %10951 = vst [vmem:[#allocation24_spill] sm:$0xff] %v9291_v4 }
 0x8d7   : > { %10952 = vst [vmem:[#allocation28_spill] sm:$0xff] %v9293_v18  ;;  %v3662_v61 = vmax.f32 %v9291_v4, %v9293_v18  ;;  %v3503_v7 = vpop.f32.mrb[166].mxu0 }
 0x8d8   : > { %v9297_v23 = vmul.f32 0.17677669, %v3503_v7  ;;  %v3505_v28 = vpop.f32.mrb[167].mxu0 }
 0x8d9   : > { %v9299_v51 = vmul.f32 0.17677669, %v3505_v28  ;;  %3663 = vmax.xlane.f32.xlu1 %v3662_v61 }
 0x8da   : > { %10953 = vst [vmem:[#allocation29_spill] sm:$0xff] %v9297_v23 }
 0x8db   : > { %10954 = vst [vmem:[#allocation35_spill] sm:$0xff] %v9299_v51  ;;  %v3665_v35 = vmax.f32 %v9297_v23, %v9299_v51 }
 0x8dd   : > { %3666 = vmax.xlane.f32.xlu0 %v3665_v35 }
 0x8ee   : > { %v3574_v29 = vpop.xlane.xlu0 %3573 }
 0x8ef   : > { %v3668_v55 = vsub.f32 %v9111_v26, %v3574_v29  ;;  %v3669_v18 = vsub.f32 %v9113_v40, %v3574_v29 }
 0x8f1   : > { %v3732_v4 = vmul.f32 1.442695, %v3668_v55  ;;  %v3734_v7 = vmul.f32 1.442695, %v3669_v18 }
 0x8f2   : > { %v3577_v34 = vpop.xlane.xlu1 %3576 }
 0x8f3   : > { %6624 = vpow2.f32 %v3732_v4  ;;  %v3670_v28 = vsub.f32 %v9117_v46, %v3577_v34  ;;  %v3671_v61 = vsub.f32 %v9119_v59, %v3577_v34 }
 0x8f4   : > { %6626 = vpow2.f32 %v3734_v7 }
 0x8f5   : > { %v3736_v51 = vmul.f32 1.442695, %v3670_v28  ;;  %v3738_v35 = vmul.f32 1.442695, %v3671_v61 }
 0x8f6   : > { %v3580_v23 = vpop.xlane.xlu0 %3579 }
 0x8f7   : > { %6628 = vpow2.f32 %v3736_v51  ;;  %v3672_v37 = vsub.f32 %v9123_v15, %v3580_v23  ;;  %v3673_v5 = vsub.f32 %v9125_v12, %v3580_v23 }
 0x8f8   : > { %6630 = vpow2.f32 %v3738_v35 }
 0x8f9   : > { %v3740_v26 = vmul.f32 1.442695, %v3672_v37  ;;  %v3742_v40 = vmul.f32 1.442695, %v3673_v5 }
 0x8fa   : > { %v3583_v29 = vpop.xlane.xlu0 %3582 }
 0x8fb   : > { %6632 = vpow2.f32 %v3740_v26  ;;  %v3674_v4 = vsub.f32 %v9129_v56, %v3583_v29  ;;  %v3675_v46 = vsub.f32 %v9131_v47, %v3583_v29 }
 0x8fc   : > { %6634 = vpow2.f32 %v3742_v40 }
 0x8fd   : > { %v9315_v59 = vpop.eup %6624  ;;  %v3744_v34 = vmul.f32 1.442695, %v3674_v4  ;;  %v3746_v18 = vmul.f32 1.442695, %v3675_v46 }
 0x8fe   : > { %v9317_v55 = vpop.eup %6626  ;;  %v3586_v51 = vpop.xlane.xlu1 %3585 }
 0x8ff   : > { %6636 = vpow2.f32 %v3744_v34  ;;  %v3676_v15 = vsub.f32 %v9135_v9, %v3586_v51  ;;  %v3677_v12 = vsub.f32 %v9137_v16, %v3586_v51  ;;  %v3860_v37 = vadd.f32 %v9317_v55, %v9315_v59 }
 0x900   : > { %6638 = vpow2.f32 %v3746_v18 }
 0x901   : > { %v9323_v56 = vpop.eup %6628  ;;  %v3748_v47 = vmul.f32 1.442695, %v3676_v15  ;;  %v3750_v23 = vmul.f32 1.442695, %v3677_v12  ;;  %3861 = vadd.xlane.f32.xlu1 %v3860_v37  ;;  %v366_v37 = vld [vmem:[%s10524_s2 + $0x108] sm:$0xff] }
 0x902   : > { %v9325_v5 = vpop.eup %6630  ;;  %v3589_v7 = vpop.xlane.xlu0 %3588 }
 0x903   : > { %6640 = vpow2.f32 %v3748_v47  ;;  %v3678_v28 = vsub.f32 %v9141_v45, %v3589_v7  ;;  %v3679_v61 = vsub.f32 %v9143_v17, %v3589_v7  ;;  %v3863_v9 = vadd.f32 %v9325_v5, %v9323_v56  ;;  %v365_v47 = vld [vmem:[%s10524_s2 + $0x100] sm:$0xff] }
 0x904   : > { %6642 = vpow2.f32 %v3750_v23 }
 0x905   : > { %v9331_v16 = vpop.eup %6632  ;;  %v3752_v35 = vmul.f32 1.442695, %v3678_v28  ;;  %v3754_v26 = vmul.f32 1.442695, %v3679_v61  ;;  %3864 = vadd.xlane.f32.xlu0 %v3863_v9 }
 0x906   : > { %v9333_v40 = vpop.eup %6634  ;;  %v3592_v23 = vpop.xlane.xlu1 %3591 }
 0x907   : > { %6644 = vpow2.f32 %v3752_v35  ;;  %v3866_v29 = vadd.f32 %v9333_v40, %v9331_v16  ;;  %v3680_v28 = vsub.f32 %v9147_v27, %v3592_v23  ;;  %v3681_v61 = vsub.f32 %v9149_v3, %v3592_v23 }
 0x908   : > { %6646 = vpow2.f32 %v3754_v26 }
 0x909   : > { %v9337_v4 = vpop.eup %6636  ;;  %3867 = vadd.xlane.f32.xlu1 %v3866_v29 }
 0x90a   : > { %v9339_v45 = vpop.eup %6638  ;;  %v3595_v7 = vpop.xlane.xlu0 %3594 }
 0x90b   : > { %v3869_v17 = vadd.f32 %v9339_v45, %v9337_v4  ;;  %v3682_v35 = vsub.f32 %v9153_v39, %v3595_v7  ;;  %v3683_v26 = vsub.f32 %v9155_v44, %v3595_v7 }
 0x90d   : > { %v9343_v46 = vpop.eup %6640  ;;  %3870 = vadd.xlane.f32.xlu0 %v3869_v17  ;;  %v3756_v17 = vmul.f32 1.442695, %v3680_v28 }
 0x90e   : > { %10957 = vst [vmem:[#allocation32_spill] sm:$0xff] %v9343_v46  ;;  %v9345_v34 = vpop.eup %6642  ;;  %v3598_v9 = vpop.xlane.xlu1 %3597 }
 0x90f   : > { %v3872_v18 = vadd.f32 %v9345_v34, %v9343_v46  ;;  %v3760_v46 = vmul.f32 1.442695, %v3682_v35  ;;  %6648 = vpow2.f32 %v3756_v17 }
 0x911   : > { %v9349_v51 = vpop.eup %6644  ;;  %3873 = vadd.xlane.f32.xlu1 %v3872_v18  ;;  %v3684_v18 = vsub.f32 %v9159_v31, %v3598_v9 }
 0x912   : > { %10958 = vst [vmem:[#allocation60_spill] sm:$0xff] %v9349_v51  ;;  %v9351_v15 = vpop.eup %6646  ;;  %v3601_v29 = vpop.xlane.xlu0 %3600 }
 0x913   : > { %10959 = vst [vmem:[#allocation61_spill] sm:$0xff] %v9351_v15  ;;  %v3875_v12 = vadd.f32 %v9351_v15, %v9349_v51  ;;  %v3762_v15 = vmul.f32 1.442695, %v3683_v26  ;;  %v3687_v27 = vsub.f32 %v9167_v48, %v3601_v29  ;;  %v3764_v23 = vmul.f32 1.442695, %v3684_v18 }
 0x915   : > { %3876 = vadd.xlane.f32.xlu0 %v3875_v12  ;;  %v3758_v12 = vmul.f32 1.442695, %v3681_v61  ;;  %v3770_v61 = vmul.f32 1.442695, %v3687_v27 }
 0x916   : > { %v3604_v51 = vpop.xlane.xlu1 %3603 }
 0x917   : > { %v3688_v39 = vsub.f32 %v9171_v41, %v3604_v51  ;;  %6650 = vpow2.f32 %v3758_v12  ;;  %v3689_v7 = vsub.f32 %v9173_v57, %v3604_v51 }
 0x918   : > { %6652 = vpow2.f32 %v3760_v46 }
 0x919   : > { %6654 = vpow2.f32 %v3762_v15  ;;  %v3772_v48 = vmul.f32 1.442695, %v3688_v39  ;;  %v3774_v41 = vmul.f32 1.442695, %v3689_v7 }
 0x91a   : > { %v3607_v3 = vpop.xlane.xlu0 %3606  ;;  %6656 = vpow2.f32 %v3764_v23 }
 0x91e   : > { %v3610_v31 = vpop.xlane.xlu1 %3609 }
 0x91f   : > { %v3692_v35 = vsub.f32 %v9183_v13, %v3610_v31  ;;  %v3693_v26 = vsub.f32 %v9185_v49, %v3610_v31  ;;  %v9379_v49 = vpop.eup %6648 }
 0x921   : > { %v3782_v13 = vmul.f32 1.442695, %v3693_v26 }
 0x922   : > { %548 = vperm.xlu1 %6239, %v366_v37   ;;  %v3685_v37 = vsub.f32 %v9161_v36, %v3598_v9  ;;  %v3690_v36 = vsub.f32 %v9177_v54, %v3607_v3  ;;  %v3613_v9 = vpop.xlane.xlu0 %3612 }
 0x923   : > { %v3694_v46 = vsub.f32 %v9189_v63, %v3613_v9  ;;  %v3695_v51 = vsub.f32 %v9191_v32, %v3613_v9 }
 0x924   : > { %v3766_v44 = vmul.f32 1.442695, %v3685_v37  ;;  %v3776_v57 = vmul.f32 1.442695, %v3690_v36 }
 0x925   : > { %v3784_v37 = vmul.f32 1.442695, %v3694_v46  ;;  %v3786_v32 = vmul.f32 1.442695, %v3695_v51 }
 0x926   : > { %6658 = vpow2.f32 %v3766_v44 }
 0x92a   : > { %v3619_v15 = vpop.xlane.xlu0 %3618 }
 0x92b   : > { %543 = vperm.xlu0 %6238, %v365_v47   ;;  %v3686_v47 = vsub.f32 %v9165_v8, %v3601_v29  ;;  %v3691_v8 = vsub.f32 %v9179_v10, %v3607_v3  ;;  %v3616_v29 = vpop.xlane.xlu1 %3615  ;;  %v3780_v10 = vmul.f32 1.442695, %v3692_v35  ;;  %v3698_v63 = vsub.f32 %v9201_v53, %v3619_v15 }
 0x92c   : > { %v3696_v17 = vsub.f32 %v9195_v25, %v3616_v29  ;;  %v3697_v18 = vsub.f32 %v9197_v52, %v3616_v29  ;;  %v3699_v27 = vsub.f32 %v9203_v22, %v3619_v15 }
 0x92d   : > { %v3768_v28 = vmul.f32 1.442695, %v3686_v47  ;;  %v3778_v54 = vmul.f32 1.442695, %v3691_v8  ;;  %v9382_v47 = vpop.eup %6650 }
 0x92e   : > { %v9385_v23 = vpop.eup %6652  ;;  %v3788_v25 = vmul.f32 1.442695, %v3696_v17  ;;  %v3790_v44 = vmul.f32 1.442695, %v3697_v18  ;;  %v3878_v36 = vadd.f32 %v9382_v47, %v9379_v49 }
 0x92f   : > { %6660 = vpow2.f32 %v3768_v28  ;;  %v3622_v12 = vpop.xlane.xlu1 %3621  ;;  %v9388_v39 = vpop.eup %6654  ;;  %v3792_v28 = vmul.f32 1.442695, %v3698_v63 }
 0x930   : > { %6662 = vpow2.f32 %v3770_v61  ;;  %v3700_v52 = vsub.f32 %v9207_v30, %v3622_v12  ;;  %v3701_v7 = vsub.f32 %v9209_v58, %v3622_v12  ;;  %v9391_v31 = vpop.eup %6656  ;;  %v3794_v30 = vmul.f32 1.442695, %v3699_v27 }
 0x931   : > { %6664 = vpow2.f32 %v3772_v48  ;;  %v9396_v61 = vpop.eup %6658 }
 0x932   : > { %6666 = vpow2.f32 %v3774_v41  ;;  %v3625_v3 = vpop.xlane.xlu0 %3624  ;;  %v3796_v58 = vmul.f32 1.442695, %v3700_v52 }
 0x933   : > { %6668 = vpow2.f32 %v3776_v57  ;;  %v3702_v22 = vsub.f32 %v9213_v20, %v3625_v3  ;;  %v3703_v8 = vsub.f32 %v9215_v60, %v3625_v3  ;;  %v3798_v20 = vmul.f32 1.442695, %v3701_v7 }
 0x934   : > { %6670 = vpow2.f32 %v3778_v54  ;;  %v3881_v57 = vadd.f32 %v9388_v39, %v9385_v23 }
 0x935   : > { %6672 = vpow2.f32 %v3780_v10  ;;  %v3800_v60 = vmul.f32 1.442695, %v3702_v22  ;;  %v3802_v15 = vmul.f32 1.442695, %v3703_v8 }
 0x936   : > { %6674 = vpow2.f32 %v3782_v13  ;;  %v3628_v53 = vpop.xlane.xlu1 %3627 }
 0x937   : > { %6676 = vpow2.f32 %v3784_v37  ;;  %v3704_v35 = vsub.f32 %v9219_v6, %v3628_v53  ;;  %v3705_v26 = vsub.f32 %v9221_v0, %v3628_v53  ;;  %v3884_v6 = vadd.f32 %v9396_v61, %v9391_v31 }
 0x938   : > { %6678 = vpow2.f32 %v3786_v32 }
 0x939   : > { %v9399_v48 = vpop.eup %6660  ;;  %6680 = vpow2.f32 %v3788_v25  ;;  %v3804_v13 = vmul.f32 1.442695, %v3704_v35 }
 0x93a   : > { %v3631_v9 = vpop.xlane.xlu0 %3630  ;;  %v9402_v41 = vpop.eup %6662  ;;  %6682 = vpow2.f32 %v3790_v44 }
 0x93b   : > { %v9407_v46 = vpop.eup %6664  ;;  %6684 = vpow2.f32 %v3792_v28  ;;  %v3706_v54 = vsub.f32 %v9225_v14, %v3631_v9  ;;  %v3707_v10 = vsub.f32 %v9227_v43, %v3631_v9  ;;  %v3806_v14 = vmul.f32 1.442695, %v3705_v26 }
 0x93c   : > { %v9412_v51 = vpop.eup %6666  ;;  %6686 = vpow2.f32 %v3794_v30  ;;  %v3887_v32 = vadd.f32 %v9402_v41, %v9399_v48 }
 0x93d   : > { %v9415_v17 = vpop.eup %6668  ;;  %6688 = vpow2.f32 %v3796_v58  ;;  %v3808_v27 = vmul.f32 1.442695, %v3706_v54  ;;  %v3810_v52 = vmul.f32 1.442695, %v3707_v10 }
 0x93e   : > { %v3634_v29 = vpop.xlane.xlu1 %3633  ;;  %v9418_v12 = vpop.eup %6670  ;;  %6690 = vpow2.f32 %v3798_v20 }
 0x93f   : > { %v3708_v18 = vsub.f32 %v9231_v1, %v3634_v29  ;;  %v3709_v37 = vsub.f32 %v9233_v11, %v3634_v29  ;;  %v9423_v43 = vpop.eup %6672  ;;  %6692 = vpow2.f32 %v3800_v60  ;;  %v3890_v1 = vadd.f32 %v9412_v51, %v9407_v46 }
 0x940   : > { %v9428_v25 = vpop.eup %6674  ;;  %6694 = vpow2.f32 %v3802_v15  ;;  %v3893_v8 = vadd.f32 %v9418_v12, %v9415_v17 }
 0x941   : > { %v9431_v7 = vpop.eup %6676  ;;  %6696 = vpow2.f32 %v3804_v13  ;;  %v3812_v53 = vmul.f32 1.442695, %v3708_v18 }
 0x942   : > { %v3637_v0 = vpop.xlane.xlu0 %3636  ;;  %v9434_v22 = vpop.eup %6678  ;;  %6698 = vpow2.f32 %v3806_v14  ;;  %v10960_v14 = vld [vmem:[#allocation40_spill] sm:$0xff] }
 0x943   : > { %v3710_v3 = vsub.f32 %v9237_v2, %v3637_v0  ;;  %v3711_v44 = vsub.f32 %v9239_v21, %v3637_v0  ;;  %v3814_v2 = vmul.f32 1.442695, %v3709_v37  ;;  %v9439_v21 = vpop.eup %6680  ;;  %6700 = vpow2.f32 %v3808_v27 }
 0x944   : > { %v9444_v35 = vpop.eup %6682  ;;  %6702 = vpow2.f32 %v3810_v52  ;;  %v3899_v15 = vadd.f32 %v9434_v22, %v9431_v7  ;;  %v10962_v52 = vld [vmem:[#allocation46_spill] sm:$0xff] }
 0x945   : > { %v3816_v9 = vmul.f32 1.442695, %v3710_v3  ;;  %v3818_v20 = vmul.f32 1.442695, %v3711_v44  ;;  %6704 = vpow2.f32 %v3812_v53  ;;  %v10961_v3 = vld [vmem:[#allocation15_spill] sm:$0xff] }
 0x946   : > { %3879 = vadd.xlane.f32.xlu1 %v3878_v36  ;;  %v3640_v63 = vpop.xlane.xlu1 %3639  ;;  %6706 = vpow2.f32 %v3814_v2 }
 0x947   : > { %v3712_v28 = vsub.f32 %v9243_v42, %v3640_v63  ;;  %v3713_v36 = vsub.f32 %v9245_v19, %v3640_v63  ;;  %v3896_v42 = vadd.f32 %v9428_v25, %v9423_v43  ;;  %v9447_v19 = vpop.eup %6684  ;;  %6708 = vpow2.f32 %v3816_v9 }
 0x948   : > { %v9450_v54 = vpop.eup %6686  ;;  %6710 = vpow2.f32 %v3818_v20 }
 0x949   : > { %v3820_v29 = vmul.f32 1.442695, %v3712_v28  ;;  %v9455_v10 = vpop.eup %6688  ;;  %v3905_v2 = vadd.f32 %v9450_v54, %v9447_v19 }
 0x94a   : > { %3885 = vadd.xlane.f32.xlu1 %v3884_v6  ;;  %3882 = vadd.xlane.f32.xlu0 %v3881_v57  ;;  %v3643_v11 = vpop.xlane.xlu0 %3642  ;;  %v9460_v13 = vpop.eup %6690 }
 0x94b   : > { %v3714_v58 = vsub.f32 %v9249_v50, %v3643_v11  ;;  %v3715_v26 = vsub.f32 %v9251_v33, %v3643_v11  ;;  %v3822_v50 = vmul.f32 1.442695, %v3713_v36  ;;  %v9463_v63 = vpop.eup %6692  ;;  %6712 = vpow2.f32 %v3820_v29 }
 0x94c   : > { %v9465_v27 = vpop.eup %6694  ;;  %v3908_v28 = vadd.f32 %v9460_v13, %v9455_v10 }
 0x94d   : > { %v3824_v33 = vmul.f32 1.442695, %v3714_v58  ;;  %v3826_v18 = vmul.f32 1.442695, %v3715_v26  ;;  %6714 = vpow2.f32 %v3822_v50  ;;  %v9469_v11 = vpop.eup %6696  ;;  %v10963_v26 = vld [vmem:[#allocation44_spill] sm:$0xff] }
 0x94e   : > { %3891 = vadd.xlane.f32.xlu1 %v3890_v1  ;;  %3888 = vadd.xlane.f32.xlu0 %v3887_v32  ;;  %v3646_v30 = vpop.xlane.xlu1 %3645  ;;  %v9475_v36 = vpop.eup %6698 }
 0x94f   : > { %v3716_v57 = vsub.f32 %v9255_v38, %v3646_v30  ;;  %v3717_v6 = vsub.f32 %v9257_v24, %v3646_v30  ;;  %v3902_v38 = vadd.f32 %v9444_v35, %v9439_v21  ;;  %6716 = vpow2.f32 %v3824_v33 }
 0x950   : > { %6718 = vpow2.f32 %v3826_v18 }
 0x951   : > { %v3828_v24 = vmul.f32 1.442695, %v3716_v57  ;;  %v10964_v57 = vld [vmem:[#allocation45_spill] sm:$0xff] }
 0x952   : > { %3897 = vadd.xlane.f32.xlu1 %v3896_v42  ;;  %3894 = vadd.xlane.f32.xlu0 %v3893_v8  ;;  %v3649_v60 = vpop.xlane.xlu0 %3648  ;;  %v9477_v8 = vpop.eup %6700 }
 0x953   : > { %v3718_v0 = vsub.f32 %v9261_v62, %v3649_v60  ;;  %v3719_v37 = vsub.f32 %v10960_v14, %v3649_v60  ;;  %v3830_v62 = vmul.f32 1.442695, %v3717_v6  ;;  %6720 = vpow2.f32 %v3828_v24  ;;  %v9479_v42 = vpop.eup %6702  ;;  %v10965_v24 = vld [vmem:[#allocation43_spill] sm:$0xff] }
 0x954   : > { %v9483_v50 = vpop.eup %6704  ;;  %v3914_v6 = vadd.f32 %v9475_v36, %v9469_v11 }
 0x955   : > { %v3832_v53 = vmul.f32 1.442695, %v3718_v0  ;;  %v3834_v30 = vmul.f32 1.442695, %v3719_v37  ;;  %6722 = vpow2.f32 %v3830_v62  ;;  %v9489_v33 = vpop.eup %6706  ;;  %v10966_v62 = vld [vmem:[#allocation31_spill] sm:$0xff] }
 0x956   : > { %3903 = vadd.xlane.f32.xlu1 %v3902_v38  ;;  %3900 = vadd.xlane.f32.xlu0 %v3899_v15  ;;  %v3652_v32 = vpop.xlane.xlu1 %3651  ;;  %v3911_v15 = vadd.f32 %v9465_v27, %v9463_v63  ;;  %v9491_v38 = vpop.eup %6708 }
 0x957   : > { %v3720_v1 = vsub.f32 %v10961_v3, %v3652_v32  ;;  %v3721_v44 = vsub.f32 %v10962_v52, %v3652_v32  ;;  %6724 = vpow2.f32 %v3832_v53  ;;  %v9493_v37 = vpop.eup %6710  ;;  %v3920_v52 = vadd.f32 %v9489_v33, %v9483_v50 }
 0x958   : > { %6726 = vpow2.f32 %v3834_v30 }
 0x959   : > { %v3836_v9 = vmul.f32 1.442695, %v3720_v1  ;;  %v3838_v20 = vmul.f32 1.442695, %v3721_v44  ;;  %v9497_v1 = vpop.eup %6712  ;;  %v3917_v44 = vadd.f32 %v9479_v42, %v9477_v8 }
 0x95a   : > { %3909 = vadd.xlane.f32.xlu1 %v3908_v28  ;;  %3906 = vadd.xlane.f32.xlu0 %v3905_v2  ;;  %v3655_v58 = vpop.xlane.xlu0 %3654  ;;  %v9503_v53 = vpop.eup %6714 }
 0x95b   : > { %v3722_v29 = vsub.f32 %v10963_v26, %v3655_v58  ;;  %v3723_v60 = vsub.f32 %v10964_v57, %v3655_v58  ;;  %6728 = vpow2.f32 %v3836_v9  ;;  %v9505_v30 = vpop.eup %6716 }
 0x95c   : > { %6730 = vpow2.f32 %v3838_v20  ;;  %v9507_v58 = vpop.eup %6718  ;;  %v10967_v20 = vld [vmem:[#allocation33_spill] sm:$0xff] }
 0x95d   : > { %v3840_v0 = vmul.f32 1.442695, %v3722_v29  ;;  %v3842_v18 = vmul.f32 1.442695, %v3723_v60  ;;  %v10968_v29 = vld [vmem:[#allocation41_spill] sm:$0xff]  ;;  %v9511_v60 = vpop.eup %6720 }
 0x95e   : > { %3915 = vadd.xlane.f32.xlu1 %v3914_v6  ;;  %3912 = vadd.xlane.f32.xlu0 %v3911_v15  ;;  %v3658_v14 = vpop.xlane.xlu1 %3657  ;;  %10969 = vst [vmem:[#allocation40_spill] sm:$0xff] %v9511_v60  ;;  %v3926_v6 = vadd.f32 %v9503_v53, %v9497_v1  ;;  %v3923_v15 = vadd.f32 %v9493_v37, %v9491_v38 }
 0x95f   : > { %v3724_v32 = vsub.f32 %v10965_v24, %v3658_v14  ;;  %v3725_v3 = vsub.f32 %v10966_v62, %v3658_v14  ;;  %6732 = vpow2.f32 %v3840_v0  ;;  %v9517_v0 = vpop.eup %6722 }
 0x960   : > { %6734 = vpow2.f32 %v3842_v18  ;;  %10970 = vst [vmem:[#allocation15_spill] sm:$0xff] %v9517_v0 }
 0x961   : > { %v3844_v28 = vmul.f32 1.442695, %v3724_v32  ;;  %v3846_v2 = vmul.f32 1.442695, %v3725_v3  ;;  %v9519_v24 = vpop.eup %6724  ;;  %v3932_v3 = vadd.f32 %v9517_v0, %v9511_v60 }
 0x962   : > { %3921 = vadd.xlane.f32.xlu1 %v3920_v52  ;;  %3918 = vadd.xlane.f32.xlu0 %v3917_v44  ;;  %v3661_v9 = vpop.xlane.xlu0 %3660  ;;  %10971 = vst [vmem:[#allocation46_spill] sm:$0xff] %v9519_v24  ;;  %v9521_v32 = vpop.eup %6726  ;;  %v3929_v52 = vadd.f32 %v9507_v58, %v9505_v30 }
 0x963   : > { %6736 = vpow2.f32 %v3844_v28  ;;  %v3726_v26 = vsub.f32 %v10967_v20, %v3661_v9  ;;  %v3727_v57 = vsub.f32 %v10968_v29, %v3661_v9  ;;  %v3935_v20 = vadd.f32 %v9521_v32, %v9519_v24 }
 0x964   : > { %6738 = vpow2.f32 %v3846_v2 }
 0x965   : > { %v3848_v18 = vmul.f32 1.442695, %v3726_v26  ;;  %v3850_v14 = vmul.f32 1.442695, %v3727_v57  ;;  %v9523_v62 = vpop.eup %6728 }
 0x966   : > { %3927 = vadd.xlane.f32.xlu1 %v3926_v6  ;;  %3924 = vadd.xlane.f32.xlu0 %v3923_v15  ;;  %10972 = vst [vmem:[#allocation44_spill] sm:$0xff] %v9523_v62  ;;  %v9529_v44 = vpop.eup %6730 }
 0x967   : > { %6740 = vpow2.f32 %v3848_v18  ;;  %10973 = vst [vmem:[#allocation45_spill] sm:$0xff] %v9529_v44  ;;  %v3938_v9 = vadd.f32 %v9529_v44, %v9523_v62 }
 0x968   : > { %6742 = vpow2.f32 %v3850_v14 }
 0x969   : > { %v9531_v28 = vpop.eup %6732 }
 0x96a   : > { %3933 = vadd.xlane.f32.xlu1 %v3932_v3  ;;  %3930 = vadd.xlane.f32.xlu0 %v3929_v52  ;;  %10974 = vst [vmem:[#allocation43_spill] sm:$0xff] %v9531_v28  ;;  %v9533_v2 = vpop.eup %6734  ;;  %v374_v3 = vld [vmem:[%s10524_s2 + $0x148] sm:$0xff]  ;;  %v373_v52 = vld [vmem:[%s10524_s2 + $0x140] sm:$0xff] }
 0x96b   : > { %10975 = vst [vmem:[#allocation31_spill] sm:$0xff] %v9533_v2  ;;  %v3941_v6 = vadd.f32 %v9533_v2, %v9531_v28 }
 0x96d   : > { %v9539_v26 = vpop.eup %6736 }
 0x96e   : > { %10976 = vst [vmem:[#allocation33_spill] sm:$0xff] %v9539_v26  ;;  %v9541_v29 = vpop.eup %6738  ;;  %3939 = vadd.xlane.f32.xlu1 %v3938_v9  ;;  %3936 = vadd.xlane.f32.xlu0 %v3935_v20  ;;  %v3664_v9 = vpop.xlane.xlu1 %3663 }
 0x96f   : > { %10977 = vst [vmem:[#allocation41_spill] sm:$0xff] %v9541_v29  ;;  %v3944_v57 = vadd.f32 %v9541_v29, %v9539_v26  ;;  %v3667_v20 = vpop.xlane.xlu0 %3666  ;;  %v10980_v29 = vld [vmem:[#allocation24_spill] sm:$0xff] }
 0x971   : > { %v9547_v15 = vpop.eup %6740 }
 0x972   : > { %10978 = vst [vmem:[#allocation62_spill] sm:$0xff] %v9547_v15  ;;  %v9549_v18 = vpop.eup %6742  ;;  %3945 = vadd.xlane.f32.xlu1 %v3944_v57  ;;  %3942 = vadd.xlane.f32.xlu0 %v3941_v6  ;;  %v3728_v57 = vsub.f32 %v10980_v29, %v3664_v9  ;;  %v10981_v6 = vld [vmem:[#allocation28_spill] sm:$0xff] }
 0x973   : > { %10979 = vst [vmem:[#allocation63_spill] sm:$0xff] %v9549_v18  ;;  %v3947_v14 = vadd.f32 %v9549_v18, %v9547_v15  ;;  %v3729_v62 = vsub.f32 %v10981_v6, %v3664_v9  ;;  %v10982_v15 = vld [vmem:[#allocation29_spill] sm:$0xff] }
 0x974   : > { %v3852_v28 = vmul.f32 1.442695, %v3728_v57 }
 0x975   : > { %v3854_v44 = vmul.f32 1.442695, %v3729_v62 }
 0x976   : > { %3948 = vadd.xlane.f32.xlu0 %v3947_v14  ;;  %v3730_v14 = vsub.f32 %v10982_v15, %v3667_v20 }
 0x978   : > { %v3856_v2 = vmul.f32 1.442695, %v3730_v14 }
 0x983   : > { %588 = vperm.xlu1 %6239, %v374_v3   ;;  %v10983_v3 = vld [vmem:[#allocation35_spill] sm:$0xff] }
 0x984   : > { %v3731_v60 = vsub.f32 %v10983_v3, %v3667_v20 }
 0x98c   : > { %583 = vperm.xlu0 %6238, %v373_v52   ;;  %v3858_v52 = vmul.f32 1.442695, %v3731_v60 }
 0x98e   : > { %v3862_v26 = vpop.xlane.xlu1 %3861 }
 0x98f   : > { %6744 = vrcp.f32 %v3862_v26 }
 0x992   : > { %v3865_v18 = vpop.xlane.xlu0 %3864 }
 0x993   : > { %6746 = vrcp.f32 %v3865_v18 }
 0x994   : > { %6748 = vpow2.f32 %v3852_v28 }
 0x995   : > { %6750 = vpow2.f32 %v3854_v44 }
 0x996   : > { %v3868_v24 = vpop.xlane.xlu1 %3867 }
 0x997   : > { %6752 = vrcp.f32 %v3868_v24 }
 0x998   : > { %6754 = vpow2.f32 %v3856_v2 }
 0x999   : > { %v6745_v29 = vpop.eup %6744 }
 0x99a   : > { %v3871_v0 = vpop.xlane.xlu0 %3870  ;;  %v3989_v15 = vmul.f32 %v6745_v29, %v9317_v55  ;;  %v3988_v62 = vmul.f32 %v6745_v29, %v9315_v59 }
 0x99b   : > { %6756 = vrcp.f32 %v3871_v0 }
 0x99c   : > { %6758 = vpow2.f32 %v3858_v52 }
 0x99d   : > { %v6747_v26 = vpop.eup %6746 }
 0x99e   : > { %v3874_v9 = vpop.xlane.xlu1 %3873  ;;  %v3991_v18 = vmul.f32 %v6747_v26, %v9325_v5  ;;  %v3990_v20 = vmul.f32 %v6747_v26, %v9323_v56  ;;  %v9567_v44 = vpop.eup %6748 }
 0x99f   : > { %6760 = vrcp.f32 %v3874_v9  ;;  %v9569_v60 = vpop.eup %6750 }
 0x9a0   : > { %v6004_v57 = vpack.c.bf16 %v3991_v18, %v3989_v15  ;;  %v6006_v28 = vpack.c.bf16 %v3990_v20, %v3988_v62  ;;  %v3950_v59 = vadd.f32 %v9569_v60, %v9567_v44  ;;  %v10984_v18 = vld [vmem:[#allocation17_spill] sm:$0xff]  ;;  %v10986_v20 = vld [vmem:[#allocation32_spill] sm:$0xff] }
 0x9a1   : > { %v6753_v24 = vpop.eup %6752 }
 0x9a2   : > { %6005 = vmatprep.subr.bf16.mxu1 %v6004_v57  ;;  %v3877_v0 = vpop.xlane.xlu0 %3876  ;;  %v9571_v2 = vpop.eup %6754  ;;  %v3993_v56 = vmul.f32 %v6753_v24, %v9333_v40  ;;  %v3992_v14 = vmul.f32 %v6753_v24, %v9331_v16 }
 0x9a3   : > { %6762 = vrcp.f32 %v3877_v0  ;;  %6007 = vmatpush1.bf16.xpose.msra.mxu1 %v6006_v28  ;;  %v10987_v28 = vld [vmem:[#allocation60_spill] sm:$0xff] }
 0x9a5   : > { %v6757_v55 = vpop.eup %6756 }
 0x9a6   : > { %v9575_v5 = vpop.eup %6758  ;;  %v3995_v6 = vmul.f32 %v6757_v55, %v9339_v45  ;;  %v3994_v3 = vmul.f32 %v6757_v55, %v9337_v4  ;;  %v10985_v4 = vld [vmem:[#allocation61_spill] sm:$0xff] }
 0x9a7   : > { %3951 = vadd.xlane.f32.xlu1 %v3950_v59  ;;  %v3953_v26 = vadd.f32 %v9575_v5, %v9571_v2  ;;  %v375_v59 = vld [vmem:[%s10524_s2 + $0x150] sm:$0xff] }
 0x9a8   : > { %v6008_v52 = vpack.c.bf16 %v3995_v6, %v3993_v56  ;;  %v6010_v29 = vpack.c.bf16 %v3994_v3, %v3992_v14  ;;  %v368_v56 = vld [vmem:[%s10524_s2 + $0x118] sm:$0xff]  ;;  %v9603_v14 = vpop.permute.xlu1 %548 }
 0x9a9   : > { %v6761_v15 = vpop.eup %6760  ;;  %v376_v6 = vld [vmem:[%s10524_s2 + $0x158] sm:$0xff] }
 0x9aa   : > { %6009 = vmatprep.subr.bf16.mxu1 %v6008_v52  ;;  %v9583_v9 = vpop.permute.xlu0 %543  ;;  %v3997_v16 = vmul.f32 %v6761_v15, %v9345_v34  ;;  %v3996_v57 = vmul.f32 %v6761_v15, %v10986_v20  ;;  %v367_v34 = vld [vmem:[%s10524_s2 + $0x110] sm:$0xff] }
 0x9ab   : > { %v882_v62 = vadd.f32 %v10984_v18, %v9583_v9  ;;  %3954 = vadd.xlane.f32.xlu0 %v3953_v26  ;;  %6011 = vmatpush1.bf16.xpose.msra.mxu1 %v6010_v29 }
 0x9ad   : > { %v6763_v40 = vpop.eup %6762  ;;  %4116 = vmatprep.mubr.f32.mxu1 %v882_v62 }
 0x9ae   : > { %v3999_v45 = vmul.f32 %v6763_v40, %v10985_v4  ;;  %v3998_v0 = vmul.f32 %v6763_v40, %v10987_v28 }
 0x9b0   : > { %v6012_v24 = vpack.c.bf16 %v3999_v45, %v3997_v16  ;;  %v6014_v55 = vpack.c.bf16 %v3998_v0, %v3996_v57  ;;  %v10988_v45 = vld [vmem:[#allocation57_spill] sm:$0xff] }
 0x9b2   : > { %6013 = vmatprep.subr.bf16.mxu1 %v6012_v24 }
 0x9b3   : > { %6015 = vmatpush1.bf16.xpose.msra.mxu1 %v6014_v55 }
 0x9b8   : > { %593 = vperm.xlu1 %6239, %v375_v59   ;;  %v10989_v59 = vld [vmem:[#allocation47_spill] sm:$0xff] }
 0x9bc   : > { %558 = vperm.xlu1 %6239, %v368_v56   ;;  %v10990_v56 = vld [vmem:[#allocation20_spill] sm:$0xff] }
 0x9c1   : > { %553 = vperm.xlu0 %6238, %v367_v34   ;;  %v910_v34 = vadd.f32 %v10990_v56, %v10989_v59  ;;  %v10996_v56 = vld [vmem:[#allocation39_spill] sm:$0xff] }
 0x9c5   : > { %598 = vperm.xlu0 %6238, %v376_v6   ;;  %v10991_v6 = vld [vmem:[#allocation58_spill] sm:$0xff] }
 0x9d3   : > { %v3880_v3 = vpop.xlane.xlu1 %3879 }
 0x9d4   : > { %6764 = vrcp.f32 %v3880_v3 }
 0x9d7   : > { %v3886_v52 = vpop.xlane.xlu1 %3885  ;;  %v3883_v29 = vpop.xlane.xlu0 %3882 }
 0x9d8   : > { %6766 = vrcp.f32 %v3883_v29 }
 0x9d9   : > { %6768 = vrcp.f32 %v3886_v52 }
 0x9db   : > { %v3892_v26 = vpop.xlane.xlu1 %3891  ;;  %v3889_v15 = vpop.xlane.xlu0 %3888 }
 0x9dc   : > { %6770 = vrcp.f32 %v3889_v15 }
 0x9dd   : > { %6772 = vrcp.f32 %v3892_v26  ;;  %v10992_v26 = vld [vmem:[#allocation22_spill] sm:$0xff] }
 0x9de   : > { %v6765_v40 = vpop.eup %6764  ;;  %v912_v15 = vadd.f32 %v10992_v26, %v10989_v59  ;;  %v10995_v59 = vld [vmem:[#allocation25_spill] sm:$0xff] }
 0x9df   : > { %v3898_v18 = vpop.xlane.xlu1 %3897  ;;  %v3895_v62 = vpop.xlane.xlu0 %3894  ;;  %v4001_v57 = vmul.f32 %v6765_v40, %v9382_v47  ;;  %v4000_v0 = vmul.f32 %v6765_v40, %v9379_v49 }
 0x9e0   : > { %6774 = vrcp.f32 %v3895_v62 }
 0x9e2   : > { %v6767_v16 = vpop.eup %6766 }
 0x9e3   : > { %v3904_v4 = vpop.xlane.xlu1 %3903  ;;  %4149 = vxpose.xlu0.b32.start [1/4] (short) %v10988_v45, 128  ;;  %v3901_v20 = vpop.xlane.xlu0 %3900  ;;  %v4003_v28 = vmul.f32 %v6767_v16, %v9388_v39  ;;  %v4002_v24 = vmul.f32 %v6767_v16, %v9385_v23 }
 0x9e4   : > { %v6769_v55 = vpop.eup %6768  ;;  %6776 = vrcp.f32 %v3901_v20 }
 0x9e5   : > { %4181 = vxpose.xlu1.b32.start [1/4] (short) %v10991_v6, 128  ;;  %v6016_v3 = vpack.c.bf16 %v4003_v28, %v4001_v57  ;;  %v6018_v52 = vpack.c.bf16 %v4002_v24, %v4000_v0  ;;  %v4005_v49 = vmul.f32 %v6769_v55, %v9396_v61  ;;  %6778 = vrcp.f32 %v3898_v18  ;;  %v10993_v57 = vld [vmem:[#allocation56_spill] sm:$0xff]  ;;  %v10994_v24 = vld [vmem:[#allocation30_spill] sm:$0xff] }
 0x9e6   : > { %v6771_v29 = vpop.eup %6770  ;;  %v922_v61 = vadd.f32 %v10995_v59, %v10994_v24 }
 0x9e7   : > { %v3910_v47 = vpop.xlane.xlu1 %3909  ;;  %4150 = vxpose.xlu0.b32.cont [2/4] (short) %v910_v34, 128  ;;  %v3907_v39 = vpop.xlane.xlu0 %3906  ;;  %6017 = vmatprep.subr.bf16.mxu1 %v6016_v3  ;;  %v4007_v23 = vmul.f32 %v6771_v29, %v9402_v41  ;;  %v4006_v20 = vmul.f32 %v6771_v29, %v9399_v48  ;;  %v4004_v41 = vmul.f32 %v6769_v55, %v9391_v31  ;;  %v10997_v34 = vld [vmem:[#allocation27_spill] sm:$0xff] }
 0x9e8   : > { %6019 = vmatpush1.bf16.xpose.msra.mxu1 %v6018_v52  ;;  %v6773_v62 = vpop.eup %6772  ;;  %v924_v6 = vadd.f32 %v10997_v34, %v10994_v24  ;;  %6780 = vrcp.f32 %v3907_v39 }
 0x9e9   : > { %4182 = vxpose.xlu1.b32.cont [2/4] (short) %v912_v15, 128  ;;  %v6020_v40 = vpack.c.bf16 %v4007_v23, %v4005_v49  ;;  %v4009_v18 = vmul.f32 %v6773_v62, %v9412_v51  ;;  %v6022_v48 = vpack.c.bf16 %v4006_v20, %v4004_v41  ;;  %6782 = vrcp.f32 %v3904_v4 }
 0x9ea   : > { %v6775_v16 = vpop.eup %6774  ;;  %v4008_v55 = vmul.f32 %v6773_v62, %v9407_v46 }
 0x9eb   : > { %v3916_v45 = vpop.xlane.xlu1 %3915  ;;  %4151 = vxpose.xlu0.b32.cont [3/4] (short) %v10993_v57, 128  ;;  %v3913_v28 = vpop.xlane.xlu0 %3912  ;;  %6021 = vmatprep.subr.bf16.mxu1 %v6020_v40  ;;  %v4011_v0 = vmul.f32 %v6775_v16, %v9418_v12  ;;  %v4010_v31 = vmul.f32 %v6775_v16, %v9415_v17 }
 0x9ec   : > { %6784 = vrcp.f32 %v3913_v28 }
 0x9ed   : > { %4183 = vxpose.xlu1.b32.cont [3/4] (short) %v10996_v56, 128  ;;  %v6024_v29 = vpack.c.bf16 %v4011_v0, %v4009_v18  ;;  %v6026_v57 = vpack.c.bf16 %v4010_v31, %v4008_v55  ;;  %6786 = vrcp.f32 %v3910_v47  ;;  %v11001_v31 = vld [vmem:[#allocation21_spill] sm:$0xff] }
 0x9ee   : > { %v6777_v26 = vpop.eup %6776 }
 0x9ef   : > { %v3922_v3 = vpop.xlane.xlu1 %3921  ;;  %4152 = vxpose.xlu0.b32.end [4/4] (short) %v922_v61, 128  ;;  %v3919_v52 = vpop.xlane.xlu0 %3918  ;;  %v4015_v51 = vmul.f32 %v6777_v26, %v9434_v22  ;;  %v4014_v17 = vmul.f32 %v6777_v26, %v9431_v7 }
 0x9f0   : > { %6023 = vmatpush1.bf16.xpose.msra.mxu1 %v6022_v48  ;;  %v6779_v12 = vpop.eup %6778  ;;  %6788 = vrcp.f32 %v3919_v52 }
 0x9f1   : > { %4184 = vxpose.xlu1.b32.end [4/4] (short) %v924_v6, 128  ;;  %6025 = vmatprep.subr.bf16.mxu1 %v6024_v29  ;;  %v4013_v39 = vmul.f32 %v6779_v12, %v9428_v25  ;;  %v4012_v46 = vmul.f32 %v6779_v12, %v9423_v43  ;;  %6790 = vrcp.f32 %v3916_v45  ;;  %v11000_v12 = vld [vmem:[#allocation19_spill] sm:$0xff] }
 0x9f2   : > { %v6781_v20 = vpop.eup %6780 }
 0x9f3   : > { %v3928_v15 = vpop.xlane.xlu1 %3927  ;;  %v3925_v49 = vpop.xlane.xlu0 %3924  ;;  %v6028_v4 = vpack.c.bf16 %v4015_v51, %v4013_v39  ;;  %v4019_v22 = vmul.f32 %v6781_v20, %v9450_v54  ;;  %v6030_v62 = vpack.c.bf16 %v4014_v17, %v4012_v46  ;;  %v4018_v7 = vmul.f32 %v6781_v20, %v9447_v19 }
 0x9f4   : > { %v6783_v0 = vpop.eup %6782  ;;  %6792 = vrcp.f32 %v3925_v49 }
 0x9f5   : > { %v4017_v25 = vmul.f32 %v6783_v0, %v9444_v35  ;;  %v4016_v41 = vmul.f32 %v6783_v0, %v9439_v21  ;;  %6794 = vrcp.f32 %v3922_v3  ;;  %v10999_v21 = vld [vmem:[#allocation26_spill] sm:$0xff] }
 0x9f6   : > { %v6785_v59 = vpop.eup %6784 }
 0x9f7   : > { %v9631_v23 = vpop.xlane.xlu1 %3933  ;;  %v3931_v40 = vpop.xlane.xlu0 %3930  ;;  %v6032_v28 = vpack.c.bf16 %v4019_v22, %v4017_v25  ;;  %v4023_v54 = vmul.f32 %v6785_v59, %v9465_v27  ;;  %v6034_v18 = vpack.c.bf16 %v4018_v7, %v4016_v41  ;;  %v4022_v29 = vmul.f32 %v6785_v59, %v9463_v63  ;;  %v10998_v27 = vld [vmem:[#allocation23_spill] sm:$0xff]  ;;  %v11003_v7 = vld [vmem:[#allocation46_spill] sm:$0xff] }
 0x9f8   : > { %6027 = vmatpush1.bf16.xpose.msra.mxu1 %v6026_v57  ;;  %v6787_v61 = vpop.eup %6786  ;;  %6796 = vrcp.f32 %v3931_v40  ;;  %v11004_v41 = vld [vmem:[#allocation31_spill] sm:$0xff] }
 0x9f9   : > { %6029 = vmatprep.subr.bf16.mxu1 %v6028_v4  ;;  %v4021_v43 = vmul.f32 %v6787_v61, %v9460_v13  ;;  %v4020_v51 = vmul.f32 %v6787_v61, %v9455_v10  ;;  %6798 = vrcp.f32 %v3928_v15 }
 0x9fa   : > { %v6789_v34 = vpop.eup %6788 }
 0x9fb   : > { %v3937_v24 = vpop.xlane.xlu0 %3936  ;;  %v9635_v16 = vpop.xlane.xlu1 %3939  ;;  %v6036_v6 = vpack.c.bf16 %v4023_v54, %v4021_v43  ;;  %v4027_v19 = vmul.f32 %v6789_v34, %v9479_v42  ;;  %v6038_v39 = vpack.c.bf16 %v4022_v29, %v4020_v51  ;;  %v4026_v0 = vmul.f32 %v6789_v34, %v9477_v8  ;;  %v11008_v29 = vld [vmem:[#allocation63_spill] sm:$0xff] }
 0x9fc   : > { %v6791_v52 = vpop.eup %6790  ;;  %6800 = vrcp.f32 %v3937_v24 }
 0x9fd   : > { %v4025_v63 = vmul.f32 %v6791_v52, %v9475_v36  ;;  %v4024_v17 = vmul.f32 %v6791_v52, %v9469_v11  ;;  %6802 = vrcp.f32 %v9631_v23  ;;  %v11007_v52 = vld [vmem:[#allocation43_spill] sm:$0xff] }
 0x9fe   : > { %v6793_v4 = vpop.eup %6792 }
 0x9ff   : > { %v3943_v47 = vpop.xlane.xlu0 %3942  ;;  %v9639_v56 = vpop.xlane.xlu1 %3945  ;;  %v6040_v57 = vpack.c.bf16 %v4027_v19, %v4025_v63  ;;  %v4031_v10 = vmul.f32 %v6793_v4, %v9493_v37  ;;  %v6042_v36 = vpack.c.bf16 %v4026_v0, %v4024_v17  ;;  %v4030_v40 = vmul.f32 %v6793_v4, %v9491_v38 }
 0xa00   : > { %6031 = vmatpush1.bf16.xpose.msra.mxu1 %v6030_v62  ;;  %v6795_v20 = vpop.eup %6794  ;;  %6804 = vrcp.f32 %v3943_v47 }
 0xa01   : > { %6033 = vmatprep.subr.bf16.mxu1 %v6032_v28  ;;  %v4029_v22 = vmul.f32 %v6795_v20, %v9489_v33  ;;  %v4028_v8 = vmul.f32 %v6795_v20, %v9483_v50  ;;  %6806 = vrcp.f32 %v9635_v16  ;;  %v11012_v20 = vld [vmem:[#allocation33_spill] sm:$0xff] }
 0xa02   : > { %v6797_v25 = vpop.eup %6796 }
 0xa03   : > { %v3949_v35 = vpop.xlane.xlu0 %3948  ;;  %v589_v45 = vpop.permute.xlu1 %588  ;;  %v6044_v46 = vpack.c.bf16 %v4031_v10, %v4029_v22  ;;  %v4035_v62 = vmul.f32 %v6797_v25, %v9507_v58  ;;  %v6046_v11 = vpack.c.bf16 %v4030_v40, %v4028_v8  ;;  %v4034_v28 = vmul.f32 %v6797_v25, %v9505_v30  ;;  %v11002_v58 = vld [vmem:[#allocation15_spill] sm:$0xff]  ;;  %v11005_v30 = vld [vmem:[#allocation40_spill] sm:$0xff] }
 0xa04   : > { %v9648_v26 = vadd.f32 %v10998_v27, %v589_v45  ;;  %v9651_v13 = vadd.f32 %v10999_v21, %v589_v45  ;;  %v6799_v15 = vpop.eup %6798  ;;  %6808 = vrcp.f32 %v3949_v35  ;;  %v11009_v27 = vld [vmem:[#allocation44_spill] sm:$0xff] }
 0xa05   : > { %v4033_v37 = vmul.f32 %v6799_v15, %v9503_v53  ;;  %v4032_v38 = vmul.f32 %v6799_v15, %v9497_v1  ;;  %6810 = vrcp.f32 %v9639_v56 }
 0xa06   : > { %v6801_v24 = vpop.eup %6800 }
 0xa07   : > { %v6048_v33 = vpack.c.bf16 %v4035_v62, %v4033_v37  ;;  %v6803_v23 = vpop.eup %6802  ;;  %v4039_v59 = vmul.f32 %v6801_v24, %v9521_v32  ;;  %v6050_v50 = vpack.c.bf16 %v4034_v28, %v4032_v38  ;;  %v4038_v54 = vmul.f32 %v6801_v24, %v11003_v7  ;;  %v11006_v32 = vld [vmem:[#allocation45_spill] sm:$0xff]  ;;  %v11013_v37 = vld [vmem:[#allocation51_spill] sm:$0xff]  ;;  %v11020_v7 = vld [vmem:[#allocation52_spill] sm:$0xff] }
 0xa08   : > { %6035 = vmatpush1.bf16.xpose.msra.mxu1 %v6034_v18  ;;  %v4037_v61 = vmul.f32 %v6803_v23, %v11002_v58  ;;  %v4036_v18 = vmul.f32 %v6803_v23, %v11005_v30  ;;  %v11015_v23 = vld [vmem:[#allocation38_spill] sm:$0xff] }
 0xa09   : > { %6037 = vmatprep.subr.bf16.mxu1 %v6036_v6 }
 0xa0a   : > { %v6052_v53 = vpack.c.bf16 %v4039_v59, %v4037_v61  ;;  %v6805_v47 = vpop.eup %6804  ;;  %v6054_v1 = vpack.c.bf16 %v4038_v54, %v4036_v18  ;;  %v11016_v59 = vld [vmem:[#allocation36_spill] sm:$0xff] }
 0xa0b   : > { %v584_v48 = vpop.permute.xlu0 %583  ;;  %v6807_v16 = vpop.eup %6806  ;;  %v4043_v43 = vmul.f32 %v6805_v47, %v11004_v41 }
 0xa0c   : > { %v9654_v49 = vadd.f32 %v11000_v12, %v584_v48  ;;  %v9657_v3 = vadd.f32 %v11001_v31, %v584_v48  ;;  %v4041_v34 = vmul.f32 %v6807_v16, %v11006_v32  ;;  %v4042_v48 = vmul.f32 %v6805_v47, %v11007_v52  ;;  %v11010_v12 = vld [vmem:[#allocation41_spill] sm:$0xff] }
 0xa0d   : > { %v4040_v21 = vmul.f32 %v6807_v16, %v11009_v27  ;;  %v11019_v47 = vld [vmem:[#allocation13_spill] sm:$0xff] }
 0xa0e   : > { %v6070_v55 = vpack.c.bf16 %v9648_v26, %v9654_v49  ;;  %v6068_v42 = vpack.c.bf16 %v9651_v13, %v9657_v3  ;;  %v6056_v6 = vpack.c.bf16 %v4043_v43, %v4041_v34  ;;  %v6809_v45 = vpop.eup %6808  ;;  %v886_v16 = vadd.f32 %v11019_v47, %v9603_v14  ;;  %v11023_v43 = vld [vmem:[#allocation42_spill] sm:$0xff] }
 0xa0f   : > { %v6811_v35 = vpop.eup %6810  ;;  %v4047_v19 = vmul.f32 %v6809_v45, %v11008_v29  ;;  %v6058_v51 = vpack.c.bf16 %v4042_v48, %v4040_v21  ;;  %v11024_v26 = vmov 0.0  }
 0xa10   : > { %6039 = vmatpush1.bf16.xpose.msra.mxu1 %v6038_v39  ;;  %v4045_v31 = vmul.f32 %v6811_v35, %v11010_v12  ;;  %v4044_v0 = vmul.f32 %v6811_v35, %v11012_v20 }
 0xa11   : > { %6041 = vmatprep.subr.bf16.mxu1 %v6040_v57  ;;  %v11011_v57 = vld [vmem:[#allocation62_spill] sm:$0xff] }
 0xa12   : > { %v6060_v39 = vpack.c.bf16 %v4047_v19, %v4045_v31  ;;  %v4046_v4 = vmul.f32 %v6809_v45, %v11011_v57 }
 0xa14   : > { %v6062_v10 = vpack.c.bf16 %v4046_v4, %v4044_v0 }
 0xa18   : > { %6043 = vmatpush1.bf16.xpose.msra.mxu1 %v6042_v36 }
 0xa19   : > { %6045 = vmatprep.subr.bf16.mxu1 %v6044_v46 }
 0xa20   : > { %6047 = vmatpush1.bf16.xpose.msra.mxu1 %v6046_v11 }
 0xa21   : > { %6049 = vmatprep.subr.bf16.mxu1 %v6048_v33  ;;  %v11014_v33 = vld [vmem:[#allocation34_spill] sm:$0xff] }
 0xa28   : > { %6051 = vmatpush1.bf16.xpose.msra.mxu1 %v6050_v50 }
 0xa29   : > { %6053 = vmatprep.subr.bf16.mxu1 %v6052_v53 }
 0xa30   : > { %6055 = vmatpush1.bf16.xpose.msra.mxu1 %v6054_v1 }
 0xa31   : > { %6057 = vmatprep.subr.bf16.mxu1 %v6056_v6 }
 0xa34   : > { %v3952_v56 = vpop.xlane.xlu1 %3951 }
 0xa35   : > { %6812 = vrcp.f32 %v3952_v56 }
 0xa38   : > { %v3955_v63 = vpop.xlane.xlu0 %3954  ;;  %6059 = vmatpush1.bf16.xpose.msra.mxu1 %v6058_v51  ;;  %v594_v36 = vpop.permute.xlu1 %593 }
 0xa39   : > { %6814 = vrcp.f32 %v3955_v63  ;;  %6061 = vmatprep.subr.bf16.mxu1 %v6060_v39  ;;  %v940_v11 = vadd.f32 %v11013_v37, %v594_v36  ;;  %v942_v24 = vadd.f32 %v11014_v33, %v594_v36 }
 0xa3c   : > { %v559_v13 = vpop.permute.xlu1 %558 }
 0xa3d   : > { %v898_v30 = vadd.f32 %v11023_v43, %v559_v13 }
 0xa3f   : > { %v6813_v22 = vpop.eup %6812 }
 0xa40   : > { %v554_v17 = vpop.permute.xlu0 %553  ;;  %6063 = vmatpush1.bf16.xpose.msra.mxu1 %v6062_v10  ;;  %v4049_v15 = vmul.f32 %v6813_v22, %v9569_v60  ;;  %v4048_v62 = vmul.f32 %v6813_v22, %v9567_v44  ;;  %v11017_v44 = vld [vmem:[#allocation14_spill] sm:$0xff] }
 0xa41   : > { %v880_v60 = vadd.f32 %v11017_v44, %v9583_v9  ;;  %v894_v54 = vadd.f32 %v11020_v7, %v554_v17  ;;  %v11021_v9 = vld [vmem:[#allocation18_spill] sm:$0xff] }
 0xa42   : > { %v892_v3 = vadd.f32 %v11021_v9, %v554_v17 }
 0xa43   : > { %v6815_v46 = vpop.eup %6814 }
 0xa44   : > { %v599_v25 = vpop.permute.xlu0 %598  ;;  %v4051_v40 = vmul.f32 %v6815_v46, %v9575_v5  ;;  %v4050_v8 = vmul.f32 %v6815_v46, %v9571_v2  ;;  %v11018_v2 = vld [vmem:[#allocation53_spill] sm:$0xff] }
 0xa45   : > { %v946_v28 = vadd.f32 %v11015_v23, %v599_v25  ;;  %v948_v38 = vadd.f32 %v11016_v59, %v599_v25  ;;  %v888_v5 = vadd.f32 %v11018_v2, %v9603_v14 }
 0xa46   : > { %v6064_v58 = vpack.c.bf16 %v4051_v40, %v4049_v15  ;;  %v6066_v61 = vpack.c.bf16 %v4050_v8, %v4048_v62 }
 0xa47   : > { %v6074_v50 = vpack.c.bf16 %v946_v28, %v940_v11  ;;  %v6072_v53 = vpack.c.bf16 %v948_v38, %v942_v24 }
 0xa48   : > { %6065 = vmatprep.subr.bf16.mxu1 %v6064_v58 }
 0xa49   : > { %6067 = vmatpush1.bf16.xpose.msra.mxu1 %v6066_v61 }
 0xa4a   : > { %6069 = vmatprep.subr.bf16.mxu1 %v6068_v42  ;;  %v11022_v42 = vld [vmem:[#allocation16_spill] sm:$0xff] }
 0xa4b   : > { %v900_v41 = vadd.f32 %v11022_v42, %v559_v13 }
 0xa50   : > { %4117 = vmatmul.mubr.f32.vlgmr.msra.gmra.mrb[136].mxu1 %v880_v60 }
 0xa51   : > { %4122 = vmatprep.mubr.f32.mxu1 %v888_v5  ;;  %6071 = vmatpush1.bf16.msra.mxu1 %v6070_v55 }
 0xa52   : > { %6073 = vmatprep.subr.bf16.mxu1 %v6072_v53 }
 0xa54   : > { %4123 = vmatmul.mubr.f32.gmra.mrb[138].mxu1 %v886_v16 }
 0xa55   : > { %4128 = vmatprep.mubr.f32.mxu1 %v894_v54  ;;  %6075 = vmatpush1.bf16.msra.mxu1 %v6074_v50 }
 0xa58   : > { %4129 = vmatmul.mubr.f32.gmra.mrb[140].mxu1 %v892_v3 }
 0xa59   : > { %4134 = vmatprep.mubr.f32.mxu1 %v900_v41 }
 0xa5c   : > { %4135 = vmatmul.mubr.f32.gmra.mrb[142].mxu1 %v898_v30 }
 0xa5d   : > { %4373 = vmatprep.mubr.f32.mxu1 %v11024_v26 }
 0xa63   : > { %v4165_v49 = vpop.trf.xlu0 }
 0xa64   : > { %5781 = vmatmul.mubr.msk.f32.vlgmr.msra.gmra.mrb[144].mxu1 %vm1038_vm0, %v4165_v49 }
 0xa65   : > { %4379 = vmatprep.mubr.f32.mxu1 %v11024_v26  ;;  %v4197_v52 = vpop.trf.xlu1 }
 0xa67   : > { %v4166_v14 = vpop.trf.xlu0 }
 0xa68   : > { %5782 = vmatmul.mubr.msk.f32.gmra.mrb[146].mxu1 %vm1038_vm0, %v4166_v14 }
 0xa69   : > { %4385 = vmatprep.mubr.f32.mxu1 %v11024_v26  ;;  %v4198_v56 = vpop.trf.xlu1 }
 0xa6b   : > { %v4167_v55 = vpop.trf.xlu0 }
 0xa6c   : > { %5783 = vmatmul.mubr.msk.f32.gmra.mrb[148].mxu1 %vm1038_vm0, %v4167_v55 }
 0xa6d   : > { %4391 = vmatprep.mubr.f32.mxu1 %v11024_v26  ;;  %v4199_v27 = vpop.trf.xlu1 }
 0xa6f   : > { %v4168_v18 = vpop.trf.xlu0 }
 0xa70   : > { %5784 = vmatmul.mubr.msk.f32.gmra.mrb[150].mxu1 %vm1038_vm0, %v4168_v18 }
 0xa71   : > { %4397 = vmatprep.mubr.f32.mxu1 %v11024_v26  ;;  %v4200_v12 = vpop.trf.xlu1 }
 0xa73   : > { %v4169_v32 = vpop.trf.xlu0 }
 0xa74   : > { %5785 = vmatmul.mubr.msk.f32.gmra.mrb[152].mxu1 %vm1038_vm0, %v4169_v32 }
 0xa75   : > { %4403 = vmatprep.mubr.f32.mxu1 %v11024_v26  ;;  %v4201_v63 = vpop.trf.xlu1 }
 0xa77   : > { %v4170_v34 = vpop.trf.xlu0 }
 0xa78   : > { %5786 = vmatmul.mubr.msk.f32.gmra.mrb[154].mxu1 %vm1038_vm0, %v4170_v34 }
 0xa79   : > { %4409 = vmatprep.mubr.f32.mxu1 %v11024_v26  ;;  %v4202_v39 = vpop.trf.xlu1 }
 0xa7b   : > { %v4171_v1 = vpop.trf.xlu0 }
 0xa7c   : > { %5787 = vmatmul.mubr.msk.f32.gmra.mrb[156].mxu1 %vm1038_vm0, %v4171_v1 }
 0xa7d   : > { %4415 = vmatprep.mubr.f32.mxu1 %v11024_v26  ;;  %v4203_v57 = vpop.trf.xlu1 }
 0xa7f   : > { %v4172_v6 = vpop.trf.xlu0 }
 0xa80   : > { %5788 = vmatmul.mubr.msk.f32.gmra.mrb[158].mxu1 %vm1038_vm0, %v4172_v6 }
 0xa81   : > { %4421 = vmatprep.mubr.f32.mxu1 %v11024_v26  ;;  %v4204_v4 = vpop.trf.xlu1 }
 0xa83   : > { %v4173_v45 = vpop.trf.xlu0 }
 0xa84   : > { %5789 = vmatmul.mubr.msk.f32.gmra.mrb[160].mxu1 %vm1038_vm0, %v4173_v45 }
 0xa85   : > { %4427 = vmatprep.mubr.f32.mxu1 %v11024_v26  ;;  %v4205_v20 = vpop.trf.xlu1 }
 0xa87   : > { %v4174_v35 = vpop.trf.xlu0 }
 0xa88   : > { %5790 = vmatmul.mubr.msk.f32.gmra.mrb[162].mxu1 %vm1038_vm0, %v4174_v35 }
 0xa89   : > { %4433 = vmatprep.mubr.f32.mxu1 %v11024_v26  ;;  %v4206_v0 = vpop.trf.xlu1 }
 0xa8b   : > { %v4175_v48 = vpop.trf.xlu0 }
 0xa8c   : > { %5791 = vmatmul.mubr.msk.f32.gmra.mrb[164].mxu1 %vm1038_vm0, %v4175_v48 }
 0xa8d   : > { %4439 = vmatprep.mubr.f32.mxu1 %v11024_v26  ;;  %v4207_v10 = vpop.trf.xlu1 }
 0xa8f   : > { %v4176_v29 = vpop.trf.xlu0 }
 0xa90   : > { %5792 = vmatmul.mubr.msk.f32.gmra.mrb[166].mxu1 %vm1038_vm0, %v4176_v29 }
 0xa91   : > { %4445 = vmatprep.mubr.f32.mxu1 %v11024_v26  ;;  %v4208_v17 = vpop.trf.xlu1 }
 0xa93   : > { %v4177_v19 = vpop.trf.xlu0 }
 0xa94   : > { %5793 = vmatmul.mubr.msk.f32.gmra.mrb[168].mxu1 %vm1038_vm0, %v4177_v19 }
 0xa95   : > { %4451 = vmatprep.mubr.f32.mxu1 %v11024_v26  ;;  %v4209_v22 = vpop.trf.xlu1 }
 0xa97   : > { %v4178_v21 = vpop.trf.xlu0 }
 0xa98   : > { %5794 = vmatmul.mubr.msk.f32.gmra.mrb[170].mxu1 %vm1038_vm0, %v4178_v21 }
 0xa99   : > { %4457 = vmatprep.mubr.f32.mxu1 %v11024_v26  ;;  %v4210_v36 = vpop.trf.xlu1 }
 0xa9b   : > { %v4179_v31 = vpop.trf.xlu0 }
 0xa9c   : > { %5795 = vmatmul.mubr.msk.f32.gmra.mrb[172].mxu1 %vm1038_vm0, %v4179_v31 }
 0xa9d   : > { %4463 = vmatprep.mubr.f32.mxu1 %v11024_v26  ;;  %v4211_v46 = vpop.trf.xlu1 }
 0xa9f   : > { %v4180_v51 = vpop.trf.xlu0 }
 0xaa0   : > { %5796 = vmatmul.mubr.msk.f32.gmra.mrb[174].mxu1 %vm1038_vm0, %v4180_v51 }
 0xaa1   : > { %4469 = vmatprep.mubr.f32.mxu1 %v11024_v26  ;;  %v4212_v25 = vpop.trf.xlu1 }
 0xaa4   : > { %5797 = vmatmul.mubr.msk.f32.gmra.mrb[176].mxu1 %vm1038_vm0, %v4197_v52 }
 0xaa5   : > { %4475 = vmatprep.mubr.f32.mxu1 %v11024_v26 }
 0xaa8   : > { %5798 = vmatmul.mubr.msk.f32.gmra.mrb[178].mxu1 %vm1038_vm0, %v4198_v56 }
 0xaa9   : > { %4481 = vmatprep.mubr.f32.mxu1 %v11024_v26 }
 0xaac   : > { %5799 = vmatmul.mubr.msk.f32.gmra.mrb[180].mxu1 %vm1038_vm0, %v4199_v27 }
 0xaad   : > { %4487 = vmatprep.mubr.f32.mxu1 %v11024_v26 }
 0xab0   : > { %5800 = vmatmul.mubr.msk.f32.gmra.mrb[182].mxu1 %vm1038_vm0, %v4200_v12 }
 0xab1   : > { %4493 = vmatprep.mubr.f32.mxu1 %v11024_v26 }
 0xab4   : > { %5801 = vmatmul.mubr.msk.f32.gmra.mrb[184].mxu1 %vm1038_vm0, %v4201_v63 }
 0xab5   : > { %4499 = vmatprep.mubr.f32.mxu1 %v11024_v26 }
 0xab8   : > { %5802 = vmatmul.mubr.msk.f32.gmra.mrb[186].mxu1 %vm1038_vm0, %v4202_v39 }
 0xab9   : > { %4505 = vmatprep.mubr.f32.mxu1 %v11024_v26 }
 0xabc   : > { %5803 = vmatmul.mubr.msk.f32.gmra.mrb[188].mxu1 %vm1038_vm0, %v4203_v57 }
 0xabd   : > { %4511 = vmatprep.mubr.f32.mxu1 %v11024_v26 }
 0xac0   : > { %5804 = vmatmul.mubr.msk.f32.gmra.mrb[190].mxu1 %vm1038_vm0, %v4204_v4 }
 0xac1   : > { %4517 = vmatprep.mubr.f32.mxu1 %v11024_v26 }
 0xac4   : > { %5805 = vmatmul.mubr.msk.f32.gmra.mrb[192].mxu1 %vm1038_vm0, %v4205_v20 }
 0xac5   : > { %4523 = vmatprep.mubr.f32.mxu1 %v11024_v26 }
 0xac8   : > { %5806 = vmatmul.mubr.msk.f32.gmra.mrb[194].mxu1 %vm1038_vm0, %v4206_v0 }
 0xac9   : > { %4529 = vmatprep.mubr.f32.mxu1 %v11024_v26 }
 0xacc   : > { %5807 = vmatmul.mubr.msk.f32.gmra.mrb[196].mxu1 %vm1038_vm0, %v4207_v10 }
 0xacd   : > { %4535 = vmatprep.mubr.f32.mxu1 %v11024_v26 }
 0xad0   : > { %5808 = vmatmul.mubr.msk.f32.gmra.mrb[198].mxu1 %vm1038_vm0, %v4208_v17 }
 0xad1   : > { %4541 = vmatprep.mubr.f32.mxu1 %v11024_v26 }
 0xad4   : > { %5809 = vmatmul.mubr.msk.f32.gmra.mrb[200].mxu1 %vm1038_vm0, %v4209_v22 }
 0xad5   : > { %4547 = vmatprep.mubr.f32.mxu1 %v11024_v26 }
 0xad8   : > { %5810 = vmatmul.mubr.msk.f32.gmra.mrb[202].mxu1 %vm1038_vm0, %v4210_v36 }
 0xad9   : > { %4553 = vmatprep.mubr.f32.mxu1 %v11024_v26 }
 0xadc   : > { %5811 = vmatmul.mubr.msk.f32.gmra.mrb[204].mxu1 %vm1038_vm0, %v4211_v46 }
 0xadd   : > { %4559 = vmatprep.mubr.f32.mxu1 %v11024_v26 }
 0xae0   : > { %5812 = vmatmul.mubr.msk.f32.gmra.mrb[206].mxu1 %vm1038_vm0, %v4212_v25 }
 0xb23   : > { %v4118_v15 = vpop.f32.mrb[136].mxu1 }
 0xb24   : > { %v4120_v40 = vpop.f32.mrb[137].mxu1 }
 0xb27   : > { %v4124_v62 = vpop.f32.mrb[138].mxu1 }
 0xb28   : > { %v6158_v8 = vpack.c.bf16 %v4124_v62, %v4118_v15  ;;  %v4126_v37 = vpop.f32.mrb[139].mxu1 }
 0xb29   : > { %v6156_v11 = vpack.c.bf16 %v4126_v37, %v4120_v40 }
 0xb2b   : > { %v4130_v33 = vpop.f32.mrb[140].mxu1  ;;  %6157 = vmatprep.subr.bf16.mxu0 %v6156_v11 }
 0xb2c   : > { %v4132_v24 = vpop.f32.mrb[141].mxu1  ;;  %6159 = vmatpush1.bf16.msra.mxu0 %v6158_v8 }
 0xb2f   : > { %v4136_v23 = vpop.f32.mrb[142].mxu1 }
 0xb30   : > { %v6162_v28 = vpack.c.bf16 %v4136_v23, %v4130_v33  ;;  %v4138_v59 = vpop.f32.mrb[143].mxu1 }
 0xb31   : > { %v6160_v38 = vpack.c.bf16 %v4138_v59, %v4132_v24 }
 0xb33   : > { %6161 = vmatprep.subr.bf16.mxu0 %v6160_v38 }
 0xb34   : > { %6163 = vmatpush1.bf16.msra.mxu0 %v6162_v28 }
 0xb37   : > { %v4375_v58 = vpop.f32.mrb[144].mxu1 }
 0xb38   : > { %v9778_v61 = vmul.f32 0.17677669, %v4375_v58  ;;  %v4377_v50 = vpop.f32.mrb[145].mxu1 }
 0xb39   : > { %v9780_v53 = vmul.f32 0.17677669, %v4377_v50 }
 0xb3b   : > { %v4630_v44 = vmax.f32 %v9778_v61, %v9780_v53  ;;  %v4381_v60 = vpop.f32.mrb[146].mxu1 }
 0xb3c   : > { %v9784_v2 = vmul.f32 0.17677669, %v4381_v60  ;;  %v4383_v5 = vpop.f32.mrb[147].mxu1 }
 0xb3d   : > { %v9786_v47 = vmul.f32 0.17677669, %v4383_v5  ;;  %4631 = vmax.xlane.f32.xlu0 %v4630_v44 }
 0xb3f   : > { %v4633_v16 = vmax.f32 %v9784_v2, %v9786_v47  ;;  %v4387_v7 = vpop.f32.mrb[148].mxu1 }
 0xb40   : > { %v9790_v54 = vmul.f32 0.17677669, %v4387_v7  ;;  %v4389_v13 = vpop.f32.mrb[149].mxu1 }
 0xb41   : > { %v9792_v9 = vmul.f32 0.17677669, %v4389_v13  ;;  %4634 = vmax.xlane.f32.xlu1 %v4633_v16 }
 0xb43   : > { %v4636_v3 = vmax.f32 %v9790_v54, %v9792_v9  ;;  %v4393_v42 = vpop.f32.mrb[150].mxu1 }
 0xb44   : > { %v9796_v41 = vmul.f32 0.17677669, %v4393_v42  ;;  %v4395_v43 = vpop.f32.mrb[151].mxu1 }
 0xb45   : > { %v9798_v30 = vmul.f32 0.17677669, %v4395_v43  ;;  %4637 = vmax.xlane.f32.xlu0 %v4636_v3 }
 0xb47   : > { %v4639_v49 = vmax.f32 %v9796_v41, %v9798_v30  ;;  %v4399_v14 = vpop.f32.mrb[152].mxu1 }
 0xb48   : > { %v9802_v55 = vmul.f32 0.17677669, %v4399_v14  ;;  %v4401_v18 = vpop.f32.mrb[153].mxu1 }
 0xb49   : > { %v9804_v32 = vmul.f32 0.17677669, %v4401_v18  ;;  %4640 = vmax.xlane.f32.xlu0 %v4639_v49 }
 0xb4b   : > { %v4642_v34 = vmax.f32 %v9802_v55, %v9804_v32  ;;  %v4405_v1 = vpop.f32.mrb[154].mxu1 }
 0xb4c   : > { %v9808_v6 = vmul.f32 0.17677669, %v4405_v1  ;;  %v4407_v45 = vpop.f32.mrb[155].mxu1 }
 0xb4d   : > { %v9810_v35 = vmul.f32 0.17677669, %v4407_v45  ;;  %4643 = vmax.xlane.f32.xlu1 %v4642_v34 }
 0xb4f   : > { %v4645_v52 = vmax.f32 %v9808_v6, %v9810_v35  ;;  %v4411_v48 = vpop.f32.mrb[156].mxu1 }
 0xb50   : > { %v9814_v56 = vmul.f32 0.17677669, %v4411_v48  ;;  %v4413_v29 = vpop.f32.mrb[157].mxu1 }
 0xb51   : > { %v9816_v19 = vmul.f32 0.17677669, %v4413_v29  ;;  %4646 = vmax.xlane.f32.xlu0 %v4645_v52 }
 0xb53   : > { %v4648_v27 = vmax.f32 %v9814_v56, %v9816_v19  ;;  %v4417_v21 = vpop.f32.mrb[158].mxu1 }
 0xb54   : > { %v9820_v12 = vmul.f32 0.17677669, %v4417_v21  ;;  %v4419_v31 = vpop.f32.mrb[159].mxu1 }
 0xb55   : > { %v9822_v51 = vmul.f32 0.17677669, %v4419_v31  ;;  %4649 = vmax.xlane.f32.xlu1 %v4648_v27 }
 0xb57   : > { %v4651_v63 = vmax.f32 %v9820_v12, %v9822_v51  ;;  %v4423_v39 = vpop.f32.mrb[160].mxu1 }
 0xb58   : > { %v9826_v57 = vmul.f32 0.17677669, %v4423_v39  ;;  %v4425_v4 = vpop.f32.mrb[161].mxu1 }
 0xb59   : > { %v9828_v20 = vmul.f32 0.17677669, %v4425_v4  ;;  %4652 = vmax.xlane.f32.xlu0 %v4651_v63 }
 0xb5b   : > { %v4654_v0 = vmax.f32 %v9826_v57, %v9828_v20  ;;  %v4429_v10 = vpop.f32.mrb[162].mxu1 }
 0xb5c   : > { %v9832_v17 = vmul.f32 0.17677669, %v4429_v10  ;;  %v4431_v22 = vpop.f32.mrb[163].mxu1 }
 0xb5d   : > { %v9834_v36 = vmul.f32 0.17677669, %v4431_v22  ;;  %4655 = vmax.xlane.f32.xlu1 %v4654_v0 }
 0xb5f   : > { %v4657_v46 = vmax.f32 %v9832_v17, %v9834_v36  ;;  %v4435_v25 = vpop.f32.mrb[164].mxu1 }
 0xb60   : > { %v9838_v15 = vmul.f32 0.17677669, %v4435_v25  ;;  %v4437_v40 = vpop.f32.mrb[165].mxu1 }
 0xb61   : > { %v9840_v62 = vmul.f32 0.17677669, %v4437_v40  ;;  %4658 = vmax.xlane.f32.xlu0 %v4657_v46 }
 0xb63   : > { %v4660_v8 = vmax.f32 %v9838_v15, %v9840_v62  ;;  %v4441_v37 = vpop.f32.mrb[166].mxu1 }
 0xb64   : > { %v9844_v11 = vmul.f32 0.17677669, %v4441_v37  ;;  %v4443_v33 = vpop.f32.mrb[167].mxu1 }
 0xb65   : > { %v9846_v24 = vmul.f32 0.17677669, %v4443_v33  ;;  %4661 = vmax.xlane.f32.xlu1 %v4660_v8 }
 0xb67   : > { %v4663_v23 = vmax.f32 %v9844_v11, %v9846_v24  ;;  %v4447_v28 = vpop.f32.mrb[168].mxu1 }
 0xb68   : > { %v9850_v59 = vmul.f32 0.17677669, %v4447_v28  ;;  %v4449_v38 = vpop.f32.mrb[169].mxu1 }
 0xb69   : > { %v9852_v58 = vmul.f32 0.17677669, %v4449_v38  ;;  %4664 = vmax.xlane.f32.xlu0 %v4663_v23 }
 0xb6b   : > { %v4666_v50 = vmax.f32 %v9850_v59, %v9852_v58  ;;  %v4453_v44 = vpop.f32.mrb[170].mxu1 }
 0xb6c   : > { %v9856_v60 = vmul.f32 0.17677669, %v4453_v44  ;;  %v4455_v5 = vpop.f32.mrb[171].mxu1 }
 0xb6d   : > { %v9858_v16 = vmul.f32 0.17677669, %v4455_v5  ;;  %4667 = vmax.xlane.f32.xlu1 %v4666_v50 }
 0xb6f   : > { %v4669_v7 = vmax.f32 %v9856_v60, %v9858_v16  ;;  %v4459_v13 = vpop.f32.mrb[172].mxu1 }
 0xb70   : > { %v9862_v3 = vmul.f32 0.17677669, %v4459_v13  ;;  %v4461_v42 = vpop.f32.mrb[173].mxu1 }
 0xb71   : > { %v9864_v43 = vmul.f32 0.17677669, %v4461_v42  ;;  %4670 = vmax.xlane.f32.xlu0 %v4669_v7 }
 0xb73   : > { %v4672_v49 = vmax.f32 %v9862_v3, %v9864_v43  ;;  %v4465_v14 = vpop.f32.mrb[174].mxu1 }
 0xb74   : > { %v9868_v18 = vmul.f32 0.17677669, %v4465_v14  ;;  %v4467_v34 = vpop.f32.mrb[175].mxu1 }
 0xb75   : > { %v9870_v1 = vmul.f32 0.17677669, %v4467_v34  ;;  %4673 = vmax.xlane.f32.xlu1 %v4672_v49 }
 0xb77   : > { %v4675_v45 = vmax.f32 %v9868_v18, %v9870_v1  ;;  %v4471_v52 = vpop.f32.mrb[176].mxu1 }
 0xb78   : > { %v9874_v48 = vmul.f32 0.17677669, %v4471_v52  ;;  %v4473_v29 = vpop.f32.mrb[177].mxu1 }
 0xb79   : > { %v9876_v27 = vmul.f32 0.17677669, %v4473_v29  ;;  %4676 = vmax.xlane.f32.xlu0 %v4675_v45 }
 0xb7b   : > { %v4678_v21 = vmax.f32 %v9874_v48, %v9876_v27  ;;  %v4477_v31 = vpop.f32.mrb[178].mxu1 }
 0xb7c   : > { %v9880_v63 = vmul.f32 0.17677669, %v4477_v31  ;;  %v4479_v39 = vpop.f32.mrb[179].mxu1 }
 0xb7d   : > { %v9882_v4 = vmul.f32 0.17677669, %v4479_v39  ;;  %4679 = vmax.xlane.f32.xlu1 %v4678_v21 }
 0xb7f   : > { %v4681_v0 = vmax.f32 %v9880_v63, %v9882_v4  ;;  %v4483_v10 = vpop.f32.mrb[180].mxu1 }
 0xb80   : > { %v9886_v22 = vmul.f32 0.17677669, %v4483_v10  ;;  %v4485_v46 = vpop.f32.mrb[181].mxu1 }
 0xb81   : > { %v9888_v25 = vmul.f32 0.17677669, %v4485_v46  ;;  %4682 = vmax.xlane.f32.xlu0 %v4681_v0 }
 0xb83   : > { %11025 = vst [vmem:[#allocation24_spill] sm:$0xff] %v9888_v25  ;;  %v4684_v40 = vmax.f32 %v9886_v22, %v9888_v25  ;;  %v4489_v8 = vpop.f32.mrb[182].mxu1 }
 0xb84   : > { %v9892_v37 = vmul.f32 0.17677669, %v4489_v8  ;;  %v4491_v33 = vpop.f32.mrb[183].mxu1 }
 0xb85   : > { %v9894_v23 = vmul.f32 0.17677669, %v4491_v33  ;;  %4685 = vmax.xlane.f32.xlu1 %v4684_v40 }
 0xb86   : > { %11026 = vst [vmem:[#allocation28_spill] sm:$0xff] %v9892_v37 }
 0xb87   : > { %11027 = vst [vmem:[#allocation29_spill] sm:$0xff] %v9894_v23  ;;  %v4687_v28 = vmax.f32 %v9892_v37, %v9894_v23  ;;  %v4495_v38 = vpop.f32.mrb[184].mxu1 }
 0xb88   : > { %v9898_v50 = vmul.f32 0.17677669, %v4495_v38  ;;  %v4497_v44 = vpop.f32.mrb[185].mxu1 }
 0xb89   : > { %v9900_v5 = vmul.f32 0.17677669, %v4497_v44  ;;  %4688 = vmax.xlane.f32.xlu0 %v4687_v28 }
 0xb8a   : > { %11028 = vst [vmem:[#allocation35_spill] sm:$0xff] %v9898_v50 }
 0xb8b   : > { %11029 = vst [vmem:[#allocation17_spill] sm:$0xff] %v9900_v5  ;;  %v4690_v7 = vmax.f32 %v9898_v50, %v9900_v5  ;;  %v4501_v13 = vpop.f32.mrb[186].mxu1 }
 0xb8c   : > { %v9904_v42 = vmul.f32 0.17677669, %v4501_v13  ;;  %v4503_v49 = vpop.f32.mrb[187].mxu1 }
 0xb8d   : > { %v9906_v14 = vmul.f32 0.17677669, %v4503_v49  ;;  %4691 = vmax.xlane.f32.xlu1 %v4690_v7 }
 0xb8e   : > { %11030 = vst [vmem:[#allocation61_spill] sm:$0xff] %v9904_v42 }
 0xb8f   : > { %11031 = vst [vmem:[#allocation32_spill] sm:$0xff] %v9906_v14  ;;  %v4693_v34 = vmax.f32 %v9904_v42, %v9906_v14  ;;  %v4507_v45 = vpop.f32.mrb[188].mxu1 }
 0xb90   : > { %v9910_v52 = vmul.f32 0.17677669, %v4507_v45  ;;  %v4509_v29 = vpop.f32.mrb[189].mxu1 }
 0xb91   : > { %v9912_v21 = vmul.f32 0.17677669, %v4509_v29  ;;  %4694 = vmax.xlane.f32.xlu0 %v4693_v34 }
 0xb92   : > { %11032 = vst [vmem:[#allocation60_spill] sm:$0xff] %v9910_v52 }
 0xb93   : > { %11033 = vst [vmem:[#allocation57_spill] sm:$0xff] %v9912_v21  ;;  %v4696_v31 = vmax.f32 %v9910_v52, %v9912_v21  ;;  %v4513_v39 = vpop.f32.mrb[190].mxu1 }
 0xb94   : > { %v9916_v0 = vmul.f32 0.17677669, %v4513_v39  ;;  %v4515_v10 = vpop.f32.mrb[191].mxu1 }
 0xb95   : > { %v9918_v46 = vmul.f32 0.17677669, %v4515_v10  ;;  %4697 = vmax.xlane.f32.xlu1 %v4696_v31 }
 0xb96   : > { %11034 = vst [vmem:[#allocation47_spill] sm:$0xff] %v9916_v0 }
 0xb97   : > { %11035 = vst [vmem:[#allocation20_spill] sm:$0xff] %v9918_v46  ;;  %v4699_v40 = vmax.f32 %v9916_v0, %v9918_v46  ;;  %v4519_v8 = vpop.f32.mrb[192].mxu1 }
 0xb98   : > { %v9922_v33 = vmul.f32 0.17677669, %v4519_v8  ;;  %v4521_v28 = vpop.f32.mrb[193].mxu1 }
 0xb99   : > { %v9924_v38 = vmul.f32 0.17677669, %v4521_v28  ;;  %4700 = vmax.xlane.f32.xlu0 %v4699_v40 }
 0xb9a   : > { %11036 = vst [vmem:[#allocation58_spill] sm:$0xff] %v9922_v33 }
 0xb9b   : > { %11037 = vst [vmem:[#allocation22_spill] sm:$0xff] %v9924_v38  ;;  %v4702_v44 = vmax.f32 %v9922_v33, %v9924_v38  ;;  %v4525_v7 = vpop.f32.mrb[194].mxu1 }
 0xb9c   : > { %v4527_v13 = vpop.f32.mrb[195].mxu1 }
 0xb9d   : > { %4703 = vmax.xlane.f32.xlu1 %v4702_v44 }
 0xb9f   : > { %v4531_v49 = vpop.f32.mrb[196].mxu1 }
 0xba0   : > { %v4533_v34 = vpop.f32.mrb[197].mxu1 }
 0xba3   : > { %v9928_v45 = vpop.f32.mrb[198].mxu1 }
 0xba4   : > { %v9930_v29 = vpop.f32.mrb[199].mxu1 }
 0xba7   : > { %v4543_v31 = vpop.f32.mrb[200].mxu1 }
 0xba8   : > { %v4545_v39 = vpop.f32.mrb[201].mxu1 }
 0xbab   : > { %v9932_v10 = vpop.f32.mrb[202].mxu1 }
 0xbac   : > { %v9934_v8 = vpop.f32.mrb[203].mxu1 }
 0xbaf   : > { %v9936_v28 = vpop.f32.mrb[204].mxu1 }
 0xbb0   : > { %v9938_v40 = vpop.f32.mrb[205].mxu1 }
 0xbb3   : > { %v9940_v26 = vpop.f32.mrb[206].mxu1 }
 0xbb4   : > { %v9942_v38 = vpop.f32.mrb[207].mxu1 }
 0xbca   : > { %v4632_v44 = vpop.xlane.xlu0 %4631 }
 0xbcb   : > { %v4726_v33 = vsub.f32 %v9778_v61, %v4632_v44  ;;  %v4727_v46 = vsub.f32 %v9780_v53, %v4632_v44 }
 0xbcd   : > { %v4790_v0 = vmul.f32 1.442695, %v4726_v33  ;;  %v4792_v21 = vmul.f32 1.442695, %v4727_v46 }
 0xbce   : > { %v4635_v52 = vpop.xlane.xlu1 %4634 }
 0xbcf   : > { %6816 = vpow2.f32 %v4790_v0  ;;  %v4728_v14 = vsub.f32 %v9784_v2, %v4635_v52  ;;  %v4729_v42 = vsub.f32 %v9786_v47, %v4635_v52  ;;  %v9952_v47 = vmul.f32 0.17677669, %v4531_v49 }
 0xbd0   : > { %6818 = vpow2.f32 %v4792_v21  ;;  %v9956_v52 = vmul.f32 0.17677669, %v4533_v34  ;;  %v9970_v49 = vmul.f32 0.17677669, %v4525_v7  ;;  %v9972_v34 = vmul.f32 0.17677669, %v4527_v13 }
 0xbd1   : > { %v4794_v5 = vmul.f32 1.442695, %v4728_v14  ;;  %v4796_v50 = vmul.f32 1.442695, %v4729_v42  ;;  %v9982_v7 = vmul.f32 0.17677669, %v4545_v39 }
 0xbd2   : > { %v4638_v23 = vpop.xlane.xlu0 %4637  ;;  %v4708_v21 = vmax.f32 %v9952_v47, %v9956_v52 }
 0xbd3   : > { %6820 = vpow2.f32 %v4794_v5  ;;  %v4730_v37 = vsub.f32 %v9790_v54, %v4638_v23  ;;  %v4731_v25 = vsub.f32 %v9792_v9, %v4638_v23 }
 0xbd4   : > { %6822 = vpow2.f32 %v4796_v50 }
 0xbd5   : > { %v4798_v61 = vmul.f32 1.442695, %v4730_v37  ;;  %v4800_v53 = vmul.f32 1.442695, %v4731_v25 }
 0xbd6   : > { %v4641_v33 = vpop.xlane.xlu0 %4640 }
 0xbd7   : > { %6824 = vpow2.f32 %v4798_v61  ;;  %v4732_v0 = vsub.f32 %v9796_v41, %v4641_v33  ;;  %v4733_v2 = vsub.f32 %v9798_v30, %v4641_v33 }
 0xbd8   : > { %6826 = vpow2.f32 %v4800_v53  ;;  %v9978_v53 = vmul.f32 0.17677669, %v4543_v31 }
 0xbd9   : > { %v9954_v14 = vpop.eup %6816  ;;  %v4802_v42 = vmul.f32 1.442695, %v4732_v0  ;;  %v4804_v5 = vmul.f32 1.442695, %v4733_v2 }
 0xbda   : > { %v9958_v54 = vpop.eup %6818  ;;  %v4644_v9 = vpop.xlane.xlu1 %4643 }
 0xbdb   : > { %6828 = vpow2.f32 %v4802_v42  ;;  %v4734_v25 = vsub.f32 %v9802_v55, %v4644_v9  ;;  %v4735_v37 = vsub.f32 %v9804_v32, %v4644_v9  ;;  %v4918_v41 = vadd.f32 %v9958_v54, %v9954_v14 }
 0xbdc   : > { %6830 = vpow2.f32 %v4804_v5 }
 0xbdd   : > { %v9964_v30 = vpop.eup %6820  ;;  %v4806_v23 = vmul.f32 1.442695, %v4734_v25  ;;  %v4808_v50 = vmul.f32 1.442695, %v4735_v37  ;;  %4919 = vadd.xlane.f32.xlu1 %v4918_v41  ;;  %v4714_v37 = vmax.f32 %v9978_v53, %v9982_v7 }
 0xbde   : > { %v9968_v46 = vpop.eup %6822  ;;  %v4647_v55 = vpop.xlane.xlu0 %4646 }
 0xbdf   : > { %6832 = vpow2.f32 %v4806_v23  ;;  %v4736_v32 = vsub.f32 %v9808_v6, %v4647_v55  ;;  %v4737_v44 = vsub.f32 %v9810_v35, %v4647_v55  ;;  %v4921_v61 = vadd.f32 %v9968_v46, %v9964_v30 }
 0xbe0   : > { %6834 = vpow2.f32 %v4808_v50  ;;  %v4705_v6 = vmax.f32 %v9970_v49, %v9972_v34  ;;  %v9999_v23 = vmul.f32 0.17677669, %v9928_v45 }
 0xbe1   : > { %v9980_v33 = vpop.eup %6824  ;;  %v4810_v0 = vmul.f32 1.442695, %v4736_v32  ;;  %v4812_v2 = vmul.f32 1.442695, %v4737_v44  ;;  %4922 = vadd.xlane.f32.xlu0 %v4921_v61  ;;  %4709 = vmax.xlane.f32.xlu1 %v4708_v21  ;;  %v10009_v32 = vmul.f32 0.17677669, %v9936_v28 }
 0xbe2   : > { %v9984_v13 = vpop.eup %6826  ;;  %v4650_v35 = vpop.xlane.xlu1 %4649 }
 0xbe3   : > { %6836 = vpow2.f32 %v4810_v0  ;;  %v4738_v42 = vsub.f32 %v9814_v56, %v4650_v35  ;;  %v4739_v31 = vsub.f32 %v9816_v19, %v4650_v35  ;;  %v4924_v5 = vadd.f32 %v9984_v13, %v9980_v33 }
 0xbe4   : > { %6838 = vpow2.f32 %v4812_v2  ;;  %v10002_v56 = vmul.f32 0.17677669, %v9930_v29  ;;  %v10014_v29 = vmul.f32 0.17677669, %v9938_v40  ;;  %v10025_v35 = vmul.f32 0.17677669, %v9932_v10 }
 0xbe5   : > { %v9992_v9 = vpop.eup %6828  ;;  %v4814_v25 = vmul.f32 1.442695, %v4738_v42  ;;  %v4816_v39 = vmul.f32 1.442695, %v4739_v31  ;;  %4706 = vmax.xlane.f32.xlu0 %v4705_v6  ;;  %4925 = vadd.xlane.f32.xlu1 %v4924_v5  ;;  %v10030_v42 = vmul.f32 0.17677669, %v9934_v8 }
 0xbe6   : > { %v9996_v41 = vpop.eup %6830  ;;  %v4653_v19 = vpop.xlane.xlu0 %4652 }
 0xbe7   : > { %6840 = vpow2.f32 %v4814_v25  ;;  %v4740_v50 = vsub.f32 %v9820_v12, %v4653_v19  ;;  %v4741_v21 = vsub.f32 %v9822_v51, %v4653_v19  ;;  %v4927_v55 = vadd.f32 %v9996_v41, %v9992_v9 }
 0xbe8   : > { %6842 = vpow2.f32 %v4816_v39  ;;  %v4711_v12 = vmax.f32 %v9999_v23, %v10002_v56  ;;  %v4720_v25 = vmax.f32 %v10009_v32, %v10014_v29  ;;  %v4717_v19 = vmax.f32 %v10025_v35, %v10030_v42 }
 0xbe9   : > { %v10011_v44 = vpop.eup %6832  ;;  %v4818_v45 = vmul.f32 1.442695, %v4740_v50  ;;  %v4820_v61 = vmul.f32 1.442695, %v4741_v21  ;;  %4715 = vmax.xlane.f32.xlu1 %v4714_v37  ;;  %4928 = vadd.xlane.f32.xlu0 %v4927_v55 }
 0xbea   : > { %v10016_v0 = vpop.eup %6834  ;;  %v4656_v51 = vpop.xlane.xlu1 %4655 }
 0xbeb   : > { %6844 = vpow2.f32 %v4818_v45  ;;  %v4742_v2 = vsub.f32 %v9826_v57, %v4656_v51  ;;  %v4743_v28 = vsub.f32 %v9828_v20, %v4656_v51  ;;  %v4930_v6 = vadd.f32 %v10016_v0, %v10011_v44 }
 0xbec   : > { %6846 = vpow2.f32 %v4820_v61 }
 0xbed   : > { %v10027_v40 = vpop.eup %6836  ;;  %v4822_v31 = vmul.f32 1.442695, %v4742_v2  ;;  %v4824_v5 = vmul.f32 1.442695, %v4743_v28  ;;  %4931 = vadd.xlane.f32.xlu1 %v4930_v6  ;;  %4712 = vmax.xlane.f32.xlu0 %v4711_v12  ;;  %v10051_v12 = vmul.f32 0.17677669, %v9940_v26 }
 0xbee   : > { %v10034_v57 = vpop.eup %6838  ;;  %v4659_v20 = vpop.xlane.xlu0 %4658  ;;  %v10056_v6 = vmul.f32 0.17677669, %v9942_v38 }
 0xbef   : > { %6848 = vpow2.f32 %v4822_v31  ;;  %v4744_v39 = vsub.f32 %v9832_v17, %v4659_v20  ;;  %v4745_v10 = vsub.f32 %v9834_v36, %v4659_v20  ;;  %v4933_v37 = vadd.f32 %v10034_v57, %v10027_v40 }
 0xbf0   : > { %6850 = vpow2.f32 %v4824_v5  ;;  %v4723_v38 = vmax.f32 %v10051_v12, %v10056_v6 }
 0xbf1   : > { %v10040_v8 = vpop.eup %6840  ;;  %v4826_v50 = vmul.f32 1.442695, %v4744_v39  ;;  %v4828_v21 = vmul.f32 1.442695, %v4745_v10  ;;  %4721 = vmax.xlane.f32.xlu1 %v4720_v25  ;;  %4934 = vadd.xlane.f32.xlu0 %v4933_v37 }
 0xbf2   : > { %v10044_v55 = vpop.eup %6842  ;;  %v4662_v45 = vpop.xlane.xlu1 %4661 }
 0xbf3   : > { %6852 = vpow2.f32 %v4826_v50  ;;  %v4746_v17 = vsub.f32 %v9838_v15, %v4662_v45  ;;  %v4747_v36 = vsub.f32 %v9840_v62, %v4662_v45  ;;  %v4936_v61 = vadd.f32 %v10044_v55, %v10040_v8 }
 0xbf4   : > { %6854 = vpow2.f32 %v4828_v21 }
 0xbf5   : > { %v10053_v51 = vpop.eup %6844  ;;  %v4830_v2 = vmul.f32 1.442695, %v4746_v17  ;;  %v4832_v28 = vmul.f32 1.442695, %v4747_v36  ;;  %4937 = vadd.xlane.f32.xlu1 %v4936_v61  ;;  %4718 = vmax.xlane.f32.xlu0 %v4717_v19 }
 0xbf6   : > { %v10058_v31 = vpop.eup %6846  ;;  %v4665_v15 = vpop.xlane.xlu0 %4664 }
 0xbf7   : > { %6856 = vpow2.f32 %v4830_v2  ;;  %v4748_v62 = vsub.f32 %v9844_v11, %v4665_v15  ;;  %v4749_v5 = vsub.f32 %v9846_v24, %v4665_v15  ;;  %v4939_v26 = vadd.f32 %v10058_v31, %v10053_v51 }
 0xbf8   : > { %6858 = vpow2.f32 %v4832_v28 }
 0xbf9   : > { %v10064_v25 = vpop.eup %6848  ;;  %v4834_v20 = vmul.f32 1.442695, %v4748_v62  ;;  %v4836_v39 = vmul.f32 1.442695, %v4749_v5  ;;  %4940 = vadd.xlane.f32.xlu0 %v4939_v26 }
 0xbfa   : > { %v10068_v10 = vpop.eup %6850  ;;  %v4668_v37 = vpop.xlane.xlu1 %4667 }
 0xbfb   : > { %6860 = vpow2.f32 %v4834_v20  ;;  %v4750_v11 = vsub.f32 %v9850_v59, %v4668_v37  ;;  %v4751_v24 = vsub.f32 %v9852_v58, %v4668_v37  ;;  %v4942_v19 = vadd.f32 %v10068_v10, %v10064_v25 }
 0xbfc   : > { %6862 = vpow2.f32 %v4836_v39 }
 0xbfd   : > { %v10074_v50 = vpop.eup %6852  ;;  %v4838_v21 = vmul.f32 1.442695, %v4750_v11  ;;  %v4840_v45 = vmul.f32 1.442695, %v4751_v24  ;;  %4943 = vadd.xlane.f32.xlu1 %v4942_v19  ;;  %4724 = vmax.xlane.f32.xlu0 %v4723_v38 }
 0xbfe   : > { %v10076_v17 = vpop.eup %6854  ;;  %v4671_v36 = vpop.xlane.xlu0 %4670 }
 0xbff   : > { %6864 = vpow2.f32 %v4838_v21  ;;  %v4752_v61 = vsub.f32 %v9856_v60, %v4671_v36  ;;  %v4753_v59 = vsub.f32 %v9858_v16, %v4671_v36  ;;  %v4945_v58 = vadd.f32 %v10076_v17, %v10074_v50 }
 0xc00   : > { %6866 = vpow2.f32 %v4840_v45 }
 0xc01   : > { %v10082_v2 = vpop.eup %6856  ;;  %v4842_v28 = vmul.f32 1.442695, %v4752_v61  ;;  %v4844_v15 = vmul.f32 1.442695, %v4753_v59  ;;  %4946 = vadd.xlane.f32.xlu0 %v4945_v58 }
 0xc02   : > { %v10084_v62 = vpop.eup %6858  ;;  %v4674_v5 = vpop.xlane.xlu1 %4673 }
 0xc03   : > { %6868 = vpow2.f32 %v4842_v28  ;;  %v4754_v26 = vsub.f32 %v9862_v3, %v4674_v5  ;;  %v4755_v20 = vsub.f32 %v9864_v43, %v4674_v5  ;;  %v4948_v60 = vadd.f32 %v10084_v62, %v10082_v2 }
 0xc04   : > { %6870 = vpow2.f32 %v4844_v15 }
 0xc05   : > { %v10090_v16 = vpop.eup %6860  ;;  %v4846_v39 = vmul.f32 1.442695, %v4754_v26  ;;  %v4848_v38 = vmul.f32 1.442695, %v4755_v20  ;;  %4949 = vadd.xlane.f32.xlu1 %v4948_v60 }
 0xc06   : > { %v10092_v37 = vpop.eup %6862  ;;  %v4677_v11 = vpop.xlane.xlu0 %4676 }
 0xc07   : > { %6872 = vpow2.f32 %v4846_v39  ;;  %v4756_v24 = vsub.f32 %v9868_v18, %v4677_v11  ;;  %v4757_v19 = vsub.f32 %v9870_v1, %v4677_v11  ;;  %v4951_v3 = vadd.f32 %v10092_v37, %v10090_v16 }
 0xc08   : > { %6874 = vpow2.f32 %v4848_v38 }
 0xc09   : > { %v10098_v43 = vpop.eup %6864  ;;  %v4850_v21 = vmul.f32 1.442695, %v4756_v24  ;;  %v4852_v45 = vmul.f32 1.442695, %v4757_v19  ;;  %4952 = vadd.xlane.f32.xlu0 %v4951_v3  ;;  %v11038_v3 = vld [vmem:[#allocation24_spill] sm:$0xff] }
 0xc0a   : > { %v10100_v36 = vpop.eup %6866  ;;  %v4680_v61 = vpop.xlane.xlu1 %4679 }
 0xc0b   : > { %6876 = vpow2.f32 %v4850_v21  ;;  %v4758_v59 = vsub.f32 %v9874_v48, %v4680_v61  ;;  %v4759_v58 = vsub.f32 %v9876_v27, %v4680_v61  ;;  %v4954_v18 = vadd.f32 %v10100_v36, %v10098_v43 }
 0xc0c   : > { %6878 = vpow2.f32 %v4852_v45 }
 0xc0d   : > { %v10106_v1 = vpop.eup %6868  ;;  %v4854_v28 = vmul.f32 1.442695, %v4758_v59  ;;  %v4856_v15 = vmul.f32 1.442695, %v4759_v58  ;;  %4955 = vadd.xlane.f32.xlu1 %v4954_v18  ;;  %v11039_v18 = vld [vmem:[#allocation28_spill] sm:$0xff] }
 0xc0e   : > { %v10108_v5 = vpop.eup %6870  ;;  %v4683_v26 = vpop.xlane.xlu0 %4682 }
 0xc0f   : > { %6880 = vpow2.f32 %v4854_v28  ;;  %v4760_v20 = vsub.f32 %v9880_v63, %v4683_v26  ;;  %v4761_v60 = vsub.f32 %v9882_v4, %v4683_v26  ;;  %v4957_v48 = vadd.f32 %v10108_v5, %v10106_v1 }
 0xc10   : > { %6882 = vpow2.f32 %v4856_v15  ;;  %v11040_v15 = vld [vmem:[#allocation29_spill] sm:$0xff] }
 0xc11   : > { %v10114_v27 = vpop.eup %6872  ;;  %v4858_v39 = vmul.f32 1.442695, %v4760_v20  ;;  %v4860_v38 = vmul.f32 1.442695, %v4761_v60  ;;  %4958 = vadd.xlane.f32.xlu0 %v4957_v48 }
 0xc12   : > { %v10116_v11 = vpop.eup %6874  ;;  %v4686_v24 = vpop.xlane.xlu1 %4685 }
 0xc13   : > { %6884 = vpow2.f32 %v4858_v39  ;;  %v4762_v19 = vsub.f32 %v9886_v22, %v4686_v24  ;;  %v4763_v21 = vsub.f32 %v11038_v3, %v4686_v24  ;;  %v4960_v63 = vadd.f32 %v10116_v11, %v10114_v27  ;;  %v11043_v24 = vld [vmem:[#allocation35_spill] sm:$0xff]  ;;  %v11044_v3 = vld [vmem:[#allocation17_spill] sm:$0xff] }
 0xc14   : > { %6886 = vpow2.f32 %v4860_v38 }
 0xc15   : > { %v10122_v4 = vpop.eup %6876  ;;  %v4862_v45 = vmul.f32 1.442695, %v4762_v19  ;;  %v4864_v61 = vmul.f32 1.442695, %v4763_v21  ;;  %4961 = vadd.xlane.f32.xlu1 %v4960_v63 }
 0xc16   : > { %v10124_v59 = vpop.eup %6878  ;;  %v4689_v58 = vpop.xlane.xlu0 %4688 }
 0xc17   : > { %6888 = vpow2.f32 %v4862_v45  ;;  %v4764_v28 = vsub.f32 %v11039_v18, %v4689_v58  ;;  %v4765_v26 = vsub.f32 %v11040_v15, %v4689_v58  ;;  %v4963_v22 = vadd.f32 %v10124_v59, %v10122_v4  ;;  %v11047_v15 = vld [vmem:[#allocation61_spill] sm:$0xff] }
 0xc18   : > { %6890 = vpow2.f32 %v4864_v61 }
 0xc19   : > { %v10130_v20 = vpop.eup %6880  ;;  %v4866_v60 = vmul.f32 1.442695, %v4764_v28  ;;  %v4868_v48 = vmul.f32 1.442695, %v4765_v26  ;;  %4964 = vadd.xlane.f32.xlu0 %v4963_v22  ;;  %v11048_v22 = vld [vmem:[#allocation32_spill] sm:$0xff] }
 0xc1a   : > { %11041 = vst [vmem:[#allocation56_spill] sm:$0xff] %v10130_v20  ;;  %v10132_v39 = vpop.eup %6882  ;;  %v4692_v38 = vpop.xlane.xlu1 %4691 }
 0xc1b   : > { %11042 = vst [vmem:[#allocation30_spill] sm:$0xff] %v10132_v39  ;;  %6892 = vpow2.f32 %v4866_v60  ;;  %v4766_v19 = vsub.f32 %v11043_v24, %v4692_v38  ;;  %v4767_v21 = vsub.f32 %v11044_v3, %v4692_v38  ;;  %v4966_v63 = vadd.f32 %v10132_v39, %v10130_v20 }
 0xc1c   : > { %6894 = vpow2.f32 %v4868_v48 }
 0xc1d   : > { %v10138_v45 = vpop.eup %6884  ;;  %v4870_v61 = vmul.f32 1.442695, %v4766_v19  ;;  %v4872_v58 = vmul.f32 1.442695, %v4767_v21  ;;  %4967 = vadd.xlane.f32.xlu1 %v4966_v63  ;;  %v11051_v63 = vld [vmem:[#allocation60_spill] sm:$0xff] }
 0xc1e   : > { %11045 = vst [vmem:[#allocation25_spill] sm:$0xff] %v10138_v45  ;;  %v10140_v18 = vpop.eup %6886  ;;  %v4695_v28 = vpop.xlane.xlu0 %4694 }
 0xc1f   : > { %11046 = vst [vmem:[#allocation39_spill] sm:$0xff] %v10140_v18  ;;  %6896 = vpow2.f32 %v4870_v61  ;;  %v4768_v26 = vsub.f32 %v11047_v15, %v4695_v28  ;;  %v4769_v60 = vsub.f32 %v11048_v22, %v4695_v28  ;;  %v4969_v38 = vadd.f32 %v10140_v18, %v10138_v45  ;;  %v11052_v61 = vld [vmem:[#allocation57_spill] sm:$0xff] }
 0xc20   : > { %6898 = vpow2.f32 %v4872_v58 }
 0xc21   : > { %v10146_v24 = vpop.eup %6888  ;;  %v4874_v48 = vmul.f32 1.442695, %v4768_v26  ;;  %v4876_v3 = vmul.f32 1.442695, %v4769_v60  ;;  %4970 = vadd.xlane.f32.xlu0 %v4969_v38  ;;  %v11053_v38 = vld [vmem:[#allocation47_spill] sm:$0xff] }
 0xc22   : > { %11049 = vst [vmem:[#allocation27_spill] sm:$0xff] %v10146_v24  ;;  %v10148_v19 = vpop.eup %6890  ;;  %v4698_v21 = vpop.xlane.xlu1 %4697 }
 0xc23   : > { %11050 = vst [vmem:[#allocation23_spill] sm:$0xff] %v10148_v19  ;;  %6900 = vpow2.f32 %v4874_v48  ;;  %v4770_v20 = vsub.f32 %v11051_v63, %v4698_v21  ;;  %v4771_v39 = vsub.f32 %v11052_v61, %v4698_v21  ;;  %v4972_v28 = vadd.f32 %v10148_v19, %v10146_v24  ;;  %v11054_v48 = vld [vmem:[#allocation20_spill] sm:$0xff] }
 0xc24   : > { %6902 = vpow2.f32 %v4876_v3 }
 0xc25   : > { %v10154_v15 = vpop.eup %6892  ;;  %v4878_v58 = vmul.f32 1.442695, %v4770_v20  ;;  %v4880_v22 = vmul.f32 1.442695, %v4771_v39  ;;  %4973 = vadd.xlane.f32.xlu1 %v4972_v28  ;;  %v11056_v28 = vld [vmem:[#allocation58_spill] sm:$0xff] }
 0xc26   : > { %v10156_v26 = vpop.eup %6894  ;;  %v4701_v60 = vpop.xlane.xlu0 %4700 }
 0xc27   : > { %6904 = vpow2.f32 %v4878_v58  ;;  %v4772_v45 = vsub.f32 %v11053_v38, %v4701_v60  ;;  %v4773_v18 = vsub.f32 %v11054_v48, %v4701_v60  ;;  %v4975_v21 = vadd.f32 %v10156_v26, %v10154_v15  ;;  %v11057_v58 = vld [vmem:[#allocation22_spill] sm:$0xff] }
 0xc28   : > { %6906 = vpow2.f32 %v4880_v22 }
 0xc29   : > { %v10162_v63 = vpop.eup %6896  ;;  %v4882_v3 = vmul.f32 1.442695, %v4772_v45  ;;  %v4884_v61 = vmul.f32 1.442695, %v4773_v18  ;;  %4976 = vadd.xlane.f32.xlu0 %v4975_v21 }
 0xc2a   : > { %11055 = vst [vmem:[#allocation26_spill] sm:$0xff] %v10162_v63  ;;  %v10164_v20 = vpop.eup %6898  ;;  %v4704_v39 = vpop.xlane.xlu1 %4703 }
 0xc2b   : > { %6908 = vpow2.f32 %v4882_v3  ;;  %v4774_v24 = vsub.f32 %v11056_v28, %v4704_v39  ;;  %v4775_v19 = vsub.f32 %v11057_v58, %v4704_v39  ;;  %v4978_v60 = vadd.f32 %v10164_v20, %v10162_v63 }
 0xc2c   : > { %6910 = vpow2.f32 %v4884_v61 }
 0xc2d   : > { %v10170_v38 = vpop.eup %6900  ;;  %v4886_v22 = vmul.f32 1.442695, %v4774_v24  ;;  %v4888_v48 = vmul.f32 1.442695, %v4775_v19  ;;  %4979 = vadd.xlane.f32.xlu1 %v4978_v60 }
 0xc2e   : > { %11058 = vst [vmem:[#allocation19_spill] sm:$0xff] %v10170_v38  ;;  %v10172_v45 = vpop.eup %6902 }
 0xc2f   : > { %11059 = vst [vmem:[#allocation21_spill] sm:$0xff] %v10172_v45  ;;  %6912 = vpow2.f32 %v4886_v22  ;;  %v4981_v18 = vadd.f32 %v10172_v45, %v10170_v38 }
 0xc30   : > { %6914 = vpow2.f32 %v4888_v48 }
 0xc31   : > { %v10176_v21 = vpop.eup %6904  ;;  %4982 = vadd.xlane.f32.xlu0 %v4981_v18 }
 0xc32   : > { %11060 = vst [vmem:[#allocation15_spill] sm:$0xff] %v10176_v21  ;;  %v10178_v3 = vpop.eup %6906 }
 0xc33   : > { %11061 = vst [vmem:[#allocation46_spill] sm:$0xff] %v10178_v3  ;;  %v4984_v61 = vadd.f32 %v10178_v3, %v10176_v21 }
 0xc35   : > { %v10182_v39 = vpop.eup %6908  ;;  %4985 = vadd.xlane.f32.xlu1 %v4984_v61 }
 0xc36   : > { %11062 = vst [vmem:[#allocation31_spill] sm:$0xff] %v10182_v39  ;;  %v10184_v24 = vpop.eup %6910 }
 0xc37   : > { %11063 = vst [vmem:[#allocation40_spill] sm:$0xff] %v10184_v24  ;;  %v4987_v19 = vadd.f32 %v10184_v24, %v10182_v39 }
 0xc39   : > { %v10188_v28 = vpop.eup %6912  ;;  %4988 = vadd.xlane.f32.xlu0 %v4987_v19 }
 0xc3a   : > { %11064 = vst [vmem:[#allocation45_spill] sm:$0xff] %v10188_v28  ;;  %v10190_v58 = vpop.eup %6914 }
 0xc3b   : > { %11065 = vst [vmem:[#allocation43_spill] sm:$0xff] %v10190_v58  ;;  %v4990_v60 = vadd.f32 %v10190_v58, %v10188_v28 }
 0xc3d   : > { %4991 = vadd.xlane.f32.xlu1 %v4990_v60 }
 0xc6a   : > { %v4920_v22 = vpop.xlane.xlu1 %4919 }
 0xc6b   : > { %6916 = vrcp.f32 %v4920_v22 }
 0xc6e   : > { %v4710_v48 = vpop.xlane.xlu1 %4709  ;;  %v4923_v18 = vpop.xlane.xlu0 %4922 }
 0xc6f   : > { %v4778_v61 = vsub.f32 %v9952_v47, %v4710_v48  ;;  %v4779_v21 = vsub.f32 %v9956_v52, %v4710_v48  ;;  %6918 = vrcp.f32 %v4923_v18 }
 0xc71   : > { %v4894_v3 = vmul.f32 1.442695, %v4778_v61  ;;  %v4896_v39 = vmul.f32 1.442695, %v4779_v21 }
 0xc72   : > { %v4926_v24 = vpop.xlane.xlu1 %4925  ;;  %v4707_v63 = vpop.xlane.xlu0 %4706 }
 0xc73   : > { %6920 = vpow2.f32 %v4894_v3  ;;  %v4776_v19 = vsub.f32 %v9970_v49, %v4707_v63  ;;  %v4777_v38 = vsub.f32 %v9972_v34, %v4707_v63 }
 0xc74   : > { %6922 = vpow2.f32 %v4896_v39 }
 0xc75   : > { %v4890_v60 = vmul.f32 1.442695, %v4776_v19  ;;  %v4892_v28 = vmul.f32 1.442695, %v4777_v38  ;;  %6924 = vrcp.f32 %v4926_v24  ;;  %v6917_v45 = vpop.eup %6916 }
 0xc76   : > { %v4716_v22 = vpop.xlane.xlu1 %4715  ;;  %v4929_v58 = vpop.xlane.xlu0 %4928  ;;  %v5047_v34 = vmul.f32 %v6917_v45, %v9958_v54  ;;  %v5046_v38 = vmul.f32 %v6917_v45, %v9954_v14 }
 0xc77   : > { %6926 = vpow2.f32 %v4890_v60  ;;  %v4782_v47 = vsub.f32 %v9978_v53, %v4716_v22  ;;  %v4783_v52 = vsub.f32 %v9982_v7, %v4716_v22 }
 0xc78   : > { %6928 = vpow2.f32 %v4892_v28 }
 0xc79   : > { %v6919_v21 = vpop.eup %6918  ;;  %v4902_v48 = vmul.f32 1.442695, %v4782_v47  ;;  %v4904_v3 = vmul.f32 1.442695, %v4783_v52  ;;  %6930 = vrcp.f32 %v4929_v58 }
 0xc7a   : > { %v4932_v49 = vpop.xlane.xlu1 %4931  ;;  %v4713_v18 = vpop.xlane.xlu0 %4712  ;;  %v5049_v63 = vmul.f32 %v6919_v21, %v9968_v46  ;;  %v5048_v39 = vmul.f32 %v6919_v21, %v9964_v30 }
 0xc7b   : > { %6932 = vpow2.f32 %v4902_v48  ;;  %v4780_v53 = vsub.f32 %v9999_v23, %v4713_v18  ;;  %v4781_v7 = vsub.f32 %v10002_v56, %v4713_v18 }
 0xc7c   : > { %6934 = vpow2.f32 %v4904_v3  ;;  %v6076_v24 = vpack.c.bf16 %v5049_v63, %v5047_v34  ;;  %v6078_v28 = vpack.c.bf16 %v5048_v39, %v5046_v38 }
 0xc7d   : > { %v10206_v61 = vpop.eup %6920  ;;  %v4898_v58 = vmul.f32 1.442695, %v4780_v53  ;;  %v4900_v19 = vmul.f32 1.442695, %v4781_v7  ;;  %6936 = vrcp.f32 %v4932_v49 }
 0xc7e   : > { %v10208_v60 = vpop.eup %6922  ;;  %v10210_v54 = vpop.xlane.xlu1 %4721  ;;  %6077 = vmatprep.subr.bf16.mxu1 %v6076_v24 }
 0xc7f   : > { %v4935_v14 = vpop.xlane.xlu0 %4934  ;;  %6938 = vpow2.f32 %v4898_v58  ;;  %6079 = vmatpush1.bf16.xpose.msra.mxu1 %v6078_v28  ;;  %v4996_v30 = vadd.f32 %v10208_v60, %v10206_v61  ;;  %v6925_v46 = vpop.eup %6924 }
 0xc80   : > { %6940 = vpow2.f32 %v4900_v19  ;;  %v5051_v3 = vmul.f32 %v6925_v46, %v9984_v13  ;;  %v5050_v18 = vmul.f32 %v6925_v46, %v9980_v33 }
 0xc81   : > { %v10214_v23 = vpop.eup %6926  ;;  %6942 = vrcp.f32 %v4935_v14  ;;  %4997 = vadd.xlane.f32.xlu1 %v4996_v30 }
 0xc82   : > { %v10216_v56 = vpop.eup %6928  ;;  %v4938_v47 = vpop.xlane.xlu1 %4937 }
 0xc83   : > { %v4719_v45 = vpop.xlane.xlu0 %4718  ;;  %v6931_v22 = vpop.eup %6930  ;;  %v4993_v48 = vadd.f32 %v10216_v56, %v10214_v23  ;;  %6944 = vrcp.f32 %v4938_v47 }
 0xc84   : > { %v4784_v52 = vsub.f32 %v10025_v35, %v4719_v45  ;;  %v4785_v21 = vsub.f32 %v10030_v42, %v4719_v45  ;;  %v5053_v49 = vmul.f32 %v6931_v22, %v9996_v41  ;;  %v5052_v34 = vmul.f32 %v6931_v22, %v9992_v9 }
 0xc85   : > { %v10226_v63 = vpop.eup %6932  ;;  %4994 = vadd.xlane.f32.xlu0 %v4993_v48 }
 0xc86   : > { %v4906_v38 = vmul.f32 1.442695, %v4784_v52  ;;  %v4908_v39 = vmul.f32 1.442695, %v4785_v21  ;;  %v10228_v53 = vpop.eup %6934  ;;  %v6080_v35 = vpack.c.bf16 %v5053_v49, %v5051_v3  ;;  %v6082_v7 = vpack.c.bf16 %v5052_v34, %v5050_v18 }
 0xc87   : > { %v4941_v42 = vpop.xlane.xlu0 %4940  ;;  %v5002_v13 = vadd.f32 %v10228_v53, %v10226_v63  ;;  %v6937_v41 = vpop.eup %6936 }
 0xc88   : > { %6946 = vpow2.f32 %v4906_v38  ;;  %6081 = vmatprep.subr.bf16.mxu1 %v6080_v35  ;;  %v5055_v46 = vmul.f32 %v6937_v41, %v10016_v0  ;;  %v5054_v22 = vmul.f32 %v6937_v41, %v10011_v44 }
 0xc89   : > { %6948 = vpow2.f32 %v4908_v39  ;;  %v10232_v33 = vpop.eup %6938  ;;  %6083 = vmatpush1.bf16.xpose.msra.mxu1 %v6082_v7  ;;  %5003 = vadd.xlane.f32.xlu1 %v5002_v13  ;;  %v377_v13 = vld [vmem:[%s10524_s2 + $0x160] sm:$0xff] }
 0xc8a   : > { %6950 = vrcp.f32 %v4941_v42  ;;  %v10234_v9 = vpop.eup %6940  ;;  %v4944_v58 = vpop.xlane.xlu1 %4943 }
 0xc8b   : > { %v4725_v24 = vpop.xlane.xlu0 %4724  ;;  %v6943_v28 = vpop.eup %6942  ;;  %v4999_v30 = vadd.f32 %v10234_v9, %v10232_v33  ;;  %6952 = vrcp.f32 %v4944_v58 }
 0xc8c   : > { %v4788_v19 = vsub.f32 %v10051_v12, %v4725_v24  ;;  %v4789_v14 = vsub.f32 %v10056_v6, %v4725_v24  ;;  %v5057_v45 = vmul.f32 %v6943_v28, %v10034_v57  ;;  %v5056_v47 = vmul.f32 %v6943_v28, %v10027_v40 }
 0xc8d   : > { %5000 = vadd.xlane.f32.xlu0 %v4999_v30  ;;  %v6945_v6 = vpop.eup %6944 }
 0xc8e   : > { %v4914_v52 = vmul.f32 1.442695, %v4788_v19  ;;  %v4916_v21 = vmul.f32 1.442695, %v4789_v14  ;;  %v6084_v48 = vpack.c.bf16 %v5057_v45, %v5055_v46  ;;  %v6086_v12 = vpack.c.bf16 %v5056_v47, %v5054_v22 }
 0xc8f   : > { %v4947_v3 = vpop.xlane.xlu0 %4946  ;;  %v5059_v18 = vmul.f32 %v6945_v6, %v10044_v55  ;;  %v5058_v38 = vmul.f32 %v6945_v6, %v10040_v8 }
 0xc90   : > { %6954 = vpow2.f32 %v4914_v52  ;;  %6085 = vmatprep.subr.bf16.mxu1 %v6084_v48 }
 0xc91   : > { %6956 = vpow2.f32 %v4916_v21  ;;  %6087 = vmatpush1.bf16.xpose.msra.mxu1 %v6086_v12  ;;  %v4787_v12 = vsub.f32 %v10014_v29, %v10210_v54 }
 0xc92   : > { %v10244_v49 = vpop.eup %6946  ;;  %6958 = vrcp.f32 %v4947_v3  ;;  %v4950_v44 = vpop.xlane.xlu1 %4949 }
 0xc93   : > { %v10246_v0 = vpop.eup %6948  ;;  %6960 = vrcp.f32 %v4950_v44 }
 0xc94   : > { %v6951_v57 = vpop.eup %6950  ;;  %v5005_v40 = vadd.f32 %v10246_v0, %v10244_v49 }
 0xc95   : > { %v5061_v34 = vmul.f32 %v6951_v57, %v10058_v31  ;;  %v5060_v39 = vmul.f32 %v6951_v57, %v10053_v51  ;;  %v6953_v41 = vpop.eup %6952 }
 0xc96   : > { %5006 = vadd.xlane.f32.xlu0 %v5005_v40  ;;  %v4953_v42 = vpop.xlane.xlu0 %4952  ;;  %v5063_v28 = vmul.f32 %v6953_v41, %v10068_v10  ;;  %v5062_v19 = vmul.f32 %v6953_v41, %v10064_v25 }
 0xc97   : > { %v6088_v35 = vpack.c.bf16 %v5061_v34, %v5059_v18  ;;  %v6090_v7 = vpack.c.bf16 %v5060_v39, %v5058_v38  ;;  %6962 = vrcp.f32 %v4953_v42  ;;  %v378_v39 = vld [vmem:[%s10524_s2 + $0x168] sm:$0xff] }
 0xc99   : > { %6089 = vmatprep.subr.bf16.mxu1 %v6088_v35 }
 0xc9a   : > { %v10257_v24 = vpop.eup %6954  ;;  %6091 = vmatpush1.bf16.xpose.msra.mxu1 %v6090_v7  ;;  %603 = vperm.xlu1 %6239, %v377_v13   ;;  %v4956_v8 = vpop.xlane.xlu1 %4955  ;;  %v5255_v7 = vld [vmem:[%s10526_s4] sm:$0xff] }
 0xc9b   : > { %v10259_v55 = vpop.eup %6956  ;;  %6964 = vrcp.f32 %v4956_v8 }
 0xc9c   : > { %v6959_v51 = vpop.eup %6958  ;;  %v5011_v31 = vadd.f32 %v10259_v55, %v10257_v24 }
 0xc9d   : > { %v5065_v58 = vmul.f32 %v6959_v51, %v10076_v17  ;;  %v5064_v14 = vmul.f32 %v6959_v51, %v10074_v50  ;;  %v6961_v22 = vpop.eup %6960  ;;  %v4786_v50 = vsub.f32 %v10009_v32, %v10210_v54 }
 0xc9e   : > { %5012 = vadd.xlane.f32.xlu0 %v5011_v31  ;;  %v4959_v46 = vpop.xlane.xlu0 %4958  ;;  %v5067_v21 = vmul.f32 %v6961_v22, %v10084_v62  ;;  %v5066_v25 = vmul.f32 %v6961_v22, %v10082_v2 }
 0xc9f   : > { %v6092_v30 = vpack.c.bf16 %v5065_v58, %v5063_v28  ;;  %v6094_v45 = vpack.c.bf16 %v5064_v14, %v5062_v19  ;;  %6966 = vrcp.f32 %v4959_v46  ;;  %v4910_v62 = vmul.f32 1.442695, %v4786_v50  ;;  %v11066_v28 = vld [vmem:[#allocation30_spill] sm:$0xff]  ;;  %v11067_v19 = vld [vmem:[#allocation39_spill] sm:$0xff] }
 0xca0   : > { %v5261_v50 = vld [vmem:[%s10526_s4 + $0x30] sm:$0xff] }
 0xca1   : > { %6093 = vmatprep.subr.bf16.mxu1 %v6092_v30  ;;  %v6963_v47 = vpop.eup %6962  ;;  %v11068_v30 = vld [vmem:[#allocation25_spill] sm:$0xff] }
 0xca2   : > { %6095 = vmatpush1.bf16.xpose.msra.mxu1 %v6094_v45  ;;  %v4962_v52 = vpop.xlane.xlu1 %4961  ;;  %v5069_v10 = vmul.f32 %v6963_v47, %v10092_v37  ;;  %v5068_v17 = vmul.f32 %v6963_v47, %v10090_v16  ;;  %v4912_v37 = vmul.f32 1.442695, %v4787_v12  ;;  %v11069_v45 = vld [vmem:[#allocation56_spill] sm:$0xff]  ;;  %v11070_v12 = vld [vmem:[#allocation23_spill] sm:$0xff] }
 0xca3   : > { %6968 = vrcp.f32 %v4962_v52  ;;  %v5259_v52 = vld [vmem:[%s10526_s4 + $0x20] sm:$0xff] }
 0xca4   : > { %v6096_v48 = vpack.c.bf16 %v5069_v10, %v5067_v21  ;;  %v6098_v3 = vpack.c.bf16 %v5068_v17, %v5066_v25 }
 0xca5   : > { %v6965_v44 = vpop.eup %6964 }
 0xca6   : > { %6097 = vmatprep.subr.bf16.mxu1 %v6096_v48  ;;  %v4965_v6 = vpop.xlane.xlu0 %4964  ;;  %v5071_v2 = vmul.f32 %v6965_v44, %v10100_v36  ;;  %v5070_v18 = vmul.f32 %v6965_v44, %v10098_v43 }
 0xca7   : > { %6970 = vrcp.f32 %v4965_v6 }
 0xca8   : > { %6972 = vpow2.f32 %v4910_v62 }
 0xca9   : > { %v6967_v57 = vpop.eup %6966 }
 0xcaa   : > { %6099 = vmatpush1.bf16.xpose.msra.mxu1 %v6098_v3  ;;  %v4968_v16 = vpop.xlane.xlu1 %4967  ;;  %v5073_v40 = vmul.f32 %v6967_v57, %v10108_v5  ;;  %v5072_v32 = vmul.f32 %v6967_v57, %v10106_v1  ;;  %v11071_v57 = vld [vmem:[#allocation27_spill] sm:$0xff] }
 0xcab   : > { %6974 = vrcp.f32 %v4968_v16  ;;  %v5263_v16 = vld [vmem:[%s10526_s4 + $0x40] sm:$0xff] }
 0xcac   : > { %v6100_v34 = vpack.c.bf16 %v5073_v40, %v5071_v2  ;;  %v6102_v29 = vpack.c.bf16 %v5072_v32, %v5070_v18  ;;  %6976 = vpow2.f32 %v4912_v37 }
 0xcad   : > { %v6969_v38 = vpop.eup %6968 }
 0xcae   : > { %6101 = vmatprep.subr.bf16.mxu1 %v6100_v34  ;;  %v4971_v54 = vpop.xlane.xlu0 %4970  ;;  %v5075_v1 = vmul.f32 %v6969_v38, %v10116_v11  ;;  %v5074_v42 = vmul.f32 %v6969_v38, %v10114_v27  ;;  %v5257_v27 = vld [vmem:[%s10526_s4 + $0x10] sm:$0xff]  ;;  %v11073_v38 = vld [vmem:[#allocation19_spill] sm:$0xff] }
 0xcaf   : > { %6978 = vrcp.f32 %v4971_v54 }
 0xcb1   : > { %v6971_v36 = vpop.eup %6970 }
 0xcb2   : > { %6103 = vmatpush1.bf16.xpose.msra.mxu1 %v6102_v29  ;;  %v4974_v5 = vpop.xlane.xlu1 %4973  ;;  %v5077_v43 = vmul.f32 %v6971_v36, %v10124_v59  ;;  %v5076_v35 = vmul.f32 %v6971_v36, %v10122_v4  ;;  %v10289_v8 = vpop.eup %6972  ;;  %v11072_v29 = vld [vmem:[#allocation21_spill] sm:$0xff]  ;;  %v11074_v36 = vld [vmem:[#allocation26_spill] sm:$0xff] }
 0xcb3   : > { %6980 = vrcp.f32 %v4974_v5 }
 0xcb4   : > { %608 = vperm.xlu0 %6238, %v378_v39   ;;  %v6104_v13 = vpack.c.bf16 %v5077_v43, %v5075_v1  ;;  %v6106_v41 = vpack.c.bf16 %v5076_v35, %v5074_v42  ;;  %v379_v1 = vld [vmem:[%s10524_s2 + $0x170] sm:$0xff]  ;;  %v5267_v43 = vld [vmem:[%s10526_s4 + $0x60] sm:$0xff] }
 0xcb5   : > { %v6975_v31 = vpop.eup %6974 }
 0xcb6   : > { %6105 = vmatprep.subr.bf16.mxu1 %v6104_v13  ;;  %v4977_v51 = vpop.xlane.xlu0 %4976  ;;  %v10291_v11 = vpop.eup %6976  ;;  %v5079_v58 = vmul.f32 %v6975_v31, %v11066_v28  ;;  %v5078_v22 = vmul.f32 %v6975_v31, %v11069_v45  ;;  %v5269_v13 = vld [vmem:[%s10526_s4 + $0x70] sm:$0xff]  ;;  %v5258_v45 = vld [vmem:[%s10526_s4 + $0x18] sm:$0xff] }
 0xcb7   : > { %6982 = vrcp.f32 %v4977_v51  ;;  %v5008_v47 = vadd.f32 %v10291_v11, %v10289_v8  ;;  %v11075_v51 = vld [vmem:[#allocation46_spill] sm:$0xff] }
 0xcb8   : > { %5273 = vperm.xlu0 %6238, %v5255_v7  }
 0xcb9   : > { %v6979_v4 = vpop.eup %6978 }
 0xcba   : > { %6107 = vmatpush1.bf16.xpose.msra.mxu1 %v6106_v41  ;;  %v4980_v59 = vpop.xlane.xlu1 %4979  ;;  %v5081_v14 = vmul.f32 %v6979_v4, %v11067_v19  ;;  %v5080_v46 = vmul.f32 %v6979_v4, %v11068_v30 }
 0xcbb   : > { %6984 = vrcp.f32 %v4980_v59  ;;  %v11077_v59 = vld [vmem:[#allocation31_spill] sm:$0xff] }
 0xcbc   : > { %5283 = vperm.xlu0 %6238, %v5257_v27   ;;  %v6108_v21 = vpack.c.bf16 %v5081_v14, %v5079_v58  ;;  %v6110_v10 = vpack.c.bf16 %v5080_v46, %v5078_v22  ;;  %v11076_v27 = vld [vmem:[#allocation40_spill] sm:$0xff]  ;;  %v11078_v58 = vld [vmem:[#allocation15_spill] sm:$0xff]  ;;  %v5256_v14 = vld [vmem:[%s10526_s4 + $0x8] sm:$0xff] }
 0xcbd   : > { %v6981_v25 = vpop.eup %6980  ;;  %v5260_v22 = vld [vmem:[%s10526_s4 + $0x28] sm:$0xff] }
 0xcbe   : > { %5009 = vadd.xlane.f32.xlu1 %v5008_v47  ;;  %6109 = vmatprep.subr.bf16.mxu1 %v6108_v21  ;;  %v4983_v17 = vpop.xlane.xlu0 %4982  ;;  %v5083_v6 = vmul.f32 %v6981_v25, %v11070_v12  ;;  %v5082_v37 = vmul.f32 %v6981_v25, %v11071_v57  ;;  %v5262_v47 = vld [vmem:[%s10526_s4 + $0x38] sm:$0xff] }
 0xcbf   : > { %6986 = vrcp.f32 %v4983_v17  ;;  %v5266_v21 = vld [vmem:[%s10526_s4 + $0x58] sm:$0xff] }
 0xcc0   : > { %5293 = vperm.xlu0 %6238, %v5259_v52   ;;  %v5264_v52 = vld [vmem:[%s10526_s4 + $0x48] sm:$0xff]  ;;  %v5270_v17 = vld [vmem:[%s10526_s4 + $0x78] sm:$0xff] }
 0xcc1   : > { %v6983_v48 = vpop.eup %6982 }
 0xcc2   : > { %6111 = vmatpush1.bf16.xpose.msra.mxu1 %v6110_v10  ;;  %v4986_v3 = vpop.xlane.xlu1 %4985  ;;  %v5085_v44 = vmul.f32 %v6983_v48, %v10156_v26  ;;  %v5084_v62 = vmul.f32 %v6983_v48, %v10154_v15  ;;  %v5265_v26 = vld [vmem:[%s10526_s4 + $0x50] sm:$0xff]  ;;  %v5268_v10 = vld [vmem:[%s10526_s4 + $0x68] sm:$0xff] }
 0xcc3   : > { %6988 = vrcp.f32 %v4986_v3 }
 0xcc4   : > { %5303 = vperm.xlu0 %6238, %v5261_v50   ;;  %v6112_v2 = vpack.c.bf16 %v5085_v44, %v5083_v6  ;;  %v6114_v40 = vpack.c.bf16 %v5084_v62, %v5082_v37  ;;  %v11079_v62 = vld [vmem:[#allocation50_spill] sm:$0xff]  ;;  %v11080_v37 = vld [vmem:[#allocation48_spill] sm:$0xff] }
 0xcc5   : > { %v6985_v18 = vpop.eup %6984 }
 0xcc6   : > { %6113 = vmatprep.subr.bf16.mxu1 %v6112_v2  ;;  %v4989_v32 = vpop.xlane.xlu0 %4988  ;;  %v5087_v34 = vmul.f32 %v6985_v18, %v10164_v20  ;;  %v5086_v5 = vmul.f32 %v6985_v18, %v11074_v36  ;;  %v380_v20 = vld [vmem:[%s10524_s2 + $0x178] sm:$0xff] }
 0xcc7   : > { %6990 = vrcp.f32 %v4989_v32 }
 0xcc8   : > { %5313 = vperm.xlu0 %6238, %v5263_v16  }
 0xcc9   : > { %v6987_v15 = vpop.eup %6986 }
 0xcca   : > { %6115 = vmatpush1.bf16.xpose.msra.mxu1 %v6114_v40  ;;  %v5089_v54 = vmul.f32 %v6987_v15, %v11072_v29  ;;  %v5088_v39 = vmul.f32 %v6987_v15, %v11073_v38  ;;  %v4992_v25 = vpop.xlane.xlu1 %4991  ;;  %v11081_v40 = vld [vmem:[#allocation43_spill] sm:$0xff] }
 0xccb   : > { %6992 = vrcp.f32 %v4992_v25 }
 0xccc   : > { %5323 = vperm.xlu0 %6238, %v5265_v26   ;;  %v6116_v35 = vpack.c.bf16 %v5089_v54, %v5087_v34  ;;  %v6118_v42 = vpack.c.bf16 %v5088_v39, %v5086_v5  ;;  %v11082_v26 = vld [vmem:[#allocation45_spill] sm:$0xff] }
 0xccd   : > { %v6989_v7 = vpop.eup %6988 }
 0xcce   : > { %6117 = vmatprep.subr.bf16.mxu1 %v6116_v35  ;;  %v5091_v31 = vmul.f32 %v6989_v7, %v11075_v51  ;;  %v5090_v19 = vmul.f32 %v6989_v7, %v11078_v58 }
 0xccf   : > { %613 = vperm.xlu1 %6239, %v379_v1  }
 0xcd0   : > { %5333 = vperm.xlu0 %6238, %v5267_v43  }
 0xcd1   : > { %v6991_v41 = vpop.eup %6990 }
 0xcd2   : > { %6119 = vmatpush1.bf16.xpose.msra.mxu1 %v6118_v42  ;;  %v5093_v4 = vmul.f32 %v6991_v41, %v11076_v27  ;;  %v5092_v28 = vmul.f32 %v6991_v41, %v11077_v59 }
 0xcd3   : > { %618 = vperm.xlu1 %6239, %v380_v20  }
 0xcd4   : > { %5343 = vperm.xlu0 %6238, %v5269_v13   ;;  %v6120_v30 = vpack.c.bf16 %v5093_v4, %v5091_v31  ;;  %v6122_v46 = vpack.c.bf16 %v5092_v28, %v5090_v19  ;;  %v11083_v19 = vld [vmem:[#allocation49_spill] sm:$0xff] }
 0xcd5   : > { %v6993_v44 = vpop.eup %6992 }
 0xcd6   : > { %6121 = vmatprep.subr.bf16.mxu1 %v6120_v30  ;;  %v5095_v32 = vmul.f32 %v6993_v44, %v11081_v40  ;;  %v5094_v15 = vmul.f32 %v6993_v44, %v11082_v26  ;;  %v11084_v30 = vld [vmem:[#allocation55_spill] sm:$0xff]  ;;  %v5208_v40 = vld [vmem:[#allocation6 + $0x8] sm:$0xff]  ;;  %v5211_v26 = vld [vmem:[#allocation6 + $0x20] sm:$0xff] }
 0xcd7   : > { %5278 = vperm.xlu1 %6239, %v5256_v14  }
 0xcda   : > { %6123 = vmatpush1.bf16.xpose.msra.mxu1 %v6122_v46 }
 0xcdb   : > { %5288 = vperm.xlu1 %6239, %v5258_v45   ;;  %v11085_v45 = vld [vmem:[#allocation54_spill] sm:$0xff] }
 0xcdf   : > { %5298 = vperm.xlu1 %6239, %v5260_v22  }
 0xce3   : > { %5308 = vperm.xlu1 %6239, %v5262_v47  }
 0xce7   : > { %5318 = vperm.xlu1 %6239, %v5264_v52   ;;  %v11088_v52 = vld [vmem:[#allocation59_spill] sm:$0xff] }
 0xceb   : > { %5328 = vperm.xlu1 %6239, %v5266_v21  }
 0xcef   : > { %5338 = vperm.xlu1 %6239, %v5268_v10  }
 0xcf3   : > { %5348 = vperm.xlu1 %6239, %v5270_v17  }
 0xd0e   : > { %v4998_v50 = vpop.xlane.xlu1 %4997 }
 0xd12   : > { %v4995_v48 = vpop.xlane.xlu0 %4994 }
 0xd13   : > { %6994 = vrcp.f32 %v4995_v48 }
 0xd14   : > { %6996 = vrcp.f32 %v4998_v50 }
 0xd16   : > { %v5004_v3 = vpop.xlane.xlu1 %5003 }
 0xd1a   : > { %v604_v12 = vpop.permute.xlu1 %603  ;;  %v5001_v6 = vpop.xlane.xlu0 %5000 }
 0xd1b   : > { %v952_v57 = vadd.f32 %v11079_v62, %v604_v12  ;;  %v954_v16 = vadd.f32 %v11080_v37, %v604_v12  ;;  %6998 = vrcp.f32 %v5001_v6 }
 0xd1c   : > { %7000 = vrcp.f32 %v5004_v3 }
 0xd1d   : > { %v6995_v2 = vpop.eup %6994  ;;  %5174 = vmatprep.mubr.f32.mxu1 %v954_v16  ;;  %v5207_v16 = vld [vmem:[#allocation6] sm:$0xff] }
 0xd1e   : > { %v5097_v18 = vmul.f32 %v6995_v2, %v10216_v56  ;;  %v5096_v34 = vmul.f32 %v6995_v2, %v10214_v23  ;;  %v6997_v39 = vpop.eup %6996  ;;  %v11089_v2 = vmov 0.0  }
 0xd1f   : > { %v5099_v5 = vmul.f32 %v6997_v39, %v10208_v60  ;;  %v5098_v43 = vmul.f32 %v6997_v39, %v10206_v61  ;;  %v5217_v39 = vld [vmem:[#allocation6 + $0x50] sm:$0xff] }
 0xd20   : > { %v6124_v29 = vpack.c.bf16 %v5097_v18, %v5095_v32  ;;  %v6126_v54 = vpack.c.bf16 %v5096_v34, %v5094_v15  ;;  %v5209_v32 = vld [vmem:[#allocation6 + $0x10] sm:$0xff]  ;;  %v5210_v18 = vld [vmem:[#allocation6 + $0x18] sm:$0xff]  ;;  %v5212_v15 = vld [vmem:[#allocation6 + $0x28] sm:$0xff] }
 0xd21   : > { %v5213_v34 = vld [vmem:[#allocation6 + $0x30] sm:$0xff] }
 0xd22   : > { %6125 = vmatprep.subr.bf16.mxu1 %v6124_v29  ;;  %v5214_v29 = vld [vmem:[#allocation6 + $0x38] sm:$0xff] }
 0xd23   : > { %v5007_v38 = vpop.xlane.xlu0 %5006  ;;  %6127 = vmatpush1.bf16.xpose.msra.mxu1 %v6126_v54  ;;  %v5215_v54 = vld [vmem:[#allocation6 + $0x40] sm:$0xff] }
 0xd24   : > { %7002 = vrcp.f32 %v5007_v38  ;;  %v5216_v38 = vld [vmem:[#allocation6 + $0x48] sm:$0xff] }
 0xd25   : > { %v6999_v36 = vpop.eup %6998 }
 0xd26   : > { %v5101_v1 = vmul.f32 %v6999_v36, %v10234_v9  ;;  %v5100_v56 = vmul.f32 %v6999_v36, %v10232_v33  ;;  %v7001_v23 = vpop.eup %7000  ;;  %v5218_v36 = vld [vmem:[#allocation6 + $0x58] sm:$0xff] }
 0xd27   : > { %v5103_v20 = vmul.f32 %v7001_v23, %v10228_v53  ;;  %v5102_v41 = vmul.f32 %v7001_v23, %v10226_v63 }
 0xd28   : > { %v6128_v35 = vpack.c.bf16 %v5101_v1, %v5099_v5  ;;  %v6130_v42 = vpack.c.bf16 %v5100_v56, %v5098_v43  ;;  %v5219_v5 = vld [vmem:[#allocation6 + $0x60] sm:$0xff]  ;;  %v5220_v1 = vld [vmem:[#allocation6 + $0x68] sm:$0xff]  ;;  %v5221_v43 = vld [vmem:[#allocation6 + $0x70] sm:$0xff] }
 0xd29   : > { %v5222_v56 = vld [vmem:[#allocation6 + $0x78] sm:$0xff] }
 0xd2a   : > { %6129 = vmatprep.subr.bf16.mxu1 %v6128_v35 }
 0xd2b   : > { %6131 = vmatpush1.bf16.xpose.msra.mxu1 %v6130_v42  ;;  %v5013_v61 = vpop.xlane.xlu0 %5012 }
 0xd2c   : > { %7004 = vrcp.f32 %v5013_v61 }
 0xd2e   : > { %v7003_v7 = vpop.eup %7002 }
 0xd2f   : > { %v5105_v13 = vmul.f32 %v7003_v7, %v10246_v0  ;;  %v5104_v60 = vmul.f32 %v7003_v7, %v10244_v49 }
 0xd31   : > { %v6132_v51 = vpack.c.bf16 %v5105_v13, %v5103_v20  ;;  %v6134_v9 = vpack.c.bf16 %v5104_v60, %v5102_v41  ;;  %v7008_v13 = vld [vmem:[%s7334_s26] sm:$0xff] }
 0xd33   : > { %6133 = vmatprep.subr.bf16.mxu1 %v6132_v51  ;;  %v609_v28 = vpop.permute.xlu0 %608  ;;  %v7009_v51 = vld [vmem:[%s7334_s26 + $0x8] sm:$0xff] }
 0xd34   : > { %6135 = vmatpush1.bf16.xpose.msra.mxu1 %v6134_v9  ;;  %v960_v14 = vadd.f32 %v11083_v19, %v609_v28  ;;  %v958_v46 = vadd.f32 %v11084_v30, %v609_v28 }
 0xd36   : > { %v7005_v31 = vpop.eup %7004 }
 0xd37   : > { %v5109_v53 = vmul.f32 %v7005_v31, %v10259_v55  ;;  %v5108_v63 = vmul.f32 %v7005_v31, %v10257_v24  ;;  %v11086_v55 = vld [vmem:[#allocation12_spill] sm:$0xff]  ;;  %v11087_v24 = vld [vmem:[#allocation37_spill] sm:$0xff]  ;;  %v5274_v35 = vpop.permute.xlu0 %5273 }
 0xd4b   : > { %v5010_v33 = vpop.xlane.xlu1 %5009 }
 0xd4c   : > { %7006 = vrcp.f32 %v5010_v33 }
 0xd4f   : > { %v614_v58 = vpop.permute.xlu1 %613 }
 0xd53   : > { %v619_v22 = vpop.permute.xlu1 %618 }
 0xd54   : > { %v972_v47 = vadd.f32 %v11087_v24, %v619_v22  ;;  %v970_v21 = vadd.f32 %v11088_v52, %v619_v22 }
 0xd56   : > { %v7007_v27 = vpop.eup %7006 }
 0xd57   : > { %v5107_v4 = vmul.f32 %v7007_v27, %v10291_v11  ;;  %v5106_v0 = vmul.f32 %v7007_v27, %v10289_v8  ;;  %v966_v11 = vadd.f32 %v11085_v45, %v614_v58  ;;  %v964_v8 = vadd.f32 %v11086_v55, %v614_v58  ;;  %v5279_v60 = vpop.permute.xlu1 %5278  ;;  %v7013_v45 = vld [vmem:[%s7334_s26 + $0x28] sm:$0xff] }
 0xd59   : > { %v6136_v59 = vpack.c.bf16 %v5109_v53, %v5107_v4  ;;  %v6138_v49 = vpack.c.bf16 %v5108_v63, %v5106_v0  ;;  %v7010_v4 = vld [vmem:[%s7334_s26 + $0x10] sm:$0xff]  ;;  %v5284_v0 = vpop.permute.xlu0 %5283  ;;  %v7011_v63 = vld [vmem:[%s7334_s26 + $0x18] sm:$0xff] }
 0xd5b   : > { %6137 = vmatprep.subr.bf16.mxu1 %v6136_v59 }
 0xd5c   : > { %6139 = vmatpush1.bf16.xpose.msra.mxu1 %v6138_v49 }
 0xd63   : > { %5175 = vmatmul.mubr.f32.vlgmr.msra.gmra.mrb[208].mxu1 %v952_v57 }
 0xd64   : > { %5180 = vmatprep.mubr.f32.mxu1 %v960_v14  ;;  %v7012_v14 = vld [vmem:[%s7334_s26 + $0x20] sm:$0xff] }
 0xd67   : > { %5181 = vmatmul.mubr.f32.gmra.mrb[210].mxu1 %v958_v46  ;;  %v5289_v46 = vpop.permute.xlu1 %5288 }
 0xd68   : > { %5186 = vmatprep.mubr.f32.mxu1 %v966_v11 }
 0xd6b   : > { %5187 = vmatmul.mubr.f32.gmra.mrb[212].mxu1 %v964_v8 }
 0xd6c   : > { %5192 = vmatprep.mubr.f32.mxu1 %v972_v47  ;;  %v7014_v47 = vld [vmem:[%s7334_s26 + $0x30] sm:$0xff] }
 0xd6f   : > { %5193 = vmatmul.mubr.f32.gmra.mrb[214].mxu1 %v970_v21  ;;  %v5294_v21 = vpop.permute.xlu0 %5293 }
 0xe36   : > { %v5176_v10 = vpop.f32.mrb[208].mxu1 }
 0xe37   : > { %v5178_v17 = vpop.f32.mrb[209].mxu1 }
 0xe3a   : > { %v5182_v25 = vpop.f32.mrb[210].mxu1 }
 0xe3b   : > { %v6166_v50 = vpack.c.bf16 %v5182_v25, %v5176_v10  ;;  %v5184_v48 = vpop.f32.mrb[211].mxu1  ;;  %v7015_v10 = vld [vmem:[%s7334_s26 + $0x38] sm:$0xff] }
 0xe3c   : > { %v6164_v3 = vpack.c.bf16 %v5184_v48, %v5178_v17 }
 0xe3e   : > { %v5188_v12 = vpop.f32.mrb[212].mxu1  ;;  %6165 = vmatprep.subr.bf16.mxu0 %v6164_v3 }
 0xe3f   : > { %v5190_v6 = vpop.f32.mrb[213].mxu1  ;;  %6167 = vmatpush1.bf16.msra.mxu0 %v6166_v50 }
 0xe42   : > { %v5194_v44 = vpop.f32.mrb[214].mxu1 }
 0xe43   : > { %v6170_v62 = vpack.c.bf16 %v5194_v44, %v5188_v12  ;;  %v5196_v57 = vpop.f32.mrb[215].mxu1  ;;  %v7016_v12 = vld [vmem:[%s7334_s26 + $0x40] sm:$0xff]  ;;  %v5299_v44 = vpop.permute.xlu1 %5298 }
 0xe44   : > { %v6168_v37 = vpack.c.bf16 %v5196_v57, %v5190_v6 }
 0xe46   : > { %6169 = vmatprep.subr.bf16.mxu0 %v6168_v37 }
 0xe47   : > { %6171 = vmatpush1.bf16.msra.mxu0 %v6170_v62  ;;  %v7017_v62 = vld [vmem:[%s7334_s26 + $0x48] sm:$0xff] }
 0xe4a   : > { %5416 = vmatmul.mubr.f32.vlgmr.msra.gmra.mrb[168].mxu0 %v5207_v16 }
 0xe4b   : > { %5421 = vmatprep.mubr.f32.mxu0 %v11089_v2 }
 0xe4e   : > { %5422 = vmatmul.mubr.f32.gmra.mrb[170].mxu0 %v5208_v40 }
 0xe4f   : > { %5427 = vmatprep.mubr.f32.mxu0 %v11089_v2 }
 0xe52   : > { %5428 = vmatmul.mubr.f32.gmra.mrb[172].mxu0 %v5209_v32  ;;  %v7018_v32 = vld [vmem:[%s7334_s26 + $0x50] sm:$0xff] }
 0xe53   : > { %5433 = vmatprep.mubr.f32.mxu0 %v11089_v2 }
 0xe56   : > { %5434 = vmatmul.mubr.f32.gmra.mrb[174].mxu0 %v5210_v18 }
 0xe57   : > { %5439 = vmatprep.mubr.f32.mxu0 %v11089_v2 }
 0xe5a   : > { %5440 = vmatmul.mubr.f32.gmra.mrb[176].mxu0 %v5211_v26  ;;  %v5304_v26 = vpop.permute.xlu0 %5303 }
 0xe5b   : > { %5445 = vmatprep.mubr.f32.mxu0 %v11089_v2 }
 0xe5e   : > { %5446 = vmatmul.mubr.f32.gmra.mrb[178].mxu0 %v5212_v15  ;;  %v7019_v15 = vld [vmem:[%s7334_s26 + $0x58] sm:$0xff] }
 0xe5f   : > { %5451 = vmatprep.mubr.f32.mxu0 %v11089_v2 }
 0xe62   : > { %5452 = vmatmul.mubr.f32.gmra.mrb[180].mxu0 %v5213_v34 }
 0xe63   : > { %5457 = vmatprep.mubr.f32.mxu0 %v11089_v2 }
 0xe66   : > { %5458 = vmatmul.mubr.f32.gmra.mrb[182].mxu0 %v5214_v29 }
 0xe67   : > { %5463 = vmatprep.mubr.f32.mxu0 %v11089_v2 }
 0xe6a   : > { %5464 = vmatmul.mubr.f32.gmra.mrb[184].mxu0 %v5215_v54 }
 0xe6b   : > { %5469 = vmatprep.mubr.f32.mxu0 %v11089_v2 }
 0xe6e   : > { %5470 = vmatmul.mubr.f32.gmra.mrb[186].mxu0 %v5216_v38 }
 0xe6f   : > { %5475 = vmatprep.mubr.f32.mxu0 %v11089_v2 }
 0xe72   : > { %5476 = vmatmul.mubr.f32.gmra.mrb[188].mxu0 %v5217_v39 }
 0xe73   : > { %5481 = vmatprep.mubr.f32.mxu0 %v11089_v2 }
 0xe76   : > { %5482 = vmatmul.mubr.f32.gmra.mrb[190].mxu0 %v5218_v36  ;;  %v7020_v36 = vld [vmem:[%s7334_s26 + $0x60] sm:$0xff] }
 0xe77   : > { %5487 = vmatprep.mubr.f32.mxu0 %v11089_v2 }
 0xe7a   : > { %5488 = vmatmul.mubr.f32.gmra.mrb[192].mxu0 %v5219_v5 }
 0xe7b   : > { %5493 = vmatprep.mubr.f32.mxu0 %v11089_v2 }
 0xe7e   : > { %5494 = vmatmul.mubr.f32.gmra.mrb[194].mxu0 %v5220_v1  ;;  %v5309_v1 = vpop.permute.xlu1 %5308 }
 0xe7f   : > { %5499 = vmatprep.mubr.f32.mxu0 %v11089_v2 }
 0xe82   : > { %5500 = vmatmul.mubr.f32.gmra.mrb[196].mxu0 %v5221_v43  ;;  %v7021_v43 = vld [vmem:[%s7334_s26 + $0x68] sm:$0xff] }
 0xe83   : > { %5505 = vmatprep.mubr.f32.mxu0 %v11089_v2 }
 0xe86   : > { %5506 = vmatmul.mubr.f32.gmra.mrb[198].mxu0 %v5222_v56 }
 0xf1d   : > { %v5417_v42 = vpop.f32.mrb[168].mxu0 }
 0xf1e   : > { %v5418_v23 = vadd.f32 %v5417_v42, %v5274_v35  ;;  %v5419_v7 = vpop.f32.mrb[169].mxu0 }
 0xf1f   : > { %v5420_v20 = vadd.f32 %v5419_v7, %v5274_v35 }
 0xf20   : > { %v5512_v41 = vadd.f32 %v7008_v13, %v5418_v23 }
 0xf21   : > { %v5513_v9 = vadd.f32 %v7009_v51, %v5420_v20  ;;  %v5423_v61 = vpop.f32.mrb[170].mxu0  ;;  %v7022_v20 = vld [vmem:[%s7334_s26 + $0x70] sm:$0xff] }
 0xf22   : > { %5544 = vst [vmem:[%s10406_s6] sm:$0xff] %v5512_v41  ;;  %v5424_v33 = vadd.f32 %v5423_v61, %v5279_v60  ;;  %v5425_v31 = vpop.f32.mrb[171].mxu0  ;;  %v5314_v41 = vpop.permute.xlu0 %5313 }
 0xf23   : > { %5545 = vst [vmem:[%s10406_s6 + $0x8] sm:$0xff] %v5513_v9  ;;  %v5426_v27 = vadd.f32 %v5425_v31, %v5279_v60  ;;  %v7023_v60 = vld [vmem:[%s7334_s26 + $0x78] sm:$0xff] }
 0xf24   : > { %v5514_v53 = vadd.f32 %v7010_v4, %v5424_v33 }
 0xf25   : > { %v5515_v59 = vadd.f32 %v7011_v63, %v5426_v27  ;;  %v5429_v49 = vpop.f32.mrb[172].mxu0  ;;  %v7024_v27 = vld [vmem:[%s7334_s26 + $0x80] sm:$0xff] }
 0xf26   : > { %5546 = vst [vmem:[%s10406_s6 + $0x10] sm:$0xff] %v5514_v53  ;;  %v5430_v28 = vadd.f32 %v5429_v49, %v5284_v0  ;;  %v5431_v58 = vpop.f32.mrb[173].mxu0  ;;  %v5319_v53 = vpop.permute.xlu1 %5318 }
 0xf27   : > { %5547 = vst [vmem:[%s10406_s6 + $0x18] sm:$0xff] %v5515_v59  ;;  %v5432_v19 = vadd.f32 %v5431_v58, %v5284_v0  ;;  %v7025_v0 = vld [vmem:[%s7334_s26 + $0x88] sm:$0xff] }
 0xf28   : > { %v5516_v30 = vadd.f32 %v7012_v14, %v5430_v28 }
 0xf29   : > { %v5517_v11 = vadd.f32 %v7013_v45, %v5432_v19  ;;  %v5435_v22 = vpop.f32.mrb[174].mxu0  ;;  %v7026_v19 = vld [vmem:[%s7334_s26 + $0x90] sm:$0xff] }
 0xf2a   : > { %5548 = vst [vmem:[%s10406_s6 + $0x20] sm:$0xff] %v5516_v30  ;;  %v5436_v55 = vadd.f32 %v5435_v22, %v5289_v46  ;;  %v5437_v8 = vpop.f32.mrb[175].mxu0  ;;  %v5324_v30 = vpop.permute.xlu0 %5323 }
 0xf2b   : > { %5549 = vst [vmem:[%s10406_s6 + $0x28] sm:$0xff] %v5517_v11  ;;  %v5438_v24 = vadd.f32 %v5437_v8, %v5289_v46  ;;  %v7027_v46 = vld [vmem:[%s7334_s26 + $0x98] sm:$0xff] }
 0xf2c   : > { %v5518_v52 = vadd.f32 %v7014_v47, %v5436_v55 }
 0xf2d   : > { %v5519_v17 = vadd.f32 %v7015_v10, %v5438_v24  ;;  %v5441_v25 = vpop.f32.mrb[176].mxu0  ;;  %v7028_v24 = vld [vmem:[%s7334_s26 + $0xa0] sm:$0xff] }
 0xf2e   : > { %5550 = vst [vmem:[%s10406_s6 + $0x30] sm:$0xff] %v5518_v52  ;;  %v5442_v50 = vadd.f32 %v5441_v25, %v5294_v21  ;;  %v5443_v48 = vpop.f32.mrb[177].mxu0  ;;  %v5329_v52 = vpop.permute.xlu1 %5328 }
 0xf2f   : > { %5551 = vst [vmem:[%s10406_s6 + $0x38] sm:$0xff] %v5519_v17  ;;  %v5444_v3 = vadd.f32 %v5443_v48, %v5294_v21  ;;  %v7029_v21 = vld [vmem:[%s7334_s26 + $0xa8] sm:$0xff] }
 0xf30   : > { %v5520_v6 = vadd.f32 %v7016_v12, %v5442_v50 }
 0xf31   : > { %v5521_v57 = vadd.f32 %v7017_v62, %v5444_v3  ;;  %v5447_v37 = vpop.f32.mrb[178].mxu0  ;;  %v7030_v3 = vld [vmem:[%s7334_s26 + $0xb0] sm:$0xff] }
 0xf32   : > { %5552 = vst [vmem:[%s10406_s6 + $0x40] sm:$0xff] %v5520_v6  ;;  %v5448_v16 = vadd.f32 %v5447_v37, %v5299_v44  ;;  %v5449_v2 = vpop.f32.mrb[179].mxu0  ;;  %v5334_v6 = vpop.permute.xlu0 %5333 }
 0xf33   : > { %5553 = vst [vmem:[%s10406_s6 + $0x48] sm:$0xff] %v5521_v57  ;;  %v5450_v40 = vadd.f32 %v5449_v2, %v5299_v44  ;;  %v7031_v44 = vld [vmem:[%s7334_s26 + $0xb8] sm:$0xff] }
 0xf34   : > { %v5522_v18 = vadd.f32 %v7018_v32, %v5448_v16 }
 0xf35   : > { %v5523_v34 = vadd.f32 %v7019_v15, %v5450_v40  ;;  %v5453_v29 = vpop.f32.mrb[180].mxu0  ;;  %v7032_v40 = vld [vmem:[%s7334_s26 + $0xc0] sm:$0xff] }
 0xf36   : > { %5554 = vst [vmem:[%s10406_s6 + $0x50] sm:$0xff] %v5522_v18  ;;  %v5454_v54 = vadd.f32 %v5453_v29, %v5304_v26  ;;  %v5455_v38 = vpop.f32.mrb[181].mxu0  ;;  %v5339_v18 = vpop.permute.xlu1 %5338 }
 0xf37   : > { %5555 = vst [vmem:[%s10406_s6 + $0x58] sm:$0xff] %v5523_v34  ;;  %v5456_v39 = vadd.f32 %v5455_v38, %v5304_v26  ;;  %v7033_v26 = vld [vmem:[%s7334_s26 + $0xc8] sm:$0xff] }
 0xf38   : > { %v5524_v5 = vadd.f32 %v7020_v36, %v5454_v54 }
 0xf39   : > { %v5525_v56 = vadd.f32 %v7021_v43, %v5456_v39  ;;  %v5459_v35 = vpop.f32.mrb[182].mxu0  ;;  %v7034_v39 = vld [vmem:[%s7334_s26 + $0xd0] sm:$0xff] }
 0xf3a   : > { %5556 = vst [vmem:[%s10406_s6 + $0x60] sm:$0xff] %v5524_v5  ;;  %v5460_v42 = vadd.f32 %v5459_v35, %v5309_v1  ;;  %v5461_v23 = vpop.f32.mrb[183].mxu0  ;;  %v5344_v5 = vpop.permute.xlu0 %5343 }
 0xf3b   : > { %5557 = vst [vmem:[%s10406_s6 + $0x68] sm:$0xff] %v5525_v56  ;;  %v5462_v7 = vadd.f32 %v5461_v23, %v5309_v1  ;;  %v7035_v1 = vld [vmem:[%s7334_s26 + $0xd8] sm:$0xff] }
 0xf3c   : > { %v5526_v13 = vadd.f32 %v7022_v20, %v5460_v42 }
 0xf3d   : > { %v5527_v51 = vadd.f32 %v7023_v60, %v5462_v7  ;;  %v5465_v9 = vpop.f32.mrb[184].mxu0  ;;  %v7036_v7 = vld [vmem:[%s7334_s26 + $0xe0] sm:$0xff] }
 0xf3e   : > { %5558 = vst [vmem:[%s10406_s6 + $0x70] sm:$0xff] %v5526_v13  ;;  %v5466_v61 = vadd.f32 %v5465_v9, %v5314_v41  ;;  %v5467_v33 = vpop.f32.mrb[185].mxu0  ;;  %v5349_v13 = vpop.permute.xlu1 %5348 }
 0xf3f   : > { %5559 = vst [vmem:[%s10406_s6 + $0x78] sm:$0xff] %v5527_v51  ;;  %v5468_v31 = vadd.f32 %v5467_v33, %v5314_v41  ;;  %v7037_v41 = vld [vmem:[%s7334_s26 + $0xe8] sm:$0xff] }
 0xf40   : > { %v5528_v4 = vadd.f32 %v7024_v27, %v5466_v61 }
 0xf41   : > { %v5529_v63 = vadd.f32 %v7025_v0, %v5468_v31  ;;  %v5471_v59 = vpop.f32.mrb[186].mxu0  ;;  %v7038_v31 = vld [vmem:[%s7334_s26 + $0xf0] sm:$0xff] }
 0xf42   : > { %5560 = vst [vmem:[%s10406_s6 + $0x80] sm:$0xff] %v5528_v4  ;;  %v5472_v49 = vadd.f32 %v5471_v59, %v5319_v53  ;;  %v5473_v28 = vpop.f32.mrb[187].mxu0  ;;  %v7039_v4 = vld [vmem:[%s7334_s26 + $0xf8] sm:$0xff] }
 0xf43   : > { %5561 = vst [vmem:[%s10406_s6 + $0x88] sm:$0xff] %v5529_v63  ;;  %v5474_v58 = vadd.f32 %v5473_v28, %v5319_v53 }
 0xf44   : > { %v5530_v14 = vadd.f32 %v7026_v19, %v5472_v49 }
 0xf45   : > { %v5531_v45 = vadd.f32 %v7027_v46, %v5474_v58  ;;  %v5477_v11 = vpop.f32.mrb[188].mxu0 }
 0xf46   : > { %5562 = vst [vmem:[%s10406_s6 + $0x90] sm:$0xff] %v5530_v14  ;;  %v5478_v22 = vadd.f32 %v5477_v11, %v5324_v30  ;;  %v5479_v55 = vpop.f32.mrb[189].mxu0 }
 0xf47   : > { %5563 = vst [vmem:[%s10406_s6 + $0x98] sm:$0xff] %v5531_v45  ;;  %v5480_v8 = vadd.f32 %v5479_v55, %v5324_v30 }
 0xf48   : > { %v5532_v47 = vadd.f32 %v7028_v24, %v5478_v22 }
 0xf49   : > { %v5533_v10 = vadd.f32 %v7029_v21, %v5480_v8  ;;  %v5483_v17 = vpop.f32.mrb[190].mxu0 }
 0xf4a   : > { %5564 = vst [vmem:[%s10406_s6 + $0xa0] sm:$0xff] %v5532_v47  ;;  %v5484_v25 = vadd.f32 %v5483_v17, %v5329_v52  ;;  %v5485_v50 = vpop.f32.mrb[191].mxu0 }
 0xf4b   : > { %5565 = vst [vmem:[%s10406_s6 + $0xa8] sm:$0xff] %v5533_v10  ;;  %v5486_v48 = vadd.f32 %v5485_v50, %v5329_v52 }
 0xf4c   : > { %v5534_v12 = vadd.f32 %v7030_v3, %v5484_v25 }
 0xf4d   : > { %v5535_v62 = vadd.f32 %v7031_v44, %v5486_v48  ;;  %v5489_v57 = vpop.f32.mrb[192].mxu0 }
 0xf4e   : > { %5566 = vst [vmem:[%s10406_s6 + $0xb0] sm:$0xff] %v5534_v12  ;;  %v5490_v37 = vadd.f32 %v5489_v57, %v5334_v6  ;;  %v5491_v16 = vpop.f32.mrb[193].mxu0 }
 0xf4f   : > { %5567 = vst [vmem:[%s10406_s6 + $0xb8] sm:$0xff] %v5535_v62  ;;  %v5492_v2 = vadd.f32 %v5491_v16, %v5334_v6 }
 0xf50   : > { %v5536_v32 = vadd.f32 %v7032_v40, %v5490_v37 }
 0xf51   : > { %v5537_v15 = vadd.f32 %v7033_v26, %v5492_v2  ;;  %v5495_v34 = vpop.f32.mrb[194].mxu0 }
 0xf52   : > { %5568 = vst [vmem:[%s10406_s6 + $0xc0] sm:$0xff] %v5536_v32  ;;  %v5496_v29 = vadd.f32 %v5495_v34, %v5339_v18  ;;  %v5497_v54 = vpop.f32.mrb[195].mxu0 }
 0xf53   : > { %5569 = vst [vmem:[%s10406_s6 + $0xc8] sm:$0xff] %v5537_v15  ;;  %v5498_v38 = vadd.f32 %v5497_v54, %v5339_v18 }
 0xf54   : > { %v5538_v36 = vadd.f32 %v7034_v39, %v5496_v29 }
 0xf55   : > { %v5539_v43 = vadd.f32 %v7035_v1, %v5498_v38  ;;  %v5501_v56 = vpop.f32.mrb[196].mxu0 }
 0xf56   : > { %5570 = vst [vmem:[%s10406_s6 + $0xd0] sm:$0xff] %v5538_v36  ;;  %v5502_v35 = vadd.f32 %v5501_v56, %v5344_v5  ;;  %v5503_v42 = vpop.f32.mrb[197].mxu0 }
 0xf57   : > { %5571 = vst [vmem:[%s10406_s6 + $0xd8] sm:$0xff] %v5539_v43  ;;  %v5504_v23 = vadd.f32 %v5503_v42, %v5344_v5 }
 0xf58   : > { %v5540_v20 = vadd.f32 %v7036_v7, %v5502_v35 }
 0xf59   : > { %v5541_v60 = vadd.f32 %v7037_v41, %v5504_v23  ;;  %v5507_v51 = vpop.f32.mrb[198].mxu0 }
 0xf5a   : > { %5572 = vst [vmem:[%s10406_s6 + $0xe0] sm:$0xff] %v5540_v20  ;;  %v5508_v9 = vadd.f32 %v5507_v51, %v5349_v13  ;;  %v5509_v61 = vpop.f32.mrb[199].mxu0 }
 0xf5b   : > { %5573 = vst [vmem:[%s10406_s6 + $0xe8] sm:$0xff] %v5541_v60  ;;  %v5510_v33 = vadd.f32 %v5509_v61, %v5349_v13 }
 0xf5c   : > { %v5542_v27 = vadd.f32 %v7038_v31, %v5508_v9 }
 0xf5d   : > { %v5543_v53 = vadd.f32 %v7039_v4, %v5510_v33 }
 0xf5e   : > { %5574 = vst [vmem:[%s10406_s6 + $0xf0] sm:$0xff] %v5542_v27 }
 0xf5f   : > { %5575 = vst [vmem:[%s10406_s6 + $0xf8] sm:$0xff] %v5543_v53 }
 0xf60   : > { %7109 = shalt.err (!%p7106_p11)
}
 0xf61   : > { %s7110_s26 = scalar_lea.hbm %s10472_s9, 4096  ;;  %s7114_s17 = scalar_lea.hbm %s10527_s5, 8192 }
 0xf62   : > { %p7111_p13 = scmp.ne.s32.totalorder %s10472_s9, %s7110_s26  ;;  %p7115_p6 = scmp.lt.u32.totalorder %s10472_s9, %s10527_s5 }
 0xf63   : > { %p7116_p9 = scmp.lt.u32.totalorder %s7114_s17, %s7110_s26  ;;  %p7118_p12 = scmp.lt.u32.totalorder %s7110_s26, %s10472_s9 }
 0xf64   : > { %p7112_p5 = pnand %p7111_p13, %p11090_p1 }
 0xf65   : > { %p7117_p10 = por %p7116_p9, %p7115_p6 }
 0xf66   : > { %p7113_p0 = pneg %p7112_p5 }
 0xf67   : > { %p7119_p2 = por %p7118_p12, %p7117_p10 }
 0xf69   : > { %p7120_p3 = pnand %p7119_p2, %p7113_p0 }
 0xf6b   : > { %7123 = shalt.err (!%p7120_p3)
}
 0xf6c   : > { %s7175_s6 = smov 256   ;;  %s7176_s30 = smov 16  }
 0xf6d   : > { %6180 = dma.vmem_to_hbm [thread:$0]  (%p11090_p1), %s10474_s8, 4096, %s10472_s9, %s10481_s22, %s7175_s6, %s7175_s6, %s7176_s30  }
 0xf6e PF: > { %p6197_p4 = scmp.ge.s32.totalorder %s7166_s21, 2  ;;  %s5605_s10 = sand.u32 1, %s7154_s18  }
 0xf6f   : > { %p11091_p7 = scmp.ne.s32.totalorder %s10673_s29, 0  ;;  %s5606_s25 = scalar_lea.sflag [#allocation5], %s5605_s10 }
 0xf71   : > { %p6190_p8 = pnand %p6197_p4, %p11091_p7 }
 0xf73   : > { %7149 = dma.done.wait (!%p6190_p8), %s5606_s25, 4096  }
 0xf74   : > { %7151 = vsyncadd (!%p6190_p8), %s5606_s25, 4294963200  ;;  %p17_p11 = scmp.ge.s32.totalorder %s7232_s24, 4   ;;  %s11092_s18 = smov %s7158_s19 }
 0xf75   : > { %s11093_s19 = smov %s7162_s20  ;;  %s11094_s20 = smov %s7243_s27 }
 0xf76   : > { %s11095_s21 = smov %s7232_s24  ;;  %19 = sbr.rel (!%p17_p11) target bundleno = 5 (0x5), region = 84 }
 0xf7d   :  { %5611 = vsyncpa [#allocation4], 1 }
 0xf7e   :  { %5613 = vsyncpa [#allocation4 + $0x1], 1 }
 0xf7f   :  { %5614 = vsyncpa [#allocation7], 1 }
 0xf80   :  { %5615 = vsyncpa [#allocation5], 1 }
 0xf81   :  { %5617 = vsyncpa [#allocation5 + $0x1], 1 }

</bundles_post_ra>
